<compile_context>
chip_gen: v5e
topology: v5e:2x2
jax: 0.10.0
libtpu: 0.0.40
codegen_flags: <defaults>
</compile_context>

<pallas_src>
import functools

import jax
import jax.numpy as jnp
from jax.experimental import pallas as pl
from jax.experimental.pallas import tpu as pltpu


def _round_up(x, m):
    return (x + m - 1) // m * m


def _ds(start, size, stride):
    if stride == 1:
        return pl.ds(start, size)
    return pl.ds(start, size, stride)


# ---------------------------------------------------------------------------
# Kernel 1: fused direct Conv2d + bias + ReLU (im2col fused into the kernel)
# ---------------------------------------------------------------------------
def _conv_relu_kernel(x_ref, w_ref, b_ref, o_ref, *, KH, KW, TOH, OW, stride):
    # x_ref: (1, HP, WP, Cin) padded NHWC image (resident across row blocks)
    # w_ref: (KH, KW, Cin, OCp) weights, OCp lane-padded
    # b_ref: (1, OCp)
    # o_ref: (1, TOH*OW, OCp) output row-block, flattened spatially
    m = pl.program_id(1)
    cin = x_ref.shape[-1]
    ocp = o_ref.shape[-1]
    row0 = m * (TOH * stride)

    acc = jnp.zeros((TOH * OW, ocp), jnp.float32)
    for kh in range(KH):
        for kw in range(KW):
            tap = x_ref[0, _ds(row0 + kh, TOH, stride), _ds(kw, OW, stride), :]
            acc = acc + jnp.dot(tap.reshape(TOH * OW, cin), w_ref[kh, kw],
                                preferred_element_type=jnp.float32)
    o_ref[0] = jnp.maximum(acc + b_ref[...], 0.0).astype(o_ref.dtype)


def conv2d_bias_relu(x_nhwc, w_oihw, b, *, stride, padding, block_rows=64):
    """ReLU(conv2d(x) + b); returns NHWC with OC zero-padded to a 128 multiple."""
    N, H, W, Cin = x_nhwc.shape
    OC, _, KH, KW = w_oihw.shape
    OH = (H + 2 * padding - KH) // stride + 1
    OW = (W + 2 * padding - KW) // stride + 1
    OCp = _round_up(OC, 128)

    if OH <= block_rows:
        TOH, n_blk = OH, 1
    else:
        TOH = block_rows                       # multiple of 8 -> TOH*OW % 8 == 0
        n_blk = (OH + TOH - 1) // TOH
    OHp = TOH * n_blk

    # Zero-pad spatially: real conv padding + extra bottom rows so every row
    # block's taps stay in range (extra rows only feed discarded outputs).
    HP = max(H + 2 * padding, (OHp - 1) * stride + KH)
    WP = W + 2 * padding
    xp = jnp.pad(x_nhwc, ((0, 0), (padding, HP - H - padding),
                          (padding, padding), (0, 0)))

    # Weights -> (KH, KW, Cin, OCp); bias -> (1, OCp); channel padding is zeros
    wt = jnp.transpose(w_oihw, (2, 3, 1, 0))
    wt = jnp.pad(wt, ((0, 0), (0, 0), (0, 0), (0, OCp - OC)))
    bp = jnp.pad(b, (0, OCp - OC)).reshape(1, OCp)

    kernel = functools.partial(_conv_relu_kernel, KH=KH, KW=KW, TOH=TOH,
                               OW=OW, stride=stride)
    out = pl.pallas_call(
        kernel,
        out_shape=jax.ShapeDtypeStruct((N, OHp * OW, OCp), jnp.float32),
        grid_spec=pltpu.PrefetchScalarGridSpec(
            num_scalar_prefetch=0,
            grid=(N, n_blk),
            in_specs=[
                # Whole padded image per batch element; same block across the
                # row-block axis -> fetched once per batch item.
                pl.BlockSpec((1, HP, WP, Cin), lambda n, m: (n, 0, 0, 0)),
                pl.BlockSpec((KH, KW, Cin, OCp), lambda n, m: (0, 0, 0, 0)),
                pl.BlockSpec((1, OCp), lambda n, m: (0, 0)),
            ],
            out_specs=pl.BlockSpec((1, TOH * OW, OCp), lambda n, m: (n, m, 0)),
        ),
        compiler_params=pltpu.CompilerParams(
            dimension_semantics=("parallel", "arbitrary")),
    )(xp, wt, bp)
    # (N, OHp*OW, OCp) -> NHWC; keep lane-padded channels (they are exactly 0).
    return out.reshape(N, OHp, OW, OCp)[:, :OH]


# ---------------------------------------------------------------------------
# Kernel 2: LocalResponseNorm(size=5, alpha=1e-4, beta=0.75, k=2)
#   Windowed channel sum-of-squares = 5 masked lane-rolls (XLU) + adds (VPU);
#   divide replaced with approx reciprocal (EUP).
# ---------------------------------------------------------------------------
def _lrn_kernel(x_ref, o_ref):
    x = x_ref[...]
    sq = x * x
    cp = x.shape[-1]
    lane = jax.lax.broadcasted_iota(jnp.int32, x.shape, 1)
    winsum = sq
    for s in (1, 2):
        lo = pltpu.roll(sq, shift=s, axis=1)           # lo[.., c] = sq[.., c - s]
        winsum = winsum + jnp.where(lane >= s, lo, 0.0)
        hi = pltpu.roll(sq, shift=cp - s, axis=1)      # hi[.., c] = sq[.., (c+s) % cp]
        winsum = winsum + jnp.where(lane < cp - s, hi, 0.0)
    base = 2.0 + (1e-4 / 5.0) * winsum                 # k + alpha/size * sum
    denom = jnp.exp(0.75 * jnp.log(base))              # base ** beta (EUP)
    o_ref[...] = x * pl.reciprocal(denom, approx=True)


def local_response_norm(x_nhwc, *, block_rows=1024):
    N, H, W, C = x_nhwc.shape
    Cp = _round_up(C, 128)
    M = N * H * W
    x2 = x_nhwc.reshape(M, C)
    if Cp != C:
        x2 = jnp.pad(x2, ((0, 0), (0, Cp - C)))        # zero channels are inert
    tm = min(block_rows, _round_up(M, 8))
    Mp = _round_up(M, tm)
    if Mp != M:
        x2 = jnp.pad(x2, ((0, Mp - M), (0, 0)))

    out = pl.pallas_call(
        _lrn_kernel,
        out_shape=jax.ShapeDtypeStruct((Mp, Cp), jnp.float32),
        grid_spec=pltpu.PrefetchScalarGridSpec(
            num_scalar_prefetch=0,
            grid=(Mp // tm,),
            in_specs=[pl.BlockSpec((tm, Cp), lambda i: (i, 0))],
            out_specs=pl.BlockSpec((tm, Cp), lambda i: (i, 0)),
        ),
        compiler_params=pltpu.CompilerParams(dimension_semantics=("parallel",)),
    )(x2)
    return out[:M, :C].reshape(N, H, W, C)


# ---------------------------------------------------------------------------
# Kernel 3: MaxPool2d(kernel=3, stride=2)
#   Four stride-2 phase images are built with cheap XLA slicing (1x the data);
#   the kernel takes an elementwise max over the 9 taps, channels on lanes.
# ---------------------------------------------------------------------------
def _maxpool_kernel(ph_ref, o_ref, *, OH, OW):
    # ph_ref: (4, PH, PW, C) -- phase (p, q) at index 2*p + q
    res = None
    for kh in range(3):
        for kw in range(3):
            p, dh = kh % 2, kh // 2
            q, dw = kw % 2, kw // 2
            t = ph_ref[2 * p + q, dh:dh + OH, dw:dw + OW, :]
            res = t if res is None else jnp.maximum(res, t)
    o_ref[0] = res


def maxpool_3x3_s2(x_nhwc):
    N, H, W, C = x_nhwc.shape
    OH = (H - 3) // 2 + 1
    OW = (W - 3) // 2 + 1
    PH, PW = (H + 1) // 2, (W + 1) // 2
    phases = []
    for p in (0, 1):
        for q in (0, 1):
            ph = x_nhwc[:, p::2, q::2, :]
            ph = jnp.pad(ph, ((0, 0), (0, PH - ph.shape[1]),
                              (0, PW - ph.shape[2]), (0, 0)))
            phases.append(ph)
    stacked = jnp.stack(phases, axis=1).reshape(N * 4, PH, PW, C)

    return pl.pallas_call(
        functools.partial(_maxpool_kernel, OH=OH, OW=OW),
        out_shape=jax.ShapeDtypeStruct((N, OH, OW, C), jnp.float32),
        grid_spec=pltpu.PrefetchScalarGridSpec(
            num_scalar_prefetch=0,
            grid=(N,),
            in_specs=[pl.BlockSpec((4, PH, PW, C), lambda n: (n, 0, 0, 0))],
            out_specs=pl.BlockSpec((1, OH, OW, C), lambda n: (n, 0, 0, 0)),
        ),
        compiler_params=pltpu.CompilerParams(dimension_semantics=("parallel",)),
    )(stacked)


# ---------------------------------------------------------------------------
# ConvBlock forward (matches the PyTorch module's semantics)
# ---------------------------------------------------------------------------
def conv_block_forward(params, x_nchw, *, stride=1, padding=1, norm_pool=False):
    OC = params["w"].shape[0]
    x = jnp.transpose(x_nchw, (0, 2, 3, 1)).astype(jnp.float32)   # NCHW -> NHWC
    x = conv2d_bias_relu(x, params["w"], params["b"],
                         stride=stride, padding=padding)
    if norm_pool:
        # Channel padding (zeros) flows through LRN / MaxPool unchanged and is
        # sliced away at the end, keeping every kernel lane-dense.
        x = local_response_norm(x)
        x = maxpool_3x3_s2(x)
    x = x[..., :OC]
    return jnp.transpose(x, (0, 3, 1, 2))                         # back to NCHW


# Pure-JAX reference for a correctness cross-check.
def conv_block_reference(params, x_nchw, *, stride=1, padding=1, norm_pool=False):
    w, b = params["w"], params["b"]
    y = jax.lax.conv_general_dilated(
        x_nchw, w, window_strides=(stride, stride),
        padding=((padding, padding), (padding, padding)),
        dimension_numbers=("NCHW", "OIHW", "NCHW"))
    y = jnp.maximum(y + b[None, :, None, None], 0.0)
    if norm_pool:
        sq = y * y
        sq_p = jnp.pad(sq, ((0, 0), (2, 2), (0, 0), (0, 0)))
        win = sum(sq_p[:, i:i + y.shape[1]] for i in range(5))
        y = y / (2.0 + (1e-4 / 5.0) * win) ** 0.75
        y = jax.lax.reduce_window(y, -jnp.inf, jax.lax.max,
                                  (1, 1, 3, 3), (1, 1, 2, 2), "VALID")
    return y


if __name__ == "__main__":
    batch, in_channels, out_channels = 2, 4, 32
    H = W = 16
    ksize, stride, padding = 3, 1, 1

    key = jax.random.PRNGKey(0)
    kw_key, kb_key, kx_key = jax.random.split(key, 3)
    params = {
        "w": 0.1 * jax.random.normal(
            kw_key, (out_channels, in_channels, ksize, ksize), jnp.float32),
        "b": 0.1 * jax.random.normal(kb_key, (out_channels,), jnp.float32),
    }
    x = jax.random.normal(kx_key, (batch, in_channels, H, W), jnp.float32)

    # norm_pool=True exercises Conv+ReLU, LRN and MaxPool kernels; False is the
    # plain Conv+ReLU path (module default).
    fwd_np = jax.jit(functools.partial(conv_block_forward, stride=stride,
                                       padding=padding, norm_pool=True))
    fwd_plain = jax.jit(functools.partial(conv_block_forward, stride=stride,
                                          padding=padding, norm_pool=False))

    out_np = jax.block_until_ready(fwd_np(params, x))
    out_plain = jax.block_until_ready(fwd_plain(params, x))

    assert out_np.shape == (batch, out_channels, 7, 7), out_np.shape
    assert out_plain.shape == (batch, out_channels, 16, 16), out_plain.shape
    assert bool(jnp.all(jnp.isfinite(out_np)))
    assert bool(jnp.all(jnp.isfinite(out_plain)))

    ref_np = conv_block_reference(params, x, stride=stride, padding=padding,
                                  norm_pool=True)
    ref_plain = conv_block_reference(params, x, stride=stride, padding=padding,
                                     norm_pool=False)
    # Loose bound: approx reciprocal in LRN + MXU rounding are well below this.
    assert float(jnp.max(jnp.abs(out_np - ref_np))) < 3e-2
    assert float(jnp.max(jnp.abs(out_plain - ref_plain))) < 3e-2

    print("KERNEL_OK")
</pallas_src>

<mosaic_0001>
module attributes {stable_mosaic.version = 11 : i64} {
  func.func @_lrn_kernel(%arg0: i32, %arg1: memref<512x128xf32, #tpu.memory_space<vmem>>, %arg2: memref<512x128xf32, #tpu.memory_space<vmem>>) attributes {dimension_semantics = [#tpu.dimension_semantics<parallel>], iteration_bounds = array<i64: 1>, scalar_prefetch = 0 : i64, scratch_operands = 0 : i64, tpu.core_type = #tpu.core_type<tc>, window_params = [{transform_indices = @transform_0, window_bounds = array<i64: 512, 128>}, {transform_indices = @transform_1, window_bounds = array<i64: 512, 128>}]} {
    %c0 = arith.constant 0 : index
    %c0_0 = arith.constant 0 : index
    %0 = vector.load %arg1[%c0, %c0_0] : memref<512x128xf32, #tpu.memory_space<vmem>>, vector<512x128xf32>
    %1 = arith.mulf %0, %0 : vector<512x128xf32>
    %2 = tpu.iota {dimensions = array<i32: 1>} : vector<512x128xi32>
    %c1_i32 = arith.constant 1 : i32
    %3 = tpu.dynamic_rotate %1 by %c1_i32 dim 1 : vector<512x128xf32>, i32 -> vector<512x128xf32>
    %c1_i32_1 = arith.constant 1 : i32
    %4 = vector.broadcast %c1_i32_1 : i32 to vector<512x128xi32>
    %5 = arith.cmpi sge, %2, %4 : vector<512x128xi32>
    %cst = arith.constant 0.000000e+00 : f32
    %6 = vector.broadcast %cst : f32 to vector<512x128xf32>
    %7 = arith.select %5, %3, %6 : vector<512x128xi1>, vector<512x128xf32>
    %8 = arith.addf %1, %7 : vector<512x128xf32>
    %c127_i32 = arith.constant 127 : i32
    %9 = tpu.dynamic_rotate %1 by %c127_i32 dim 1 : vector<512x128xf32>, i32 -> vector<512x128xf32>
    %c127_i32_2 = arith.constant 127 : i32
    %10 = vector.broadcast %c127_i32_2 : i32 to vector<512x128xi32>
    %11 = arith.cmpi slt, %2, %10 : vector<512x128xi32>
    %cst_3 = arith.constant 0.000000e+00 : f32
    %12 = vector.broadcast %cst_3 : f32 to vector<512x128xf32>
    %13 = arith.select %11, %9, %12 : vector<512x128xi1>, vector<512x128xf32>
    %14 = arith.addf %8, %13 : vector<512x128xf32>
    %c2_i32 = arith.constant 2 : i32
    %15 = tpu.dynamic_rotate %1 by %c2_i32 dim 1 : vector<512x128xf32>, i32 -> vector<512x128xf32>
    %c2_i32_4 = arith.constant 2 : i32
    %16 = vector.broadcast %c2_i32_4 : i32 to vector<512x128xi32>
    %17 = arith.cmpi sge, %2, %16 : vector<512x128xi32>
    %cst_5 = arith.constant 0.000000e+00 : f32
    %18 = vector.broadcast %cst_5 : f32 to vector<512x128xf32>
    %19 = arith.select %17, %15, %18 : vector<512x128xi1>, vector<512x128xf32>
    %20 = arith.addf %14, %19 : vector<512x128xf32>
    %c126_i32 = arith.constant 126 : i32
    %21 = tpu.dynamic_rotate %1 by %c126_i32 dim 1 : vector<512x128xf32>, i32 -> vector<512x128xf32>
    %c126_i32_6 = arith.constant 126 : i32
    %22 = vector.broadcast %c126_i32_6 : i32 to vector<512x128xi32>
    %23 = arith.cmpi slt, %2, %22 : vector<512x128xi32>
    %cst_7 = arith.constant 0.000000e+00 : f32
    %24 = vector.broadcast %cst_7 : f32 to vector<512x128xf32>
    %25 = arith.select %23, %21, %24 : vector<512x128xi1>, vector<512x128xf32>
    %26 = arith.addf %20, %25 : vector<512x128xf32>
    %cst_8 = arith.constant 2.000000e-05 : f32
    %27 = vector.broadcast %cst_8 : f32 to vector<512x128xf32>
    %28 = arith.mulf %27, %26 : vector<512x128xf32>
    %cst_9 = arith.constant 2.000000e+00 : f32
    %29 = vector.broadcast %cst_9 : f32 to vector<512x128xf32>
    %30 = arith.addf %29, %28 : vector<512x128xf32>
    %31 = math.log %30 : vector<512x128xf32>
    %cst_10 = arith.constant 7.500000e-01 : f32
    %32 = vector.broadcast %cst_10 : f32 to vector<512x128xf32>
    %33 = arith.mulf %32, %31 : vector<512x128xf32>
    %34 = math.exp %33 : vector<512x128xf32>
    %35 = tpu.reciprocal %34 {approx = true} : vector<512x128xf32> -> vector<512x128xf32>
    %36 = arith.mulf %0, %35 : vector<512x128xf32>
    %c0_11 = arith.constant 0 : index
    %c0_12 = arith.constant 0 : index
    %37 = vector.load %arg2[%c0_11, %c0_12] : memref<512x128xf32, #tpu.memory_space<vmem>>, vector<512x128xf32>
    tpu.vector_store %arg2[%c0_11, %c0_12], %36 {strides = array<i32>} : memref<512x128xf32, #tpu.memory_space<vmem>>, vector<512x128xf32>,
    return
  }
  func.func @transform_0(%arg0: i32) -> (i32, i32) {
    %c0_i32 = arith.constant 0 : i32
    %c0_i32_0 = arith.constant 0 : i32
    return %arg0, %c0_i32 : i32, i32
  }
  func.func @transform_1(%arg0: i32) -> (i32, i32) {
    %c0_i32 = arith.constant 0 : i32
    %c0_i32_0 = arith.constant 0 : i32
    return %arg0, %c0_i32 : i32, i32
  }
}

module attributes {stable_mosaic.version = 11 : i64} {
  func.func @_conv_relu_kernel(%arg0: i32, %arg1: i32, %arg2: memref<1x18x18x4xf32, #tpu.memory_space<vmem>>, %arg3: memref<3x3x4x128xf32, #tpu.memory_space<vmem>>, %arg4: memref<1x128xf32, #tpu.memory_space<vmem>>, %arg5: memref<1x256x128xf32, #tpu.memory_space<vmem>>) attributes {dimension_semantics = [#tpu.dimension_semantics<parallel>, #tpu.dimension_semantics<arbitrary>], iteration_bounds = array<i64: 2, 1>, scalar_prefetch = 0 : i64, scratch_operands = 0 : i64, tpu.core_type = #tpu.core_type<tc>, window_params = [{transform_indices = @transform_0, window_bounds = array<i64: 1, 18, 18, 4>}, {pipeline_mode = #tpu.pipeline_mode<synchronous>, transform_indices = @transform_1, window_bounds = array<i64: 3, 3, 4, 128>}, {pipeline_mode = #tpu.pipeline_mode<synchronous>, transform_indices = @transform_2, window_bounds = array<i64: 1, 128>}, {transform_indices = @transform_3, window_bounds = array<i64: 1, 256, 128>}]} {
    %c16_i32 = arith.constant 16 : i32
    %0 = arith.muli %arg1, %c16_i32 : i32
    %cst = arith.constant 0.000000e+00 : f32
    %1 = vector.broadcast %cst : f32 to vector<256x128xf32>
    %c0_i32 = arith.constant 0 : i32
    %2 = arith.addi %0, %c0_i32 : i32
    %c0 = arith.constant 0 : index
    %3 = arith.index_cast %2 : i32 to index
    %c0_0 = arith.constant 0 : index
    %c0_1 = arith.constant 0 : index
    %4 = vector.load %arg2[%c0, %3, %c0_0, %c0_1] : memref<1x18x18x4xf32, #tpu.memory_space<vmem>>, vector<1x16x16x4xf32>
    %5 = vector.shape_cast %4 : vector<1x16x16x4xf32> to vector<16x16x4xf32>
    %6 = vector.shape_cast %5 : vector<16x16x4xf32> to vector<256x4xf32>
    %c0_2 = arith.constant 0 : index
    %c0_3 = arith.constant 0 : index
    %c0_4 = arith.constant 0 : index
    %c0_5 = arith.constant 0 : index
    %7 = vector.load %arg3[%c0_2, %c0_3, %c0_4, %c0_5] : memref<3x3x4x128xf32, #tpu.memory_space<vmem>>, vector<1x1x4x128xf32>
    %8 = vector.shape_cast %7 : vector<1x1x4x128xf32> to vector<4x128xf32>
    %cst_6 = arith.constant dense<0.000000e+00> : vector<256x128xf32>
    %9 = tpu.matmul %6, %8, %cst_6 {dimension_numbers = #tpu.dot_dimension_numbers<[1], [0], [0], [1], [0, 0, 1, 1], [], []>} : vector<256x4xf32>, vector<4x128xf32>, vector<256x128xf32> -> vector<256x128xf32>
    %10 = arith.addf %1, %9 : vector<256x128xf32>
    %c0_i32_7 = arith.constant 0 : i32
    %11 = arith.addi %0, %c0_i32_7 : i32
    %c0_8 = arith.constant 0 : index
    %12 = arith.index_cast %11 : i32 to index
    %c1 = arith.constant 1 : index
    %c0_9 = arith.constant 0 : index
    %13 = vector.load %arg2[%c0_8, %12, %c1, %c0_9] : memref<1x18x18x4xf32, #tpu.memory_space<vmem>>, vector<1x16x16x4xf32>
    %14 = vector.shape_cast %13 : vector<1x16x16x4xf32> to vector<16x16x4xf32>
    %15 = vector.shape_cast %14 : vector<16x16x4xf32> to vector<256x4xf32>
    %c0_10 = arith.constant 0 : index
    %c1_11 = arith.constant 1 : index
    %c0_12 = arith.constant 0 : index
    %c0_13 = arith.constant 0 : index
    %16 = vector.load %arg3[%c0_10, %c1_11, %c0_12, %c0_13] : memref<3x3x4x128xf32, #tpu.memory_space<vmem>>, vector<1x1x4x128xf32>
    %17 = vector.shape_cast %16 : vector<1x1x4x128xf32> to vector<4x128xf32>
    %cst_14 = arith.constant dense<0.000000e+00> : vector<256x128xf32>
    %18 = tpu.matmul %15, %17, %cst_14 {dimension_numbers = #tpu.dot_dimension_numbers<[1], [0], [0], [1], [0, 0, 1, 1], [], []>} : vector<256x4xf32>, vector<4x128xf32>, vector<256x128xf32> -> vector<256x128xf32>
    %19 = arith.addf %10, %18 : vector<256x128xf32>
    %c0_i32_15 = arith.constant 0 : i32
    %20 = arith.addi %0, %c0_i32_15 : i32
    %c0_16 = arith.constant 0 : index
    %21 = arith.index_cast %20 : i32 to index
    %c2 = arith.constant 2 : index
    %c0_17 = arith.constant 0 : index
    %22 = vector.load %arg2[%c0_16, %21, %c2, %c0_17] : memref<1x18x18x4xf32, #tpu.memory_space<vmem>>, vector<1x16x16x4xf32>
    %23 = vector.shape_cast %22 : vector<1x16x16x4xf32> to vector<16x16x4xf32>
    %24 = vector.shape_cast %23 : vector<16x16x4xf32> to vector<256x4xf32>
    %c0_18 = arith.constant 0 : index
    %c2_19 = arith.constant 2 : index
    %c0_20 = arith.constant 0 : index
    %c0_21 = arith.constant 0 : index
    %25 = vector.load %arg3[%c0_18, %c2_19, %c0_20, %c0_21] : memref<3x3x4x128xf32, #tpu.memory_space<vmem>>, vector<1x1x4x128xf32>
    %26 = vector.shape_cast %25 : vector<1x1x4x128xf32> to vector<4x128xf32>
    %cst_22 = arith.constant dense<0.000000e+00> : vector<256x128xf32>
    %27 = tpu.matmul %24, %26, %cst_22 {dimension_numbers = #tpu.dot_dimension_numbers<[1], [0], [0], [1], [0, 0, 1, 1], [], []>} : vector<256x4xf32>, vector<4x128xf32>, vector<256x128xf32> -> vector<256x128xf32>
    %28 = arith.addf %19, %27 : vector<256x128xf32>
    %c1_i32 = arith.constant 1 : i32
    %29 = arith.addi %0, %c1_i32 : i32
    %c0_23 = arith.constant 0 : index
    %30 = arith.index_cast %29 : i32 to index
    %c0_24 = arith.constant 0 : index
    %c0_25 = arith.constant 0 : index
    %31 = vector.load %arg2[%c0_23, %30, %c0_24, %c0_25] : memref<1x18x18x4xf32, #tpu.memory_space<vmem>>, vector<1x16x16x4xf32>
    %32 = vector.shape_cast %31 : vector<1x16x16x4xf32> to vector<16x16x4xf32>
    %33 = vector.shape_cast %32 : vector<16x16x4xf32> to vector<256x4xf32>
    %c1_26 = arith.constant 1 : index
    %c0_27 = arith.constant 0 : index
    %c0_28 = arith.constant 0 : index
    %c0_29 = arith.constant 0 : index
    %34 = vector.load %arg3[%c1_26, %c0_27, %c0_28, %c0_29] : memref<3x3x4x128xf32, #tpu.memory_space<vmem>>, vector<1x1x4x128xf32>
    %35 = vector.shape_cast %34 : vector<1x1x4x128xf32> to vector<4x128xf32>
    %cst_30 = arith.constant dense<0.000000e+00> : vector<256x128xf32>
    %36 = tpu.matmul %33, %35, %cst_30 {dimension_numbers = #tpu.dot_dimension_numbers<[1], [0], [0], [1], [0, 0, 1, 1], [], []>} : vector<256x4xf32>, vector<4x128xf32>, vector<256x128xf32> -> vector<256x128xf32>
    %37 = arith.addf %28, %36 : vector<256x128xf32>
    %c1_i32_31 = arith.constant 1 : i32
    %38 = arith.addi %0, %c1_i32_31 : i32
    %c0_32 = arith.constant 0 : index
    %39 = arith.index_cast %38 : i32 to index
    %c1_33 = arith.constant 1 : index
    %c0_34 = arith.constant 0 : index
    %40 = vector.load %arg2[%c0_32, %39, %c1_33, %c0_34] : memref<1x18x18x4xf32, #tpu.memory_space<vmem>>, vector<1x16x16x4xf32>
    %41 = vector.shape_cast %40 : vector<1x16x16x4xf32> to vector<16x16x4xf32>
    %42 = vector.shape_cast %41 : vector<16x16x4xf32> to vector<256x4xf32>
    %c1_35 = arith.constant 1 : index
    %c1_36 = arith.constant 1 : index
    %c0_37 = arith.constant 0 : index
    %c0_38 = arith.constant 0 : index
    %43 = vector.load %arg3[%c1_35, %c1_36, %c0_37, %c0_38] : memref<3x3x4x128xf32, #tpu.memory_space<vmem>>, vector<1x1x4x128xf32>
    %44 = vector.shape_cast %43 : vector<1x1x4x128xf32> to vector<4x128xf32>
    %cst_39 = arith.constant dense<0.000000e+00> : vector<256x128xf32>
    %45 = tpu.matmul %42, %44, %cst_39 {dimension_numbers = #tpu.dot_dimension_numbers<[1], [0], [0], [1], [0, 0, 1, 1], [], []>} : vector<256x4xf32>, vector<4x128xf32>, vector<256x128xf32> -> vector<256x128xf32>
    %46 = arith.addf %37, %45 : vector<256x128xf32>
    %c1_i32_40 = arith.constant 1 : i32
    %47 = arith.addi %0, %c1_i32_40 : i32
    %c0_41 = arith.constant 0 : index
    %48 = arith.index_cast %47 : i32 to index
    %c2_42 = arith.constant 2 : index
    %c0_43 = arith.constant 0 : index
    %49 = vector.load %arg2[%c0_41, %48, %c2_42, %c0_43] : memref<1x18x18x4xf32, #tpu.memory_space<vmem>>, vector<1x16x16x4xf32>
    %50 = vector.shape_cast %49 : vector<1x16x16x4xf32> to vector<16x16x4xf32>
    %51 = vector.shape_cast %50 : vector<16x16x4xf32> to vector<256x4xf32>
    %c1_44 = arith.constant 1 : index
    %c2_45 = arith.constant 2 : index
    %c0_46 = arith.constant 0 : index
    %c0_47 = arith.constant 0 : index
    %52 = vector.load %arg3[%c1_44, %c2_45, %c0_46, %c0_47] : memref<3x3x4x128xf32, #tpu.memory_space<vmem>>, vector<1x1x4x128xf32>
    %53 = vector.shape_cast %52 : vector<1x1x4x128xf32> to vector<4x128xf32>
    %cst_48 = arith.constant dense<0.000000e+00> : vector<256x128xf32>
    %54 = tpu.matmul %51, %53, %cst_48 {dimension_numbers = #tpu.dot_dimension_numbers<[1], [0], [0], [1], [0, 0, 1, 1], [], []>} : vector<256x4xf32>, vector<4x128xf32>, vector<256x128xf32> -> vector<256x128xf32>
    %55 = arith.addf %46, %54 : vector<256x128xf32>
    %c2_i32 = arith.constant 2 : i32
    %56 = arith.addi %0, %c2_i32 : i32
    %c0_49 = arith.constant 0 : index
    %57 = arith.index_cast %56 : i32 to index
    %c0_50 = arith.constant 0 : index
    %c0_51 = arith.constant 0 : index
    %58 = vector.load %arg2[%c0_49, %57, %c0_50, %c0_51] : memref<1x18x18x4xf32, #tpu.memory_space<vmem>>, vector<1x16x16x4xf32>
    %59 = vector.shape_cast %58 : vector<1x16x16x4xf32> to vector<16x16x4xf32>
    %60 = vector.shape_cast %59 : vector<16x16x4xf32> to vector<256x4xf32>
    %c2_52 = arith.constant 2 : index
    %c0_53 = arith.constant 0 : index
    %c0_54 = arith.constant 0 : index
    %c0_55 = arith.constant 0 : index
    %61 = vector.load %arg3[%c2_52, %c0_53, %c0_54, %c0_55] : memref<3x3x4x128xf32, #tpu.memory_space<vmem>>, vector<1x1x4x128xf32>
    %62 = vector.shape_cast %61 : vector<1x1x4x128xf32> to vector<4x128xf32>
    %cst_56 = arith.constant dense<0.000000e+00> : vector<256x128xf32>
    %63 = tpu.matmul %60, %62, %cst_56 {dimension_numbers = #tpu.dot_dimension_numbers<[1], [0], [0], [1], [0, 0, 1, 1], [], []>} : vector<256x4xf32>, vector<4x128xf32>, vector<256x128xf32> -> vector<256x128xf32>
    %64 = arith.addf %55, %63 : vector<256x128xf32>
    %c2_i32_57 = arith.constant 2 : i32
    %65 = arith.addi %0, %c2_i32_57 : i32
    %c0_58 = arith.constant 0 : index
    %66 = arith.index_cast %65 : i32 to index
    %c1_59 = arith.constant 1 : index
    %c0_60 = arith.constant 0 : index
    %67 = vector.load %arg2[%c0_58, %66, %c1_59, %c0_60] : memref<1x18x18x4xf32, #tpu.memory_space<vmem>>, vector<1x16x16x4xf32>
    %68 = vector.shape_cast %67 : vector<1x16x16x4xf32> to vector<16x16x4xf32>
    %69 = vector.shape_cast %68 : vector<16x16x4xf32> to vector<256x4xf32>
    %c2_61 = arith.constant 2 : index
    %c1_62 = arith.constant 1 : index
    %c0_63 = arith.constant 0 : index
    %c0_64 = arith.constant 0 : index
    %70 = vector.load %arg3[%c2_61, %c1_62, %c0_63, %c0_64] : memref<3x3x4x128xf32, #tpu.memory_space<vmem>>, vector<1x1x4x128xf32>
    %71 = vector.shape_cast %70 : vector<1x1x4x128xf32> to vector<4x128xf32>
    %cst_65 = arith.constant dense<0.000000e+00> : vector<256x128xf32>
    %72 = tpu.matmul %69, %71, %cst_65 {dimension_numbers = #tpu.dot_dimension_numbers<[1], [0], [0], [1], [0, 0, 1, 1], [], []>} : vector<256x4xf32>, vector<4x128xf32>, vector<256x128xf32> -> vector<256x128xf32>
    %73 = arith.addf %64, %72 : vector<256x128xf32>
    %c2_i32_66 = arith.constant 2 : i32
    %74 = arith.addi %0, %c2_i32_66 : i32
    %c0_67 = arith.constant 0 : index
    %75 = arith.index_cast %74 : i32 to index
    %c2_68 = arith.constant 2 : index
    %c0_69 = arith.constant 0 : index
    %76 = vector.load %arg2[%c0_67, %75, %c2_68, %c0_69] : memref<1x18x18x4xf32, #tpu.memory_space<vmem>>, vector<1x16x16x4xf32>
    %77 = vector.shape_cast %76 : vector<1x16x16x4xf32> to vector<16x16x4xf32>
    %78 = vector.shape_cast %77 : vector<16x16x4xf32> to vector<256x4xf32>
    %c2_70 = arith.constant 2 : index
    %c2_71 = arith.constant 2 : index
    %c0_72 = arith.constant 0 : index
    %c0_73 = arith.constant 0 : index
    %79 = vector.load %arg3[%c2_70, %c2_71, %c0_72, %c0_73] : memref<3x3x4x128xf32, #tpu.memory_space<vmem>>, vector<1x1x4x128xf32>
    %80 = vector.shape_cast %79 : vector<1x1x4x128xf32> to vector<4x128xf32>
    %cst_74 = arith.constant dense<0.000000e+00> : vector<256x128xf32>
    %81 = tpu.matmul %78, %80, %cst_74 {dimension_numbers = #tpu.dot_dimension_numbers<[1], [0], [0], [1], [0, 0, 1, 1], [], []>} : vector<256x4xf32>, vector<4x128xf32>, vector<256x128xf32> -> vector<256x128xf32>
    %82 = arith.addf %73, %81 : vector<256x128xf32>
    %c0_75 = arith.constant 0 : index
    %c0_76 = arith.constant 0 : index
    %83 = vector.load %arg4[%c0_75, %c0_76] : memref<1x128xf32, #tpu.memory_space<vmem>>, vector<1x128xf32>
    %84 = vector.broadcast %83 : vector<1x128xf32> to vector<256x128xf32>
    %85 = arith.addf %82, %84 : vector<256x128xf32>
    %cst_77 = arith.constant 0.000000e+00 : f32
    %86 = vector.broadcast %cst_77 : f32 to vector<256x128xf32>
    %87 = arith.maximumf %85, %86 : vector<256x128xf32>
    %c0_78 = arith.constant 0 : index
    %c0_79 = arith.constant 0 : index
    %c0_80 = arith.constant 0 : index
    %88 = vector.load %arg5[%c0_78, %c0_79, %c0_80] : memref<1x256x128xf32, #tpu.memory_space<vmem>>, vector<1x256x128xf32>
    %89 = vector.shape_cast %88 : vector<1x256x128xf32> to vector<256x128xf32>
    %90 = vector.shape_cast %87 : vector<256x128xf32> to vector<1x256x128xf32>
    tpu.vector_store %arg5[%c0_78, %c0_79, %c0_80], %90 {strides = array<i32>} : memref<1x256x128xf32, #tpu.memory_space<vmem>>, vector<1x256x128xf32>,
    return
  }
  func.func @transform_0(%arg0: i32, %arg1: i32) -> (i32, i32, i32, i32) {
    %c0_i32 = arith.constant 0 : i32
    %c0_i32_0 = arith.constant 0 : i32
    %c0_i32_1 = arith.constant 0 : i32
    %c0_i32_2 = arith.constant 0 : i32
    return %arg0, %c0_i32, %c0_i32_0, %c0_i32_1 : i32, i32, i32, i32
  }
  func.func @transform_1(%arg0: i32, %arg1: i32) -> (i32, i32, i32, i32) {
    %c0_i32 = arith.constant 0 : i32
    %c0_i32_0 = arith.constant 0 : i32
    %c0_i32_1 = arith.constant 0 : i32
    %c0_i32_2 = arith.constant 0 : i32
    %c0_i32_3 = arith.constant 0 : i32
    return %c0_i32, %c0_i32_0, %c0_i32_1, %c0_i32_2 : i32, i32, i32, i32
  }
  func.func @transform_2(%arg0: i32, %arg1: i32) -> (i32, i32) {
    %c0_i32 = arith.constant 0 : i32
    %c0_i32_0 = arith.constant 0 : i32
    %c0_i32_1 = arith.constant 0 : i32
    return %c0_i32, %c0_i32_0 : i32, i32
  }
  func.func @transform_3(%arg0: i32, %arg1: i32) -> (i32, i32, i32) {
    %c0_i32 = arith.constant 0 : i32
    %c0_i32_0 = arith.constant 0 : i32
    return %arg0, %arg1, %c0_i32 : i32, i32, i32
  }
}

module attributes {stable_mosaic.version = 11 : i64} {
  func.func @_maxpool_kernel(%arg0: i32, %arg1: memref<4x8x8x128xf32, #tpu.memory_space<vmem>>, %arg2: memref<1x7x7x128xf32, #tpu.memory_space<vmem>>) attributes {dimension_semantics = [#tpu.dimension_semantics<parallel>], iteration_bounds = array<i64: 2>, scalar_prefetch = 0 : i64, scratch_operands = 0 : i64, tpu.core_type = #tpu.core_type<tc>, window_params = [{transform_indices = @transform_0, window_bounds = array<i64: 4, 8, 8, 128>}, {transform_indices = @transform_1, window_bounds = array<i64: 1, 7, 7, 128>}]} {
    %c0 = arith.constant 0 : index
    %c0_0 = arith.constant 0 : index
    %c0_1 = arith.constant 0 : index
    %c0_2 = arith.constant 0 : index
    %0 = vector.load %arg1[%c0, %c0_0, %c0_1, %c0_2] : memref<4x8x8x128xf32, #tpu.memory_space<vmem>>, vector<1x7x7x128xf32>
    %1 = vector.shape_cast %0 : vector<1x7x7x128xf32> to vector<7x7x128xf32>
    %c1 = arith.constant 1 : index
    %c0_3 = arith.constant 0 : index
    %c0_4 = arith.constant 0 : index
    %c0_5 = arith.constant 0 : index
    %2 = vector.load %arg1[%c1, %c0_3, %c0_4, %c0_5] : memref<4x8x8x128xf32, #tpu.memory_space<vmem>>, vector<1x7x7x128xf32>
    %3 = vector.shape_cast %2 : vector<1x7x7x128xf32> to vector<7x7x128xf32>
    %4 = arith.maximumf %1, %3 : vector<7x7x128xf32>
    %c0_6 = arith.constant 0 : index
    %c0_7 = arith.constant 0 : index
    %c1_8 = arith.constant 1 : index
    %c0_9 = arith.constant 0 : index
    %5 = vector.load %arg1[%c0_6, %c0_7, %c1_8, %c0_9] : memref<4x8x8x128xf32, #tpu.memory_space<vmem>>, vector<1x7x7x128xf32>
    %6 = vector.shape_cast %5 : vector<1x7x7x128xf32> to vector<7x7x128xf32>
    %7 = arith.maximumf %4, %6 : vector<7x7x128xf32>
    %c2 = arith.constant 2 : index
    %c0_10 = arith.constant 0 : index
    %c0_11 = arith.constant 0 : index
    %c0_12 = arith.constant 0 : index
    %8 = vector.load %arg1[%c2, %c0_10, %c0_11, %c0_12] : memref<4x8x8x128xf32, #tpu.memory_space<vmem>>, vector<1x7x7x128xf32>
    %9 = vector.shape_cast %8 : vector<1x7x7x128xf32> to vector<7x7x128xf32>
    %10 = arith.maximumf %7, %9 : vector<7x7x128xf32>
    %c3 = arith.constant 3 : index
    %c0_13 = arith.constant 0 : index
    %c0_14 = arith.constant 0 : index
    %c0_15 = arith.constant 0 : index
    %11 = vector.load %arg1[%c3, %c0_13, %c0_14, %c0_15] : memref<4x8x8x128xf32, #tpu.memory_space<vmem>>, vector<1x7x7x128xf32>
    %12 = vector.shape_cast %11 : vector<1x7x7x128xf32> to vector<7x7x128xf32>
    %13 = arith.maximumf %10, %12 : vector<7x7x128xf32>
    %c2_16 = arith.constant 2 : index
    %c0_17 = arith.constant 0 : index
    %c1_18 = arith.constant 1 : index
    %c0_19 = arith.constant 0 : index
    %14 = vector.load %arg1[%c2_16, %c0_17, %c1_18, %c0_19] : memref<4x8x8x128xf32, #tpu.memory_space<vmem>>, vector<1x7x7x128xf32>
    %15 = vector.shape_cast %14 : vector<1x7x7x128xf32> to vector<7x7x128xf32>
    %16 = arith.maximumf %13, %15 : vector<7x7x128xf32>
    %c0_20 = arith.constant 0 : index
    %c1_21 = arith.constant 1 : index
    %c0_22 = arith.constant 0 : index
    %c0_23 = arith.constant 0 : index
    %17 = vector.load %arg1[%c0_20, %c1_21, %c0_22, %c0_23] : memref<4x8x8x128xf32, #tpu.memory_space<vmem>>, vector<1x7x7x128xf32>
    %18 = vector.shape_cast %17 : vector<1x7x7x128xf32> to vector<7x7x128xf32>
    %19 = arith.maximumf %16, %18 : vector<7x7x128xf32>
    %c1_24 = arith.constant 1 : index
    %c1_25 = arith.constant 1 : index
    %c0_26 = arith.constant 0 : index
    %c0_27 = arith.constant 0 : index
    %20 = vector.load %arg1[%c1_24, %c1_25, %c0_26, %c0_27] : memref<4x8x8x128xf32, #tpu.memory_space<vmem>>, vector<1x7x7x128xf32>
    %21 = vector.shape_cast %20 : vector<1x7x7x128xf32> to vector<7x7x128xf32>
    %22 = arith.maximumf %19, %21 : vector<7x7x128xf32>
    %c0_28 = arith.constant 0 : index
    %c1_29 = arith.constant 1 : index
    %c1_30 = arith.constant 1 : index
    %c0_31 = arith.constant 0 : index
    %23 = vector.load %arg1[%c0_28, %c1_29, %c1_30, %c0_31] : memref<4x8x8x128xf32, #tpu.memory_space<vmem>>, vector<1x7x7x128xf32>
    %24 = vector.shape_cast %23 : vector<1x7x7x128xf32> to vector<7x7x128xf32>
    %25 = arith.maximumf %22, %24 : vector<7x7x128xf32>
    %c0_32 = arith.constant 0 : index
    %c0_33 = arith.constant 0 : index
    %c0_34 = arith.constant 0 : index
    %c0_35 = arith.constant 0 : index
    %26 = vector.load %arg2[%c0_32, %c0_33, %c0_34, %c0_35] : memref<1x7x7x128xf32, #tpu.memory_space<vmem>>, vector<1x7x7x128xf32>
    %27 = vector.shape_cast %26 : vector<1x7x7x128xf32> to vector<7x7x128xf32>
    %28 = vector.shape_cast %25 : vector<7x7x128xf32> to vector<1x7x7x128xf32>
    tpu.vector_store %arg2[%c0_32, %c0_33, %c0_34, %c0_35], %28 {strides = array<i32>} : memref<1x7x7x128xf32, #tpu.memory_space<vmem>>, vector<1x7x7x128xf32>,
    return
  }
  func.func @transform_0(%arg0: i32) -> (i32, i32, i32, i32) {
    %c0_i32 = arith.constant 0 : i32
    %c0_i32_0 = arith.constant 0 : i32
    %c0_i32_1 = arith.constant 0 : i32
    %c0_i32_2 = arith.constant 0 : i32
    return %arg0, %c0_i32, %c0_i32_0, %c0_i32_1 : i32, i32, i32, i32
  }
  func.func @transform_1(%arg0: i32) -> (i32, i32, i32, i32) {
    %c0_i32 = arith.constant 0 : i32
    %c0_i32_0 = arith.constant 0 : i32
    %c0_i32_1 = arith.constant 0 : i32
    %c0_i32_2 = arith.constant 0 : i32
    return %arg0, %c0_i32, %c0_i32_0, %c0_i32_1 : i32, i32, i32, i32
  }
}

</mosaic_0001>

<bundles_post_ra>
// kernel: conv_block_forward.5
= control target key start
LH: loop header
LB: loop body
LE: loop exit
PB: predicated region body
PF: predicated region fallthrough
CT: control target
= control target key end

     0   :  { %s396_s6 = smov 0   ;;  %s492_s0 = inlined_call_operand.vmem [shape: f32[8,8,8,128], index: 0, kind: input, shape index: {}]   ;;  %s493_s1 = inlined_call_operand.vmem [shape: f32[2,7,7,128], index: 1, kind: output, shape index: {}]  }
   0x1 LB: > { %s308_s7 = sadd.s32 4294967295, %s384_s6   ;;  %p312_p0 = scmp.ge.s32.totalorder %s384_s6, 1  ;;  %s384_s6 = sphi %s396_s6, %s11_s6  }
   0x2   : > { %p89_p1 = scmp.lt.s32.totalorder %s384_s6, 3 }
   0x4   : > { %p90_p2 = pnand %p312_p0, %p89_p1 }
   0x5   : > { %s313_s8 = sshll.u32 (!%p90_p2), %s308_s7, 2  ;;  %p117_p4 = scmp.lt.s32.totalorder (!%p90_p2), %s308_s7, 1 }
   0x6   : > { %93 = sbr.rel (%p90_p2) target bundleno = 47 (0x2f), region = 24  ;;  %p111_p3 = scmp.lt.s32.totalorder (!%p90_p2), %s313_s8, 7 }
   0xb   : > { %s495_s8 = smov (!%p111_p3, %s313_s8), 7  ;;  %s497_s7 = smov (!%p117_p4, %s308_s7), 1 }
   0xc   : > { %s368_s9 = sshll.u32 %s495_s8, 6  ;;  %s369_s13 = smul.u32 56, %s497_s7 }
   0xd   : > { %s407_s12 = scalar_lea.vmem %s492_s0, %s368_s9 }
   0xe   : > { %v122_v0 = vld [vmem:[%s407_s12] sm:$0x7f]  ;;  %v123_v6 = vld [vmem:[%s407_s12 + $0x8] sm:$0x7f]  ;;  %v124_v15 = vld [vmem:[%s407_s12 + $0x10] sm:$0x7f]  ;;  %s449_s16 = scalar_lea.vmem %s493_s1, %s369_s13 }
   0xf   : > { %v317_v1 = vld [vmem:[%s407_s12 + $0x40] sm:$0x7f]  ;;  %v318_v7 = vld [vmem:[%s407_s12 + $0x48] sm:$0x7f]  ;;  %v319_v16 = vld [vmem:[%s407_s12 + $0x50] sm:$0x7f] }
  0x10   : > { %v144_v2 = vld [vmem:[%s407_s12 + $0x1] sm:$0x7f]  ;;  %v137_v3 = vmax.f32 %v122_v0, %v317_v1  ;;  %v145_v8 = vld [vmem:[%s407_s12 + $0x9] sm:$0x7f]  ;;  %v138_v10 = vmax.f32 %v123_v6, %v318_v7  ;;  %v146_v17 = vld [vmem:[%s407_s12 + $0x11] sm:$0x7f]  ;;  %v139_v20 = vmax.f32 %v124_v15, %v319_v16 }
  0x11   : > { %v324_v4 = vld [vmem:[%s407_s12 + $0x80] sm:$0x7f]  ;;  %v325_v13 = vld [vmem:[%s407_s12 + $0x88] sm:$0x7f]  ;;  %v326_v24 = vld [vmem:[%s407_s12 + $0x90] sm:$0x7f] }
  0x12   : > { %v151_v5 = vmax.f32 %v137_v3, %v144_v2  ;;  %v331_v9 = vld [vmem:[%s407_s12 + $0xc0] sm:$0x7f]  ;;  %v152_v14 = vmax.f32 %v138_v10, %v145_v8  ;;  %v332_v19 = vld [vmem:[%s407_s12 + $0xc8] sm:$0x7f]  ;;  %v153_v26 = vmax.f32 %v139_v20, %v146_v17  ;;  %v125_v27 = vld [vmem:[%s407_s12 + $0x18] sm:$0x7f] }
  0x13   : > { %v338_v12 = vld [vmem:[%s407_s12 + $0x81] sm:$0x7f]  ;;  %v345_v21 = vld [vmem:[%s407_s12 + $0x8] sm:$0x7f]  ;;  %v320_v28 = vld [vmem:[%s407_s12 + $0x58] sm:$0x7f] }
  0x14   : > { %v166_v11 = vmax.f32 %v151_v5, %v324_v4  ;;  %v167_v22 = vmax.f32 %v152_v14, %v325_v13  ;;  %v339_v23 = vld [vmem:[%s407_s12 + $0x89] sm:$0x7f]  ;;  %v147_v29 = vld [vmem:[%s407_s12 + $0x19] sm:$0x7f]  ;;  %v333_v33 = vld [vmem:[%s407_s12 + $0xd0] sm:$0x7f]  ;;  %v140_v34 = vmax.f32 %v125_v27, %v320_v28  ;;  %v168_v37 = vmax.f32 %v153_v26, %v326_v24 }
  0x15   : > { %v352_v30 = vld [vmem:[%s407_s12 + $0x48] sm:$0x7f]  ;;  %v346_v36 = vld [vmem:[%s407_s12 + $0x10] sm:$0x7f]  ;;  %v327_v39 = vld [vmem:[%s407_s12 + $0x98] sm:$0x7f] }
  0x16   : > { %v181_v18 = vmax.f32 %v166_v11, %v331_v9  ;;  %v359_v31 = vld [vmem:[%s407_s12 + $0x9] sm:$0x7f]  ;;  %v182_v32 = vmax.f32 %v167_v22, %v332_v19  ;;  %v340_v38 = vld [vmem:[%s407_s12 + $0x91] sm:$0x7f]  ;;  %v154_v41 = vmax.f32 %v140_v34, %v147_v29  ;;  %v126_v42 = vld [vmem:[%s407_s12 + $0x20] sm:$0x7f]  ;;  %v183_v48 = vmax.f32 %v168_v37, %v333_v33 }
  0x17   : > { %v321_v43 = vld [vmem:[%s407_s12 + $0x60] sm:$0x7f]  ;;  %v353_v46 = vld [vmem:[%s407_s12 + $0x50] sm:$0x7f]  ;;  %v334_v49 = vld [vmem:[%s407_s12 + $0xd8] sm:$0x7f] }
  0x18   : > { %v195_v25 = vmax.f32 %v181_v18, %v338_v12  ;;  %v196_v40 = vmax.f32 %v182_v32, %v339_v23  ;;  %v148_v44 = vld [vmem:[%s407_s12 + $0x21] sm:$0x7f]  ;;  %v360_v47 = vld [vmem:[%s407_s12 + $0x11] sm:$0x7f]  ;;  %v141_v50 = vmax.f32 %v126_v42, %v321_v43  ;;  %v347_v52 = vld [vmem:[%s407_s12 + $0x18] sm:$0x7f]  ;;  %v169_v53 = vmax.f32 %v154_v41, %v327_v39 }
  0x19   : > { %v341_v54 = vld [vmem:[%s407_s12 + $0x99] sm:$0x7f]  ;;  %v328_v55 = vld [vmem:[%s407_s12 + $0xa0] sm:$0x7f]  ;;  %v197_v57 = vmax.f32 %v183_v48, %v340_v38  ;;  %v127_v59 = vld [vmem:[%s407_s12 + $0x28] sm:$0x7f] }
  0x1a   : > { %v210_v35 = vmax.f32 %v195_v25, %v345_v21  ;;  %v211_v51 = vmax.f32 %v196_v40, %v346_v36  ;;  %v155_v58 = vmax.f32 %v141_v50, %v148_v44  ;;  %v322_v60 = vld [vmem:[%s407_s12 + $0x68] sm:$0x7f]  ;;  %v354_v63 = vld [vmem:[%s407_s12 + $0x58] sm:$0x7f]  ;;  %v184_v1 = vmax.f32 %v169_v53, %v334_v49  ;;  %v335_v2 = vld [vmem:[%s407_s12 + $0xe0] sm:$0x7f] }
  0x1b   : > { %v149_v61 = vld [vmem:[%s407_s12 + $0x29] sm:$0x7f]  ;;  %v361_v0 = vld [vmem:[%s407_s12 + $0x19] sm:$0x7f]  ;;  %v142_v3 = vmax.f32 %v127_v59, %v322_v60  ;;  %v212_v4 = vmax.f32 %v197_v57, %v347_v52  ;;  %v348_v5 = vld [vmem:[%s407_s12 + $0x20] sm:$0x7f] }
  0x1c   : > { %v225_v45 = vmax.f32 %v210_v35, %v352_v30  ;;  %v226_v62 = vmax.f32 %v211_v51, %v353_v46  ;;  %v170_v6 = vmax.f32 %v155_v58, %v328_v55  ;;  %v329_v7 = vld [vmem:[%s407_s12 + $0xa8] sm:$0x7f]  ;;  %v198_v9 = vmax.f32 %v184_v1, %v341_v54  ;;  %v342_v10 = vld [vmem:[%s407_s12 + $0xa1] sm:$0x7f]  ;;  %v128_v12 = vld [vmem:[%s407_s12 + $0x30] sm:$0x7f] }
  0x1d   : > { %v156_v11 = vmax.f32 %v142_v3, %v149_v61  ;;  %v323_v13 = vld [vmem:[%s407_s12 + $0x70] sm:$0x7f]  ;;  %v227_v14 = vmax.f32 %v212_v4, %v354_v63  ;;  %v355_v15 = vld [vmem:[%s407_s12 + $0x60] sm:$0x7f]  ;;  %v336_v17 = vld [vmem:[%s407_s12 + $0xe8] sm:$0x7f] }
  0x1e   : > { %v239_v56 = vmax.f32 %v225_v45, %v359_v31  ;;  %v240_v8 = vmax.f32 %v226_v62, %v360_v47  ;;  %v185_v16 = vmax.f32 %v170_v6, %v335_v2  ;;  %v143_v18 = vmax.f32 %v128_v12, %v323_v13  ;;  %v150_v19 = vld [vmem:[%s407_s12 + $0x31] sm:$0x7f]  ;;  %v349_v21 = vld [vmem:[%s407_s12 + $0x28] sm:$0x7f]  ;;  %v362_v25 = vld [vmem:[%s407_s12 + $0x21] sm:$0x7f] }
  0x1f   : > { %v213_v20 = vmax.f32 %v198_v9, %v348_v5  ;;  %v171_v22 = vmax.f32 %v156_v11, %v329_v7  ;;  %v330_v23 = vld [vmem:[%s407_s12 + $0xb0] sm:$0x7f]  ;;  %v241_v24 = vmax.f32 %v227_v14, %v361_v0  ;;  %v343_v27 = vld [vmem:[%s407_s12 + $0xa9] sm:$0x7f]  ;;  %v351_v44 = vld [vmem:[%s407_s12 + $0x38] sm:$0x7f] }
  0x20   : > { %246 = vst [vmem:[%s449_s16] sm:$0x7f] %v239_v56  ;;  %v199_v26 = vmax.f32 %v185_v16, %v342_v10  ;;  %v157_v28 = vmax.f32 %v143_v18, %v150_v19  ;;  %v356_v30 = vld [vmem:[%s407_s12 + $0x68] sm:$0x7f]  ;;  %v337_v32 = vld [vmem:[%s407_s12 + $0xf0] sm:$0x7f] }
  0x21   : > { %247 = vst [vmem:[%s449_s16 + $0x8] sm:$0x7f] %v240_v8  ;;  %v228_v29 = vmax.f32 %v213_v20, %v355_v15  ;;  %v186_v31 = vmax.f32 %v171_v22, %v336_v17  ;;  %v350_v34 = vld [vmem:[%s407_s12 + $0x30] sm:$0x7f]  ;;  %v363_v37 = vld [vmem:[%s407_s12 + $0x29] sm:$0x7f] }
  0x22   : > { %248 = vst [vmem:[%s449_s16 + $0x10] sm:$0x7f] %v241_v24  ;;  %v214_v33 = vmax.f32 %v199_v26, %v349_v21  ;;  %v172_v35 = vmax.f32 %v157_v28, %v330_v23  ;;  %v344_v39 = vld [vmem:[%s407_s12 + $0xb1] sm:$0x7f]  ;;  %v358_v49 = vld [vmem:[%s407_s12 + $0x78] sm:$0x7f] }
  0x23   : > { %v242_v36 = vmax.f32 %v228_v29, %v362_v25  ;;  %v200_v38 = vmax.f32 %v186_v31, %v343_v27  ;;  %v357_v41 = vld [vmem:[%s407_s12 + $0x70] sm:$0x7f]  ;;  %v365_v52 = vld [vmem:[%s407_s12 + $0x39] sm:$0x7f] }
  0x24   : > { %v229_v40 = vmax.f32 %v214_v33, %v356_v30  ;;  %v187_v42 = vmax.f32 %v172_v35, %v337_v32  ;;  %v364_v46 = vld [vmem:[%s407_s12 + $0x31] sm:$0x7f] }
  0x25   : > { %249 = vst [vmem:[%s449_s16 + $0x18] sm:$0x7f] %v242_v36  ;;  %v215_v43 = vmax.f32 %v200_v38, %v350_v34 }
  0x26   : > { %v243_v45 = vmax.f32 %v229_v40, %v363_v37  ;;  %v201_v47 = vmax.f32 %v187_v42, %v344_v39 }
  0x27   : > { %v230_v48 = vmax.f32 %v215_v43, %v357_v41 }
  0x28   : > { %250 = vst [vmem:[%s449_s16 + $0x20] sm:$0x7f] %v243_v45  ;;  %v216_v50 = vmax.f32 %v201_v47, %v351_v44 }
  0x29   : > { %v244_v51 = vmax.f32 %v230_v48, %v364_v46 }
  0x2a   : > { %v231_v53 = vmax.f32 %v216_v50, %v358_v49 }
  0x2b   : > { %251 = vst [vmem:[%s449_s16 + $0x28] sm:$0x7f] %v244_v51 }
  0x2c   : > { %v245_v54 = vmax.f32 %v231_v53, %v365_v52 }
  0x2e   : > { %252 = vst [vmem:[%s449_s16 + $0x30] sm:$0x7f] %v245_v54 }
  0x2f PF: > { %s11_s6 = sadd.s32 1, %s384_s6  }
  0x30   : > { %p8_p5 = scmp.ge.s32.totalorder %s11_s6, 4  }
  0x32   :  { %10 = sbr.rel (!%p8_p5) target bundleno = 1 (0x1), region = 59 }

// kernel: conv_block_forward.4
= control target key start
LH: loop header
LB: loop body
LE: loop exit
PB: predicated region body
PF: predicated region fallthrough
CT: control target
= control target key end

     0   :  { %s2262_s12 = smov 1   ;;  %s2263_s23 = smov 127   ;;  %s5049_s0 = inlined_call_operand.vmem [shape: f32[512,128], index: 0, kind: input, shape index: {}]   ;;  %s5050_s1 = inlined_call_operand.vmem [shape: f32[512,128], index: 1, kind: output, shape index: {}]  }
   0x1   :  { %v12_v0 = vld [vmem:[%s5049_s0 + $0x20] sm:$0xff]  ;;  %v10_v1 = vld [vmem:[%s5049_s0 + $0x10] sm:$0xff]  ;;  %v13_v6 = vld [vmem:[%s5049_s0 + $0x28] sm:$0xff]  ;;  %s2265_s24 = smov 126  }
   0x2   :  { %v8_v2 = vld [vmem:[%s5049_s0] sm:$0xff]  ;;  %v2285_v3 = vmul.f32 %v12_v0, %v12_v0  ;;  %v2287_v4 = vmul.f32 %v10_v1, %v10_v1  ;;  %v11_v7 = vld [vmem:[%s5049_s0 + $0x18] sm:$0xff]  ;;  %v9_v8 = vld [vmem:[%s5049_s0 + $0x8] sm:$0xff]  ;;  %v2306_v9 = vmul.f32 %v13_v6, %v13_v6 }
   0x3   :  { %v2289_v5 = vmul.f32 %v8_v2, %v8_v2  ;;  %v2308_v10 = vmul.f32 %v11_v7, %v11_v7  ;;  %v2310_v11 = vmul.f32 %v9_v8, %v9_v8  ;;  %v16_v12 = vld [vmem:[%s5049_s0 + $0x40] sm:$0xff]  ;;  %v15_v13 = vld [vmem:[%s5049_s0 + $0x38] sm:$0xff]  ;;  %v14_v14 = vld [vmem:[%s5049_s0 + $0x30] sm:$0xff] }
   0x4   :  { %146 = vrot.lane.b32.xlu2 %v2285_v3, %s2262_s12  ;;  %142 = vrot.lane.b32.xlu1 %v2287_v4, %s2262_s12  ;;  %v2327_v15 = vmul.f32 %v16_v12, %v16_v12  ;;  %v2329_v16 = vmul.f32 %v15_v13, %v15_v13  ;;  %v2331_v17 = vmul.f32 %v14_v14, %v14_v14  ;;  %v19_v18 = vld [vmem:[%s5049_s0 + $0x58] sm:$0xff]  ;;  %v18_v19 = vld [vmem:[%s5049_s0 + $0x50] sm:$0xff] }
   0x5   :  { %5110 = vst [vmem:[#allocation2_spill] sm:$0xff] %v2289_v5  ;;  %138 = vrot.lane.b32.xlu0 %v2289_v5, %s2262_s12  ;;  %v17_v20 = vld [vmem:[%s5049_s0 + $0x48] sm:$0xff]  ;;  %v2348_v21 = vmul.f32 %v19_v18, %v19_v18  ;;  %v2350_v22 = vmul.f32 %v18_v19, %v18_v19  ;;  %v22_v24 = vld [vmem:[%s5049_s0 + $0x70] sm:$0xff]  ;;  %v20_v26 = vld [vmem:[%s5049_s0 + $0x60] sm:$0xff] }
   0x6   :  { %5111 = vst [vmem:[#allocation3_spill] sm:$0xff] %v2310_v11  ;;  %v2352_v23 = vmul.f32 %v17_v20, %v17_v20  ;;  %v21_v25 = vld [vmem:[%s5049_s0 + $0x68] sm:$0xff]  ;;  %v2369_v27 = vmul.f32 %v22_v24, %v22_v24  ;;  %v2373_v29 = vmul.f32 %v20_v26, %v20_v26  ;;  %v24_v31 = vld [vmem:[%s5049_s0 + $0x80] sm:$0xff]  ;;  %v23_v32 = vld [vmem:[%s5049_s0 + $0x78] sm:$0xff] }
   0x7   :  { %v2371_v28 = vmul.f32 %v21_v25, %v21_v25  ;;  %v25_v30 = vld [vmem:[%s5049_s0 + $0x88] sm:$0xff]  ;;  %v2392_v34 = vmul.f32 %v24_v31, %v24_v31  ;;  %v2394_v35 = vmul.f32 %v23_v32, %v23_v32  ;;  %v28_v36 = vld [vmem:[%s5049_s0 + $0xa0] sm:$0xff]  ;;  %v27_v37 = vld [vmem:[%s5049_s0 + $0x98] sm:$0xff] }
   0x8   :  { %v2390_v33 = vmul.f32 %v25_v30, %v25_v30  ;;  %v26_v38 = vld [vmem:[%s5049_s0 + $0x90] sm:$0xff]  ;;  %v2411_v39 = vmul.f32 %v28_v36, %v28_v36  ;;  %v2413_v40 = vmul.f32 %v27_v37, %v27_v37  ;;  %v31_v42 = vld [vmem:[%s5049_s0 + $0xb8] sm:$0xff]  ;;  %v29_v44 = vld [vmem:[%s5049_s0 + $0xa8] sm:$0xff] }
   0x9   :  { %v2415_v41 = vmul.f32 %v26_v38, %v26_v38  ;;  %v30_v43 = vld [vmem:[%s5049_s0 + $0xb0] sm:$0xff]  ;;  %v2432_v45 = vmul.f32 %v31_v42, %v31_v42  ;;  %v2436_v47 = vmul.f32 %v29_v44, %v29_v44  ;;  %v33_v49 = vld [vmem:[%s5049_s0 + $0xc8] sm:$0xff]  ;;  %v32_v50 = vld [vmem:[%s5049_s0 + $0xc0] sm:$0xff] }
   0xa   :  { %v2434_v46 = vmul.f32 %v30_v43, %v30_v43  ;;  %v34_v48 = vld [vmem:[%s5049_s0 + $0xd0] sm:$0xff]  ;;  %v2455_v52 = vmul.f32 %v33_v49, %v33_v49  ;;  %v2457_v53 = vmul.f32 %v32_v50, %v32_v50  ;;  %v37_v54 = vld [vmem:[%s5049_s0 + $0xe8] sm:$0xff]  ;;  %v36_v55 = vld [vmem:[%s5049_s0 + $0xe0] sm:$0xff] }
   0xb   :  { %v2453_v51 = vmul.f32 %v34_v48, %v34_v48  ;;  %v35_v56 = vld [vmem:[%s5049_s0 + $0xd8] sm:$0xff]  ;;  %v2474_v57 = vmul.f32 %v37_v54, %v37_v54  ;;  %v2476_v58 = vmul.f32 %v36_v55, %v36_v55  ;;  %v40_v60 = vld [vmem:[%s5049_s0 + $0x100] sm:$0xff]  ;;  %v38_v62 = vld [vmem:[%s5049_s0 + $0xf0] sm:$0xff] }
   0xc   :  { %148 = vrot.lane.b32.xlu2 %v2306_v9, %s2262_s12  ;;  %144 = vrot.lane.b32.xlu1 %v2308_v10, %s2262_s12  ;;  %v2478_v59 = vmul.f32 %v35_v56, %v35_v56  ;;  %v39_v61 = vld [vmem:[%s5049_s0 + $0xf8] sm:$0xff]  ;;  %v2495_v63 = vmul.f32 %v40_v60, %v40_v60  ;;  %v2499_v1 = vmul.f32 %v38_v62, %v38_v62  ;;  %v42_v6 = vld [vmem:[%s5049_s0 + $0x110] sm:$0xff] }
   0xd   :  { %140 = vrot.lane.b32.xlu0 %v2310_v11, %s2262_s12  ;;  %v2497_v0 = vmul.f32 %v39_v61, %v39_v61  ;;  %v43_v2 = vld [vmem:[%s5049_s0 + $0x118] sm:$0xff]  ;;  %v41_v7 = vld [vmem:[%s5049_s0 + $0x108] sm:$0xff]  ;;  %v2518_v12 = vmul.f32 %v42_v6, %v42_v6  ;;  %v46_v14 = vld [vmem:[%s5049_s0 + $0x130] sm:$0xff] }
   0xe   :  { %5112 = vst [vmem:[#allocation4_spill] sm:$0xff] %v2478_v59  ;;  %v2516_v8 = vmul.f32 %v43_v2, %v43_v2  ;;  %v2520_v13 = vmul.f32 %v41_v7, %v41_v7  ;;  %v45_v18 = vld [vmem:[%s5049_s0 + $0x128] sm:$0xff]  ;;  %v44_v20 = vld [vmem:[%s5049_s0 + $0x120] sm:$0xff]  ;;  %v2539_v24 = vmul.f32 %v46_v14, %v46_v14  ;;  %v47_v36 = vld [vmem:[%s5049_s0 + $0x138] sm:$0xff] }
   0xf   :  { %5113 = vst [vmem:[#allocation5_spill] sm:$0xff] %v2499_v1  ;;  %v2541_v25 = vmul.f32 %v45_v18, %v45_v18  ;;  %v2543_v26 = vmul.f32 %v44_v20, %v44_v20  ;;  %v49_v30 = vld [vmem:[%s5049_s0 + $0x148] sm:$0xff]  ;;  %v48_v31 = vld [vmem:[%s5049_s0 + $0x140] sm:$0xff]  ;;  %v2566_v42 = vmul.f32 %v47_v36, %v47_v36  ;;  %v51_v44 = vld [vmem:[%s5049_s0 + $0x158] sm:$0xff] }
  0x10   :  { %5114 = vst [vmem:[#allocation6_spill] sm:$0xff] %v2516_v8  ;;  %v2562_v37 = vmul.f32 %v49_v30, %v49_v30  ;;  %v2564_v38 = vmul.f32 %v48_v31, %v48_v31  ;;  %v52_v43 = vld [vmem:[%s5049_s0 + $0x160] sm:$0xff]  ;;  %v50_v49 = vld [vmem:[%s5049_s0 + $0x150] sm:$0xff]  ;;  %v2587_v54 = vmul.f32 %v51_v44, %v51_v44  ;;  %v55_v56 = vld [vmem:[%s5049_s0 + $0x178] sm:$0xff] }
  0x11   :  { %5115 = vst [vmem:[#allocation7_spill] sm:$0xff] %v2520_v13  ;;  %v2585_v50 = vmul.f32 %v52_v43, %v52_v43  ;;  %v2589_v55 = vmul.f32 %v50_v49, %v50_v49  ;;  %v54_v60 = vld [vmem:[%s5049_s0 + $0x170] sm:$0xff]  ;;  %v53_v2 = vld [vmem:[%s5049_s0 + $0x168] sm:$0xff]  ;;  %v2612_v7 = vmul.f32 %v55_v56, %v55_v56  ;;  %v56_v43 = vld [vmem:[%s5049_s0 + $0x180] sm:$0xff] }
  0x12   :  { %5117 = vst [vmem:[#allocation9_spill] sm:$0xff] %v2539_v24  ;;  %v2614_v14 = vmul.f32 %v54_v60, %v54_v60  ;;  %v2616_v18 = vmul.f32 %v53_v2, %v53_v2  ;;  %v58_v20 = vld [vmem:[%s5049_s0 + $0x190] sm:$0xff]  ;;  %v57_v30 = vld [vmem:[%s5049_s0 + $0x188] sm:$0xff]  ;;  %v2643_v60 = vmul.f32 %v56_v43, %v56_v43 }
  0x13   :  { %5118 = vst [vmem:[#allocation10_spill] sm:$0xff] %v2541_v25  ;;  %v2639_v49 = vmul.f32 %v58_v20, %v58_v20  ;;  %v2641_v56 = vmul.f32 %v57_v30, %v57_v30  ;;  %v61_v2 = vld [vmem:[%s5049_s0 + $0x1a8] sm:$0xff]  ;;  %v60_v20 = vld [vmem:[%s5049_s0 + $0x1a0] sm:$0xff] }
  0x14   :  { %154 = vrot.lane.b32.xlu2 %v2327_v15, %s2262_s12  ;;  %152 = vrot.lane.b32.xlu1 %v2329_v16, %s2262_s12  ;;  %5119 = vst [vmem:[#allocation11_spill] sm:$0xff] %v2543_v26 }
  0x15   :  { %150 = vrot.lane.b32.xlu0 %v2331_v17, %s2262_s12  ;;  %5121 = vst [vmem:[#allocation13_spill] sm:$0xff] %v2562_v37 }
  0x16   :  { %5122 = vst [vmem:[#allocation14_spill] sm:$0xff] %v2564_v38 }
  0x17   :  { %5123 = vst [vmem:[#allocation15_spill] sm:$0xff] %v2566_v42 }
  0x18   :  { %5125 = vst [vmem:[#allocation17_spill] sm:$0xff] %v2585_v50 }
  0x19   :  { %5126 = vst [vmem:[#allocation18_spill] sm:$0xff] %v2587_v54 }
  0x1a   :  { %5127 = vst [vmem:[#allocation19_spill] sm:$0xff] %v2589_v55 }
  0x1b   :  { %5131 = vst [vmem:[#allocation23_spill] sm:$0xff] %v2612_v7 }
  0x1c   :  { %160 = vrot.lane.b32.xlu2 %v2348_v21, %s2262_s12  ;;  %158 = vrot.lane.b32.xlu1 %v2350_v22, %s2262_s12  ;;  %5132 = vst [vmem:[#allocation24_spill] sm:$0xff] %v2614_v14 }
  0x1d   :  { %156 = vrot.lane.b32.xlu0 %v2352_v23, %s2262_s12  ;;  %5133 = vst [vmem:[#allocation25_spill] sm:$0xff] %v2616_v18 }
  0x1e   :  { %5137 = vst [vmem:[#allocation29_spill] sm:$0xff] %v2639_v49 }
  0x1f   :  { %5138 = vst [vmem:[#allocation30_spill] sm:$0xff] %v2641_v56 }
  0x20   :  { %5139 = vst [vmem:[#allocation31_spill] sm:$0xff] %v2643_v60 }
  0x24   :  { %166 = vrot.lane.b32.xlu2 %v2369_v27, %s2262_s12  ;;  %164 = vrot.lane.b32.xlu1 %v2371_v28, %s2262_s12 }
  0x25   :  { %162 = vrot.lane.b32.xlu0 %v2373_v29, %s2262_s12 }
  0x2c   :  { %172 = vrot.lane.b32.xlu2 %v2390_v33, %s2262_s12  ;;  %170 = vrot.lane.b32.xlu1 %v2392_v34, %s2262_s12 }
  0x2d   :  { %168 = vrot.lane.b32.xlu0 %v2394_v35, %s2262_s12 }
  0x34   :  { %178 = vrot.lane.b32.xlu2 %v2411_v39, %s2262_s12  ;;  %176 = vrot.lane.b32.xlu1 %v2413_v40, %s2262_s12 }
  0x35   :  { %174 = vrot.lane.b32.xlu0 %v2415_v41, %s2262_s12 }
  0x3c   :  { %184 = vrot.lane.b32.xlu2 %v2432_v45, %s2262_s12  ;;  %182 = vrot.lane.b32.xlu1 %v2434_v46, %s2262_s12 }
  0x3d   :  { %180 = vrot.lane.b32.xlu0 %v2436_v47, %s2262_s12 }
  0x44   :  { %190 = vrot.lane.b32.xlu2 %v2453_v51, %s2262_s12  ;;  %188 = vrot.lane.b32.xlu1 %v2455_v52, %s2262_s12 }
  0x45   :  { %186 = vrot.lane.b32.xlu0 %v2457_v53, %s2262_s12 }
  0x4c   :  { %196 = vrot.lane.b32.xlu2 %v2474_v57, %s2262_s12  ;;  %194 = vrot.lane.b32.xlu1 %v2476_v58, %s2262_s12 }
  0x4d   :  { %192 = vrot.lane.b32.xlu0 %v2478_v59, %s2262_s12 }
  0x54   :  { %202 = vrot.lane.b32.xlu2 %v2495_v63, %s2262_s12  ;;  %200 = vrot.lane.b32.xlu1 %v2497_v0, %s2262_s12 }
  0x55   :  { %198 = vrot.lane.b32.xlu0 %v2499_v1, %s2262_s12 }
  0x5c   :  { %208 = vrot.lane.b32.xlu2 %v2516_v8, %s2262_s12  ;;  %206 = vrot.lane.b32.xlu1 %v2518_v12, %s2262_s12 }
  0x5d   :  { %204 = vrot.lane.b32.xlu0 %v2520_v13, %s2262_s12 }
  0x5e   :  { %v2534_v19 = vpop.permute.xlu2 %146 }
  0x5f   :  { %5116 = vst [vmem:[#allocation8_spill] sm:$0xff] %v2534_v19 }
  0x64   :  { %214 = vrot.lane.b32.xlu2 %v2539_v24, %s2262_s12  ;;  %212 = vrot.lane.b32.xlu1 %v2541_v25, %s2262_s12 }
  0x65   :  { %210 = vrot.lane.b32.xlu0 %v2543_v26, %s2262_s12 }
  0x66   :  { %v2557_v32 = vpop.permute.xlu2 %148 }
  0x67   :  { %5120 = vst [vmem:[#allocation12_spill] sm:$0xff] %v2557_v32 }
  0x6c   :  { %220 = vrot.lane.b32.xlu2 %v2562_v37, %s2262_s12  ;;  %218 = vrot.lane.b32.xlu1 %v2564_v38, %s2262_s12 }
  0x6d   :  { %216 = vrot.lane.b32.xlu0 %v2566_v42, %s2262_s12 }
  0x6e   :  { %v2580_v48 = vpop.permute.xlu2 %154 }
  0x6f   :  { %5124 = vst [vmem:[#allocation16_spill] sm:$0xff] %v2580_v48 }
  0x74   :  { %226 = vrot.lane.b32.xlu2 %v2585_v50, %s2262_s12  ;;  %224 = vrot.lane.b32.xlu1 %v2587_v54, %s2262_s12 }
  0x75   :  { %222 = vrot.lane.b32.xlu0 %v2589_v55, %s2262_s12 }
  0x76   :  { %v2603_v61 = vpop.permute.xlu2 %160  ;;  %v2605_v62 = vpop.permute.xlu1 %142 }
  0x77   :  { %5128 = vst [vmem:[#allocation20_spill] sm:$0xff] %v2603_v61  ;;  %v2610_v6 = vpop.permute.xlu0 %138 }
  0x78   :  { %5129 = vst [vmem:[#allocation21_spill] sm:$0xff] %v2605_v62 }
  0x79   :  { %5130 = vst [vmem:[#allocation22_spill] sm:$0xff] %v2610_v6  ;;  %v2668_v6 = vmul.f32 %v60_v20, %v60_v20 }
  0x7b   :  { %5144 = vst [vmem:[#allocation36_spill] sm:$0xff] %v2668_v6 }
  0x7c   :  { %232 = vrot.lane.b32.xlu2 %v2612_v7, %s2262_s12  ;;  %230 = vrot.lane.b32.xlu1 %v2614_v14, %s2262_s12 }
  0x7d   :  { %228 = vrot.lane.b32.xlu0 %v2616_v18, %s2262_s12 }
  0x7e   :  { %v2630_v31 = vpop.permute.xlu2 %166  ;;  %v2632_v36 = vpop.permute.xlu1 %144 }
  0x7f   :  { %5134 = vst [vmem:[#allocation26_spill] sm:$0xff] %v2630_v31  ;;  %v2637_v44 = vpop.permute.xlu0 %140  ;;  %v2666_v31 = vmul.f32 %v61_v2, %v61_v2  ;;  %v63_v2 = vld [vmem:[%s5049_s0 + $0x1b8] sm:$0xff] }
  0x80   :  { %5135 = vst [vmem:[#allocation27_spill] sm:$0xff] %v2632_v36  ;;  %v2695_v48 = vmul.f32 %v63_v2, %v63_v2 }
  0x81   :  { %5136 = vst [vmem:[#allocation28_spill] sm:$0xff] %v2637_v44  ;;  %v59_v44 = vld [vmem:[%s5049_s0 + $0x198] sm:$0xff] }
  0x82   :  { %5143 = vst [vmem:[#allocation35_spill] sm:$0xff] %v2666_v31  ;;  %v2670_v62 = vmul.f32 %v59_v44, %v59_v44 }
  0x83   :  { %5150 = vst [vmem:[#allocation42_spill] sm:$0xff] %v2695_v48 }
  0x84   :  { %238 = vrot.lane.b32.xlu2 %v2639_v49, %s2262_s12  ;;  %236 = vrot.lane.b32.xlu1 %v2641_v56, %s2262_s12  ;;  %5145 = vst [vmem:[#allocation37_spill] sm:$0xff] %v2670_v62 }
  0x85   :  { %234 = vrot.lane.b32.xlu0 %v2643_v60, %s2262_s12 }
  0x86   :  { %v2657_v30 = vpop.permute.xlu2 %172  ;;  %v2659_v43 = vpop.permute.xlu1 %152 }
  0x87   :  { %5140 = vst [vmem:[#allocation32_spill] sm:$0xff] %v2657_v30  ;;  %v2664_v36 = vpop.permute.xlu0 %150 }
  0x88   :  { %5141 = vst [vmem:[#allocation33_spill] sm:$0xff] %v2659_v43  ;;  %v64_v43 = vld [vmem:[%s5049_s0 + $0x1c0] sm:$0xff] }
  0x89   :  { %5142 = vst [vmem:[#allocation34_spill] sm:$0xff] %v2664_v36  ;;  %v62_v36 = vld [vmem:[%s5049_s0 + $0x1b0] sm:$0xff]  ;;  %v2693_v61 = vmul.f32 %v64_v43, %v64_v43 }
  0x8a   :  { %v2697_v32 = vmul.f32 %v62_v36, %v62_v36  ;;  %v66_v43 = vld [vmem:[%s5049_s0 + $0x1d0] sm:$0xff] }
  0x8b   :  { %5149 = vst [vmem:[#allocation41_spill] sm:$0xff] %v2693_v61 }
  0x8c   :  { %244 = vrot.lane.b32.xlu2 %v2666_v31, %s2262_s12  ;;  %242 = vrot.lane.b32.xlu1 %v2668_v6, %s2262_s12  ;;  %5151 = vst [vmem:[#allocation43_spill] sm:$0xff] %v2697_v32 }
  0x8d   :  { %240 = vrot.lane.b32.xlu0 %v2670_v62, %s2262_s12 }
  0x8e   :  { %v2684_v20 = vpop.permute.xlu2 %178  ;;  %v2686_v44 = vpop.permute.xlu1 %158 }
  0x8f   :  { %5146 = vst [vmem:[#allocation38_spill] sm:$0xff] %v2684_v20  ;;  %v2691_v30 = vpop.permute.xlu0 %156 }
  0x90   :  { %5147 = vst [vmem:[#allocation39_spill] sm:$0xff] %v2686_v44  ;;  %v67_v44 = vld [vmem:[%s5049_s0 + $0x1d8] sm:$0xff] }
  0x91   :  { %5148 = vst [vmem:[#allocation40_spill] sm:$0xff] %v2691_v30  ;;  %v65_v30 = vld [vmem:[%s5049_s0 + $0x1c8] sm:$0xff]  ;;  %v2720_v19 = vmul.f32 %v67_v44, %v67_v44 }
  0x92   :  { %v2724_v31 = vmul.f32 %v65_v30, %v65_v30  ;;  %v69_v44 = vld [vmem:[%s5049_s0 + $0x1e8] sm:$0xff] }
  0x93   :  { %5155 = vst [vmem:[#allocation47_spill] sm:$0xff] %v2720_v19 }
  0x94   :  { %250 = vrot.lane.b32.xlu2 %v2693_v61, %s2262_s12  ;;  %248 = vrot.lane.b32.xlu1 %v2695_v48, %s2262_s12  ;;  %v2722_v61 = vmul.f32 %v66_v43, %v66_v43  ;;  %5157 = vst [vmem:[#allocation49_spill] sm:$0xff] %v2724_v31 }
  0x95   :  { %246 = vrot.lane.b32.xlu0 %v2697_v32, %s2262_s12 }
  0x96   :  { %v2711_v2 = vpop.permute.xlu2 %184  ;;  %v2713_v36 = vpop.permute.xlu1 %164  ;;  %5156 = vst [vmem:[#allocation48_spill] sm:$0xff] %v2722_v61 }
  0x97   :  { %5152 = vst [vmem:[#allocation44_spill] sm:$0xff] %v2711_v2  ;;  %v2718_v20 = vpop.permute.xlu0 %162 }
  0x98   :  { %5153 = vst [vmem:[#allocation45_spill] sm:$0xff] %v2713_v36  ;;  %v70_v36 = vld [vmem:[%s5049_s0 + $0x1f0] sm:$0xff] }
  0x99   :  { %5154 = vst [vmem:[#allocation46_spill] sm:$0xff] %v2718_v20  ;;  %v68_v20 = vld [vmem:[%s5049_s0 + $0x1e0] sm:$0xff] }
  0x9c   :  { %256 = vrot.lane.b32.xlu2 %v2720_v19, %s2262_s12  ;;  %254 = vrot.lane.b32.xlu1 %v2722_v61, %s2262_s12  ;;  %v2747_v19 = vmul.f32 %v70_v36, %v70_v36  ;;  %v2751_v61 = vmul.f32 %v68_v20, %v68_v20  ;;  %v71_v36 = vld [vmem:[%s5049_s0 + $0x1f8] sm:$0xff] }
  0x9d   :  { %252 = vrot.lane.b32.xlu0 %v2724_v31, %s2262_s12  ;;  %v2749_v31 = vmul.f32 %v69_v44, %v69_v44  ;;  %v2768_v20 = vmul.f32 %v71_v36, %v71_v36 }
  0x9e   :  { %v2738_v43 = vpop.permute.xlu2 %190  ;;  %v2740_v30 = vpop.permute.xlu1 %170  ;;  %5161 = vst [vmem:[#allocation53_spill] sm:$0xff] %v2747_v19 }
  0x9f   :  { %5158 = vst [vmem:[#allocation50_spill] sm:$0xff] %v2738_v43  ;;  %v2745_v2 = vpop.permute.xlu0 %168 }
  0xa0   :  { %5159 = vst [vmem:[#allocation51_spill] sm:$0xff] %v2740_v30 }
  0xa1   :  { %5160 = vst [vmem:[#allocation52_spill] sm:$0xff] %v2745_v2 }
  0xa2   :  { %5162 = vst [vmem:[#allocation54_spill] sm:$0xff] %v2749_v31 }
  0xa3   :  { %5163 = vst [vmem:[#allocation55_spill] sm:$0xff] %v2751_v61 }
  0xa4   :  { %262 = vrot.lane.b32.xlu2 %v2747_v19, %s2262_s12  ;;  %260 = vrot.lane.b32.xlu1 %v2749_v31, %s2262_s12  ;;  %5167 = vst [vmem:[#allocation59_spill] sm:$0xff] %v2768_v20 }
  0xa5   :  { %258 = vrot.lane.b32.xlu0 %v2751_v61, %s2262_s12 }
  0xa6   :  { %v2759_v30 = vpop.permute.xlu2 %196  ;;  %v2761_v43 = vpop.permute.xlu1 %176 }
  0xa7   :  { %5164 = vst [vmem:[#allocation56_spill] sm:$0xff] %v2759_v30  ;;  %v2766_v44 = vpop.permute.xlu0 %174 }
  0xa8   :  { %5165 = vst [vmem:[#allocation57_spill] sm:$0xff] %v2761_v43 }
  0xa9   :  { %5166 = vst [vmem:[#allocation58_spill] sm:$0xff] %v2766_v44 }
  0xac   :  { %397 = vrot.lane.b32.xlu2 %v2310_v11, %s2263_s23  ;;  %395 = vrot.lane.b32.xlu1 %v2289_v5, %s2263_s23 }
  0xad   :  { %264 = vrot.lane.b32.xlu0 %v2768_v20, %s2262_s12  ;;  %s2264_s12 = smov 2  }
  0xae   :  { %v2776_v30 = vpop.permute.xlu2 %202  ;;  %v2778_v43 = vpop.permute.xlu1 %182 }
  0xaf   :  { %5168 = vst [vmem:[#allocation60_spill] sm:$0xff] %v2776_v30  ;;  %v2780_v2 = vpop.permute.xlu0 %180 }
  0xb0   :  { %5169 = vst [vmem:[#allocation61_spill] sm:$0xff] %v2778_v43 }
  0xb1   :  { %5170 = vst [vmem:[#allocation62_spill] sm:$0xff] %v2780_v2 }
  0xb4   :  { %403 = vrot.lane.b32.xlu2 %v2285_v3, %s2263_s23  ;;  %401 = vrot.lane.b32.xlu1 %v2308_v10, %s2263_s23 }
  0xb5   :  { %399 = vrot.lane.b32.xlu0 %v2287_v4, %s2263_s23 }
  0xb6   :  { %v2788_v36 = vpop.permute.xlu2 %208  ;;  %v2790_v44 = vpop.permute.xlu1 %188 }
  0xb7   :  { %5171 = vst [vmem:[#allocation63_spill] sm:$0xff] %v2788_v36  ;;  %v2792_v11 = vpop.permute.xlu0 %186 }
  0xb8   :  { %5172 = vst [vmem:[#allocation64_spill] sm:$0xff] %v2790_v44 }
  0xb9   :  { %5173 = vst [vmem:[#allocation65_spill] sm:$0xff] %v2792_v11 }
  0xbc   :  { %409 = vrot.lane.b32.xlu2 %v2329_v16, %s2263_s23  ;;  %407 = vrot.lane.b32.xlu1 %v2331_v17, %s2263_s23 }
  0xbd   :  { %405 = vrot.lane.b32.xlu0 %v2306_v9, %s2263_s23 }
  0xbe   :  { %v2800_v2 = vpop.permute.xlu2 %214  ;;  %v2802_v43 = vpop.permute.xlu1 %194 }
  0xbf   :  { %5174 = vst [vmem:[#allocation66_spill] sm:$0xff] %v2800_v2  ;;  %v2804_v30 = vpop.permute.xlu0 %192 }
  0xc0   :  { %5175 = vst [vmem:[#allocation67_spill] sm:$0xff] %v2802_v43 }
  0xc1   :  { %5176 = vst [vmem:[#allocation68_spill] sm:$0xff] %v2804_v30 }
  0xc4   :  { %415 = vrot.lane.b32.xlu2 %v2350_v22, %s2263_s23  ;;  %413 = vrot.lane.b32.xlu1 %v2352_v23, %s2263_s23 }
  0xc5   :  { %411 = vrot.lane.b32.xlu0 %v2327_v15, %s2263_s23 }
  0xc6   :  { %v2812_v11 = vpop.permute.xlu2 %220  ;;  %v2814_v44 = vpop.permute.xlu1 %200 }
  0xc7   :  { %5177 = vst [vmem:[#allocation69_spill] sm:$0xff] %v2812_v11  ;;  %v2816_v36 = vpop.permute.xlu0 %198 }
  0xc8   :  { %5178 = vst [vmem:[#allocation70_spill] sm:$0xff] %v2814_v44 }
  0xc9   :  { %5179 = vst [vmem:[#allocation71_spill] sm:$0xff] %v2816_v36 }
  0xcc   :  { %421 = vrot.lane.b32.xlu2 %v2371_v28, %s2263_s23  ;;  %419 = vrot.lane.b32.xlu1 %v2373_v29, %s2263_s23 }
  0xcd   :  { %417 = vrot.lane.b32.xlu0 %v2348_v21, %s2263_s23 }
  0xce   :  { %v2824_v30 = vpop.permute.xlu2 %226  ;;  %v2826_v43 = vpop.permute.xlu1 %206 }
  0xcf   :  { %5180 = vst [vmem:[#allocation72_spill] sm:$0xff] %v2824_v30  ;;  %v2828_v2 = vpop.permute.xlu0 %204 }
  0xd0   :  { %5181 = vst [vmem:[#allocation73_spill] sm:$0xff] %v2826_v43 }
  0xd1   :  { %5182 = vst [vmem:[#allocation74_spill] sm:$0xff] %v2828_v2 }
  0xd4   :  { %427 = vrot.lane.b32.xlu2 %v2392_v34, %s2263_s23  ;;  %425 = vrot.lane.b32.xlu1 %v2394_v35, %s2263_s23 }
  0xd5   :  { %423 = vrot.lane.b32.xlu0 %v2369_v27, %s2263_s23 }
  0xd6   :  { %v2836_v36 = vpop.permute.xlu2 %232  ;;  %v2838_v44 = vpop.permute.xlu1 %212 }
  0xd7   :  { %5183 = vst [vmem:[#allocation75_spill] sm:$0xff] %v2836_v36  ;;  %v2840_v11 = vpop.permute.xlu0 %210 }
  0xd8   :  { %5184 = vst [vmem:[#allocation76_spill] sm:$0xff] %v2838_v44 }
  0xd9   :  { %5185 = vst [vmem:[#allocation77_spill] sm:$0xff] %v2840_v11 }
  0xdc   :  { %433 = vrot.lane.b32.xlu2 %v2413_v40, %s2263_s23  ;;  %431 = vrot.lane.b32.xlu1 %v2415_v41, %s2263_s23 }
  0xdd   :  { %429 = vrot.lane.b32.xlu0 %v2390_v33, %s2263_s23 }
  0xde   :  { %v2848_v2 = vpop.permute.xlu2 %238  ;;  %v2850_v43 = vpop.permute.xlu1 %218 }
  0xdf   :  { %5186 = vst [vmem:[#allocation78_spill] sm:$0xff] %v2848_v2  ;;  %v2852_v30 = vpop.permute.xlu0 %216 }
  0xe0   :  { %5187 = vst [vmem:[#allocation79_spill] sm:$0xff] %v2850_v43 }
  0xe1   :  { %5188 = vst [vmem:[#allocation80_spill] sm:$0xff] %v2852_v30 }
  0xe4   :  { %439 = vrot.lane.b32.xlu2 %v2434_v46, %s2263_s23  ;;  %437 = vrot.lane.b32.xlu1 %v2436_v47, %s2263_s23 }
  0xe5   :  { %435 = vrot.lane.b32.xlu0 %v2411_v39, %s2263_s23 }
  0xe6   :  { %v2860_v11 = vpop.permute.xlu2 %244  ;;  %v2862_v44 = vpop.permute.xlu1 %224 }
  0xe7   :  { %5189 = vst [vmem:[#allocation81_spill] sm:$0xff] %v2860_v11  ;;  %v2864_v36 = vpop.permute.xlu0 %222 }
  0xe8   :  { %5190 = vst [vmem:[#allocation82_spill] sm:$0xff] %v2862_v44 }
  0xe9   :  { %5191 = vst [vmem:[#allocation83_spill] sm:$0xff] %v2864_v36 }
  0xec   :  { %445 = vrot.lane.b32.xlu2 %v2455_v52, %s2263_s23  ;;  %443 = vrot.lane.b32.xlu1 %v2457_v53, %s2263_s23 }
  0xed   :  { %441 = vrot.lane.b32.xlu0 %v2432_v45, %s2263_s23 }
  0xee   :  { %v2872_v30 = vpop.permute.xlu2 %250  ;;  %v2874_v43 = vpop.permute.xlu1 %230 }
  0xef   :  { %5192 = vst [vmem:[#allocation84_spill] sm:$0xff] %v2872_v30  ;;  %v2876_v2 = vpop.permute.xlu0 %228 }
  0xf0   :  { %5193 = vst [vmem:[#allocation85_spill] sm:$0xff] %v2874_v43 }
  0xf1   :  { %5194 = vst [vmem:[#allocation86_spill] sm:$0xff] %v2876_v2 }
  0xf4   :  { %451 = vrot.lane.b32.xlu2 %v2476_v58, %s2263_s23  ;;  %449 = vrot.lane.b32.xlu1 %v2478_v59, %s2263_s23 }
  0xf5   :  { %447 = vrot.lane.b32.xlu0 %v2453_v51, %s2263_s23 }
  0xf6   :  { %v2884_v36 = vpop.permute.xlu2 %256  ;;  %v2886_v44 = vpop.permute.xlu1 %236 }
  0xf7   :  { %5195 = vst [vmem:[#allocation87_spill] sm:$0xff] %v2884_v36  ;;  %v2888_v11 = vpop.permute.xlu0 %234 }
  0xf8   :  { %5196 = vst [vmem:[#allocation88_spill] sm:$0xff] %v2886_v44 }
  0xf9   :  { %5197 = vst [vmem:[#allocation89_spill] sm:$0xff] %v2888_v11 }
  0xfc   :  { %457 = vrot.lane.b32.xlu2 %v2497_v0, %s2263_s23  ;;  %455 = vrot.lane.b32.xlu1 %v2499_v1, %s2263_s23 }
  0xfd   :  { %453 = vrot.lane.b32.xlu0 %v2474_v57, %s2263_s23 }
  0xfe   :  { %v2896_v43 = vpop.permute.xlu2 %262  ;;  %v2898_v30 = vpop.permute.xlu1 %242 }
  0xff   :  { %5198 = vst [vmem:[#allocation90_spill] sm:$0xff] %v2896_v43  ;;  %v2900_v2 = vpop.permute.xlu0 %240 }
 0x100   :  { %5199 = vst [vmem:[#allocation91_spill] sm:$0xff] %v2898_v30 }
 0x101   :  { %5200 = vst [vmem:[#allocation92_spill] sm:$0xff] %v2900_v2 }
 0x104   :  { %463 = vrot.lane.b32.xlu2 %v2518_v12, %s2263_s23  ;;  %461 = vrot.lane.b32.xlu1 %v2520_v13, %s2263_s23 }
 0x105   :  { %459 = vrot.lane.b32.xlu0 %v2495_v63, %s2263_s23 }
 0x106   :  { %v2908_v44 = vpop.permute.xlu1 %248  ;;  %v2910_v36 = vpop.permute.xlu2 %397 }
 0x107   :  { %5201 = vst [vmem:[#allocation93_spill] sm:$0xff] %v2908_v44  ;;  %v2912_v11 = vpop.permute.xlu0 %246 }
 0x108   :  { %5202 = vst [vmem:[#allocation94_spill] sm:$0xff] %v2910_v36 }
 0x109   :  { %5203 = vst [vmem:[#allocation95_spill] sm:$0xff] %v2912_v11 }
 0x10c   :  { %469 = vrot.lane.b32.xlu2 %v2541_v25, %s2263_s23  ;;  %467 = vrot.lane.b32.xlu1 %v2543_v26, %s2263_s23 }
 0x10d   :  { %465 = vrot.lane.b32.xlu0 %v2516_v8, %s2263_s23 }
 0x10e   :  { %v2920_v30 = vpop.permute.xlu1 %254  ;;  %v2922_v43 = vpop.permute.xlu2 %403 }
 0x10f   :  { %5204 = vst [vmem:[#allocation96_spill] sm:$0xff] %v2920_v30  ;;  %v2924_v2 = vpop.permute.xlu0 %252 }
 0x110   :  { %5205 = vst [vmem:[#allocation97_spill] sm:$0xff] %v2922_v43 }
 0x111   :  { %5206 = vst [vmem:[#allocation98_spill] sm:$0xff] %v2924_v2 }
 0x114   :  { %475 = vrot.lane.b32.xlu2 %v2564_v38, %s2263_s23  ;;  %473 = vrot.lane.b32.xlu1 %v2566_v42, %s2263_s23 }
 0x115   :  { %471 = vrot.lane.b32.xlu0 %v2539_v24, %s2263_s23 }
 0x116   :  { %v2932_v36 = vpop.permute.xlu1 %260  ;;  %v2934_v44 = vpop.permute.xlu2 %409 }
 0x117   :  { %5207 = vst [vmem:[#allocation99_spill] sm:$0xff] %v2932_v36  ;;  %v2936_v11 = vpop.permute.xlu0 %258 }
 0x118   :  { %5208 = vst [vmem:[#allocation100_spill] sm:$0xff] %v2934_v44 }
 0x119   :  { %5209 = vst [vmem:[#allocation101_spill] sm:$0xff] %v2936_v11 }
 0x11c   :  { %481 = vrot.lane.b32.xlu2 %v2587_v54, %s2263_s23  ;;  %479 = vrot.lane.b32.xlu1 %v2589_v55, %s2263_s23 }
 0x11d   :  { %477 = vrot.lane.b32.xlu0 %v2562_v37, %s2263_s23 }
 0x11e   :  { %v2944_v43 = vpop.permute.xlu2 %415  ;;  %v2946_v30 = vpop.permute.xlu1 %395 }
 0x11f   :  { %5210 = vst [vmem:[#allocation102_spill] sm:$0xff] %v2944_v43  ;;  %v2948_v2 = vpop.permute.xlu0 %264 }
 0x120   :  { %5211 = vst [vmem:[#allocation103_spill] sm:$0xff] %v2946_v30 }
 0x121   :  { %5212 = vst [vmem:[#allocation104_spill] sm:$0xff] %v2948_v2 }
 0x124   :  { %487 = vrot.lane.b32.xlu2 %v2614_v14, %s2263_s23  ;;  %485 = vrot.lane.b32.xlu1 %v2616_v18, %s2263_s23 }
 0x125   :  { %483 = vrot.lane.b32.xlu0 %v2585_v50, %s2263_s23 }
 0x126   :  { %v2956_v11 = vpop.permute.xlu2 %421  ;;  %v2958_v44 = vpop.permute.xlu1 %401 }
 0x127   :  { %5213 = vst [vmem:[#allocation105_spill] sm:$0xff] %v2956_v11  ;;  %v2960_v36 = vpop.permute.xlu0 %399 }
 0x128   :  { %5214 = vst [vmem:[#allocation106_spill] sm:$0xff] %v2958_v44 }
 0x129   :  { %5215 = vst [vmem:[#allocation107_spill] sm:$0xff] %v2960_v36 }
 0x12c   :  { %493 = vrot.lane.b32.xlu2 %v2641_v56, %s2263_s23  ;;  %491 = vrot.lane.b32.xlu1 %v2643_v60, %s2263_s23 }
 0x12d   :  { %489 = vrot.lane.b32.xlu0 %v2612_v7, %s2263_s23 }
 0x12e   :  { %v2968_v2 = vpop.permute.xlu2 %427  ;;  %v2970_v30 = vpop.permute.xlu1 %407 }
 0x12f   :  { %5216 = vst [vmem:[#allocation108_spill] sm:$0xff] %v2968_v2  ;;  %v2972_v43 = vpop.permute.xlu0 %405 }
 0x130   :  { %5217 = vst [vmem:[#allocation109_spill] sm:$0xff] %v2970_v30 }
 0x131   :  { %5218 = vst [vmem:[#allocation110_spill] sm:$0xff] %v2972_v43  ;;  %v5222_v43 = vld [vmem:[#allocation35_spill] sm:$0xff] }
 0x134   :  { %499 = vrot.lane.b32.xlu2 %v2668_v6, %s2263_s23  ;;  %497 = vrot.lane.b32.xlu1 %v2670_v62, %s2263_s23 }
 0x135   :  { %495 = vrot.lane.b32.xlu0 %v2639_v49, %s2263_s23 }
 0x136   :  { %v2980_v36 = vpop.permute.xlu2 %433  ;;  %v2982_v44 = vpop.permute.xlu1 %413 }
 0x137   :  { %5219 = vst [vmem:[#allocation111_spill] sm:$0xff] %v2980_v36  ;;  %v2984_v11 = vpop.permute.xlu0 %411  ;;  %v5226_v36 = vld [vmem:[#allocation48_spill] sm:$0xff] }
 0x138   :  { %5220 = vst [vmem:[#allocation112_spill] sm:$0xff] %v2982_v44  ;;  %v5228_v44 = vld [vmem:[#allocation41_spill] sm:$0xff] }
 0x139   :  { %5221 = vst [vmem:[#allocation113_spill] sm:$0xff] %v2984_v11  ;;  %v5227_v11 = vld [vmem:[#allocation49_spill] sm:$0xff] }
 0x13c   :  { %505 = vrot.lane.b32.xlu2 %v2695_v48, %s2263_s23  ;;  %503 = vrot.lane.b32.xlu1 %v2697_v32, %s2263_s23 }
 0x13d   :  { %501 = vrot.lane.b32.xlu0 %v5222_v43, %s2263_s23 }
 0x13e   :  { %v2992_v30 = vpop.permute.xlu2 %439  ;;  %v2994_v2 = vpop.permute.xlu1 %419 }
 0x13f   :  { %5223 = vst [vmem:[#allocation114_spill] sm:$0xff] %v2992_v30  ;;  %v2996_v6 = vpop.permute.xlu0 %417 }
 0x140   :  { %5224 = vst [vmem:[#allocation115_spill] sm:$0xff] %v2994_v2 }
 0x141   :  { %5225 = vst [vmem:[#allocation116_spill] sm:$0xff] %v2996_v6  ;;  %v5232_v6 = vld [vmem:[#allocation47_spill] sm:$0xff] }
 0x144   :  { %511 = vrot.lane.b32.xlu2 %v5226_v36, %s2263_s23  ;;  %509 = vrot.lane.b32.xlu1 %v5227_v11, %s2263_s23 }
 0x145   :  { %507 = vrot.lane.b32.xlu0 %v5228_v44, %s2263_s23 }
 0x146   :  { %v3004_v48 = vpop.permute.xlu2 %445  ;;  %v3006_v32 = vpop.permute.xlu1 %425 }
 0x147   :  { %5229 = vst [vmem:[#allocation117_spill] sm:$0xff] %v3004_v48  ;;  %v3008_v43 = vpop.permute.xlu0 %423 }
 0x148   :  { %5230 = vst [vmem:[#allocation118_spill] sm:$0xff] %v3006_v32 }
 0x149   :  { %5231 = vst [vmem:[#allocation119_spill] sm:$0xff] %v3008_v43 }
 0x14c   :  { %517 = vrot.lane.b32.xlu2 %v2749_v31, %s2263_s23  ;;  %515 = vrot.lane.b32.xlu1 %v2751_v61, %s2263_s23 }
 0x14d   :  { %513 = vrot.lane.b32.xlu0 %v5232_v6, %s2263_s23 }
 0x14e   :  { %v3016_v2 = vpop.permute.xlu2 %451  ;;  %v3018_v30 = vpop.permute.xlu1 %431 }
 0x14f   :  { %5233 = vst [vmem:[#allocation120_spill] sm:$0xff] %v3016_v2  ;;  %v3020_v36 = vpop.permute.xlu0 %429 }
 0x150   :  { %5234 = vst [vmem:[#allocation121_spill] sm:$0xff] %v3018_v30 }
 0x151   :  { %5235 = vst [vmem:[#allocation122_spill] sm:$0xff] %v3020_v36  ;;  %v5239_v36 = vld [vmem:[#allocation3_spill] sm:$0xff] }
 0x154   :  { %652 = vrot.lane.b32.xlu2 %v2289_v5, %s2264_s12  ;;  %521 = vrot.lane.b32.xlu1 %v2768_v20, %s2263_s23 }
 0x155   :  { %519 = vrot.lane.b32.xlu0 %v2747_v19, %s2263_s23 }
 0x156   :  { %v3028_v43 = vpop.permute.xlu2 %457  ;;  %v3030_v32 = vpop.permute.xlu1 %437 }
 0x157   :  { %5236 = vst [vmem:[#allocation123_spill] sm:$0xff] %v3028_v43  ;;  %v3032_v48 = vpop.permute.xlu0 %435 }
 0x158   :  { %5237 = vst [vmem:[#allocation124_spill] sm:$0xff] %v3030_v32 }
 0x159   :  { %5238 = vst [vmem:[#allocation125_spill] sm:$0xff] %v3032_v48 }
 0x15c   :  { %658 = vrot.lane.b32.xlu2 %v2308_v10, %s2264_s12  ;;  %656 = vrot.lane.b32.xlu1 %v2287_v4, %s2264_s12 }
 0x15d   :  { %654 = vrot.lane.b32.xlu0 %v5239_v36, %s2264_s12 }
 0x15e   :  { %v3040_v30 = vpop.permute.xlu2 %463  ;;  %v3042_v2 = vpop.permute.xlu1 %443 }
 0x15f   :  { %5240 = vst [vmem:[#allocation3_spill] sm:$0xff] %v3040_v30  ;;  %v3044_v5 = vpop.permute.xlu0 %441 }
 0x160   :  { %5241 = vst [vmem:[#allocation126_spill] sm:$0xff] %v3042_v2 }
 0x161   :  { %5242 = vst [vmem:[#allocation127_spill] sm:$0xff] %v3044_v5 }
 0x164   :  { %664 = vrot.lane.b32.xlu2 %v2331_v17, %s2264_s12  ;;  %662 = vrot.lane.b32.xlu1 %v2306_v9, %s2264_s12 }
 0x165   :  { %660 = vrot.lane.b32.xlu0 %v2285_v3, %s2264_s12 }
 0x166   :  { %v3052_v48 = vpop.permute.xlu2 %469  ;;  %v3054_v32 = vpop.permute.xlu1 %449 }
 0x167   :  { %5243 = vst [vmem:[#allocation128_spill] sm:$0xff] %v3052_v48  ;;  %v3056_v43 = vpop.permute.xlu0 %447 }
 0x168   :  { %5244 = vst [vmem:[#allocation129_spill] sm:$0xff] %v3054_v32 }
 0x169   :  { %5245 = vst [vmem:[#allocation130_spill] sm:$0xff] %v3056_v43 }
 0x16c   :  { %670 = vrot.lane.b32.xlu2 %v2352_v23, %s2264_s12  ;;  %668 = vrot.lane.b32.xlu1 %v2327_v15, %s2264_s12 }
 0x16d   :  { %666 = vrot.lane.b32.xlu0 %v2329_v16, %s2264_s12 }
 0x16e   :  { %v3064_v5 = vpop.permute.xlu2 %475  ;;  %v3066_v2 = vpop.permute.xlu1 %455 }
 0x16f   :  { %5246 = vst [vmem:[#allocation131_spill] sm:$0xff] %v3064_v5  ;;  %v3068_v30 = vpop.permute.xlu0 %453 }
 0x170   :  { %5247 = vst [vmem:[#allocation132_spill] sm:$0xff] %v3066_v2 }
 0x171   :  { %5248 = vst [vmem:[#allocation133_spill] sm:$0xff] %v3068_v30 }
 0x174   :  { %676 = vrot.lane.b32.xlu2 %v2373_v29, %s2264_s12  ;;  %674 = vrot.lane.b32.xlu1 %v2348_v21, %s2264_s12 }
 0x175   :  { %672 = vrot.lane.b32.xlu0 %v2350_v22, %s2264_s12 }
 0x176   :  { %v3076_v43 = vpop.permute.xlu2 %481  ;;  %v3078_v32 = vpop.permute.xlu1 %461 }
 0x177   :  { %5249 = vst [vmem:[#allocation134_spill] sm:$0xff] %v3076_v43  ;;  %v3080_v48 = vpop.permute.xlu0 %459 }
 0x178   :  { %5250 = vst [vmem:[#allocation135_spill] sm:$0xff] %v3078_v32 }
 0x179   :  { %5251 = vst [vmem:[#allocation136_spill] sm:$0xff] %v3080_v48 }
 0x17c   :  { %682 = vrot.lane.b32.xlu2 %v2394_v35, %s2264_s12  ;;  %680 = vrot.lane.b32.xlu1 %v2369_v27, %s2264_s12 }
 0x17d   :  { %678 = vrot.lane.b32.xlu0 %v2371_v28, %s2264_s12 }
 0x17e   :  { %v3088_v30 = vpop.permute.xlu2 %487  ;;  %v3090_v2 = vpop.permute.xlu1 %467 }
 0x17f   :  { %5252 = vst [vmem:[#allocation137_spill] sm:$0xff] %v3088_v30  ;;  %v3092_v5 = vpop.permute.xlu0 %465 }
 0x180   :  { %5253 = vst [vmem:[#allocation138_spill] sm:$0xff] %v3090_v2 }
 0x181   :  { %5254 = vst [vmem:[#allocation139_spill] sm:$0xff] %v3092_v5 }
 0x184   :  { %688 = vrot.lane.b32.xlu2 %v2415_v41, %s2264_s12  ;;  %686 = vrot.lane.b32.xlu1 %v2390_v33, %s2264_s12 }
 0x185   :  { %684 = vrot.lane.b32.xlu0 %v2392_v34, %s2264_s12 }
 0x186   :  { %v3100_v48 = vpop.permute.xlu2 %493  ;;  %v3102_v32 = vpop.permute.xlu1 %473 }
 0x187   :  { %5255 = vst [vmem:[#allocation140_spill] sm:$0xff] %v3100_v48  ;;  %v3104_v43 = vpop.permute.xlu0 %471 }
 0x188   :  { %5256 = vst [vmem:[#allocation141_spill] sm:$0xff] %v3102_v32 }
 0x189   :  { %5257 = vst [vmem:[#allocation142_spill] sm:$0xff] %v3104_v43 }
 0x18c   :  { %694 = vrot.lane.b32.xlu2 %v2436_v47, %s2264_s12  ;;  %692 = vrot.lane.b32.xlu1 %v2411_v39, %s2264_s12 }
 0x18d   :  { %690 = vrot.lane.b32.xlu0 %v2413_v40, %s2264_s12 }
 0x18e   :  { %v3112_v5 = vpop.permute.xlu2 %499  ;;  %v3114_v2 = vpop.permute.xlu1 %479 }
 0x18f   :  { %5258 = vst [vmem:[#allocation143_spill] sm:$0xff] %v3112_v5  ;;  %v3116_v30 = vpop.permute.xlu0 %477 }
 0x190   :  { %5259 = vst [vmem:[#allocation144_spill] sm:$0xff] %v3114_v2 }
 0x191   :  { %5260 = vst [vmem:[#allocation145_spill] sm:$0xff] %v3116_v30 }
 0x194   :  { %700 = vrot.lane.b32.xlu2 %v2457_v53, %s2264_s12  ;;  %698 = vrot.lane.b32.xlu1 %v2432_v45, %s2264_s12 }
 0x195   :  { %696 = vrot.lane.b32.xlu0 %v2434_v46, %s2264_s12 }
 0x196   :  { %v3124_v43 = vpop.permute.xlu2 %505  ;;  %v3126_v32 = vpop.permute.xlu1 %485 }
 0x197   :  { %5261 = vst [vmem:[#allocation146_spill] sm:$0xff] %v3124_v43  ;;  %v3128_v48 = vpop.permute.xlu0 %483 }
 0x198   :  { %5262 = vst [vmem:[#allocation147_spill] sm:$0xff] %v3128_v48 }
 0x19c   :  { %706 = vrot.lane.b32.xlu2 %v2478_v59, %s2264_s12  ;;  %704 = vrot.lane.b32.xlu1 %v2453_v51, %s2264_s12 }
 0x19d   :  { %702 = vrot.lane.b32.xlu0 %v2455_v52, %s2264_s12 }
 0x19e   :  { %v3136_v30 = vpop.permute.xlu2 %511  ;;  %v3138_v2 = vpop.permute.xlu1 %491 }
 0x19f   :  { %5263 = vst [vmem:[#allocation148_spill] sm:$0xff] %v3136_v30  ;;  %v3140_v5 = vpop.permute.xlu0 %489 }
 0x1a0   :  { %5264 = vst [vmem:[#allocation149_spill] sm:$0xff] %v3140_v5 }
 0x1a4   :  { %712 = vrot.lane.b32.xlu2 %v2499_v1, %s2264_s12  ;;  %710 = vrot.lane.b32.xlu1 %v2474_v57, %s2264_s12 }
 0x1a5   :  { %708 = vrot.lane.b32.xlu0 %v2476_v58, %s2264_s12 }
 0x1a6   :  { %v3148_v48 = vpop.permute.xlu2 %517  ;;  %v3150_v43 = vpop.permute.xlu1 %497 }
 0x1a7   :  { %5265 = vst [vmem:[#allocation150_spill] sm:$0xff] %v3148_v48  ;;  %v3152_v59 = vpop.permute.xlu0 %495 }
 0x1a8   :  { %5266 = vst [vmem:[#allocation151_spill] sm:$0xff] %v3152_v59 }
 0x1ac   :  { %718 = vrot.lane.b32.xlu2 %v2520_v13, %s2264_s12  ;;  %716 = vrot.lane.b32.xlu1 %v2495_v63, %s2264_s12 }
 0x1ad   :  { %714 = vrot.lane.b32.xlu0 %v2497_v0, %s2264_s12 }
 0x1ae   :  { %v3160_v30 = vpop.permute.xlu2 %652  ;;  %v3162_v5 = vpop.permute.xlu1 %503 }
 0x1af   :  { %5267 = vst [vmem:[#allocation152_spill] sm:$0xff] %v3160_v30  ;;  %v3164_v1 = vpop.permute.xlu0 %501 }
 0x1b0   :  { %5268 = vst [vmem:[#allocation153_spill] sm:$0xff] %v3162_v5 }
 0x1b1   :  { %5269 = vst [vmem:[#allocation154_spill] sm:$0xff] %v3164_v1 }
 0x1b4   :  { %724 = vrot.lane.b32.xlu2 %v2543_v26, %s2264_s12  ;;  %722 = vrot.lane.b32.xlu1 %v2516_v8, %s2264_s12 }
 0x1b5   :  { %720 = vrot.lane.b32.xlu0 %v2518_v12, %s2264_s12 }
 0x1b6   :  { %v3172_v48 = vpop.permute.xlu2 %658  ;;  %v3174_v59 = vpop.permute.xlu1 %509 }
 0x1b7   :  { %5270 = vst [vmem:[#allocation155_spill] sm:$0xff] %v3172_v48  ;;  %v3176_v13 = vpop.permute.xlu0 %507 }
 0x1b8   :  { %5271 = vst [vmem:[#allocation156_spill] sm:$0xff] %v3174_v59 }
 0x1b9   :  { %5272 = vst [vmem:[#allocation157_spill] sm:$0xff] %v3176_v13 }
 0x1bc   :  { %730 = vrot.lane.b32.xlu2 %v2566_v42, %s2264_s12  ;;  %728 = vrot.lane.b32.xlu1 %v2539_v24, %s2264_s12  ;;  %v5327_v42 = vld [vmem:[#allocation28_spill] sm:$0xff] }
 0x1bd   :  { %726 = vrot.lane.b32.xlu0 %v2541_v25, %s2264_s12 }
 0x1be   :  { %v3184_v30 = vpop.permute.xlu2 %664  ;;  %v3186_v1 = vpop.permute.xlu1 %515 }
 0x1bf   :  { %5273 = vst [vmem:[#allocation158_spill] sm:$0xff] %v3184_v30  ;;  %v3188_v5 = vpop.permute.xlu0 %513 }
 0x1c0   :  { %5274 = vst [vmem:[#allocation159_spill] sm:$0xff] %v3186_v1 }
 0x1c1   :  { %5275 = vst [vmem:[#allocation160_spill] sm:$0xff] %v3188_v5 }
 0x1c4   :  { %736 = vrot.lane.b32.xlu2 %v2589_v55, %s2264_s12  ;;  %734 = vrot.lane.b32.xlu1 %v2562_v37, %s2264_s12 }
 0x1c5   :  { %732 = vrot.lane.b32.xlu0 %v2564_v38, %s2264_s12 }
 0x1c6   :  { %v3196_v48 = vpop.permute.xlu2 %670  ;;  %v3198_v13 = vpop.permute.xlu1 %521 }
 0x1c7   :  { %5276 = vst [vmem:[#allocation161_spill] sm:$0xff] %v3196_v48  ;;  %v3200_v59 = vpop.permute.xlu0 %519 }
 0x1c8   :  { %5277 = vst [vmem:[#allocation162_spill] sm:$0xff] %v3198_v13 }
 0x1c9   :  { %5278 = vst [vmem:[#allocation163_spill] sm:$0xff] %v3200_v59 }
 0x1cc   :  { %742 = vrot.lane.b32.xlu2 %v2616_v18, %s2264_s12  ;;  %740 = vrot.lane.b32.xlu1 %v2585_v50, %s2264_s12 }
 0x1cd   :  { %738 = vrot.lane.b32.xlu0 %v2587_v54, %s2264_s12  ;;  %v5323_v54 = vld [vmem:[#allocation22_spill] sm:$0xff] }
 0x1ce   :  { %v3208_v30 = vpop.permute.xlu2 %676  ;;  %v3210_v5 = vpop.permute.xlu1 %656 }
 0x1cf   :  { %5279 = vst [vmem:[#allocation164_spill] sm:$0xff] %v3208_v30  ;;  %v3212_v1 = vpop.permute.xlu0 %654 }
 0x1d0   :  { %5280 = vst [vmem:[#allocation165_spill] sm:$0xff] %v3210_v5 }
 0x1d1   :  { %5281 = vst [vmem:[#allocation166_spill] sm:$0xff] %v3212_v1 }
 0x1d4   :  { %748 = vrot.lane.b32.xlu2 %v2643_v60, %s2264_s12  ;;  %746 = vrot.lane.b32.xlu1 %v2612_v7, %s2264_s12 }
 0x1d5   :  { %744 = vrot.lane.b32.xlu0 %v2614_v14, %s2264_s12 }
 0x1d6   :  { %v3220_v59 = vpop.permute.xlu2 %682  ;;  %v3222_v48 = vpop.permute.xlu1 %662 }
 0x1d7   :  { %5282 = vst [vmem:[#allocation167_spill] sm:$0xff] %v3220_v59  ;;  %v3224_v13 = vpop.permute.xlu0 %660  ;;  %v5288_v59 = vld [vmem:[#allocation43_spill] sm:$0xff] }
 0x1d8   :  { %5283 = vst [vmem:[#allocation168_spill] sm:$0xff] %v3222_v48  ;;  %v5290_v48 = vld [vmem:[#allocation36_spill] sm:$0xff] }
 0x1d9   :  { %5284 = vst [vmem:[#allocation169_spill] sm:$0xff] %v3224_v13  ;;  %v5289_v13 = vld [vmem:[#allocation35_spill] sm:$0xff] }
 0x1dc   :  { %754 = vrot.lane.b32.xlu2 %v2670_v62, %s2264_s12  ;;  %752 = vrot.lane.b32.xlu1 %v2639_v49, %s2264_s12 }
 0x1dd   :  { %750 = vrot.lane.b32.xlu0 %v2641_v56, %s2264_s12 }
 0x1de   :  { %v3232_v1 = vpop.permute.xlu2 %688  ;;  %v3234_v30 = vpop.permute.xlu1 %668 }
 0x1df   :  { %5285 = vst [vmem:[#allocation170_spill] sm:$0xff] %v3232_v1  ;;  %v3236_v5 = vpop.permute.xlu0 %666 }
 0x1e0   :  { %5286 = vst [vmem:[#allocation171_spill] sm:$0xff] %v3234_v30 }
 0x1e1   :  { %5287 = vst [vmem:[#allocation172_spill] sm:$0xff] %v3236_v5  ;;  %v5294_v5 = vld [vmem:[#allocation42_spill] sm:$0xff] }
 0x1e4   :  { %760 = vrot.lane.b32.xlu2 %v5288_v59, %s2264_s12  ;;  %758 = vrot.lane.b32.xlu1 %v5289_v13, %s2264_s12  ;;  %v5324_v13 = vld [vmem:[#allocation26_spill] sm:$0xff] }
 0x1e5   :  { %756 = vrot.lane.b32.xlu0 %v5290_v48, %s2264_s12 }
 0x1e6   :  { %v3244_v14 = vpop.permute.xlu2 %694  ;;  %v3246_v55 = vpop.permute.xlu1 %674 }
 0x1e7   :  { %5291 = vst [vmem:[#allocation173_spill] sm:$0xff] %v3244_v14  ;;  %v3248_v56 = vpop.permute.xlu0 %672 }
 0x1e8   :  { %5292 = vst [vmem:[#allocation174_spill] sm:$0xff] %v3246_v55 }
 0x1e9   :  { %5293 = vst [vmem:[#allocation175_spill] sm:$0xff] %v3248_v56  ;;  %v5298_v56 = vld [vmem:[#allocation48_spill] sm:$0xff] }
 0x1ec   :  { %766 = vrot.lane.b32.xlu2 %v5227_v11, %s2264_s12  ;;  %764 = vrot.lane.b32.xlu1 %v5228_v44, %s2264_s12  ;;  %v5322_v44 = vld [vmem:[#allocation21_spill] sm:$0xff] }
 0x1ed   :  { %762 = vrot.lane.b32.xlu0 %v5294_v5, %s2264_s12  ;;  %v5320_v5 = vld [vmem:[#allocation20_spill] sm:$0xff] }
 0x1ee   :  { %v3256_v1 = vpop.permute.xlu2 %700  ;;  %v3258_v30 = vpop.permute.xlu1 %680 }
 0x1ef   :  { %5295 = vst [vmem:[#allocation176_spill] sm:$0xff] %v3256_v1  ;;  %v3260_v48 = vpop.permute.xlu0 %678 }
 0x1f0   :  { %5296 = vst [vmem:[#allocation177_spill] sm:$0xff] %v3258_v30 }
 0x1f1   :  { %5297 = vst [vmem:[#allocation178_spill] sm:$0xff] %v3260_v48 }
 0x1f4   :  { %772 = vrot.lane.b32.xlu2 %v2751_v61, %s2264_s12  ;;  %770 = vrot.lane.b32.xlu1 %v5232_v6, %s2264_s12 }
 0x1f5   :  { %768 = vrot.lane.b32.xlu0 %v5298_v56, %s2264_s12 }
 0x1f6   :  { %v3268_v55 = vpop.permute.xlu2 %706  ;;  %v3270_v14 = vpop.permute.xlu1 %686 }
 0x1f7   :  { %5299 = vst [vmem:[#allocation179_spill] sm:$0xff] %v3268_v55  ;;  %v3272_v11 = vpop.permute.xlu0 %684 }
 0x1f8   :  { %5300 = vst [vmem:[#allocation180_spill] sm:$0xff] %v3270_v14 }
 0x1f9   :  { %5301 = vst [vmem:[#allocation181_spill] sm:$0xff] %v3272_v11  ;;  %v5305_v11 = vld [vmem:[#allocation2_spill] sm:$0xff] }
 0x1fc   :  { %778 = vrot.lane.b32.xlu2 %v2768_v20, %s2264_s12  ;;  %776 = vrot.lane.b32.xlu1 %v2747_v19, %s2264_s12 }
 0x1fd   :  { %774 = vrot.lane.b32.xlu0 %v2749_v31, %s2264_s12 }
 0x1fe   :  { %v3280_v48 = vpop.permute.xlu2 %712  ;;  %v3282_v30 = vpop.permute.xlu1 %692 }
 0x1ff   :  { %5302 = vst [vmem:[#allocation182_spill] sm:$0xff] %v3280_v48  ;;  %v3284_v1 = vpop.permute.xlu0 %690 }
 0x200   :  { %5303 = vst [vmem:[#allocation183_spill] sm:$0xff] %v3282_v30 }
 0x201   :  { %5304 = vst [vmem:[#allocation184_spill] sm:$0xff] %v3284_v1 }
 0x204   :  { %913 = vrot.lane.b32.xlu2 %v2287_v4, %s2265_s24  ;;  %911 = vrot.lane.b32.xlu1 %v5239_v36, %s2265_s24 }
 0x205   :  { %909 = vrot.lane.b32.xlu0 %v5305_v11, %s2265_s24 }
 0x206   :  { %v3292_v14 = vpop.permute.xlu2 %718  ;;  %v3294_v55 = vpop.permute.xlu1 %698 }
 0x207   :  { %5306 = vst [vmem:[#allocation2_spill] sm:$0xff] %v3292_v14  ;;  %v3296_v20 = vpop.permute.xlu0 %696 }
 0x208   :  { %5307 = vst [vmem:[#allocation185_spill] sm:$0xff] %v3294_v55 }
 0x209   :  { %5308 = vst [vmem:[#allocation186_spill] sm:$0xff] %v3296_v20  ;;  %v136_v20 = vlaneseq }
 0x20c   :  { %919 = vrot.lane.b32.xlu2 %v2306_v9, %s2265_s24  ;;  %917 = vrot.lane.b32.xlu1 %v2285_v3, %s2265_s24 }
 0x20d   :  { %915 = vrot.lane.b32.xlu0 %v2308_v10, %s2265_s24 }
 0x20e   :  { %v3304_v1 = vpop.permute.xlu2 %724  ;;  %v3306_v30 = vpop.permute.xlu1 %704 }
 0x20f   :  { %5309 = vst [vmem:[#allocation187_spill] sm:$0xff] %v3304_v1  ;;  %v3308_v48 = vpop.permute.xlu0 %702  ;;  %v3322_v1 = vand.u32 127, %v136_v20 }
 0x210   :  { %5310 = vst [vmem:[#allocation188_spill] sm:$0xff] %v3306_v30 }
 0x211   :  { %5311 = vst [vmem:[#allocation189_spill] sm:$0xff] %v3308_v48  ;;  %vm266_vm0 = vcmp.ge.s32.totalorder %v3322_v1, 1  ;;  %v5315_v48 = vld [vmem:[#allocation8_spill] sm:$0xff]  ;;  %vm523_vm1 = vcmp.lt.s32.totalorder %v3322_v1, 127  ;;  %vm780_vm2 = vcmp.ge.s32.totalorder %v3322_v1, 2  ;;  %vm1037_vm3 = vcmp.lt.s32.totalorder %v3322_v1, 126 }
 0x212   :  { %v278_v19 = vsel %vm266_vm0, %v5320_v5, 0.0 }
 0x213   :  { %v3371_v59 = vadd.f32 %v278_v19, %v2348_v21  ;;  %v5328_v19 = vld [vmem:[#allocation32_spill] sm:$0xff] }
 0x214   :  { %925 = vrot.lane.b32.xlu2 %v2327_v15, %s2265_s24  ;;  %923 = vrot.lane.b32.xlu1 %v2329_v16, %s2265_s24 }
 0x215   :  { %921 = vrot.lane.b32.xlu0 %v2331_v17, %s2265_s24 }
 0x216   :  { %v3316_v55 = vpop.permute.xlu2 %730  ;;  %v3318_v14 = vpop.permute.xlu1 %710 }
 0x217   :  { %5312 = vst [vmem:[#allocation190_spill] sm:$0xff] %v3316_v55  ;;  %v3320_v61 = vpop.permute.xlu0 %708  ;;  %v271_v55 = vsel %vm266_vm0, %v5315_v48, 0.0  ;;  %v269_v48 = vsel %vm266_vm0, %v5322_v44, 0.0 }
 0x218   :  { %5313 = vst [vmem:[#allocation191_spill] sm:$0xff] %v3318_v14  ;;  %v5316_v14 = vld [vmem:[#allocation12_spill] sm:$0xff] }
 0x219   :  { %5314 = vst [vmem:[#allocation192_spill] sm:$0xff] %v3320_v61  ;;  %v272_v20 = vsel %vm266_vm0, %v5316_v14, 0.0  ;;  %v5317_v61 = vld [vmem:[#allocation16_spill] sm:$0xff]  ;;  %v267_v14 = vsel %vm266_vm0, %v5323_v54, 0.0  ;;  %v5326_v54 = vld [vmem:[#allocation27_spill] sm:$0xff] }
 0x21a   :  { %v275_v30 = vsel %vm266_vm0, %v5317_v61, 0.0  ;;  %v281_v61 = vsel %vm266_vm0, %v5324_v13, 0.0  ;;  %v270_v13 = vsel %vm266_vm0, %v5326_v54, 0.0  ;;  %v5332_v54 = vld [vmem:[#allocation39_spill] sm:$0xff] }
 0x21b   :  { %v3365_v5 = vadd.f32 %v275_v30, %v2327_v15  ;;  %v3384_v15 = vadd.f32 %v267_v14, %v5305_v11  ;;  %v5331_v14 = vld [vmem:[#allocation38_spill] sm:$0xff] }
 0x21c   :  { %931 = vrot.lane.b32.xlu2 %v2348_v21, %s2265_s24  ;;  %929 = vrot.lane.b32.xlu1 %v2350_v22, %s2265_s24  ;;  %v569_v21 = vsel %vm523_vm1, %v3126_v32, 0.0  ;;  %v3407_v32 = vadd.f32 %v270_v13, %v2308_v10  ;;  %v5334_v10 = vld [vmem:[#allocation44_spill] sm:$0xff] }
 0x21d   :  { %927 = vrot.lane.b32.xlu0 %v2352_v23, %s2265_s24 }
 0x21e   :  { %v3340_v31 = vpop.permute.xlu2 %736  ;;  %v3342_v56 = vpop.permute.xlu1 %716 }
 0x21f   :  { %5318 = vst [vmem:[#allocation8_spill] sm:$0xff] %v3340_v31  ;;  %v3347_v6 = vpop.permute.xlu0 %714  ;;  %v3359_v31 = vadd.f32 %v271_v55, %v2285_v3  ;;  %v268_v3 = vsel %vm266_vm0, %v5327_v42, 0.0  ;;  %v3387_v55 = vadd.f32 %v281_v61, %v2369_v27  ;;  %v5329_v42 = vld [vmem:[#allocation33_spill] sm:$0xff]  ;;  %v287_v61 = vsel %vm266_vm0, %v5331_v14, 0.0 }
 0x220   :  { %5319 = vst [vmem:[#allocation12_spill] sm:$0xff] %v3342_v56  ;;  %v3362_v56 = vadd.f32 %v272_v20, %v2306_v9  ;;  %v3381_v9 = vadd.f32 %v269_v48, %v2287_v4  ;;  %v274_v30 = vsel %vm266_vm0, %v5329_v42, 0.0  ;;  %v5330_v4 = vld [vmem:[#allocation34_spill] sm:$0xff]  ;;  %v3410_v48 = vadd.f32 %v268_v3, %v5239_v36 }
 0x221   :  { %5321 = vst [vmem:[#allocation16_spill] sm:$0xff] %v3347_v6  ;;  %v5325_v6 = vld [vmem:[#allocation86_spill] sm:$0xff]  ;;  %v273_v11 = vsel %vm266_vm0, %v5330_v4, 0.0  ;;  %v290_v36 = vsel %vm266_vm0, %v5334_v10, 0.0  ;;  %v3433_v14 = vadd.f32 %v274_v30, %v2329_v16  ;;  %v5338_v10 = vld [vmem:[#allocation45_spill] sm:$0xff] }
 0x222   :  { %v312_v44 = vsel %vm266_vm0, %v5325_v6, 0.0  ;;  %v284_v6 = vsel %vm266_vm0, %v5328_v19, 0.0  ;;  %v3457_v30 = vadd.f32 %v290_v36, %v2432_v45 }
 0x223   :  { %v376_v20 = vadd.f32 %v312_v44, %v2616_v18  ;;  %v277_v44 = vsel %vm266_vm0, %v5332_v54, 0.0  ;;  %v3430_v4 = vadd.f32 %v284_v6, %v2390_v33  ;;  %v3436_v54 = vadd.f32 %v273_v11, %v2331_v17  ;;  %v5341_v11 = vld [vmem:[#allocation46_spill] sm:$0xff] }
 0x224   :  { %937 = vrot.lane.b32.xlu2 %v2369_v27, %s2265_s24  ;;  %935 = vrot.lane.b32.xlu1 %v2371_v28, %s2265_s24  ;;  %v5333_v27 = vld [vmem:[#allocation40_spill] sm:$0xff]  ;;  %v280_v6 = vsel %vm266_vm0, %v5338_v10, 0.0  ;;  %5340 = vst [vmem:[#allocation86_spill] sm:$0xff] %v3457_v30 }
 0x225   :  { %933 = vrot.lane.b32.xlu0 %v2373_v29, %s2265_s24  ;;  %v276_v19 = vsel %vm266_vm0, %v5333_v27, 0.0  ;;  %v633_v13 = vadd.f32 %v569_v21, %v376_v20  ;;  %v3443_v21 = vadd.f32 %v287_v61, %v2411_v39  ;;  %v3446_v20 = vadd.f32 %v277_v44, %v2350_v22  ;;  %v5343_v44 = vld [vmem:[#allocation50_spill] sm:$0xff]  ;;  %v5349_v30 = vld [vmem:[#allocation60_spill] sm:$0xff] }
 0x226   :  { %v743_v3 = vpop.permute.xlu2 %742  ;;  %v3427_v42 = vpop.permute.xlu1 %722  ;;  %v3454_v17 = vadd.f32 %v276_v19, %v2352_v23  ;;  %v279_v61 = vsel %vm266_vm0, %v5341_v11, 0.0  ;;  %v293_v10 = vsel %vm266_vm0, %v5343_v44, 0.0  ;;  %v5345_v19 = vld [vmem:[#allocation52_spill] sm:$0xff]  ;;  %v5348_v44 = vld [vmem:[#allocation58_spill] sm:$0xff] }
 0x227   :  { %5335 = vst [vmem:[#allocation20_spill] sm:$0xff] %v3427_v42  ;;  %v826_v27 = vsel %vm780_vm2, %v743_v3, 0.0  ;;  %v3440_v18 = vpop.permute.xlu0 %720  ;;  %v5342_v3 = vld [vmem:[#allocation89_spill] sm:$0xff]  ;;  %v282_v36 = vsel %vm266_vm0, %v5345_v19, 0.0  ;;  %v285_v42 = vsel %vm266_vm0, %v5348_v44, 0.0  ;;  %v3490_v19 = vadd.f32 %v279_v61, %v2373_v29 }
 0x228   :  { %5336 = vst [vmem:[#allocation21_spill] sm:$0xff] %v3440_v18  ;;  %v3451_v16 = vadd.f32 %v826_v27, %v633_v13  ;;  %v315_v22 = vsel %vm266_vm0, %v5342_v3, 0.0  ;;  %v5344_v13 = vld [vmem:[#allocation51_spill] sm:$0xff]  ;;  %v5346_v27 = vld [vmem:[#allocation56_spill] sm:$0xff]  ;;  %v5347_v3 = vld [vmem:[#allocation57_spill] sm:$0xff] }
 0x229   :  { %5337 = vst [vmem:[#allocation22_spill] sm:$0xff] %v3443_v21  ;;  %v283_v23 = vsel %vm266_vm0, %v5344_v13, 0.0  ;;  %v296_v11 = vsel %vm266_vm0, %v5346_v27, 0.0  ;;  %v286_v18 = vsel %vm266_vm0, %v5347_v3, 0.0  ;;  %v572_v13 = vsel %vm523_vm1, %v3138_v2, 0.0 }
 0x22a   :  { %5339 = vst [vmem:[#allocation26_spill] sm:$0xff] %v3451_v16  ;;  %v3478_v16 = vadd.f32 %v280_v6, %v2371_v28  ;;  %v299_v28 = vsel %vm266_vm0, %v5349_v30, 0.0  ;;  %v5350_v6 = vld [vmem:[#allocation61_spill] sm:$0xff]  ;;  %v379_v3 = vadd.f32 %v315_v22, %v2643_v60  ;;  %v3504_v2 = vadd.f32 %v293_v10, %v2453_v51  ;;  %v5353_v10 = vld [vmem:[#allocation62_spill] sm:$0xff] }
 0x22b   :  { %v289_v27 = vsel %vm266_vm0, %v5350_v6, 0.0  ;;  %v3507_v29 = vadd.f32 %v283_v23, %v2392_v34  ;;  %v3510_v30 = vadd.f32 %v282_v36, %v2394_v35  ;;  %v3513_v61 = vadd.f32 %v296_v11, %v2474_v57 }
 0x22c   :  { %943 = vrot.lane.b32.xlu2 %v2390_v33, %s2265_s24  ;;  %941 = vrot.lane.b32.xlu1 %v2392_v34, %s2265_s24  ;;  %5351 = vst [vmem:[#allocation27_spill] sm:$0xff] %v3504_v2  ;;  %v3518_v33 = vadd.f32 %v286_v18, %v2413_v40  ;;  %v3521_v22 = vadd.f32 %v285_v42, %v2415_v41  ;;  %v288_v34 = vsel %vm266_vm0, %v5353_v10, 0.0  ;;  %v5358_v10 = vld [vmem:[#allocation64_spill] sm:$0xff] }
 0x22d   :  { %5352 = vst [vmem:[#allocation28_spill] sm:$0xff] %v3513_v61  ;;  %939 = vrot.lane.b32.xlu0 %v2394_v35, %s2265_s24  ;;  %v636_v23 = vadd.f32 %v572_v13, %v379_v3  ;;  %v3529_v11 = vadd.f32 %v299_v28, %v2495_v63  ;;  %v3532_v6 = vadd.f32 %v289_v27, %v2434_v46  ;;  %v5356_v35 = vld [vmem:[#allocation63_spill] sm:$0xff]  ;;  %v292_v13 = vsel %vm266_vm0, %v5358_v10, 0.0  ;;  %v5359_v3 = vld [vmem:[#allocation65_spill] sm:$0xff]  ;;  %v5363_v61 = vld [vmem:[#allocation68_spill] sm:$0xff] }
 0x22e   :  { %v749_v44 = vpop.permute.xlu2 %748  ;;  %v3526_v36 = vpop.permute.xlu1 %728  ;;  %v302_v18 = vsel %vm266_vm0, %v5356_v35, 0.0  ;;  %v291_v28 = vsel %vm266_vm0, %v5359_v3, 0.0  ;;  %v3553_v35 = vadd.f32 %v288_v34, %v2436_v47  ;;  %v294_v10 = vsel %vm266_vm0, %v5363_v61, 0.0  ;;  %v5364_v2 = vld [vmem:[#allocation92_spill] sm:$0xff] }
 0x22f   :  { %5354 = vst [vmem:[#allocation32_spill] sm:$0xff] %v3526_v36  ;;  %v829_v42 = vsel %vm780_vm2, %v749_v44, 0.0  ;;  %v3539_v60 = vpop.permute.xlu0 %726  ;;  %v5360_v36 = vld [vmem:[#allocation66_spill] sm:$0xff]  ;;  %v5362_v44 = vld [vmem:[#allocation67_spill] sm:$0xff]  ;;  %v318_v3 = vsel %vm266_vm0, %v5364_v2, 0.0  ;;  %v3565_v21 = vadd.f32 %v302_v18, %v2516_v8  ;;  %v3577_v61 = vadd.f32 %v292_v13, %v2455_v52 }
 0x230   :  { %5355 = vst [vmem:[#allocation33_spill] sm:$0xff] %v3529_v11  ;;  %v305_v27 = vsel %vm266_vm0, %v5360_v36, 0.0  ;;  %v3550_v11 = vadd.f32 %v829_v42, %v636_v23  ;;  %v5366_v23 = vld [vmem:[#allocation69_spill] sm:$0xff]  ;;  %v5367_v36 = vld [vmem:[#allocation70_spill] sm:$0xff]  ;;  %v3580_v2 = vadd.f32 %v291_v28, %v2457_v53 }
 0x231   :  { %5357 = vst [vmem:[#allocation34_spill] sm:$0xff] %v3539_v60  ;;  %v295_v60 = vsel %vm266_vm0, %v5362_v44, 0.0  ;;  %v308_v34 = vsel %vm266_vm0, %v5366_v23, 0.0  ;;  %v298_v42 = vsel %vm266_vm0, %v5367_v36, 0.0  ;;  %v5368_v44 = vld [vmem:[#allocation71_spill] sm:$0xff]  ;;  %v3583_v18 = vadd.f32 %v305_v27, %v2539_v24  ;;  %v5371_v36 = vld [vmem:[#allocation4_spill] sm:$0xff] }
 0x232   :  { %5361 = vst [vmem:[#allocation38_spill] sm:$0xff] %v3550_v11  ;;  %v297_v11 = vsel %vm266_vm0, %v5368_v44, 0.0  ;;  %v575_v23 = vsel %vm523_vm1, %v3150_v43, 0.0  ;;  %v3592_v8 = vadd.f32 %v294_v10, %v5371_v36  ;;  %v382_v44 = vadd.f32 %v318_v3, %v2670_v62  ;;  %v5374_v43 = vld [vmem:[#allocation5_spill] sm:$0xff]  ;;  %v5376_v27 = vld [vmem:[#allocation72_spill] sm:$0xff]  ;;  %v5378_v3 = vld [vmem:[#allocation74_spill] sm:$0xff] }
 0x233   :  { %5365 = vst [vmem:[#allocation39_spill] sm:$0xff] %v3565_v21  ;;  %v3589_v21 = vadd.f32 %v295_v60, %v2476_v58  ;;  %v3600_v13 = vadd.f32 %v308_v34, %v2562_v37  ;;  %v3603_v28 = vadd.f32 %v298_v42, %v2497_v0  ;;  %v3606_v60 = vadd.f32 %v297_v11, %v5374_v43  ;;  %v5379_v42 = vld [vmem:[#allocation75_spill] sm:$0xff]  ;;  %v5383_v24 = vld [vmem:[#allocation78_spill] sm:$0xff] }
 0x234   :  { %5369 = vst [vmem:[#allocation40_spill] sm:$0xff] %v3580_v2  ;;  %949 = vrot.lane.b32.xlu2 %v2411_v39, %s2265_s24  ;;  %947 = vrot.lane.b32.xlu1 %v2413_v40, %s2265_s24  ;;  %v311_v10 = vsel %vm266_vm0, %v5376_v27, 0.0  ;;  %v5377_v39 = vld [vmem:[#allocation73_spill] sm:$0xff]  ;;  %v300_v34 = vsel %vm266_vm0, %v5378_v3, 0.0  ;;  %v314_v11 = vsel %vm266_vm0, %v5379_v42, 0.0  ;;  %v639_v62 = vadd.f32 %v575_v23, %v382_v44  ;;  %v5381_v27 = vld [vmem:[#allocation76_spill] sm:$0xff] }
 0x235   :  { %5370 = vst [vmem:[#allocation44_spill] sm:$0xff] %v3583_v18  ;;  %945 = vrot.lane.b32.xlu0 %v2415_v41, %s2265_s24  ;;  %v301_v40 = vsel %vm266_vm0, %v5377_v39, 0.0  ;;  %v304_v41 = vsel %vm266_vm0, %v5381_v27, 0.0  ;;  %v5382_v18 = vld [vmem:[#allocation77_spill] sm:$0xff]  ;;  %v317_v3 = vsel %vm266_vm0, %v5383_v24, 0.0  ;;  %v3638_v23 = vadd.f32 %v311_v10, %v2585_v50  ;;  %v5386_v44 = vld [vmem:[#allocation79_spill] sm:$0xff] }
 0x236   :  { %5372 = vst [vmem:[#allocation45_spill] sm:$0xff] %v3592_v8  ;;  %v755_v37 = vpop.permute.xlu2 %754  ;;  %v303_v39 = vsel %vm266_vm0, %v5382_v18, 0.0  ;;  %v307_v27 = vsel %vm266_vm0, %v5386_v44, 0.0  ;;  %v3649_v24 = vadd.f32 %v301_v40, %v2518_v12  ;;  %v5389_v2 = vld [vmem:[#allocation7_spill] sm:$0xff]  ;;  %v3659_v44 = vadd.f32 %v304_v41, %v2541_v25 }
 0x237   :  { %5373 = vst [vmem:[#allocation46_spill] sm:$0xff] %v3600_v13  ;;  %v3622_v13 = vpop.permute.xlu1 %734  ;;  %v3635_v42 = vpop.permute.xlu0 %732  ;;  %v5391_v10 = vld [vmem:[#allocation95_spill] sm:$0xff]  ;;  %v3671_v40 = vadd.f32 %v307_v27, %v2564_v38 }
 0x238   :  { %5375 = vst [vmem:[#allocation89_spill] sm:$0xff] %v3606_v60  ;;  %v832_v60 = vsel %vm780_vm2, %v755_v37, 0.0  ;;  %v3652_v37 = vadd.f32 %v300_v34, %v5389_v2  ;;  %v321_v50 = vsel %vm266_vm0, %v5391_v10, 0.0  ;;  %v5396_v34 = vld [vmem:[#allocation15_spill] sm:$0xff]  ;;  %v5398_v10 = vld [vmem:[#allocation82_spill] sm:$0xff] }
 0x239   :  { %5380 = vst [vmem:[#allocation50_spill] sm:$0xff] %v3622_v13  ;;  %v5387_v13 = vld [vmem:[#allocation80_spill] sm:$0xff]  ;;  %v3646_v8 = vadd.f32 %v832_v60, %v639_v62  ;;  %v3665_v62 = vadd.f32 %v317_v3, %v2639_v49  ;;  %v310_v41 = vsel %vm266_vm0, %v5398_v10, 0.0  ;;  %v5400_v3 = vld [vmem:[#allocation83_spill] sm:$0xff] }
 0x23a   :  { %5384 = vst [vmem:[#allocation51_spill] sm:$0xff] %v3635_v42  ;;  %v306_v18 = vsel %vm266_vm0, %v5387_v13, 0.0  ;;  %v378_v42 = vadd.f32 %v314_v11, %v2612_v7  ;;  %v5394_v13 = vld [vmem:[#allocation81_spill] sm:$0xff]  ;;  %v309_v49 = vsel %vm266_vm0, %v5400_v3, 0.0  ;;  %v5401_v7 = vld [vmem:[#allocation84_spill] sm:$0xff]  ;;  %v5405_v3 = vld [vmem:[#allocation87_spill] sm:$0xff] }
 0x23b   :  { %5385 = vst [vmem:[#allocation52_spill] sm:$0xff] %v3638_v23  ;;  %v3662_v23 = vadd.f32 %v303_v39, %v2543_v26  ;;  %v320_v60 = vsel %vm266_vm0, %v5394_v13, 0.0  ;;  %v3674_v11 = vadd.f32 %v306_v18, %v5396_v34  ;;  %v323_v27 = vsel %vm266_vm0, %v5401_v7, 0.0  ;;  %v5402_v13 = vld [vmem:[#allocation85_spill] sm:$0xff]  ;;  %v5403_v34 = vld [vmem:[#allocation43_spill] sm:$0xff]  ;;  %v5406_v7 = vld [vmem:[#allocation88_spill] sm:$0xff] }
 0x23c   :  { %5388 = vst [vmem:[#allocation56_spill] sm:$0xff] %v3646_v8  ;;  %v5399_v8 = vld [vmem:[#allocation153_spill] sm:$0xff]  ;;  %v313_v18 = vsel %vm266_vm0, %v5402_v13, 0.0  ;;  %v385_v38 = vadd.f32 %v321_v50, %v5403_v34  ;;  %955 = vrot.lane.b32.xlu2 %v2432_v45, %s2265_s24  ;;  %953 = vrot.lane.b32.xlu1 %v2434_v46, %s2265_s24  ;;  %v316_v26 = vsel %vm266_vm0, %v5406_v7, 0.0  ;;  %v5407_v13 = vld [vmem:[#allocation90_spill] sm:$0xff]  ;;  %v5413_v25 = vld [vmem:[#allocation19_spill] sm:$0xff] }
 0x23d   :  { %5390 = vst [vmem:[#allocation57_spill] sm:$0xff] %v3652_v37  ;;  %v578_v39 = vsel %vm523_vm1, %v5399_v8, 0.0  ;;  %v5404_v8 = vld [vmem:[#allocation35_spill] sm:$0xff]  ;;  %v329_v50 = vsel %vm266_vm0, %v5407_v13, 0.0  ;;  %951 = vrot.lane.b32.xlu0 %v2436_v47, %s2265_s24  ;;  %v5408_v45 = vld [vmem:[#allocation18_spill] sm:$0xff]  ;;  %v3722_v13 = vadd.f32 %v309_v49, %v5413_v25 }
 0x23e   :  { %5392 = vst [vmem:[#allocation58_spill] sm:$0xff] %v3659_v44  ;;  %v3697_v10 = vadd.f32 %v320_v60, %v5404_v8  ;;  %v3711_v46 = vadd.f32 %v310_v41, %v5408_v45  ;;  %v5410_v60 = vld [vmem:[#allocation91_spill] sm:$0xff]  ;;  %v5411_v8 = vld [vmem:[#allocation93_spill] sm:$0xff]  ;;  %v761_v7 = vpop.permute.xlu2 %760  ;;  %v5416_v41 = vld [vmem:[#allocation24_spill] sm:$0xff] }
 0x23f   :  { %5393 = vst [vmem:[#allocation60_spill] sm:$0xff] %v3662_v23  ;;  %v319_v34 = vsel %vm266_vm0, %v5410_v60, 0.0  ;;  %v642_v23 = vadd.f32 %v578_v39, %v385_v38  ;;  %v3719_v37 = vpop.permute.xlu1 %740  ;;  %v377_v45 = vadd.f32 %v313_v18, %v5416_v41  ;;  %v3730_v60 = vpop.permute.xlu0 %738  ;;  %v5418_v2 = vld [vmem:[#allocation47_spill] sm:$0xff]  ;;  %v5420_v38 = vld [vmem:[#allocation30_spill] sm:$0xff] }
 0x240   :  { %5395 = vst [vmem:[#allocation61_spill] sm:$0xff] %v3671_v40  ;;  %v5415_v40 = vld [vmem:[#allocation41_spill] sm:$0xff]  ;;  %v3736_v39 = vadd.f32 %v316_v26, %v5420_v38  ;;  %v5425_v18 = vld [vmem:[#allocation42_spill] sm:$0xff]  ;;  %v5435_v38 = vld [vmem:[#allocation156_spill] sm:$0xff] }
 0x241   :  { %5397 = vst [vmem:[#allocation62_spill] sm:$0xff] %v3674_v11  ;;  %v326_v11 = vsel %vm266_vm0, %v5405_v3, 0.0  ;;  %v322_v3 = vsel %vm266_vm0, %v5411_v8, 0.0  ;;  %v3725_v47 = vadd.f32 %v323_v27, %v5415_v40  ;;  %v5421_v8 = vld [vmem:[#allocation53_spill] sm:$0xff]  ;;  %v5424_v27 = vld [vmem:[#allocation36_spill] sm:$0xff] }
 0x242   :  { %5409 = vst [vmem:[#allocation63_spill] sm:$0xff] %v3711_v46  ;;  %v835_v46 = vsel %vm780_vm2, %v761_v7, 0.0  ;;  %v3733_v44 = vadd.f32 %v326_v11, %v5418_v2  ;;  %v3744_v40 = vadd.f32 %v319_v34, %v5424_v27  ;;  %v3747_v41 = vadd.f32 %v322_v3, %v5425_v18  ;;  %v5426_v7 = vld [vmem:[#allocation94_spill] sm:$0xff]  ;;  %v5428_v2 = vld [vmem:[#allocation96_spill] sm:$0xff]  ;;  %v5434_v27 = vld [vmem:[#allocation149_spill] sm:$0xff] }
 0x243   :  { %5412 = vst [vmem:[#allocation64_spill] sm:$0xff] %v3719_v37  ;;  %v3739_v37 = vadd.f32 %v329_v50, %v5421_v8  ;;  %v3741_v49 = vadd.f32 %v835_v46, %v642_v23  ;;  %v5427_v11 = vld [vmem:[#allocation98_spill] sm:$0xff]  ;;  %v325_v50 = vsel %vm266_vm0, %v5428_v2, 0.0  ;;  %v5429_v23 = vld [vmem:[#allocation97_spill] sm:$0xff]  ;;  %v5430_v46 = vld [vmem:[#allocation99_spill] sm:$0xff] }
 0x244   :  { %5414 = vst [vmem:[#allocation65_spill] sm:$0xff] %v3722_v13  ;;  %v324_v26 = vsel %vm266_vm0, %v5427_v11, 0.0  ;;  %v528_v34 = vsel %vm523_vm1, %v5429_v23, 0.0  ;;  %v328_v3 = vsel %vm266_vm0, %v5430_v46, 0.0  ;;  %v5432_v8 = vld [vmem:[#allocation101_spill] sm:$0xff]  ;;  %v5433_v18 = vld [vmem:[#allocation102_spill] sm:$0xff]  ;;  %961 = vrot.lane.b32.xlu2 %v2453_v51, %s2265_s24  ;;  %959 = vrot.lane.b32.xlu1 %v2455_v52, %s2265_s24 }
 0x245   :  { %5417 = vst [vmem:[#allocation66_spill] sm:$0xff] %v3730_v60  ;;  %v525_v60 = vsel %vm523_vm1, %v5426_v7, 0.0  ;;  %v327_v11 = vsel %vm266_vm0, %v5432_v8, 0.0  ;;  %v534_v2 = vsel %vm523_vm1, %v5433_v18, 0.0  ;;  %v571_v23 = vsel %vm523_vm1, %v5434_v27, 0.0  ;;  %v5438_v13 = vld [vmem:[#allocation103_spill] sm:$0xff]  ;;  %957 = vrot.lane.b32.xlu0 %v2457_v53, %s2265_s24 }
 0x246   :  { %5419 = vst [vmem:[#allocation67_spill] sm:$0xff] %v3733_v44  ;;  %v581_v46 = vsel %vm523_vm1, %v5435_v38, 0.0  ;;  %v3780_v25 = vadd.f32 %v525_v60, %v3410_v48  ;;  %v524_v8 = vsel %vm523_vm1, %v5438_v13, 0.0  ;;  %v5439_v44 = vld [vmem:[#allocation137_spill] sm:$0xff]  ;;  %v5440_v38 = vld [vmem:[#allocation48_spill] sm:$0xff]  ;;  %v3797_v48 = vadd.f32 %v528_v34, %v3359_v31  ;;  %v5441_v60 = vld [vmem:[#allocation54_spill] sm:$0xff] }
 0x247   :  { %5422 = vst [vmem:[#allocation68_spill] sm:$0xff] %v3739_v37  ;;  %v570_v18 = vsel %vm523_vm1, %v5439_v44, 0.0  ;;  %v3794_v27 = vadd.f32 %v325_v50, %v5440_v38  ;;  %v5442_v44 = vld [vmem:[#allocation55_spill] sm:$0xff]  ;;  %v635_v52 = vadd.f32 %v571_v23, %v378_v42  ;;  %v767_v38 = vpop.permute.xlu2 %766  ;;  %v3812_v31 = vadd.f32 %v524_v8, %v3384_v15  ;;  %v745_v53 = vpop.permute.xlu0 %744 }
 0x248   :  { %5423 = vst [vmem:[#allocation92_spill] sm:$0xff] %v3741_v49  ;;  %v5431_v49 = vld [vmem:[#allocation100_spill] sm:$0xff]  ;;  %v391_v51 = vadd.f32 %v327_v11, %v5442_v44  ;;  %v634_v34 = vadd.f32 %v570_v18, %v377_v45  ;;  %v827_v15 = vsel %vm780_vm2, %v745_v53, 0.0  ;;  %v5447_v23 = vld [vmem:[#allocation107_spill] sm:$0xff] }
 0x249   :  { %v531_v7 = vsel %vm523_vm1, %v5431_v49, 0.0  ;;  %5436 = vst [vmem:[#allocation69_spill] sm:$0xff] %v3780_v25  ;;  %v5437_v49 = vld [vmem:[#allocation49_spill] sm:$0xff]  ;;  %v747_v25 = vpop.permute.xlu1 %746  ;;  %v5449_v18 = vld [vmem:[#allocation108_spill] sm:$0xff]  ;;  %v5452_v53 = vld [vmem:[#allocation111_spill] sm:$0xff] }
 0x24a   :  { %v388_v37 = vadd.f32 %v324_v26, %v5437_v49  ;;  %v3800_v26 = vadd.f32 %v328_v3, %v5441_v60  ;;  %v3803_v13 = vadd.f32 %v531_v7, %v3433_v14  ;;  %v3809_v49 = vadd.f32 %v534_v2, %v3446_v20  ;;  %v5443_v7 = vld [vmem:[#allocation104_spill] sm:$0xff]  ;;  %v5446_v2 = vld [vmem:[#allocation106_spill] sm:$0xff] }
 0x24b   :  { %v838_v14 = vsel %vm780_vm2, %v767_v38, 0.0  ;;  %v828_v3 = vsel %vm780_vm2, %v747_v25, 0.0  ;;  %v330_v20 = vsel %vm266_vm0, %v5443_v7, 0.0  ;;  %v527_v25 = vsel %vm523_vm1, %v5446_v2, 0.0 }
 0x24c   :  { %v645_v50 = vadd.f32 %v581_v46, %v388_v37  ;;  %v3823_v42 = vadd.f32 %v828_v3, %v635_v52  ;;  %v5445_v37 = vld [vmem:[#allocation105_spill] sm:$0xff]  ;;  %v526_v46 = vsel %vm523_vm1, %v5447_v23, 0.0  ;;  %v3836_v8 = vadd.f32 %v827_v15, %v634_v34  ;;  %v5454_v34 = vld [vmem:[#allocation112_spill] sm:$0xff]  ;;  %v5455_v23 = vld [vmem:[#allocation151_spill] sm:$0xff]  ;;  %967 = vrot.lane.b32.xlu2 %v2474_v57, %s2265_s24  ;;  %965 = vrot.lane.b32.xlu1 %v2476_v58, %s2265_s24 }
 0x24d   :  { %v537_v45 = vsel %vm523_vm1, %v5445_v37, 0.0  ;;  %v540_v38 = vsel %vm523_vm1, %v5449_v18, 0.0  ;;  %v5450_v52 = vld [vmem:[#allocation109_spill] sm:$0xff]  ;;  %v543_v7 = vsel %vm523_vm1, %v5452_v53, 0.0  ;;  %v5453_v37 = vld [vmem:[#allocation59_spill] sm:$0xff]  ;;  %v533_v15 = vsel %vm523_vm1, %v5454_v34, 0.0  ;;  %963 = vrot.lane.b32.xlu0 %v5371_v36, %s2265_s24 }
 0x24e   :  { %v3821_v11 = vadd.f32 %v838_v14, %v645_v50  ;;  %5448 = vst [vmem:[#allocation71_spill] sm:$0xff] %v3836_v8  ;;  %v530_v50 = vsel %vm523_vm1, %v5450_v52, 0.0  ;;  %v5451_v14 = vld [vmem:[#allocation110_spill] sm:$0xff]  ;;  %v394_v2 = vadd.f32 %v330_v20, %v5453_v37  ;;  %v574_v18 = vsel %vm523_vm1, %v5455_v23, 0.0  ;;  %v5457_v53 = vld [vmem:[#allocation140_spill] sm:$0xff] }
 0x24f   :  { %v529_v3 = vsel %vm523_vm1, %v5451_v14, 0.0  ;;  %v3861_v14 = vadd.f32 %v537_v45, %v3478_v16  ;;  %v3864_v8 = vadd.f32 %v527_v25, %v3407_v32  ;;  %v3867_v20 = vadd.f32 %v526_v46, %v3381_v9  ;;  %v5458_v45 = vld [vmem:[#allocation113_spill] sm:$0xff]  ;;  %v773_v25 = vpop.permute.xlu2 %772  ;;  %v5463_v23 = vld [vmem:[#allocation116_spill] sm:$0xff] }
 0x250   :  { %5444 = vst [vmem:[#allocation70_spill] sm:$0xff] %v3821_v11  ;;  %v5456_v11 = vld [vmem:[#allocation159_spill] sm:$0xff]  ;;  %v573_v34 = vsel %vm523_vm1, %v5457_v53, 0.0  ;;  %v3880_v16 = vadd.f32 %v530_v50, %v3436_v54  ;;  %v3883_v32 = vadd.f32 %v529_v3, %v3362_v56  ;;  %v3886_v9 = vadd.f32 %v543_v7, %v3518_v33  ;;  %v5459_v56 = vld [vmem:[#allocation114_spill] sm:$0xff]  ;;  %v751_v50 = vpop.permute.xlu0 %750 }
 0x251   :  { %v584_v52 = vsel %vm523_vm1, %v5456_v11, 0.0  ;;  %v3877_v11 = vadd.f32 %v540_v38, %v3507_v29  ;;  %v3891_v57 = vadd.f32 %v533_v15, %v3454_v17  ;;  %v532_v58 = vsel %vm523_vm1, %v5458_v45, 0.0  ;;  %v753_v46 = vpop.permute.xlu1 %752  ;;  %v5460_v3 = vld [vmem:[#allocation115_spill] sm:$0xff]  ;;  %v5466_v45 = vld [vmem:[#allocation118_spill] sm:$0xff] }
 0x252   :  { %v638_v29 = vadd.f32 %v574_v18, %v3665_v62  ;;  %v648_v54 = vadd.f32 %v584_v52, %v391_v51  ;;  %v546_v33 = vsel %vm523_vm1, %v5459_v56, 0.0  ;;  %v637_v38 = vadd.f32 %v573_v34, %v3736_v39  ;;  %v5464_v52 = vld [vmem:[#allocation117_spill] sm:$0xff] }
 0x253   :  { %v841_v36 = vsel %vm780_vm2, %v773_v25, 0.0  ;;  %v831_v17 = vsel %vm780_vm2, %v753_v46, 0.0  ;;  %v536_v62 = vsel %vm523_vm1, %v5460_v3, 0.0  ;;  %v830_v15 = vsel %vm780_vm2, %v751_v50, 0.0  ;;  %v5469_v46 = vld [vmem:[#allocation121_spill] sm:$0xff]  ;;  %v5471_v3 = vld [vmem:[#allocation162_spill] sm:$0xff] }
 0x254   :  { %v3908_v51 = vadd.f32 %v841_v36, %v648_v54  ;;  %v3910_v7 = vadd.f32 %v831_v17, %v638_v29  ;;  %v3915_v39 = vadd.f32 %v532_v58, %v3365_v5  ;;  %v535_v18 = vsel %vm523_vm1, %v5463_v23, 0.0  ;;  %v5467_v54 = vld [vmem:[#allocation119_spill] sm:$0xff]  ;;  %v5468_v5 = vld [vmem:[#allocation120_spill] sm:$0xff]  ;;  %v5470_v17 = vld [vmem:[#allocation154_spill] sm:$0xff]  ;;  %973 = vrot.lane.b32.xlu2 %v2495_v63, %s2265_s24  ;;  %971 = vrot.lane.b32.xlu1 %v2497_v0, %s2265_s24 }
 0x255   :  { %v549_v53 = vsel %vm523_vm1, %v5464_v52, 0.0  ;;  %v3923_v34 = vadd.f32 %v830_v15, %v637_v38  ;;  %v539_v29 = vsel %vm523_vm1, %v5466_v45, 0.0  ;;  %v538_v25 = vsel %vm523_vm1, %v5467_v54, 0.0  ;;  %v5472_v45 = vld [vmem:[#allocation122_spill] sm:$0xff]  ;;  %969 = vrot.lane.b32.xlu0 %v5374_v43, %s2265_s24  ;;  %v5475_v0 = vld [vmem:[#allocation124_spill] sm:$0xff] }
 0x256   :  { %5461 = vst [vmem:[#allocation4_spill] sm:$0xff] %v3908_v51  ;;  %v552_v58 = vsel %vm523_vm1, %v5468_v5, 0.0  ;;  %v542_v56 = vsel %vm523_vm1, %v5469_v46, 0.0  ;;  %v3938_v36 = vadd.f32 %v546_v33, %v3532_v6  ;;  %v3941_v38 = vadd.f32 %v536_v62, %v3490_v19  ;;  %v5473_v19 = vld [vmem:[#allocation143_spill] sm:$0xff]  ;;  %v5476_v46 = vld [vmem:[#allocation125_spill] sm:$0xff] }
 0x257   :  { %5462 = vst [vmem:[#allocation5_spill] sm:$0xff] %v3910_v7  ;;  %v577_v50 = vsel %vm523_vm1, %v5470_v17, 0.0  ;;  %v587_v15 = vsel %vm523_vm1, %v5471_v3, 0.0  ;;  %v3950_v23 = vadd.f32 %v535_v18, %v3371_v59  ;;  %v3953_v52 = vadd.f32 %v549_v53, %v3577_v61  ;;  %v5474_v53 = vld [vmem:[#allocation123_spill] sm:$0xff]  ;;  %v779_v54 = vpop.permute.xlu2 %778 }
 0x258   :  { %5465 = vst [vmem:[#allocation72_spill] sm:$0xff] %v3923_v34  ;;  %v541_v6 = vsel %vm523_vm1, %v5472_v45, 0.0  ;;  %v576_v33 = vsel %vm523_vm1, %v5473_v19, 0.0  ;;  %v3966_v59 = vadd.f32 %v539_v29, %v3510_v30  ;;  %v3969_v61 = vadd.f32 %v538_v25, %v3387_v55  ;;  %v5481_v45 = vld [vmem:[#allocation126_spill] sm:$0xff]  ;;  %v5482_v19 = vld [vmem:[#allocation127_spill] sm:$0xff]  ;;  %v5522_v34 = vld [vmem:[#allocation60_spill] sm:$0xff] }
 0x259   :  { %v3972_v62 = vadd.f32 %v552_v58, %v3589_v21  ;;  %v3975_v18 = vadd.f32 %v542_v56, %v3521_v22  ;;  %v555_v63 = vsel %vm523_vm1, %v5474_v53, 0.0  ;;  %v545_v30 = vsel %vm523_vm1, %v5475_v0, 0.0  ;;  %v759_v21 = vpop.permute.xlu1 %758  ;;  %v757_v58 = vpop.permute.xlu0 %756  ;;  %v5483_v53 = vld [vmem:[#allocation128_spill] sm:$0xff]  ;;  %v5485_v0 = vld [vmem:[#allocation22_spill] sm:$0xff] }
 0x25a   :  { %v641_v55 = vadd.f32 %v577_v50, %v3697_v10  ;;  %v651_v29 = vadd.f32 %v587_v15, %v394_v2  ;;  %v3987_v25 = vadd.f32 %v541_v6, %v3430_v4  ;;  %v640_v22 = vadd.f32 %v576_v33, %v3744_v40  ;;  %v5479_v50 = vld [vmem:[#allocation3_spill] sm:$0xff] }
 0x25b   :  { %v844_v43 = vsel %vm780_vm2, %v779_v54, 0.0  ;;  %v834_v5 = vsel %vm780_vm2, %v759_v21, 0.0  ;;  %v544_v56 = vsel %vm523_vm1, %v5476_v46, 0.0  ;;  %v833_v4 = vsel %vm780_vm2, %v757_v58, 0.0  ;;  %v5487_v54 = vld [vmem:[#allocation157_spill] sm:$0xff]  ;;  %v5489_v58 = vld [vmem:[#allocation131_spill] sm:$0xff] }
 0x25c   :  { %v3997_v10 = vadd.f32 %v844_v43, %v651_v29  ;;  %v3999_v2 = vadd.f32 %v834_v5, %v641_v55  ;;  %v4004_v40 = vadd.f32 %v555_v63, %v3603_v28  ;;  %v4007_v17 = vadd.f32 %v545_v30, %v3553_v35  ;;  %v5484_v35 = vld [vmem:[#allocation129_spill] sm:$0xff]  ;;  %v5486_v55 = vld [vmem:[#allocation130_spill] sm:$0xff]  ;;  %977 = vrot.lane.b32.xlu1 %v2518_v12, %s2265_s24  ;;  %v5498_v12 = vld [vmem:[#allocation132_spill] sm:$0xff] }
 0x25d   :  { %v558_v3 = vsel %vm523_vm1, %v5479_v50, 0.0  ;;  %v4012_v15 = vadd.f32 %v833_v4, %v640_v22  ;;  %v548_v6 = vsel %vm523_vm1, %v5481_v45, 0.0  ;;  %v547_v33 = vsel %vm523_vm1, %v5482_v19, 0.0  ;;  %v5488_v22 = vld [vmem:[#allocation165_spill] sm:$0xff]  ;;  %v5491_v50 = vld [vmem:[#allocation6_spill] sm:$0xff]  ;;  %v5492_v45 = vld [vmem:[#allocation40_spill] sm:$0xff] }
 0x25e   :  { %5477 = vst [vmem:[#allocation73_spill] sm:$0xff] %v3997_v10  ;;  %v561_v28 = vsel %vm523_vm1, %v5483_v53, 0.0  ;;  %v551_v63 = vsel %vm523_vm1, %v5484_v35, 0.0  ;;  %v4027_v30 = vadd.f32 %v544_v56, %v5485_v0  ;;  %v550_v29 = vsel %vm523_vm1, %v5486_v55, 0.0  ;;  %v5490_v56 = vld [vmem:[#allocation146_spill] sm:$0xff]  ;;  %979 = vrot.lane.b32.xlu2 %v5491_v50, %s2265_s24  ;;  %v5495_v0 = vld [vmem:[#allocation45_spill] sm:$0xff] }
 0x25f   :  { %5478 = vst [vmem:[#allocation74_spill] sm:$0xff] %v3999_v2  ;;  %v580_v21 = vsel %vm523_vm1, %v5487_v54, 0.0  ;;  %v783_v43 = vsel %vm780_vm2, %v5488_v22, 0.0  ;;  %v4039_v5 = vadd.f32 %v558_v3, %v3649_v24  ;;  %v564_v46 = vsel %vm523_vm1, %v5489_v58, 0.0  ;;  %v5493_v24 = vld [vmem:[#allocation86_spill] sm:$0xff]  ;;  %v5496_v54 = vld [vmem:[#allocation7_spill] sm:$0xff]  ;;  %v914_v50 = vpop.permute.xlu2 %913 }
 0x260   :  { %5480 = vst [vmem:[#allocation75_spill] sm:$0xff] %v4012_v15  ;;  %v579_v4 = vsel %vm523_vm1, %v5490_v56, 0.0  ;;  %v4053_v19 = vadd.f32 %v548_v6, %v5492_v45  ;;  %v4056_v3 = vadd.f32 %v547_v33, %v5493_v24  ;;  %v5494_v53 = vld [vmem:[#allocation58_spill] sm:$0xff]  ;;  %v4062_v55 = vadd.f32 %v551_v63, %v5495_v0  ;;  %975 = vrot.lane.b32.xlu0 %v5496_v54, %s2265_s24  ;;  %v5497_v22 = vld [vmem:[#allocation27_spill] sm:$0xff]  ;;  %v5499_v45 = vld [vmem:[#allocation61_spill] sm:$0xff] }
 0x261   :  { %v4059_v35 = vadd.f32 %v561_v28, %v5494_v53  ;;  %v4067_v58 = vadd.f32 %v550_v29, %v5497_v22  ;;  %v554_v6 = vsel %vm523_vm1, %v5498_v12, 0.0  ;;  %v644_v56 = vadd.f32 %v580_v21, %v3725_v47  ;;  %v765_v28 = vpop.permute.xlu1 %764  ;;  %v763_v0 = vpop.permute.xlu0 %762  ;;  %v5501_v54 = vld [vmem:[#allocation133_spill] sm:$0xff]  ;;  %v5505_v12 = vld [vmem:[#allocation135_spill] sm:$0xff] }
 0x262   :  { %v847_v33 = vadd.f32 %v783_v43, %v3867_v20  ;;  %v4075_v24 = vadd.f32 %v564_v46, %v5499_v45  ;;  %v643_v63 = vadd.f32 %v579_v4, %v3747_v41  ;;  %v1040_v53 = vsel %vm1037_vm3, %v914_v50, 0.0  ;;  %v5503_v46 = vld [vmem:[#allocation89_spill] sm:$0xff]  ;;  %v5504_v41 = vld [vmem:[#allocation134_spill] sm:$0xff]  ;;  %v5507_v45 = vld [vmem:[#allocation136_spill] sm:$0xff] }
 0x263   :  { %v837_v29 = vsel %vm780_vm2, %v765_v28, 0.0  ;;  %v553_v47 = vsel %vm523_vm1, %v5501_v54, 0.0  ;;  %v836_v43 = vsel %vm780_vm2, %v763_v0, 0.0  ;;  %v4090_v22 = vadd.f32 %v554_v6, %v5503_v46  ;;  %v5509_v6 = vld [vmem:[#allocation139_spill] sm:$0xff]  ;;  %v5510_v54 = vld [vmem:[#allocation28_spill] sm:$0xff]  ;;  %v5520_v15 = vld [vmem:[#allocation57_spill] sm:$0xff] }
 0x264   :  { %5500 = vst [vmem:[#allocation76_spill] sm:$0xff] %v4075_v24  ;;  %v1104_v21 = vadd.f32 %v1040_v53, %v847_v33  ;;  %v4085_v20 = vadd.f32 %v837_v29, %v644_v56  ;;  %v567_v4 = vsel %vm523_vm1, %v5504_v41, 0.0  ;;  %v557_v50 = vsel %vm523_vm1, %v5505_v12, 0.0  ;;  %v5508_v33 = vld [vmem:[#allocation138_spill] sm:$0xff]  ;;  %v5511_v41 = vld [vmem:[#allocation141_spill] sm:$0xff]  ;;  %v5514_v10 = vld [vmem:[#allocation63_spill] sm:$0xff] }
 0x265   :  { %v4098_v28 = vadd.f32 %v836_v43, %v643_v63  ;;  %v556_v56 = vsel %vm523_vm1, %v5507_v45, 0.0  ;;  %v560_v53 = vsel %vm523_vm1, %v5508_v33, 0.0  ;;  %v559_v29 = vsel %vm523_vm1, %v5509_v6, 0.0  ;;  %v5512_v43 = vld [vmem:[#allocation160_spill] sm:$0xff]  ;;  %v5516_v6 = vld [vmem:[#allocation142_spill] sm:$0xff] }
 0x266   :  { %5502 = vst [vmem:[#allocation77_spill] sm:$0xff] %v4085_v20  ;;  %v1168_v0 = vmul.f32 2e-05, %v1104_v21  ;;  %v4110_v46 = vadd.f32 %v553_v47, %v5510_v54  ;;  %v563_v63 = vsel %vm523_vm1, %v5511_v41, 0.0  ;;  %v583_v12 = vsel %vm523_vm1, %v5512_v43, 0.0  ;;  %v5513_v45 = vld [vmem:[#allocation168_spill] sm:$0xff] }
 0x267   :  { %5506 = vst [vmem:[#allocation78_spill] sm:$0xff] %v4098_v28  ;;  %v786_v33 = vsel %vm780_vm2, %v5513_v45, 0.0  ;;  %v4122_v51 = vadd.f32 %v567_v4, %v5514_v10  ;;  %v562_v47 = vsel %vm523_vm1, %v5516_v6, 0.0  ;;  %v5517_v21 = vld [vmem:[#allocation148_spill] sm:$0xff]  ;;  %v5518_v28 = vld [vmem:[#allocation9_spill] sm:$0xff]  ;;  %v5519_v43 = vld [vmem:[#allocation10_spill] sm:$0xff]  ;;  %v4135_v45 = vadd.f32 %v557_v50, %v5520_v15  ;;  %v920_v50 = vpop.permute.xlu2 %919 }
 0x268   :  { %v582_v54 = vsel %vm523_vm1, %v5517_v21, 0.0  ;;  %v1232_v41 = vadd.f32 2.0, %v1168_v0  ;;  %985 = vrot.lane.b32.xlu2 %v5518_v28, %s2265_s24  ;;  %983 = vrot.lane.b32.xlu1 %v5519_v43, %s2265_s24  ;;  %v5521_v10 = vld [vmem:[#allocation33_spill] sm:$0xff]  ;;  %v4141_v20 = vadd.f32 %v560_v53, %v5522_v34  ;;  %v5523_v6 = vld [vmem:[#allocation39_spill] sm:$0xff]  ;;  %v5525_v21 = vld [vmem:[#allocation62_spill] sm:$0xff]  ;;  %v850_v15 = vadd.f32 %v786_v33, %v3883_v32 }
 0x269   :  { %5515 = vst [vmem:[#allocation79_spill] sm:$0xff] %v4122_v51  ;;  %v4138_v4 = vadd.f32 %v556_v56, %v5521_v10  ;;  %v4144_v2 = vadd.f32 %v559_v29, %v5523_v6  ;;  %v5524_v0 = vld [vmem:[#allocation11_spill] sm:$0xff]  ;;  %v4149_v28 = vadd.f32 %v563_v63, %v5525_v21  ;;  %v771_v56 = vpop.permute.xlu1 %770  ;;  %v5527_v10 = vld [vmem:[#allocation44_spill] sm:$0xff]  ;;  %v646_v34 = vadd.f32 %v582_v54, %v3794_v27  ;;  %v769_v63 = vpop.permute.xlu0 %768 }
 0x26a   :  { %981 = vrot.lane.b32.xlu0 %v5524_v0, %s2265_s24  ;;  %v5526_v51 = vld [vmem:[#allocation67_spill] sm:$0xff]  ;;  %1814 = vlog2.f32 %v1232_v41  ;;  %v4154_v7 = vadd.f32 %v562_v47, %v5527_v10  ;;  %v1043_v53 = vsel %vm1037_vm3, %v920_v50, 0.0  ;;  %v840_v29 = vsel %vm780_vm2, %v771_v56, 0.0  ;;  %v5528_v6 = vld [vmem:[#allocation144_spill] sm:$0xff]  ;;  %v5530_v47 = vld [vmem:[#allocation145_spill] sm:$0xff] }
 0x26b   :  { %v647_v43 = vadd.f32 %v583_v12, %v5526_v51  ;;  %v566_v51 = vsel %vm523_vm1, %v5528_v6, 0.0  ;;  %v1107_v32 = vadd.f32 %v1043_v53, %v850_v15  ;;  %v839_v33 = vsel %vm780_vm2, %v769_v63, 0.0  ;;  %v5531_v54 = vld [vmem:[#allocation147_spill] sm:$0xff]  ;;  %v5532_v0 = vld [vmem:[#allocation150_spill] sm:$0xff]  ;;  %v5534_v15 = vld [vmem:[#allocation152_spill] sm:$0xff] }
 0x26c   :  { %v565_v27 = vsel %vm523_vm1, %v5530_v47, 0.0  ;;  %v568_v41 = vsel %vm523_vm1, %v5531_v54, 0.0  ;;  %v585_v21 = vsel %vm523_vm1, %v5532_v0, 0.0  ;;  %v4177_v50 = vadd.f32 %v839_v33, %v646_v34  ;;  %v5535_v56 = vld [vmem:[#allocation155_spill] sm:$0xff]  ;;  %v5536_v53 = vld [vmem:[#allocation158_spill] sm:$0xff]  ;;  %v5537_v6 = vld [vmem:[#allocation65_spill] sm:$0xff] }
 0x26d   :  { %v4164_v12 = vadd.f32 %v840_v29, %v647_v43  ;;  %v781_v43 = vsel %vm780_vm2, %v5534_v15, 0.0  ;;  %v784_v10 = vsel %vm780_vm2, %v5535_v56, 0.0  ;;  %v787_v29 = vsel %vm780_vm2, %v5536_v53, 0.0  ;;  %v5539_v54 = vld [vmem:[#allocation161_spill] sm:$0xff]  ;;  %v5540_v33 = vld [vmem:[#allocation163_spill] sm:$0xff] }
 0x26e   :  { %5533 = vst [vmem:[#allocation95_spill] sm:$0xff] %v4177_v50  ;;  %v1171_v63 = vmul.f32 2e-05, %v1107_v32  ;;  %v4189_v47 = vadd.f32 %v566_v51, %v5537_v6  ;;  %v790_v34 = vsel %vm780_vm2, %v5539_v54, 0.0  ;;  %v586_v0 = vsel %vm523_vm1, %v5540_v33, 0.0  ;;  %v5541_v15 = vld [vmem:[#allocation171_spill] sm:$0xff] }
 0x26f   :  { %5529 = vst [vmem:[#allocation80_spill] sm:$0xff] %v4164_v12  ;;  %v789_v56 = vsel %vm780_vm2, %v5541_v15, 0.0  ;;  %v5542_v12 = vld [vmem:[#allocation46_spill] sm:$0xff]  ;;  %v5543_v32 = vld [vmem:[#allocation52_spill] sm:$0xff]  ;;  %v649_v51 = vadd.f32 %v585_v21, %v3800_v26  ;;  %v5544_v54 = vld [vmem:[#allocation13_spill] sm:$0xff]  ;;  %v4212_v33 = vadd.f32 %v781_v43, %v3812_v31  ;;  %v4215_v15 = vadd.f32 %v784_v10, %v3864_v8  ;;  %v926_v31 = vpop.permute.xlu2 %925 }
 0x270   :  { %5538 = vst [vmem:[#allocation81_spill] sm:$0xff] %v4189_v47  ;;  %v1815_v50 = vpop.eup %1814  ;;  %v4201_v24 = vadd.f32 %v565_v27, %v5542_v12  ;;  %v4204_v53 = vadd.f32 %v568_v41, %v5543_v32  ;;  %v1235_v6 = vadd.f32 2.0, %v1171_v63  ;;  %991 = vrot.lane.b32.xlu2 %v5544_v54, %s2265_s24  ;;  %v5545_v47 = vld [vmem:[#allocation14_spill] sm:$0xff]  ;;  %v4218_v12 = vadd.f32 %v787_v29, %v3880_v16  ;;  %v5546_v41 = vld [vmem:[#allocation15_spill] sm:$0xff]  ;;  %v5547_v21 = vld [vmem:[#allocation68_spill] sm:$0xff] }
 0x271   :  { %989 = vrot.lane.b32.xlu1 %v5545_v47, %s2265_s24  ;;  %v1299_v27 = vmul.f32 0.6931472, %v1815_v50  ;;  %v4223_v26 = vadd.f32 %v790_v34, %v3891_v57  ;;  %v650_v63 = vadd.f32 %v586_v0, %v5547_v21  ;;  %v853_v47 = vadd.f32 %v789_v56, %v3915_v39  ;;  %v777_v43 = vpop.permute.xlu1 %776  ;;  %v5548_v32 = vld [vmem:[#allocation164_spill] sm:$0xff]  ;;  %v775_v57 = vpop.permute.xlu0 %774  ;;  %v5549_v29 = vld [vmem:[#allocation166_spill] sm:$0xff] }
 0x272   :  { %987 = vrot.lane.b32.xlu0 %v5546_v41, %s2265_s24  ;;  %1816 = vlog2.f32 %v1235_v6  ;;  %v793_v8 = vsel %vm780_vm2, %v5548_v32, 0.0  ;;  %v1046_v50 = vsel %vm1037_vm3, %v926_v31, 0.0  ;;  %v843_v10 = vsel %vm780_vm2, %v777_v43, 0.0  ;;  %v5550_v6 = vld [vmem:[#allocation167_spill] sm:$0xff]  ;;  %v5553_v43 = vld [vmem:[#allocation170_spill] sm:$0xff] }
 0x273   :  { %v1424_v16 = vmul.f32 0.75, %v1299_v27  ;;  %v782_v34 = vsel %vm780_vm2, %v5549_v29, 0.0  ;;  %v1110_v39 = vadd.f32 %v1046_v50, %v853_v47  ;;  %v4237_v0 = vadd.f32 %v843_v10, %v650_v63  ;;  %v5551_v27 = vld [vmem:[#allocation169_spill] sm:$0xff]  ;;  %v5554_v63 = vld [vmem:[#allocation172_spill] sm:$0xff] }
 0x274   :  { %v842_v56 = vsel %vm780_vm2, %v775_v57, 0.0  ;;  %v796_v54 = vsel %vm780_vm2, %v5550_v6, 0.0  ;;  %v785_v41 = vsel %vm780_vm2, %v5551_v27, 0.0  ;;  %v799_v47 = vsel %vm780_vm2, %v5553_v43, 0.0  ;;  %v5555_v50 = vld [vmem:[#allocation173_spill] sm:$0xff]  ;;  %v5556_v6 = vld [vmem:[#allocation174_spill] sm:$0xff] }
 0x275   :  { %v1490_v21 = vmul.f32 1.442695, %v1424_v16  ;;  %v4247_v31 = vadd.f32 %v842_v56, %v649_v51  ;;  %v788_v32 = vsel %vm780_vm2, %v5554_v63, 0.0  ;;  %v802_v10 = vsel %vm780_vm2, %v5555_v50, 0.0  ;;  %v5557_v16 = vld [vmem:[#allocation175_spill] sm:$0xff]  ;;  %v5558_v43 = vld [vmem:[#allocation69_spill] sm:$0xff] }
 0x276   :  { %v1174_v57 = vmul.f32 2e-05, %v1110_v39  ;;  %v4259_v29 = vadd.f32 %v793_v8, %v3941_v38  ;;  %v792_v51 = vsel %vm780_vm2, %v5556_v6, 0.0  ;;  %v791_v56 = vsel %vm780_vm2, %v5557_v16, 0.0  ;;  %v5559_v8 = vld [vmem:[#allocation17_spill] sm:$0xff]  ;;  %v5560_v50 = vld [vmem:[#allocation18_spill] sm:$0xff] }
 0x277   :  { %5552 = vst [vmem:[#allocation82_spill] sm:$0xff] %v4247_v31  ;;  %1818 = vpow2.f32 %v1490_v21  ;;  %v846_v63 = vadd.f32 %v782_v34, %v5558_v43  ;;  %v4269_v31 = vadd.f32 %v796_v54, %v3966_v59  ;;  %v4272_v39 = vadd.f32 %v785_v41, %v3797_v48  ;;  %v5561_v48 = vld [vmem:[#allocation19_spill] sm:$0xff] }
 0x278   :  { %v1817_v27 = vpop.eup %1816  ;;  %v1238_v38 = vadd.f32 2.0, %v1174_v57  ;;  %997 = vrot.lane.b32.xlu2 %v5559_v8, %s2265_s24  ;;  %v4279_v6 = vadd.f32 %v799_v47, %v3975_v18  ;;  %v4282_v21 = vadd.f32 %v788_v32, %v3803_v13  ;;  %v4285_v34 = vadd.f32 %v802_v10, %v4007_v17  ;;  %v5562_v57 = vld [vmem:[#allocation176_spill] sm:$0xff]  ;;  %v932_v47 = vpop.permute.xlu2 %931  ;;  %v5563_v32 = vld [vmem:[#allocation177_spill] sm:$0xff] }
 0x279   :  { %995 = vrot.lane.b32.xlu1 %v5560_v50, %s2265_s24  ;;  %v1305_v59 = vmul.f32 0.6931472, %v1817_v27  ;;  %v856_v54 = vadd.f32 %v792_v51, %v3950_v23  ;;  %v4291_v41 = vadd.f32 %v791_v56, %v3809_v49  ;;  %v805_v18 = vsel %vm780_vm2, %v5562_v57, 0.0  ;;  %v912_v13 = vpop.permute.xlu1 %911  ;;  %v910_v49 = vpop.permute.xlu0 %909  ;;  %v5564_v51 = vld [vmem:[#allocation178_spill] sm:$0xff]  ;;  %v5565_v50 = vld [vmem:[#allocation179_spill] sm:$0xff] }
 0x27a   :  { %993 = vrot.lane.b32.xlu0 %v5561_v48, %s2265_s24  ;;  %1820 = vlog2.f32 %v1238_v38  ;;  %v795_v17 = vsel %vm780_vm2, %v5563_v32, 0.0  ;;  %v1049_v16 = vsel %vm1037_vm3, %v932_v47, 0.0  ;;  %v1039_v23 = vsel %vm1037_vm3, %v912_v13, 0.0  ;;  %v5566_v48 = vld [vmem:[#allocation180_spill] sm:$0xff]  ;;  %v5567_v32 = vld [vmem:[#allocation181_spill] sm:$0xff] }
 0x27b   :  { %v1427_v10 = vmul.f32 0.75, %v1305_v59  ;;  %v794_v56 = vsel %vm780_vm2, %v5564_v51, 0.0  ;;  %v1113_v27 = vadd.f32 %v1049_v16, %v856_v54  ;;  %v1103_v43 = vadd.f32 %v1039_v23, %v846_v63 }
 0x27c   :  { %v1038_v38 = vsel %vm1037_vm3, %v910_v49, 0.0  ;;  %v808_v59 = vsel %vm780_vm2, %v5565_v50, 0.0  ;;  %v798_v57 = vsel %vm780_vm2, %v5566_v48, 0.0  ;;  %v797_v54 = vsel %vm780_vm2, %v5567_v32, 0.0 }
 0x27d   :  { %v1819_v8 = vpop.eup %1818  ;;  %v1496_v47 = vmul.f32 1.442695, %v1427_v10  ;;  %v1102_v13 = vadd.f32 %v1038_v38, %v4212_v33  ;;  %v1177_v63 = vmul.f32 2e-05, %v1113_v27  ;;  %v1167_v16 = vmul.f32 2e-05, %v1103_v43 }
 0x27e   :  { %1822 = vrcp.f32 %v1819_v8  ;;  %v4319_v23 = vadd.f32 %v805_v18, %v4053_v19  ;;  %v859_v49 = vadd.f32 %v795_v17, %v3969_v61  ;;  %v4323_v48 = vadd.f32 %v794_v56, %v3861_v14  ;;  %v5568_v8 = vld [vmem:[#allocation23_spill] sm:$0xff]  ;;  %v5569_v27 = vld [vmem:[#allocation24_spill] sm:$0xff]  ;;  %v5570_v17 = vld [vmem:[#allocation25_spill] sm:$0xff] }
 0x27f   :  { %1824 = vpow2.f32 %v1496_v47  ;;  %v1166_v51 = vmul.f32 2e-05, %v1102_v13  ;;  %v4326_v33 = vadd.f32 %v808_v59, %v4062_v55  ;;  %v1241_v10 = vadd.f32 2.0, %v1177_v63  ;;  %v5571_v55 = vld [vmem:[#allocation182_spill] sm:$0xff]  ;;  %v5572_v43 = vld [vmem:[#allocation183_spill] sm:$0xff]  ;;  %v5573_v47 = vld [vmem:[#allocation184_spill] sm:$0xff] }
 0x280   :  { %v1821_v50 = vpop.eup %1820  ;;  %v1231_v38 = vadd.f32 2.0, %v1167_v16  ;;  %1003 = vrot.lane.b32.xlu2 %v5568_v8, %s2265_s24  ;;  %v4333_v19 = vadd.f32 %v798_v57, %v3987_v25  ;;  %v4336_v61 = vadd.f32 %v797_v54, %v3877_v11  ;;  %v811_v56 = vsel %vm780_vm2, %v5571_v55, 0.0  ;;  %v938_v11 = vpop.permute.xlu2 %937 }
 0x281   :  { %1001 = vrot.lane.b32.xlu1 %v5569_v27, %s2265_s24  ;;  %v1311_v18 = vmul.f32 0.6931472, %v1821_v50  ;;  %v1230_v14 = vadd.f32 2.0, %v1166_v51  ;;  %v801_v59 = vsel %vm780_vm2, %v5572_v43, 0.0  ;;  %v800_v25 = vsel %vm780_vm2, %v5573_v47, 0.0  ;;  %v918_v57 = vpop.permute.xlu1 %917  ;;  %v916_v63 = vpop.permute.xlu0 %915  ;;  %v5574_v27 = vld [vmem:[#allocation2_spill] sm:$0xff] }
 0x282   :  { %999 = vrot.lane.b32.xlu0 %v5570_v17, %s2265_s24  ;;  %1826 = vlog2.f32 %v1241_v10  ;;  %v1052_v32 = vsel %vm1037_vm3, %v938_v11, 0.0  ;;  %v1042_v54 = vsel %vm1037_vm3, %v918_v57, 0.0  ;;  %v1041_v8 = vsel %vm1037_vm3, %v916_v63, 0.0 }
 0x283   :  { %v1430_v13 = vmul.f32 0.75, %v1311_v18  ;;  %1828 = vlog2.f32 %v1231_v38  ;;  %v1116_v51 = vadd.f32 %v1052_v32, %v859_v49  ;;  %v1106_v50 = vadd.f32 %v1042_v54, %v4272_v39  ;;  %v2198_v18 = vld [vmem:[%s5049_s0 + $0x10] sm:$0xff] }
 0x284   :  { %v1823_v16 = vpop.eup %1822  ;;  %1830 = vlog2.f32 %v1230_v14  ;;  %v814_v38 = vsel %vm780_vm2, %v5574_v27, 0.0  ;;  %v1105_v43 = vadd.f32 %v1041_v8, %v4215_v15  ;;  %v5575_v14 = vld [vmem:[#allocation185_spill] sm:$0xff]  ;;  %v4367_v11 = vadd.f32 %v811_v56, %v4090_v22 }
 0x285   :  { %v1825_v10 = vpop.eup %1824  ;;  %v1680_v17 = vmul.f32 %v2198_v18, %v1823_v16  ;;  %v1502_v55 = vmul.f32 1.442695, %v1430_v13  ;;  %v804_v39 = vsel %vm780_vm2, %v5575_v14, 0.0  ;;  %v1180_v49 = vmul.f32 2e-05, %v1116_v51  ;;  %v5576_v22 = vld [vmem:[#allocation29_spill] sm:$0xff] }
 0x286   :  { %1832 = vrcp.f32 %v1825_v10  ;;  %v1170_v47 = vmul.f32 2e-05, %v1106_v50  ;;  %v4370_v57 = vadd.f32 %v801_v59, %v4027_v30  ;;  %v1169_v13 = vmul.f32 2e-05, %v1105_v43  ;;  %v5577_v30 = vld [vmem:[#allocation30_spill] sm:$0xff]  ;;  %v5580_v10 = vld [vmem:[#allocation187_spill] sm:$0xff] }
 0x287   :  { %1744 = vst [vmem:[%s5050_s1 + $0x10] sm:$0xff] %v1680_v17  ;;  %1834 = vpow2.f32 %v1502_v55  ;;  %v4376_v32 = vadd.f32 %v800_v25, %v3886_v9  ;;  %v4379_v54 = vadd.f32 %v814_v38, %v4135_v45  ;;  %v1244_v63 = vadd.f32 2.0, %v1180_v49  ;;  %v5578_v51 = vld [vmem:[#allocation186_spill] sm:$0xff]  ;;  %v5579_v45 = vld [vmem:[#allocation31_spill] sm:$0xff]  ;;  %v5581_v38 = vld [vmem:[#allocation188_spill] sm:$0xff] }
 0x288   :  { %v1827_v15 = vpop.eup %1826  ;;  %v1234_v16 = vadd.f32 2.0, %v1170_v47  ;;  %1009 = vrot.lane.b32.xlu2 %v5576_v22, %s2265_s24  ;;  %v4386_v59 = vadd.f32 %v804_v39, %v4056_v3  ;;  %v803_v9 = vsel %vm780_vm2, %v5578_v51, 0.0  ;;  %v1233_v50 = vadd.f32 2.0, %v1169_v13  ;;  %v944_v17 = vpop.permute.xlu2 %943 }
 0x289   :  { %1007 = vrot.lane.b32.xlu1 %v5577_v30, %s2265_s24  ;;  %v1829_v56 = vpop.eup %1828  ;;  %v1317_v25 = vmul.f32 0.6931472, %v1827_v15  ;;  %v817_v27 = vsel %vm780_vm2, %v5580_v10, 0.0  ;;  %v807_v18 = vsel %vm780_vm2, %v5581_v38, 0.0  ;;  %1836 = vlog2.f32 %v1244_v63  ;;  %v924_v55 = vpop.permute.xlu1 %923  ;;  %v2199_v63 = vld [vmem:[%s5049_s0 + $0x28] sm:$0xff] }
 0x28a   :  { %1005 = vrot.lane.b32.xlu0 %v5579_v45, %s2265_s24  ;;  %v1831_v8 = vpop.eup %1830  ;;  %v1297_v3 = vmul.f32 0.6931472, %v1829_v56  ;;  %1838 = vlog2.f32 %v1234_v16  ;;  %v1055_v39 = vsel %vm1037_vm3, %v944_v17, 0.0  ;;  %v922_v49 = vpop.permute.xlu0 %921  ;;  %v1045_v22 = vsel %vm1037_vm3, %v924_v55, 0.0 }
 0x28b   :  { %v1433_v43 = vmul.f32 0.75, %v1317_v25  ;;  %v1295_v14 = vmul.f32 0.6931472, %v1831_v8  ;;  %1840 = vlog2.f32 %v1233_v50  ;;  %v1119_v15 = vadd.f32 %v1055_v39, %v4333_v19 }
 0x28c   :  { %v1833_v47 = vpop.eup %1832  ;;  %v1423_v13 = vmul.f32 0.75, %v1297_v3  ;;  %v1109_v25 = vadd.f32 %v1045_v22, %v4282_v21  ;;  %v1044_v50 = vsel %vm1037_vm3, %v922_v49, 0.0  ;;  %v4415_v17 = vadd.f32 %v803_v9, %v3938_v36  ;;  %v5585_v9 = vld [vmem:[#allocation189_spill] sm:$0xff] }
 0x28d   :  { %v1835_v30 = vpop.eup %1834  ;;  %v1683_v56 = vmul.f32 %v2199_v63, %v1833_v47  ;;  %v1508_v51 = vmul.f32 1.442695, %v1433_v43  ;;  %v1422_v16 = vmul.f32 0.75, %v1295_v14  ;;  %v1183_v8 = vmul.f32 2e-05, %v1119_v15  ;;  %v5582_v43 = vld [vmem:[#allocation35_spill] sm:$0xff] }
 0x28e   :  { %1842 = vrcp.f32 %v1835_v30  ;;  %v1488_v45 = vmul.f32 1.442695, %v1423_v13  ;;  %v1173_v10 = vmul.f32 2e-05, %v1109_v25  ;;  %v1108_v38 = vadd.f32 %v1044_v50, %v4218_v12  ;;  %v5583_v14 = vld [vmem:[#allocation36_spill] sm:$0xff]  ;;  %v5584_v13 = vld [vmem:[#allocation37_spill] sm:$0xff] }
 0x28f   :  { %1747 = vst [vmem:[%s5050_s1 + $0x28] sm:$0xff] %v1683_v56  ;;  %1844 = vpow2.f32 %v1508_v51  ;;  %v1486_v19 = vmul.f32 1.442695, %v1422_v16  ;;  %v1837_v3 = vpop.eup %1836  ;;  %v4418_v21 = vadd.f32 %v817_v27, %v4141_v20  ;;  %v1247_v55 = vadd.f32 2.0, %v1183_v8 }
 0x290   :  { %1846 = vpow2.f32 %v1488_v45  ;;  %1015 = vrot.lane.b32.xlu2 %v5582_v43, %s2265_s24  ;;  %v1839_v39 = vpop.eup %1838  ;;  %v1323_v49 = vmul.f32 0.6931472, %v1837_v3  ;;  %v1237_v47 = vadd.f32 2.0, %v1173_v10  ;;  %v1172_v12 = vmul.f32 2e-05, %v1108_v38  ;;  %v950_v22 = vpop.permute.xlu2 %949 }
 0x291   :  { %1013 = vrot.lane.b32.xlu1 %v5583_v14, %s2265_s24  ;;  %1848 = vpow2.f32 %v1486_v19  ;;  %v1841_v36 = vpop.eup %1840  ;;  %v4427_v20 = vadd.f32 %v807_v18, %v4067_v58  ;;  %v4432_v27 = vsel %vm780_vm2, %v5585_v9, 0.0  ;;  %v1303_v15 = vmul.f32 0.6931472, %v1839_v39  ;;  %v930_v30 = vpop.permute.xlu1 %929  ;;  %v2200_v19 = vld [vmem:[%s5049_s0 + $0x40] sm:$0xff] }
 0x292   :  { %1011 = vrot.lane.b32.xlu0 %v5584_v13, %s2265_s24  ;;  %1850 = vlog2.f32 %v1247_v55  ;;  %v1436_v63 = vmul.f32 0.75, %v1323_v49  ;;  %v1301_v56 = vmul.f32 0.6931472, %v1841_v36  ;;  %v1236_v51 = vadd.f32 2.0, %v1172_v12  ;;  %v928_v16 = vpop.permute.xlu0 %927 }
 0x293   :  { %1852 = vlog2.f32 %v1237_v47  ;;  %v1426_v45 = vmul.f32 0.75, %v1303_v15  ;;  %v1058_v58 = vsel %vm1037_vm3, %v950_v22, 0.0  ;;  %v1048_v18 = vsel %vm1037_vm3, %v930_v30, 0.0  ;;  %v5586_v47 = vld [vmem:[#allocation191_spill] sm:$0xff]  ;;  %v5587_v15 = vld [vmem:[#allocation192_spill] sm:$0xff]  ;;  %v5588_v30 = vld [vmem:[#allocation41_spill] sm:$0xff] }
 0x294   :  { %v1843_v25 = vpop.eup %1842  ;;  %v1047_v8 = vsel %vm1037_vm3, %v928_v16, 0.0  ;;  %v1514_v38 = vmul.f32 1.442695, %v1436_v63  ;;  %v1425_v3 = vmul.f32 0.75, %v1301_v56  ;;  %1854 = vlog2.f32 %v1236_v51  ;;  %v5589_v63 = vld [vmem:[#allocation42_spill] sm:$0xff]  ;;  %v5590_v51 = vld [vmem:[#allocation12_spill] sm:$0xff] }
 0x295   :  { %v1845_v50 = vpop.eup %1844  ;;  %v1686_v10 = vmul.f32 %v2200_v19, %v1843_v25  ;;  %v1494_v43 = vmul.f32 1.442695, %v1426_v45  ;;  %v1122_v14 = vadd.f32 %v1058_v58, %v4370_v57  ;;  %v1112_v39 = vadd.f32 %v1048_v18, %v4291_v41  ;;  %v5591_v45 = vld [vmem:[#allocation43_spill] sm:$0xff] }
 0x296   :  { %v1847_v55 = vpop.eup %1846  ;;  %1856 = vrcp.f32 %v1845_v50  ;;  %v4448_v12 = vsel %vm780_vm2, %v5586_v47, 0.0  ;;  %v1492_v13 = vmul.f32 1.442695, %v1425_v3  ;;  %v1111_v36 = vadd.f32 %v1047_v8, %v4223_v26 }
 0x297   :  { %v1849_v49 = vpop.eup %1848  ;;  %1750 = vst [vmem:[%s5050_s1 + $0x40] sm:$0xff] %v1686_v10  ;;  %1858 = vrcp.f32 %v1847_v55  ;;  %v4457_v57 = vsel %vm780_vm2, %v5587_v15, 0.0  ;;  %v1186_v41 = vmul.f32 2e-05, %v1122_v14  ;;  %v1176_v22 = vmul.f32 2e-05, %v1112_v39 }
 0x298   :  { %v1851_v9 = vpop.eup %1850  ;;  %1860 = vrcp.f32 %v1849_v49  ;;  %1021 = vrot.lane.b32.xlu2 %v5588_v30, %s2265_s24  ;;  %v813_v26 = vsel %vm780_vm2, %v5590_v51, 0.0  ;;  %v1175_v25 = vmul.f32 2e-05, %v1111_v36  ;;  %v956_v50 = vpop.permute.xlu2 %955  ;;  %v2202_v30 = vld [vmem:[%s5049_s0 + $0x8] sm:$0xff] }
 0x299   :  { %1019 = vrot.lane.b32.xlu1 %v5589_v63, %s2265_s24  ;;  %v1853_v56 = vpop.eup %1852  ;;  %1862 = vpow2.f32 %v1514_v38  ;;  %v1329_v16 = vmul.f32 0.6931472, %v1851_v9  ;;  %v1250_v18 = vadd.f32 2.0, %v1186_v41  ;;  %v1240_v8 = vadd.f32 2.0, %v1176_v22  ;;  %v936_v19 = vpop.permute.xlu1 %935  ;;  %v2201_v9 = vld [vmem:[%s5049_s0 + $0x58] sm:$0xff] }
 0x29a   :  { %1017 = vrot.lane.b32.xlu0 %v5591_v45, %s2265_s24  ;;  %1864 = vpow2.f32 %v1494_v43  ;;  %v1309_v58 = vmul.f32 0.6931472, %v1853_v56  ;;  %v1855_v10 = vpop.eup %1854  ;;  %v1239_v55 = vadd.f32 2.0, %v1175_v25  ;;  %v1061_v14 = vsel %vm1037_vm3, %v956_v50, 0.0  ;;  %v934_v39 = vpop.permute.xlu0 %933 }
 0x29b   :  { %1866 = vpow2.f32 %v1492_v13  ;;  %v1439_v3 = vmul.f32 0.75, %v1329_v16  ;;  %v1307_v47 = vmul.f32 0.6931472, %v1855_v10  ;;  %v1125_v36 = vadd.f32 %v1061_v14, %v4386_v59  ;;  %v2203_v16 = vld [vmem:[%s5049_s0] sm:$0xff]  ;;  %v5592_v10 = vld [vmem:[#allocation47_spill] sm:$0xff]  ;;  %v5594_v14 = vld [vmem:[#allocation49_spill] sm:$0xff] }
 0x29c   :  { %v1857_v38 = vpop.eup %1856  ;;  %v1429_v49 = vmul.f32 0.75, %v1309_v58  ;;  %1868 = vlog2.f32 %v1250_v18  ;;  %v1051_v13 = vsel %vm1037_vm3, %v936_v19, 0.0  ;;  %v1050_v19 = vsel %vm1037_vm3, %v934_v39, 0.0 }
 0x29d   :  { %v1859_v43 = vpop.eup %1858  ;;  %v1689_v15 = vmul.f32 %v2201_v9, %v1857_v38  ;;  %v1520_v41 = vmul.f32 1.442695, %v1439_v3  ;;  %1870 = vlog2.f32 %v1240_v8  ;;  %v1428_v51 = vmul.f32 0.75, %v1307_v47  ;;  %v5593_v3 = vld [vmem:[#allocation48_spill] sm:$0xff] }
 0x29e   :  { %v1861_v22 = vpop.eup %1860  ;;  %v1679_v63 = vmul.f32 %v2202_v30, %v1859_v43  ;;  %v1500_v56 = vmul.f32 1.442695, %v1429_v49  ;;  %1872 = vlog2.f32 %v1239_v55  ;;  %v1189_v45 = vmul.f32 2e-05, %v1125_v36 }
 0x29f   :  { %v1863_v59 = vpop.eup %1862  ;;  %1753 = vst [vmem:[%s5050_s1 + $0x58] sm:$0xff] %v1689_v15  ;;  %v1678_v25 = vmul.f32 %v2203_v16, %v1861_v22  ;;  %1874 = vpow2.f32 %v1520_v41  ;;  %v1115_v58 = vadd.f32 %v1051_v13, %v4323_v48  ;;  %v4488_v8 = vadd.f32 %v4432_v27, %v3953_v52 }
 0x2a0   :  { %v1865_v18 = vpop.eup %1864  ;;  %1743 = vst [vmem:[%s5050_s1 + $0x8] sm:$0xff] %v1679_v63  ;;  %1876 = vrcp.f32 %v1863_v59  ;;  %v1498_v50 = vmul.f32 1.442695, %v1428_v51  ;;  %1027 = vrot.lane.b32.xlu2 %v5592_v10, %s2265_s24  ;;  %v1253_v52 = vadd.f32 2.0, %v1189_v45  ;;  %v1114_v55 = vadd.f32 %v1050_v19, %v4259_v29  ;;  %v962_v36 = vpop.permute.xlu2 %961  ;;  %v2205_v19 = vld [vmem:[%s5049_s0 + $0x20] sm:$0xff] }
 0x2a1   :  { %1025 = vrot.lane.b32.xlu1 %v5593_v3, %s2265_s24  ;;  %v1867_v48 = vpop.eup %1866  ;;  %1742 = vst [vmem:[%s5050_s1] sm:$0xff] %v1678_v25  ;;  %1878 = vrcp.f32 %v1865_v18  ;;  %v1179_v27 = vmul.f32 2e-05, %v1115_v58  ;;  %v4507_v38 = vadd.f32 %v4448_v12, %v4110_v46  ;;  %v4511_v49 = vadd.f32 %v4457_v57, %v3972_v62  ;;  %v942_v43 = vpop.permute.xlu1 %941  ;;  %v2204_v25 = vld [vmem:[%s5049_s0 + $0x70] sm:$0xff] }
 0x2a2   :  { %1023 = vrot.lane.b32.xlu0 %v5594_v14, %s2265_s24  ;;  %v1869_v39 = vpop.eup %1868  ;;  %v4514_v47 = vadd.f32 %v813_v26, %v4138_v4  ;;  %1880 = vrcp.f32 %v1867_v48  ;;  %v1178_v41 = vmul.f32 2e-05, %v1114_v55  ;;  %v940_v13 = vpop.permute.xlu0 %939  ;;  %v1064_v12 = vsel %vm1037_vm3, %v962_v36, 0.0  ;;  %v5596_v36 = vld [vmem:[#allocation20_spill] sm:$0xff] }
 0x2a3   :  { %v1871_v9 = vpop.eup %1870  ;;  %1882 = vpow2.f32 %v1500_v56  ;;  %v1335_v29 = vmul.f32 0.6931472, %v1869_v39  ;;  %v1243_v15 = vadd.f32 2.0, %v1179_v27  ;;  %v1054_v62 = vsel %vm1037_vm3, %v942_v43, 0.0 }
 0x2a4   :  { %v1873_v22 = vpop.eup %1872  ;;  %1884 = vpow2.f32 %v1498_v50  ;;  %v1315_v46 = vmul.f32 0.6931472, %v1871_v9  ;;  %v1242_v30 = vadd.f32 2.0, %v1178_v41  ;;  %v1128_v51 = vadd.f32 %v1064_v12, %v4427_v20 }
 0x2a5   :  { %v1875_v4 = vpop.eup %1874  ;;  %v1442_v57 = vmul.f32 0.75, %v1335_v29  ;;  %v1313_v26 = vmul.f32 0.6931472, %v1873_v22  ;;  %1886 = vlog2.f32 %v1253_v52  ;;  %v1118_v59 = vadd.f32 %v1054_v62, %v4336_v61  ;;  %v5595_v61 = vld [vmem:[#allocation53_spill] sm:$0xff] }
 0x2a6   :  { %v1877_v63 = vpop.eup %1876  ;;  %1888 = vrcp.f32 %v1875_v4  ;;  %v1432_v56 = vmul.f32 0.75, %v1315_v46  ;;  %v1192_v20 = vmul.f32 2e-05, %v1128_v51  ;;  %v2206_v52 = vld [vmem:[%s5049_s0 + $0x18] sm:$0xff]  ;;  %v1053_v9 = vsel %vm1037_vm3, %v940_v13, 0.0 }
 0x2a7   :  { %v1879_v16 = vpop.eup %1878  ;;  %v1692_v45 = vmul.f32 %v2204_v25, %v1877_v63  ;;  %v1526_v58 = vmul.f32 1.442695, %v1442_v57  ;;  %v1431_v18 = vmul.f32 0.75, %v1313_v26  ;;  %1890 = vlog2.f32 %v1243_v15 }
 0x2a8   :  { %v1881_v50 = vpop.eup %1880  ;;  %v1682_v10 = vmul.f32 %v2205_v19, %v1879_v16  ;;  %v1506_v3 = vmul.f32 1.442695, %v1432_v56  ;;  %1892 = vlog2.f32 %v1242_v30  ;;  %1033 = vrot.lane.b32.xlu2 %v5595_v61, %s2265_s24  ;;  %v1182_v14 = vmul.f32 2e-05, %v1118_v59  ;;  %v968_v29 = vpop.permute.xlu2 %967  ;;  %v2207_v30 = vld [vmem:[%s5049_s0 + $0x88] sm:$0xff] }
 0x2a9   :  { %1031 = vrot.lane.b32.xlu1 %v5441_v60, %s2265_s24  ;;  %v1883_v48 = vpop.eup %1882  ;;  %1756 = vst [vmem:[%s5050_s1 + $0x70] sm:$0xff] %v1692_v45  ;;  %v1681_v27 = vmul.f32 %v2206_v52, %v1881_v50  ;;  %1894 = vpow2.f32 %v1526_v58  ;;  %v1504_v55 = vmul.f32 1.442695, %v1431_v18  ;;  %v4543_v60 = vsel %vm780_vm2, %v5596_v36, 0.0  ;;  %v948_v15 = vpop.permute.xlu1 %947 }
 0x2aa   :  { %1029 = vrot.lane.b32.xlu0 %v5442_v44, %s2265_s24  ;;  %v1885_v39 = vpop.eup %1884  ;;  %1746 = vst [vmem:[%s5050_s1 + $0x20] sm:$0xff] %v1682_v10  ;;  %1896 = vrcp.f32 %v1883_v48  ;;  %v1256_v43 = vadd.f32 2.0, %v1192_v20  ;;  %v1246_v44 = vadd.f32 2.0, %v1182_v14  ;;  %v1117_v22 = vadd.f32 %v1053_v9, %v4269_v31  ;;  %v946_v12 = vpop.permute.xlu0 %945  ;;  %v2208_v20 = vld [vmem:[%s5049_s0 + $0x38] sm:$0xff] }
 0x2ab   :  { %v1887_v41 = vpop.eup %1886  ;;  %1745 = vst [vmem:[%s5050_s1 + $0x18] sm:$0xff] %v1681_v27  ;;  %1898 = vrcp.f32 %v1885_v39  ;;  %v1067_v46 = vsel %vm1037_vm3, %v968_v29, 0.0  ;;  %v1057_v57 = vsel %vm1037_vm3, %v948_v15, 0.0  ;;  %v1056_v36 = vsel %vm1037_vm3, %v946_v12, 0.0 }
 0x2ac   :  { %v1889_v62 = vpop.eup %1888  ;;  %1900 = vpow2.f32 %v1506_v3  ;;  %v1341_v4 = vmul.f32 0.6931472, %v1887_v41  ;;  %v1131_v13 = vadd.f32 %v1067_v46, %v4507_v38  ;;  %v1181_v31 = vmul.f32 2e-05, %v1117_v22 }
 0x2ad   :  { %v1891_v26 = vpop.eup %1890  ;;  %v1695_v63 = vmul.f32 %v2207_v30, %v1889_v62  ;;  %1902 = vpow2.f32 %v1504_v55  ;;  %v1121_v56 = vadd.f32 %v1057_v57, %v4376_v32  ;;  %v2209_v55 = vld [vmem:[%s5049_s0 + $0x30] sm:$0xff]  ;;  %v1120_v15 = vadd.f32 %v1056_v36, %v4279_v6 }
 0x2ae   :  { %v1893_v51 = vpop.eup %1892  ;;  %v1445_v59 = vmul.f32 0.75, %v1341_v4  ;;  %v1321_v16 = vmul.f32 0.6931472, %v1891_v26  ;;  %1904 = vlog2.f32 %v1256_v43  ;;  %v1195_v25 = vmul.f32 2e-05, %v1131_v13 }
 0x2af   :  { %v1895_v45 = vpop.eup %1894  ;;  %1759 = vst [vmem:[%s5050_s1 + $0x88] sm:$0xff] %v1695_v63  ;;  %v1319_v38 = vmul.f32 0.6931472, %v1893_v51  ;;  %1906 = vlog2.f32 %v1246_v44  ;;  %v1245_v58 = vadd.f32 2.0, %v1181_v31  ;;  %v1185_v18 = vmul.f32 2e-05, %v1121_v56 }
 0x2b0   :  { %v1897_v50 = vpop.eup %1896  ;;  %1908 = vrcp.f32 %v1895_v45  ;;  %v1532_v19 = vmul.f32 1.442695, %v1445_v59  ;;  %v1435_v10 = vmul.f32 0.75, %v1321_v16  ;;  %v1259_v3 = vadd.f32 2.0, %v1195_v25  ;;  %v974_v43 = vpop.permute.xlu2 %973 }
 0x2b1   :  { %v1899_v32 = vpop.eup %1898  ;;  %v1685_v61 = vmul.f32 %v2208_v20, %v1897_v50  ;;  %v1434_v48 = vmul.f32 0.75, %v1319_v38  ;;  %1910 = vlog2.f32 %v1245_v58  ;;  %v1249_v52 = vadd.f32 2.0, %v1185_v18  ;;  %v954_v9 = vpop.permute.xlu1 %953  ;;  %v5597_v18 = vld [vmem:[#allocation32_spill] sm:$0xff] }
 0x2b2   :  { %1035 = vrot.lane.b32.xlu0 %v5453_v37, %s2265_s24  ;;  %v1901_v27 = vpop.eup %1900  ;;  %v1684_v14 = vmul.f32 %v2209_v55, %v1899_v32  ;;  %1912 = vpow2.f32 %v1532_v19  ;;  %v1512_v39 = vmul.f32 1.442695, %v1435_v10  ;;  %v1070_v41 = vsel %vm1037_vm3, %v974_v43, 0.0  ;;  %v952_v44 = vpop.permute.xlu0 %951 }
 0x2b3   :  { %v1903_v29 = vpop.eup %1902  ;;  %1749 = vst [vmem:[%s5050_s1 + $0x38] sm:$0xff] %v1685_v61  ;;  %1914 = vrcp.f32 %v1901_v27  ;;  %v1510_v37 = vmul.f32 1.442695, %v1434_v48  ;;  %v1134_v46 = vadd.f32 %v1070_v41, %v4514_v47  ;;  %v1060_v12 = vsel %vm1037_vm3, %v954_v9, 0.0  ;;  %v2210_v47 = vld [vmem:[%s5049_s0 + $0xa0] sm:$0xff] }
 0x2b4   :  { %v1905_v22 = vpop.eup %1904  ;;  %1748 = vst [vmem:[%s5050_s1 + $0x30] sm:$0xff] %v1684_v14  ;;  %1916 = vrcp.f32 %v1903_v29  ;;  %v1059_v62 = vsel %vm1037_vm3, %v952_v44, 0.0  ;;  %v1184_v13 = vmul.f32 2e-05, %v1120_v15  ;;  %v1124_v57 = vadd.f32 %v1060_v12, %v4415_v17  ;;  %v5598_v15 = vld [vmem:[#allocation16_spill] sm:$0xff] }
 0x2b5   :  { %v1907_v4 = vpop.eup %1906  ;;  %1918 = vpow2.f32 %v1512_v39  ;;  %v1347_v6 = vmul.f32 0.6931472, %v1905_v22  ;;  %v1198_v63 = vmul.f32 2e-05, %v1134_v46  ;;  %v1123_v31 = vadd.f32 %v1059_v62, %v4285_v34 }
 0x2b6   :  { %v1909_v26 = vpop.eup %1908  ;;  %1920 = vpow2.f32 %v1510_v37  ;;  %v1327_v30 = vmul.f32 0.6931472, %v1907_v4  ;;  %v1248_v16 = vadd.f32 2.0, %v1184_v13  ;;  %v880_v45 = vadd.f32 %v4543_v60, %v4144_v2  ;;  %v2211_v2 = vld [vmem:[%s5049_s0 + $0x50] sm:$0xff] }
 0x2b7   :  { %v1911_v56 = vpop.eup %1910  ;;  %v1698_v51 = vmul.f32 %v2210_v47, %v1909_v26  ;;  %v1448_v59 = vmul.f32 0.75, %v1347_v6  ;;  %1922 = vlog2.f32 %v1259_v3  ;;  %v819_v34 = vsel %vm780_vm2, %v5597_v18, 0.0 }
 0x2b8   :  { %v1913_v25 = vpop.eup %1912  ;;  %v1438_v17 = vmul.f32 0.75, %v1327_v30  ;;  %v1325_v38 = vmul.f32 0.6931472, %v1911_v56  ;;  %1924 = vlog2.f32 %v1249_v52  ;;  %v1188_v19 = vmul.f32 2e-05, %v1124_v57  ;;  %v980_v20 = vpop.permute.xlu2 %979  ;;  %v2212_v52 = vld [vmem:[%s5049_s0 + $0x48] sm:$0xff] }
 0x2b9   :  { %v1915_v58 = vpop.eup %1914  ;;  %1762 = vst [vmem:[%s5050_s1 + $0xa0] sm:$0xff] %v1698_v51  ;;  %1926 = vrcp.f32 %v1913_v25  ;;  %v1538_v50 = vmul.f32 1.442695, %v1448_v59  ;;  %v960_v61 = vpop.permute.xlu1 %959  ;;  %v1262_v55 = vadd.f32 2.0, %v1198_v63  ;;  %v1187_v14 = vmul.f32 2e-05, %v1123_v31 }
 0x2ba   :  { %v1917_v10 = vpop.eup %1916  ;;  %v1688_v60 = vmul.f32 %v2211_v2, %v1915_v58  ;;  %v1518_v3 = vmul.f32 1.442695, %v1438_v17  ;;  %v1437_v32 = vmul.f32 0.75, %v1325_v38  ;;  %1928 = vlog2.f32 %v1248_v16  ;;  %v958_v39 = vpop.permute.xlu0 %957  ;;  %v2213_v63 = vld [vmem:[%s5049_s0 + $0xb8] sm:$0xff] }
 0x2bb   :  { %v1919_v48 = vpop.eup %1918  ;;  %v1687_v27 = vmul.f32 %v2212_v52, %v1917_v10  ;;  %1930 = vpow2.f32 %v1538_v50  ;;  %v1073_v9 = vsel %vm1037_vm3, %v980_v20, 0.0  ;;  %v1063_v29 = vsel %vm1037_vm3, %v960_v61, 0.0 }
 0x2bc   :  { %v1921_v36 = vpop.eup %1920  ;;  %1752 = vst [vmem:[%s5050_s1 + $0x50] sm:$0xff] %v1688_v60  ;;  %1932 = vrcp.f32 %v1919_v48  ;;  %v1516_v43 = vmul.f32 1.442695, %v1437_v32  ;;  %v812_v41 = vsel %vm780_vm2, %v5598_v15, 0.0  ;;  %v1252_v44 = vadd.f32 2.0, %v1188_v19 }
 0x2bd   :  { %v1923_v37 = vpop.eup %1922  ;;  %1751 = vst [vmem:[%s5050_s1 + $0x48] sm:$0xff] %v1687_v27  ;;  %1934 = vrcp.f32 %v1921_v36  ;;  %v1137_v22 = vadd.f32 %v1073_v9, %v880_v45  ;;  %v1127_v62 = vadd.f32 %v1063_v29, %v4488_v8  ;;  %v1062_v4 = vsel %vm1037_vm3, %v958_v39, 0.0 }
 0x2be   :  { %v1925_v46 = vpop.eup %1924  ;;  %1936 = vpow2.f32 %v1518_v3  ;;  %v1353_v12 = vmul.f32 0.6931472, %v1923_v37  ;;  %v883_v13 = vadd.f32 %v819_v34, %v4154_v7  ;;  %v1251_v26 = vadd.f32 2.0, %v1187_v14  ;;  %v5599_v7 = vld [vmem:[#allocation50_spill] sm:$0xff]  ;;  %v2214_v34 = vld [vmem:[%s5049_s0 + $0x68] sm:$0xff] }
 0x2bf   :  { %v1927_v6 = vpop.eup %1926  ;;  %1938 = vpow2.f32 %v1516_v43  ;;  %v1333_v57 = vmul.f32 0.6931472, %v1925_v46  ;;  %v1126_v47 = vadd.f32 %v1062_v4, %v4319_v23  ;;  %v1201_v16 = vmul.f32 2e-05, %v1137_v22  ;;  %v2215_v3 = vld [vmem:[%s5049_s0 + $0x60] sm:$0xff]  ;;  %v2216_v4 = vld [vmem:[%s5049_s0 + $0xd0] sm:$0xff] }
 0x2c0   :  { %v1929_v30 = vpop.eup %1928  ;;  %v1701_v31 = vmul.f32 %v2213_v63, %v1927_v6  ;;  %v1451_v56 = vmul.f32 0.75, %v1353_v12  ;;  %1940 = vlog2.f32 %v1262_v55  ;;  %v822_v45 = vsel %vm780_vm2, %v5599_v7, 0.0 }
 0x2c1   :  { %v1931_v8 = vpop.eup %1930  ;;  %v1441_v51 = vmul.f32 0.75, %v1333_v57  ;;  %v1331_v59 = vmul.f32 0.6931472, %v1929_v30  ;;  %1942 = vlog2.f32 %v1252_v44  ;;  %v1191_v38 = vmul.f32 2e-05, %v1127_v62  ;;  %v966_v18 = vpop.permute.xlu1 %965 }
 0x2c2   :  { %v1933_v25 = vpop.eup %1932  ;;  %1765 = vst [vmem:[%s5050_s1 + $0xb8] sm:$0xff] %v1701_v31  ;;  %1944 = vrcp.f32 %v1931_v8  ;;  %v1544_v17 = vmul.f32 1.442695, %v1451_v56  ;;  %v986_v58 = vpop.permute.xlu2 %985  ;;  %v1190_v20 = vmul.f32 2e-05, %v1126_v47  ;;  %v1265_v27 = vadd.f32 2.0, %v1201_v16 }
 0x2c3   :  { %v1935_v23 = vpop.eup %1934  ;;  %v1691_v50 = vmul.f32 %v2214_v34, %v1933_v25  ;;  %v1524_v19 = vmul.f32 1.442695, %v1441_v51  ;;  %v1440_v10 = vmul.f32 0.75, %v1331_v59  ;;  %1946 = vlog2.f32 %v1251_v26  ;;  %v964_v2 = vpop.permute.xlu0 %963  ;;  %v2217_v51 = vld [vmem:[%s5049_s0 + $0x80] sm:$0xff] }
 0x2c4   :  { %v1937_v60 = vpop.eup %1936  ;;  %v1690_v32 = vmul.f32 %v2215_v3, %v1935_v23  ;;  %1948 = vpow2.f32 %v1544_v17  ;;  %v1076_v61 = vsel %vm1037_vm3, %v986_v58, 0.0  ;;  %v1066_v55 = vsel %vm1037_vm3, %v966_v18, 0.0 }
 0x2c5   :  { %v1939_v48 = vpop.eup %1938  ;;  %1755 = vst [vmem:[%s5050_s1 + $0x68] sm:$0xff] %v1691_v50  ;;  %1950 = vrcp.f32 %v1937_v60  ;;  %v1522_v52 = vmul.f32 1.442695, %v1440_v10  ;;  %v1255_v39 = vadd.f32 2.0, %v1191_v38  ;;  %v1140_v36 = vadd.f32 %v1076_v61, %v883_v13  ;;  %v2218_v38 = vld [vmem:[%s5049_s0 + $0x78] sm:$0xff] }
 0x2c6   :  { %v1941_v14 = vpop.eup %1940  ;;  %1754 = vst [vmem:[%s5050_s1 + $0x60] sm:$0xff] %v1690_v32  ;;  %1952 = vrcp.f32 %v1939_v48  ;;  %v1065_v43 = vsel %vm1037_vm3, %v964_v2, 0.0  ;;  %v876_v29 = vadd.f32 %v812_v41, %v4004_v40  ;;  %v1130_v15 = vadd.f32 %v1066_v55, %v4511_v49 }
 0x2c7   :  { %v1943_v9 = vpop.eup %1942  ;;  %1954 = vpow2.f32 %v1524_v19  ;;  %v1359_v37 = vmul.f32 0.6931472, %v1941_v14  ;;  %v886_v22 = vadd.f32 %v822_v45, %v4201_v24  ;;  %v1254_v12 = vadd.f32 2.0, %v1190_v20  ;;  %v5600_v45 = vld [vmem:[#allocation64_spill] sm:$0xff]  ;;  %v5601_v20 = vld [vmem:[#allocation21_spill] sm:$0xff] }
 0x2c8   :  { %v1945_v44 = vpop.eup %1944  ;;  %1956 = vpow2.f32 %v1522_v52  ;;  %v1339_v46 = vmul.f32 0.6931472, %v1943_v9  ;;  %v1129_v40 = vadd.f32 %v1065_v43, %v4326_v33  ;;  %v1204_v49 = vmul.f32 2e-05, %v1140_v36  ;;  %v2219_v43 = vld [vmem:[%s5049_s0 + $0xe8] sm:$0xff] }
 0x2c9   :  { %v1947_v62 = vpop.eup %1946  ;;  %v1704_v6 = vmul.f32 %v2216_v4, %v1945_v44  ;;  %v1454_v13 = vmul.f32 0.75, %v1359_v37  ;;  %1958 = vlog2.f32 %v1265_v27  ;;  %v972_v24 = vpop.permute.xlu1 %971  ;;  %v1194_v56 = vmul.f32 2e-05, %v1130_v15 }
 0x2ca   :  { %v1949_v41 = vpop.eup %1948  ;;  %v1444_v57 = vmul.f32 0.75, %v1339_v46  ;;  %v1337_v26 = vmul.f32 0.6931472, %v1947_v62  ;;  %1960 = vlog2.f32 %v1255_v39  ;;  %v992_v30 = vpop.permute.xlu2 %991  ;;  %v825_v17 = vsel %vm780_vm2, %v5600_v45, 0.0 }
 0x2cb   :  { %v1951_v63 = vpop.eup %1950  ;;  %1768 = vst [vmem:[%s5050_s1 + $0xd0] sm:$0xff] %v1704_v6  ;;  %1962 = vrcp.f32 %v1949_v41  ;;  %v1550_v31 = vmul.f32 1.442695, %v1454_v13  ;;  %v1079_v47 = vsel %vm1037_vm3, %v992_v30, 0.0  ;;  %v970_v8 = vpop.permute.xlu0 %969  ;;  %v1193_v18 = vmul.f32 2e-05, %v1129_v40 }
 0x2cc   :  { %v1953_v33 = vpop.eup %1952  ;;  %v1694_v59 = vmul.f32 %v2217_v51, %v1951_v63  ;;  %v1530_v16 = vmul.f32 1.442695, %v1444_v57  ;;  %v1443_v25 = vmul.f32 0.75, %v1337_v26  ;;  %1964 = vlog2.f32 %v1254_v12  ;;  %v2220_v41 = vld [vmem:[%s5049_s0 + $0x98] sm:$0xff] }
 0x2cd   :  { %v1955_v7 = vpop.eup %1954  ;;  %v1693_v58 = vmul.f32 %v2218_v38, %v1953_v33  ;;  %1966 = vpow2.f32 %v1550_v31  ;;  %v1268_v50 = vadd.f32 2.0, %v1204_v49  ;;  %v1069_v19 = vsel %vm1037_vm3, %v972_v24, 0.0  ;;  %v2221_v24 = vld [vmem:[%s5049_s0 + $0x90] sm:$0xff] }
 0x2ce   :  { %v1957_v23 = vpop.eup %1956  ;;  %1758 = vst [vmem:[%s5050_s1 + $0x80] sm:$0xff] %v1694_v59  ;;  %1968 = vrcp.f32 %v1955_v7  ;;  %v1528_v34 = vmul.f32 1.442695, %v1443_v25  ;;  %v1258_v2 = vadd.f32 2.0, %v1194_v56  ;;  %v1143_v60 = vadd.f32 %v1079_v47, %v886_v22 }
 0x2cf   :  { %v1959_v10 = vpop.eup %1958  ;;  %1757 = vst [vmem:[%s5050_s1 + $0x78] sm:$0xff] %v1693_v58  ;;  %1970 = vrcp.f32 %v1957_v23  ;;  %v1068_v3 = vsel %vm1037_vm3, %v970_v8, 0.0  ;;  %v815_v61 = vsel %vm780_vm2, %v5601_v20, 0.0  ;;  %v1133_v52 = vadd.f32 %v1069_v19, %v876_v29  ;;  %v5603_v23 = vld [vmem:[#allocation34_spill] sm:$0xff] }
 0x2d0   :  { %v1961_v32 = vpop.eup %1960  ;;  %1972 = vpow2.f32 %v1530_v16  ;;  %v1365_v48 = vmul.f32 0.6931472, %v1959_v10  ;;  %v889_v55 = vadd.f32 %v825_v17, %v4204_v53  ;;  %v1257_v39 = vadd.f32 2.0, %v1193_v18 }
 0x2d1   :  { %v1963_v27 = vpop.eup %1962  ;;  %1974 = vpow2.f32 %v1528_v34  ;;  %v1345_v14 = vmul.f32 0.6931472, %v1961_v32  ;;  %v1132_v15 = vadd.f32 %v1068_v3, %v4367_v11  ;;  %v978_v22 = vpop.permute.xlu1 %977  ;;  %v1207_v53 = vmul.f32 2e-05, %v1143_v60  ;;  %v2222_v3 = vld [vmem:[%s5049_s0 + $0x100] sm:$0xff] }
 0x2d2   :  { %v1965_v36 = vpop.eup %1964  ;;  %v1707_v9 = vmul.f32 %v2219_v43, %v1963_v27  ;;  %v1457_v37 = vmul.f32 0.75, %v1365_v48  ;;  %1976 = vlog2.f32 %v1268_v50  ;;  %v998_v44 = vpop.permute.xlu2 %997  ;;  %v1197_v13 = vmul.f32 2e-05, %v1133_v52 }
 0x2d3   :  { %v1967_v46 = vpop.eup %1966  ;;  %v1447_v29 = vmul.f32 0.75, %v1345_v14  ;;  %v1343_v12 = vmul.f32 0.6931472, %v1965_v36  ;;  %1978 = vlog2.f32 %v1258_v2  ;;  %v976_v62 = vpop.permute.xlu0 %975  ;;  %v1082_v40 = vsel %vm1037_vm3, %v998_v44, 0.0 }
 0x2d4   :  { %v1969_v4 = vpop.eup %1968  ;;  %1771 = vst [vmem:[%s5050_s1 + $0xe8] sm:$0xff] %v1707_v9  ;;  %1980 = vrcp.f32 %v1967_v46  ;;  %v1556_v6 = vmul.f32 1.442695, %v1457_v37  ;;  %v1196_v31 = vmul.f32 2e-05, %v1132_v15  ;;  %v1072_v56 = vsel %vm1037_vm3, %v978_v22, 0.0 }
 0x2d5   :  { %v1971_v11 = vpop.eup %1970  ;;  %v1697_v57 = vmul.f32 %v2220_v41, %v1969_v4  ;;  %v1536_v26 = vmul.f32 1.442695, %v1447_v29  ;;  %v1446_v49 = vmul.f32 0.75, %v1343_v12  ;;  %1982 = vlog2.f32 %v1257_v39  ;;  %v2224_v29 = vld [vmem:[%s5049_s0 + $0xa8] sm:$0xff] }
 0x2d6   :  { %v1973_v30 = vpop.eup %1972  ;;  %v1696_v63 = vmul.f32 %v2221_v24, %v1971_v11  ;;  %1984 = vpow2.f32 %v1556_v6  ;;  %v879_v8 = vadd.f32 %v815_v61, %v4039_v5  ;;  %v1271_v51 = vadd.f32 2.0, %v1207_v53  ;;  %v5602_v5 = vld [vmem:[#allocation190_spill] sm:$0xff] }
 0x2d7   :  { %v1975_v47 = vpop.eup %1974  ;;  %1761 = vst [vmem:[%s5050_s1 + $0x98] sm:$0xff] %v1697_v57  ;;  %1986 = vrcp.f32 %v1973_v30  ;;  %v1534_v33 = vmul.f32 1.442695, %v1446_v49  ;;  %v1261_v16 = vadd.f32 2.0, %v1197_v13  ;;  %v1146_v25 = vadd.f32 %v1082_v40, %v889_v55 }
 0x2d8   :  { %v1977_v59 = vpop.eup %1976  ;;  %1760 = vst [vmem:[%s5050_s1 + $0x90] sm:$0xff] %v1696_v63  ;;  %1988 = vrcp.f32 %v1975_v47  ;;  %v1071_v7 = vsel %vm1037_vm3, %v976_v62, 0.0  ;;  %v820_v17 = vsel %vm780_vm2, %v5602_v5, 0.0  ;;  %v1136_v58 = vadd.f32 %v1072_v56, %v879_v8  ;;  %v5604_v47 = vld [vmem:[#allocation51_spill] sm:$0xff] }
 0x2d9   :  { %v1979_v45 = vpop.eup %1978  ;;  %1990 = vpow2.f32 %v1536_v26  ;;  %v1371_v38 = vmul.f32 0.6931472, %v1977_v59  ;;  %v818_v34 = vsel %vm780_vm2, %v5603_v23, 0.0  ;;  %v1260_v19 = vadd.f32 2.0, %v1196_v31 }
 0x2da   :  { %v1981_v18 = vpop.eup %1980  ;;  %1992 = vpow2.f32 %v1534_v33  ;;  %v1351_v50 = vmul.f32 0.6931472, %v1979_v45  ;;  %v1004_v10 = vpop.permute.xlu2 %1003  ;;  %v1135_v61 = vadd.f32 %v1071_v7, %v4379_v54  ;;  %v1210_v14 = vmul.f32 2e-05, %v1146_v25  ;;  %v2223_v54 = vld [vmem:[%s5049_s0 + $0xb0] sm:$0xff] }
 0x2db   :  { %v984_v2 = vpop.permute.xlu1 %983  ;;  %v1983_v60 = vpop.eup %1982  ;;  %v1710_v32 = vmul.f32 %v2222_v3, %v1981_v18  ;;  %v1460_v20 = vmul.f32 0.75, %v1371_v38  ;;  %1994 = vlog2.f32 %v1271_v51  ;;  %v1200_v43 = vmul.f32 2e-05, %v1136_v58  ;;  %v2227_v3 = vld [vmem:[%s5049_s0 + $0xc0] sm:$0xff] }
 0x2dc   :  { %v982_v48 = vpop.permute.xlu0 %981  ;;  %v1985_v52 = vpop.eup %1984  ;;  %v1450_v27 = vmul.f32 0.75, %v1351_v50  ;;  %v1349_v55 = vmul.f32 0.6931472, %v1983_v60  ;;  %1996 = vlog2.f32 %v1261_v16  ;;  %v1085_v9 = vsel %vm1037_vm3, %v1004_v10, 0.0 }
 0x2dd   :  { %v1987_v39 = vpop.eup %1986  ;;  %1774 = vst [vmem:[%s5050_s1 + $0x100] sm:$0xff] %v1710_v32  ;;  %1998 = vrcp.f32 %v1985_v52  ;;  %v1562_v36 = vmul.f32 1.442695, %v1460_v20  ;;  %v1199_v53 = vmul.f32 2e-05, %v1135_v61  ;;  %v1075_v62 = vsel %vm1037_vm3, %v984_v2, 0.0 }
 0x2de   :  { %v1989_v37 = vpop.eup %1988  ;;  %v1700_v15 = vmul.f32 %v2223_v54, %v1987_v39  ;;  %v1542_v44 = vmul.f32 1.442695, %v1450_v27  ;;  %v1449_v22 = vmul.f32 0.75, %v1349_v55  ;;  %2000 = vlog2.f32 %v1260_v19  ;;  %v5605_v52 = vld [vmem:[#allocation76_spill] sm:$0xff] }
 0x2df   :  { %v1991_v46 = vpop.eup %1990  ;;  %v1699_v12 = vmul.f32 %v2224_v29, %v1989_v37  ;;  %2002 = vpow2.f32 %v1562_v36  ;;  %v882_v6 = vadd.f32 %v818_v34, %v4059_v35  ;;  %v1274_v40 = vadd.f32 2.0, %v1210_v14 }
 0x2e0   :  { %v1993_v4 = vpop.eup %1992  ;;  %1764 = vst [vmem:[%s5050_s1 + $0xb0] sm:$0xff] %v1700_v15  ;;  %2004 = vrcp.f32 %v1991_v46  ;;  %v1540_v13 = vmul.f32 1.442695, %v1449_v22  ;;  %v1264_v41 = vadd.f32 2.0, %v1200_v43  ;;  %v1149_v57 = vadd.f32 %v1085_v9, %v3823_v42  ;;  %v5606_v43 = vld [vmem:[#allocation5_spill] sm:$0xff]  ;;  %v5607_v22 = vld [vmem:[#allocation8_spill] sm:$0xff] }
 0x2e1   :  { %v1995_v11 = vpop.eup %1994  ;;  %1763 = vst [vmem:[%s5050_s1 + $0xa8] sm:$0xff] %v1699_v12  ;;  %2006 = vrcp.f32 %v1993_v4  ;;  %v1074_v26 = vsel %vm1037_vm3, %v982_v48, 0.0  ;;  %v4749_v49 = vadd.f32 %v820_v17, %v4149_v28  ;;  %v1139_v24 = vadd.f32 %v1075_v62, %v882_v6  ;;  %v2225_v28 = vld [vmem:[%s5049_s0 + $0x118] sm:$0xff]  ;;  %v5608_v4 = vld [vmem:[#allocation66_spill] sm:$0xff] }
 0x2e2   :  { %v1997_v35 = vpop.eup %1996  ;;  %2008 = vpow2.f32 %v1542_v44  ;;  %v1377_v30 = vmul.f32 0.6931472, %v1995_v11  ;;  %v1010_v63 = vpop.permute.xlu2 %1009  ;;  %v821_v8 = vsel %vm780_vm2, %v5604_v47, 0.0  ;;  %v1263_v42 = vadd.f32 2.0, %v1199_v53 }
 0x2e3   :  { %v990_v31 = vpop.permute.xlu1 %989  ;;  %v1999_v56 = vpop.eup %1998  ;;  %2010 = vpow2.f32 %v1540_v13  ;;  %v1357_v33 = vmul.f32 0.6931472, %v1997_v35  ;;  %v1138_v7 = vadd.f32 %v1074_v26, %v4418_v21  ;;  %v1213_v38 = vmul.f32 2e-05, %v1149_v57  ;;  %v2226_v21 = vld [vmem:[%s5049_s0 + $0xc8] sm:$0xff] }
 0x2e4   :  { %v988_v51 = vpop.permute.xlu0 %987  ;;  %v2001_v59 = vpop.eup %2000  ;;  %v1713_v16 = vmul.f32 %v2225_v28, %v1999_v56  ;;  %v1463_v25 = vmul.f32 0.75, %v1377_v30  ;;  %2012 = vlog2.f32 %v1274_v40  ;;  %v1203_v23 = vmul.f32 2e-05, %v1139_v24 }
 0x2e5   :  { %v2003_v45 = vpop.eup %2002  ;;  %v1453_v5 = vmul.f32 0.75, %v1357_v33  ;;  %v1355_v17 = vmul.f32 0.6931472, %v2001_v59  ;;  %2014 = vlog2.f32 %v1264_v41  ;;  %v1088_v34 = vsel %vm1037_vm3, %v1010_v63, 0.0  ;;  %v2228_v41 = vld [vmem:[%s5049_s0 + $0x130] sm:$0xff] }
 0x2e6   :  { %v2005_v58 = vpop.eup %2004  ;;  %1777 = vst [vmem:[%s5050_s1 + $0x118] sm:$0xff] %v1713_v16  ;;  %2016 = vrcp.f32 %v2003_v45  ;;  %v1568_v18 = vmul.f32 1.442695, %v1463_v25  ;;  %v1202_v20 = vmul.f32 2e-05, %v1138_v7  ;;  %v1078_v61 = vsel %vm1037_vm3, %v990_v31, 0.0 }
 0x2e7   :  { %v2007_v50 = vpop.eup %2006  ;;  %v1703_v19 = vmul.f32 %v2226_v21, %v2005_v58  ;;  %v1548_v10 = vmul.f32 1.442695, %v1453_v5  ;;  %v1452_v2 = vmul.f32 0.75, %v1355_v17  ;;  %2018 = vlog2.f32 %v1263_v42  ;;  %v2230_v25 = vld [vmem:[%s5049_s0 + $0xd8] sm:$0xff] }
 0x2e8   :  { %v2009_v60 = vpop.eup %2008  ;;  %v1702_v32 = vmul.f32 %v2227_v3, %v2007_v50  ;;  %2020 = vpow2.f32 %v1568_v18  ;;  %v885_v27 = vadd.f32 %v821_v8, %v5605_v52  ;;  %v1277_v14 = vadd.f32 2.0, %v1213_v38  ;;  %v5609_v38 = vld [vmem:[#allocation79_spill] sm:$0xff] }
 0x2e9   :  { %v2011_v48 = vpop.eup %2010  ;;  %1767 = vst [vmem:[%s5050_s1 + $0xc8] sm:$0xff] %v1703_v19  ;;  %2022 = vrcp.f32 %v2009_v60  ;;  %v1546_v55 = vmul.f32 1.442695, %v1452_v2  ;;  %v1267_v36 = vadd.f32 2.0, %v1203_v23  ;;  %v1152_v9 = vadd.f32 %v1088_v34, %v5606_v43  ;;  %v5610_v19 = vld [vmem:[#allocation74_spill] sm:$0xff] }
 0x2ea   :  { %v2013_v39 = vpop.eup %2012  ;;  %1766 = vst [vmem:[%s5050_s1 + $0xc0] sm:$0xff] %v1702_v32  ;;  %2024 = vrcp.f32 %v2011_v48  ;;  %v1077_v37 = vsel %vm1037_vm3, %v988_v51, 0.0  ;;  %v1016_v54 = vpop.permute.xlu2 %1015  ;;  %v823_v46 = vsel %vm780_vm2, %v5607_v22, 0.0  ;;  %v1142_v12 = vadd.f32 %v1078_v61, %v885_v27 }
 0x2eb   :  { %v996_v15 = vpop.permute.xlu1 %995  ;;  %v2015_v44 = vpop.eup %2014  ;;  %2026 = vpow2.f32 %v1548_v10  ;;  %v1383_v29 = vmul.f32 0.6931472, %v2013_v39  ;;  %v824_v6 = vsel %vm780_vm2, %v5608_v4, 0.0  ;;  %v1266_v40 = vadd.f32 2.0, %v1202_v20  ;;  %v5611_v20 = vld [vmem:[#allocation81_spill] sm:$0xff] }
 0x2ec   :  { %v994_v53 = vpop.permute.xlu0 %993  ;;  %v2017_v62 = vpop.eup %2016  ;;  %2028 = vpow2.f32 %v1546_v55  ;;  %v1363_v13 = vmul.f32 0.6931472, %v2015_v44  ;;  %v1141_v35 = vadd.f32 %v1077_v37, %v4749_v49  ;;  %v1216_v31 = vmul.f32 2e-05, %v1152_v9  ;;  %v2229_v49 = vld [vmem:[%s5049_s0 + $0xe0] sm:$0xff]  ;;  %v2232_v4 = vld [vmem:[%s5049_s0 + $0xf8] sm:$0xff] }
 0x2ed   :  { %v2019_v11 = vpop.eup %2018  ;;  %v1716_v57 = vmul.f32 %v2228_v41, %v2017_v62  ;;  %v1466_v26 = vmul.f32 0.75, %v1383_v29  ;;  %2030 = vlog2.f32 %v1277_v14  ;;  %v1206_v8 = vmul.f32 2e-05, %v1142_v12  ;;  %v2233_v41 = vld [vmem:[%s5049_s0 + $0xf0] sm:$0xff] }
 0x2ee   :  { %v2021_v30 = vpop.eup %2020  ;;  %v1456_v24 = vmul.f32 0.75, %v1363_v13  ;;  %v1361_v63 = vmul.f32 0.6931472, %v2019_v11  ;;  %2032 = vlog2.f32 %v1267_v36  ;;  %v1091_v33 = vsel %vm1037_vm3, %v1016_v54, 0.0  ;;  %v2231_v36 = vld [vmem:[%s5049_s0 + $0x148] sm:$0xff] }
 0x2ef   :  { %v2023_v56 = vpop.eup %2022  ;;  %1780 = vst [vmem:[%s5050_s1 + $0x130] sm:$0xff] %v1716_v57  ;;  %2034 = vrcp.f32 %v2021_v30  ;;  %v1574_v47 = vmul.f32 1.442695, %v1466_v26  ;;  %v1205_v45 = vmul.f32 2e-05, %v1141_v35  ;;  %v1081_v5 = vsel %vm1037_vm3, %v996_v15, 0.0 }
 0x2f0   :  { %v2025_v42 = vpop.eup %2024  ;;  %v1706_v51 = vmul.f32 %v2229_v49, %v2023_v56  ;;  %v1554_v59 = vmul.f32 1.442695, %v1456_v24  ;;  %v1455_v28 = vmul.f32 0.75, %v1361_v63  ;;  %2036 = vlog2.f32 %v1266_v40 }
 0x2f1   :  { %v2027_v16 = vpop.eup %2026  ;;  %v1705_v7 = vmul.f32 %v2230_v25, %v2025_v42  ;;  %2038 = vpow2.f32 %v1574_v47  ;;  %v888_v58 = vadd.f32 %v824_v6, %v5609_v38  ;;  %v1280_v23 = vadd.f32 2.0, %v1216_v31  ;;  %v2234_v38 = vld [vmem:[%s5049_s0 + $0x160] sm:$0xff] }
 0x2f2   :  { %v2029_v17 = vpop.eup %2028  ;;  %1770 = vst [vmem:[%s5050_s1 + $0xe0] sm:$0xff] %v1706_v51  ;;  %2040 = vrcp.f32 %v2027_v16  ;;  %v1552_v18 = vmul.f32 1.442695, %v1455_v28  ;;  %v1270_v21 = vadd.f32 2.0, %v1206_v8  ;;  %v1155_v10 = vadd.f32 %v1091_v33, %v5610_v19  ;;  %v1022_v60 = vpop.permute.xlu2 %1021  ;;  %v5612_v33 = vld [vmem:[#allocation77_spill] sm:$0xff]  ;;  %v5613_v28 = vld [vmem:[#allocation71_spill] sm:$0xff] }
 0x2f3   :  { %v1002_v34 = vpop.permute.xlu1 %1001  ;;  %v2031_v50 = vpop.eup %2030  ;;  %1769 = vst [vmem:[%s5050_s1 + $0xd8] sm:$0xff] %v1705_v7  ;;  %2042 = vrcp.f32 %v2029_v17  ;;  %v1080_v2 = vsel %vm1037_vm3, %v994_v53, 0.0  ;;  %v887_v61 = vadd.f32 %v823_v46, %v5611_v20  ;;  %v1145_v52 = vadd.f32 %v1081_v5, %v888_v58 }
 0x2f4   :  { %v1000_v3 = vpop.permute.xlu0 %999  ;;  %v2033_v32 = vpop.eup %2032  ;;  %2044 = vpow2.f32 %v1554_v59  ;;  %v1389_v48 = vmul.f32 0.6931472, %v2031_v50  ;;  %v1269_v14 = vadd.f32 2.0, %v1205_v45  ;;  %v1219_v22 = vmul.f32 2e-05, %v1155_v10 }
 0x2f5   :  { %v2035_v27 = vpop.eup %2034  ;;  %2046 = vpow2.f32 %v1552_v18  ;;  %v1369_v55 = vmul.f32 0.6931472, %v2033_v32  ;;  %v1144_v37 = vadd.f32 %v1080_v2, %v887_v61  ;;  %v1209_v12 = vmul.f32 2e-05, %v1145_v52  ;;  %v2235_v61 = vld [vmem:[%s5049_s0 + $0x110] sm:$0xff] }
 0x2f6   :  { %v2037_v39 = vpop.eup %2036  ;;  %v1719_v43 = vmul.f32 %v2231_v36, %v2035_v27  ;;  %v1469_v9 = vmul.f32 0.75, %v1389_v48  ;;  %2048 = vlog2.f32 %v1280_v23  ;;  %v1094_v53 = vsel %vm1037_vm3, %v1022_v60, 0.0  ;;  %v5614_v23 = vld [vmem:[#allocation26_spill] sm:$0xff] }
 0x2f7   :  { %v2039_v54 = vpop.eup %2038  ;;  %v1459_v15 = vmul.f32 0.75, %v1369_v55  ;;  %v1367_v44 = vmul.f32 0.6931472, %v2037_v39  ;;  %2050 = vlog2.f32 %v1270_v21  ;;  %v1208_v26 = vmul.f32 2e-05, %v1144_v37  ;;  %v2236_v39 = vld [vmem:[%s5049_s0 + $0x108] sm:$0xff] }
 0x2f8   :  { %v2041_v46 = vpop.eup %2040  ;;  %1783 = vst [vmem:[%s5050_s1 + $0x148] sm:$0xff] %v1719_v43  ;;  %2052 = vrcp.f32 %v2039_v54  ;;  %v1580_v29 = vmul.f32 1.442695, %v1469_v9  ;;  %v1084_v35 = vsel %vm1037_vm3, %v1002_v34, 0.0  ;;  %v1283_v31 = vadd.f32 2.0, %v1219_v22 }
 0x2f9   :  { %v2043_v62 = vpop.eup %2042  ;;  %v1709_v6 = vmul.f32 %v2232_v4, %v2041_v46  ;;  %v1560_v13 = vmul.f32 1.442695, %v1459_v15  ;;  %v1458_v40 = vmul.f32 0.75, %v1367_v44  ;;  %2054 = vlog2.f32 %v1269_v14 }
 0x2fa   :  { %v2045_v11 = vpop.eup %2044  ;;  %v1708_v57 = vmul.f32 %v2233_v41, %v2043_v62  ;;  %2056 = vpow2.f32 %v1580_v29  ;;  %v1273_v8 = vadd.f32 2.0, %v1209_v12  ;;  %v1158_v42 = vadd.f32 %v1094_v53, %v5612_v33  ;;  %v1028_v25 = vpop.permute.xlu2 %1027  ;;  %v5615_v29 = vld [vmem:[#allocation80_spill] sm:$0xff] }
 0x2fb   :  { %v1008_v30 = vpop.permute.xlu1 %1007  ;;  %v2047_v24 = vpop.eup %2046  ;;  %1773 = vst [vmem:[%s5050_s1 + $0xf8] sm:$0xff] %v1709_v6  ;;  %2058 = vrcp.f32 %v2045_v11  ;;  %v1558_v63 = vmul.f32 1.442695, %v1458_v40  ;;  %v1083_v49 = vsel %vm1037_vm3, %v1000_v3, 0.0  ;;  %v1148_v16 = vadd.f32 %v1084_v35, %v5613_v28  ;;  %v5616_v6 = vld [vmem:[#allocation72_spill] sm:$0xff]  ;;  %v2237_v35 = vld [vmem:[%s5049_s0 + $0x178] sm:$0xff] }
 0x2fc   :  { %v1006_v56 = vpop.permute.xlu0 %1005  ;;  %v2049_v47 = vpop.eup %2048  ;;  %1772 = vst [vmem:[%s5050_s1 + $0xf0] sm:$0xff] %v1708_v57  ;;  %2060 = vrcp.f32 %v2047_v24  ;;  %v1272_v5 = vadd.f32 2.0, %v1208_v26  ;;  %v1147_v34 = vadd.f32 %v1083_v49, %v5614_v23  ;;  %v1222_v10 = vmul.f32 2e-05, %v1158_v42 }
 0x2fd   :  { %v2051_v51 = vpop.eup %2050  ;;  %2062 = vpow2.f32 %v1560_v13  ;;  %v1395_v59 = vmul.f32 0.6931472, %v2049_v47  ;;  %v1212_v3 = vmul.f32 2e-05, %v1148_v16  ;;  %v1097_v32 = vsel %vm1037_vm3, %v1028_v25, 0.0  ;;  %v2238_v25 = vld [vmem:[%s5049_s0 + $0x128] sm:$0xff] }
 0x2fe   :  { %v2053_v7 = vpop.eup %2052  ;;  %2064 = vpow2.f32 %v1558_v63  ;;  %v1375_v45 = vmul.f32 0.6931472, %v2051_v51  ;;  %v1211_v43 = vmul.f32 2e-05, %v1147_v34  ;;  %v1087_v9 = vsel %vm1037_vm3, %v1008_v30, 0.0  ;;  %v5617_v63 = vld [vmem:[#allocation38_spill] sm:$0xff] }
 0x2ff   :  { %v2055_v17 = vpop.eup %2054  ;;  %v1722_v58 = vmul.f32 %v2234_v38, %v2053_v7  ;;  %v1472_v18 = vmul.f32 0.75, %v1395_v59  ;;  %2066 = vlog2.f32 %v1283_v31  ;;  %v1286_v44 = vadd.f32 2.0, %v1222_v10 }
 0x300   :  { %v2057_v50 = vpop.eup %2056  ;;  %v1462_v21 = vmul.f32 0.75, %v1375_v45  ;;  %v1373_v19 = vmul.f32 0.6931472, %v2055_v17  ;;  %2068 = vlog2.f32 %v1273_v8  ;;  %v1276_v46 = vadd.f32 2.0, %v1212_v3 }
 0x301   :  { %v2059_v2 = vpop.eup %2058  ;;  %1786 = vst [vmem:[%s5050_s1 + $0x160] sm:$0xff] %v1722_v58  ;;  %2070 = vrcp.f32 %v2057_v50  ;;  %v1586_v60 = vmul.f32 1.442695, %v1472_v18  ;;  %v1161_v12 = vadd.f32 %v1097_v32, %v5615_v29  ;;  %v1086_v53 = vsel %vm1037_vm3, %v1006_v56, 0.0  ;;  %v2239_v58 = vld [vmem:[%s5049_s0 + $0x120] sm:$0xff] }
 0x302   :  { %v2061_v20 = vpop.eup %2060  ;;  %v1712_v48 = vmul.f32 %v2235_v61, %v2059_v2  ;;  %v1566_v52 = vmul.f32 1.442695, %v1462_v21  ;;  %v1461_v27 = vmul.f32 0.75, %v1373_v19  ;;  %2072 = vlog2.f32 %v1272_v5  ;;  %v1034_v57 = vpop.permute.xlu2 %1033  ;;  %v5618_v61 = vld [vmem:[#allocation75_spill] sm:$0xff] }
 0x303   :  { %v1014_v55 = vpop.permute.xlu1 %1013  ;;  %v2063_v14 = vpop.eup %2062  ;;  %v1711_v36 = vmul.f32 %v2236_v39, %v2061_v20  ;;  %2074 = vpow2.f32 %v1586_v60  ;;  %v1151_v13 = vadd.f32 %v1087_v9, %v5616_v6  ;;  %v1275_v41 = vadd.f32 2.0, %v1211_v43  ;;  %v2240_v39 = vld [vmem:[%s5049_s0 + $0x190] sm:$0xff]  ;;  %v2241_v6 = vld [vmem:[%s5049_s0 + $0x140] sm:$0xff] }
 0x304   :  { %v1012_v37 = vpop.permute.xlu0 %1011  ;;  %v2065_v54 = vpop.eup %2064  ;;  %1776 = vst [vmem:[%s5050_s1 + $0x110] sm:$0xff] %v1712_v48  ;;  %2076 = vrcp.f32 %v2063_v14  ;;  %v1564_v15 = vmul.f32 1.442695, %v1461_v27  ;;  %v1150_v31 = vadd.f32 %v1086_v53, %v5617_v63  ;;  %v1225_v33 = vmul.f32 2e-05, %v1161_v12 }
 0x305   :  { %v2067_v22 = vpop.eup %2066  ;;  %1775 = vst [vmem:[%s5050_s1 + $0x108] sm:$0xff] %v1711_v36  ;;  %2078 = vrcp.f32 %v2065_v54  ;;  %v1215_v51 = vmul.f32 2e-05, %v1151_v13  ;;  %v1100_v59 = vsel %vm1037_vm3, %v1034_v57, 0.0  ;;  %v1090_v34 = vsel %vm1037_vm3, %v1014_v55, 0.0  ;;  %v2242_v57 = vld [vmem:[%s5049_s0 + $0x138] sm:$0xff] }
 0x306   :  { %v2069_v62 = vpop.eup %2068  ;;  %2080 = vpow2.f32 %v1566_v52  ;;  %v1401_v4 = vmul.f32 0.6931472, %v2067_v22  ;;  %v1214_v23 = vmul.f32 2e-05, %v1150_v31  ;;  %v1289_v19 = vadd.f32 2.0, %v1225_v33 }
 0x307   :  { %v2071_v40 = vpop.eup %2070  ;;  %2082 = vpow2.f32 %v1564_v15  ;;  %v1381_v11 = vmul.f32 0.6931472, %v2069_v62  ;;  %v1279_v2 = vadd.f32 2.0, %v1215_v51  ;;  %v1164_v60 = vadd.f32 %v1100_v59, %v4237_v0  ;;  %v5619_v0 = vld [vmem:[#allocation56_spill] sm:$0xff] }
 0x308   :  { %v2073_v26 = vpop.eup %2072  ;;  %v1725_v30 = vmul.f32 %v2237_v35, %v2071_v40  ;;  %v1475_v24 = vmul.f32 0.75, %v1401_v4  ;;  %2084 = vlog2.f32 %v1286_v44  ;;  %v1089_v3 = vsel %vm1037_vm3, %v1012_v37, 0.0  ;;  %v5621_v59 = vld [vmem:[#allocation92_spill] sm:$0xff] }
 0x309   :  { %v2075_v56 = vpop.eup %2074  ;;  %v1465_v47 = vmul.f32 0.75, %v1381_v11  ;;  %v1379_v8 = vmul.f32 0.6931472, %v2073_v26  ;;  %2086 = vlog2.f32 %v1276_v46  ;;  %v1154_v48 = vadd.f32 %v1090_v34, %v5618_v61  ;;  %v2244_v61 = vld [vmem:[%s5049_s0 + $0x158] sm:$0xff] }
 0x30a   :  { %v2077_v42 = vpop.eup %2076  ;;  %1789 = vst [vmem:[%s5050_s1 + $0x178] sm:$0xff] %v1725_v30  ;;  %2088 = vrcp.f32 %v2075_v56  ;;  %v1592_v49 = vmul.f32 1.442695, %v1475_v24  ;;  %v1278_v55 = vadd.f32 2.0, %v1214_v23  ;;  %v1153_v9 = vadd.f32 %v1089_v3, %v5619_v0 }
 0x30b   :  { %v1020_v28 = vpop.permute.xlu1 %1019  ;;  %v2079_v16 = vpop.eup %2078  ;;  %v1715_v7 = vmul.f32 %v2238_v25, %v2077_v42  ;;  %v1572_v45 = vmul.f32 1.442695, %v1465_v47  ;;  %v1464_v5 = vmul.f32 0.75, %v1379_v8  ;;  %2090 = vlog2.f32 %v1275_v41  ;;  %v5620_v8 = vld [vmem:[#allocation78_spill] sm:$0xff] }
 0x30c   :  { %v1018_v17 = vpop.permute.xlu0 %1017  ;;  %v2081_v38 = vpop.eup %2080  ;;  %v1714_v18 = vmul.f32 %v2239_v58, %v2079_v16  ;;  %2092 = vpow2.f32 %v1592_v49  ;;  %v1228_v44 = vmul.f32 2e-05, %v1164_v60  ;;  %v1218_v12 = vmul.f32 2e-05, %v1154_v48  ;;  %v5622_v58 = vld [vmem:[#allocation95_spill] sm:$0xff] }
 0x30d   :  { %v2083_v50 = vpop.eup %2082  ;;  %1779 = vst [vmem:[%s5050_s1 + $0x128] sm:$0xff] %v1715_v7  ;;  %2094 = vrcp.f32 %v2081_v38  ;;  %v1570_v21 = vmul.f32 1.442695, %v1464_v5  ;;  %v1093_v53 = vsel %vm1037_vm3, %v1020_v28, 0.0  ;;  %v1217_v35 = vmul.f32 2e-05, %v1153_v9 }
 0x30e   :  { %v2085_v10 = vpop.eup %2084  ;;  %1778 = vst [vmem:[%s5050_s1 + $0x120] sm:$0xff] %v1714_v18  ;;  %2096 = vrcp.f32 %v2083_v50  ;;  %v1092_v30 = vsel %vm1037_vm3, %v1018_v17, 0.0  ;;  %v1292_v31 = vadd.f32 2.0, %v1228_v44  ;;  %v1282_v47 = vadd.f32 2.0, %v1218_v12  ;;  %v2243_v5 = vld [vmem:[%s5049_s0 + $0x1a8] sm:$0xff]  ;;  %v5623_v44 = vld [vmem:[#allocation70_spill] sm:$0xff] }
 0x30f   :  { %v2087_v32 = vpop.eup %2086  ;;  %2098 = vpow2.f32 %v1572_v45  ;;  %v1407_v20 = vmul.f32 0.6931472, %v2085_v10  ;;  %v1157_v33 = vadd.f32 %v1093_v53, %v5620_v8  ;;  %v1156_v28 = vadd.f32 %v1092_v30, %v5621_v59  ;;  %v5624_v53 = vld [vmem:[#allocation82_spill] sm:$0xff] }
 0x310   :  { %v2089_v52 = vpop.eup %2088  ;;  %2100 = vpow2.f32 %v1570_v21  ;;  %v1387_v27 = vmul.f32 0.6931472, %v2087_v32  ;;  %v1281_v7 = vadd.f32 2.0, %v1217_v35 }
 0x311   :  { %v2091_v14 = vpop.eup %2090  ;;  %v1728_v36 = vmul.f32 %v2240_v39, %v2089_v52  ;;  %v1478_v43 = vmul.f32 0.75, %v1407_v20  ;;  %2102 = vlog2.f32 %v1289_v19  ;;  %v1221_v21 = vmul.f32 2e-05, %v1157_v33 }
 0x312   :  { %v2093_v37 = vpop.eup %2092  ;;  %v1468_v54 = vmul.f32 0.75, %v1387_v27  ;;  %v1385_v15 = vmul.f32 0.6931472, %v2091_v14  ;;  %2104 = vlog2.f32 %v1279_v2  ;;  %v1220_v3 = vmul.f32 2e-05, %v1156_v28  ;;  %v2245_v14 = vld [vmem:[%s5049_s0 + $0x150] sm:$0xff] }
 0x313   :  { %v1026_v22 = vpop.permute.xlu1 %1025  ;;  %v2095_v46 = vpop.eup %2094  ;;  %1792 = vst [vmem:[%s5050_s1 + $0x190] sm:$0xff] %v1728_v36  ;;  %2106 = vrcp.f32 %v2093_v37  ;;  %v1598_v29 = vmul.f32 1.442695, %v1478_v43  ;;  %v1285_v37 = vadd.f32 2.0, %v1221_v21 }
 0x314   :  { %v1024_v62 = vpop.permute.xlu0 %1023  ;;  %v2097_v4 = vpop.eup %2096  ;;  %v1718_v13 = vmul.f32 %v2241_v6, %v2095_v46  ;;  %v1578_v40 = vmul.f32 1.442695, %v1468_v54  ;;  %v1467_v11 = vmul.f32 0.75, %v1385_v15  ;;  %2108 = vlog2.f32 %v1278_v55 }
 0x315   :  { %v2099_v41 = vpop.eup %2098  ;;  %v1717_v26 = vmul.f32 %v2242_v57, %v2097_v4  ;;  %2110 = vpow2.f32 %v1598_v29  ;;  %v1096_v42 = vsel %vm1037_vm3, %v1026_v22, 0.0  ;;  %v1095_v32 = vsel %vm1037_vm3, %v1024_v62, 0.0 }
 0x316   :  { %v2101_v24 = vpop.eup %2100  ;;  %1782 = vst [vmem:[%s5050_s1 + $0x140] sm:$0xff] %v1718_v13  ;;  %2112 = vrcp.f32 %v2099_v41  ;;  %v1576_v63 = vmul.f32 1.442695, %v1467_v11  ;;  %v1160_v18 = vadd.f32 %v1096_v42, %v5622_v58  ;;  %v1284_v15 = vadd.f32 2.0, %v1220_v3  ;;  %v2246_v11 = vld [vmem:[%s5049_s0 + $0x1c0] sm:$0xff]  ;;  %v2249_v3 = vld [vmem:[%s5049_s0 + $0x1d8] sm:$0xff] }
 0x317   :  { %v2103_v56 = vpop.eup %2102  ;;  %1781 = vst [vmem:[%s5050_s1 + $0x138] sm:$0xff] %v1717_v26  ;;  %2114 = vrcp.f32 %v2101_v24  ;;  %v1159_v22 = vadd.f32 %v1095_v32, %v5623_v44  ;;  %v5625_v26 = vld [vmem:[#allocation4_spill] sm:$0xff] }
 0x318   :  { %v2105_v49 = vpop.eup %2104  ;;  %2116 = vpow2.f32 %v1578_v40  ;;  %v1413_v51 = vmul.f32 0.6931472, %v2103_v56  ;;  %v1224_v36 = vmul.f32 2e-05, %v1160_v18 }
 0x319   :  { %v2107_v16 = vpop.eup %2106  ;;  %2118 = vpow2.f32 %v1576_v63  ;;  %v1393_v25 = vmul.f32 0.6931472, %v2105_v49  ;;  %v1223_v56 = vmul.f32 2e-05, %v1159_v22 }
 0x31a   :  { %v2109_v45 = vpop.eup %2108  ;;  %v1731_v17 = vmul.f32 %v2243_v5, %v2107_v16  ;;  %v1481_v38 = vmul.f32 0.75, %v1413_v51  ;;  %2120 = vlog2.f32 %v1292_v31  ;;  %v1288_v13 = vadd.f32 2.0, %v1224_v36  ;;  %v2247_v51 = vld [vmem:[%s5049_s0 + $0x170] sm:$0xff]  ;;  %v2250_v36 = vld [vmem:[%s5049_s0 + $0x188] sm:$0xff] }
 0x31b   :  { %v2111_v23 = vpop.eup %2110  ;;  %v1471_v34 = vmul.f32 0.75, %v1393_v25  ;;  %v1391_v50 = vmul.f32 0.6931472, %v2109_v45  ;;  %2122 = vlog2.f32 %v1282_v47  ;;  %v1032_v19 = vpop.permute.xlu1 %1031 }
 0x31c   :  { %v1030_v10 = vpop.permute.xlu0 %1029  ;;  %v2113_v2 = vpop.eup %2112  ;;  %1795 = vst [vmem:[%s5050_s1 + $0x1a8] sm:$0xff] %v1731_v17  ;;  %2124 = vrcp.f32 %v2111_v23  ;;  %v1604_v60 = vmul.f32 1.442695, %v1481_v38  ;;  %v1099_v43 = vsel %vm1037_vm3, %v1032_v19, 0.0  ;;  %v1287_v38 = vadd.f32 2.0, %v1223_v56  ;;  %v5626_v23 = vld [vmem:[#allocation73_spill] sm:$0xff] }
 0x31d   :  { %v2115_v20 = vpop.eup %2114  ;;  %v1721_v48 = vmul.f32 %v2244_v61, %v2113_v2  ;;  %v1584_v52 = vmul.f32 1.442695, %v1471_v34  ;;  %v1470_v27 = vmul.f32 0.75, %v1391_v50  ;;  %2126 = vlog2.f32 %v1281_v7  ;;  %v2248_v7 = vld [vmem:[%s5049_s0 + $0x168] sm:$0xff] }
 0x31e   :  { %v2117_v55 = vpop.eup %2116  ;;  %v1720_v39 = vmul.f32 %v2245_v14, %v2115_v20  ;;  %2128 = vpow2.f32 %v1604_v60  ;;  %v1098_v46 = vsel %vm1037_vm3, %v1030_v10, 0.0  ;;  %v1163_v62 = vadd.f32 %v1099_v43, %v5624_v53 }
 0x31f   :  { %v2119_v0 = vpop.eup %2118  ;;  %1785 = vst [vmem:[%s5050_s1 + $0x158] sm:$0xff] %v1721_v48  ;;  %2130 = vrcp.f32 %v2117_v55  ;;  %v1582_v9 = vmul.f32 1.442695, %v1470_v27  ;;  %v1162_v35 = vadd.f32 %v1098_v46, %v5625_v26 }
 0x320   :  { %v2121_v54 = vpop.eup %2120  ;;  %1784 = vst [vmem:[%s5050_s1 + $0x150] sm:$0xff] %v1720_v39  ;;  %2132 = vrcp.f32 %v2119_v0  ;;  %v1227_v33 = vmul.f32 2e-05, %v1163_v62 }
 0x321   :  { %v2123_v29 = vpop.eup %2122  ;;  %2134 = vpow2.f32 %v1584_v52  ;;  %v1419_v12 = vmul.f32 0.6931472, %v2121_v54  ;;  %v1226_v5 = vmul.f32 2e-05, %v1162_v35  ;;  %v2251_v54 = vld [vmem:[%s5049_s0 + $0x180] sm:$0xff] }
 0x322   :  { %v2125_v4 = vpop.eup %2124  ;;  %2136 = vpow2.f32 %v1582_v9  ;;  %v1399_v6 = vmul.f32 0.6931472, %v2123_v29  ;;  %v1291_v18 = vadd.f32 2.0, %v1227_v33  ;;  %v2254_v33 = vld [vmem:[%s5049_s0 + $0x198] sm:$0xff] }
 0x323   :  { %v2127_v40 = vpop.eup %2126  ;;  %v1734_v41 = vmul.f32 %v2246_v11, %v2125_v4  ;;  %v1484_v57 = vmul.f32 0.75, %v1419_v12  ;;  %2138 = vlog2.f32 %v1285_v37  ;;  %v1290_v2 = vadd.f32 2.0, %v1226_v5 }
 0x324   :  { %v1036_v30 = vpop.permute.xlu0 %1035  ;;  %v2129_v24 = vpop.eup %2128  ;;  %v1474_v63 = vmul.f32 0.75, %v1399_v6  ;;  %v1397_v31 = vmul.f32 0.6931472, %v2127_v40  ;;  %2140 = vlog2.f32 %v1284_v15 }
 0x325   :  { %v2131_v47 = vpop.eup %2130  ;;  %1798 = vst [vmem:[%s5050_s1 + $0x1c0] sm:$0xff] %v1734_v41  ;;  %2142 = vrcp.f32 %v2129_v24  ;;  %v1610_v8 = vmul.f32 1.442695, %v1484_v57  ;;  %v1101_v42 = vsel %vm1037_vm3, %v1036_v30, 0.0 }
 0x326   :  { %v2133_v49 = vpop.eup %2132  ;;  %v1724_v59 = vmul.f32 %v2247_v51, %v2131_v47  ;;  %v1590_v28 = vmul.f32 1.442695, %v1474_v63  ;;  %v1473_v16 = vmul.f32 0.75, %v1397_v31  ;;  %2144 = vlog2.f32 %v1288_v13  ;;  %v2252_v13 = vld [vmem:[%s5049_s0 + $0x1f0] sm:$0xff]  ;;  %v2253_v63 = vld [vmem:[%s5049_s0 + $0x1a0] sm:$0xff] }
 0x327   :  { %v2135_v25 = vpop.eup %2134  ;;  %v1723_v45 = vmul.f32 %v2248_v7, %v2133_v49  ;;  %2146 = vpow2.f32 %v1610_v8  ;;  %v1165_v34 = vadd.f32 %v1101_v42, %v5626_v23 }
 0x328   :  { %v2137_v17 = vpop.eup %2136  ;;  %1788 = vst [vmem:[%s5050_s1 + $0x170] sm:$0xff] %v1724_v59  ;;  %2148 = vrcp.f32 %v2135_v25  ;;  %v1588_v1 = vmul.f32 1.442695, %v1473_v16  ;;  %v2255_v25 = vld [vmem:[%s5049_s0 + $0x1b8] sm:$0xff] }
 0x329   :  { %v2139_v58 = vpop.eup %2138  ;;  %1787 = vst [vmem:[%s5050_s1 + $0x168] sm:$0xff] %v1723_v45  ;;  %2150 = vrcp.f32 %v2137_v17  ;;  %v1229_v27 = vmul.f32 2e-05, %v1165_v34  ;;  %v2257_v34 = vld [vmem:[%s5049_s0 + $0x1d0] sm:$0xff] }
 0x32a   :  { %v2141_v50 = vpop.eup %2140  ;;  %2152 = vpow2.f32 %v1590_v28  ;;  %v1405_v21 = vmul.f32 0.6931472, %v2139_v58  ;;  %v2256_v58 = vld [vmem:[%s5049_s0 + $0x1b0] sm:$0xff] }
 0x32b   :  { %v2143_v19 = vpop.eup %2142  ;;  %2154 = vpow2.f32 %v1588_v1  ;;  %v1403_v10 = vmul.f32 0.6931472, %v2141_v50  ;;  %v1293_v46 = vadd.f32 2.0, %v1229_v27 }
 0x32c   :  { %v2145_v60 = vpop.eup %2144  ;;  %v1737_v32 = vmul.f32 %v2249_v3, %v2143_v19  ;;  %v1477_v20 = vmul.f32 0.75, %v1405_v21  ;;  %2156 = vlog2.f32 %v1287_v38 }
 0x32d   :  { %v2147_v61 = vpop.eup %2146  ;;  %v1476_v48 = vmul.f32 0.75, %v1403_v10  ;;  %v1411_v52 = vmul.f32 0.6931472, %v2145_v60  ;;  %2158 = vlog2.f32 %v1291_v18  ;;  %v2258_v10 = vld [vmem:[%s5049_s0 + $0x1c8] sm:$0xff] }
 0x32e   :  { %v2149_v55 = vpop.eup %2148  ;;  %1801 = vst [vmem:[%s5050_s1 + $0x1d8] sm:$0xff] %v1737_v32  ;;  %2160 = vrcp.f32 %v2147_v61  ;;  %v1596_v14 = vmul.f32 1.442695, %v1477_v20  ;;  %v2259_v20 = vld [vmem:[%s5049_s0 + $0x1e8] sm:$0xff] }
 0x32f   :  { %v2151_v39 = vpop.eup %2150  ;;  %v1727_v43 = vmul.f32 %v2250_v36, %v2149_v55  ;;  %v1594_v0 = vmul.f32 1.442695, %v1476_v48  ;;  %v1480_v9 = vmul.f32 0.75, %v1411_v52  ;;  %2162 = vlog2.f32 %v1290_v2  ;;  %v2260_v48 = vld [vmem:[%s5049_s0 + $0x1e0] sm:$0xff]  ;;  %v2261_v55 = vld [vmem:[%s5049_s0 + $0x1f8] sm:$0xff] }
 0x330   :  { %v2153_v37 = vpop.eup %2152  ;;  %v1726_v15 = vmul.f32 %v2251_v54, %v2151_v39  ;;  %2164 = vpow2.f32 %v1596_v14 }
 0x331   :  { %v2155_v44 = vpop.eup %2154  ;;  %1791 = vst [vmem:[%s5050_s1 + $0x188] sm:$0xff] %v1727_v43  ;;  %2166 = vrcp.f32 %v2153_v37  ;;  %v1602_v22 = vmul.f32 1.442695, %v1480_v9 }
 0x332   :  { %v2157_v29 = vpop.eup %2156  ;;  %1790 = vst [vmem:[%s5050_s1 + $0x180] sm:$0xff] %v1726_v15  ;;  %2168 = vrcp.f32 %v2155_v44 }
 0x333   :  { %v2159_v12 = vpop.eup %2158  ;;  %2170 = vpow2.f32 %v1594_v0  ;;  %v1409_v53 = vmul.f32 0.6931472, %v2157_v29 }
 0x334   :  { %v2161_v62 = vpop.eup %2160  ;;  %2172 = vpow2.f32 %v1602_v22  ;;  %v1417_v4 = vmul.f32 0.6931472, %v2159_v12 }
 0x335   :  { %v2163_v6 = vpop.eup %2162  ;;  %v1740_v40 = vmul.f32 %v2252_v13, %v2161_v62  ;;  %v1479_v11 = vmul.f32 0.75, %v1409_v53  ;;  %2174 = vlog2.f32 %v1293_v46 }
 0x336   :  { %v2165_v41 = vpop.eup %2164  ;;  %v1483_v57 = vmul.f32 0.75, %v1417_v4  ;;  %v1415_v26 = vmul.f32 0.6931472, %v2163_v6 }
 0x337   :  { %v2167_v35 = vpop.eup %2166  ;;  %1804 = vst [vmem:[%s5050_s1 + $0x1f0] sm:$0xff] %v1740_v40  ;;  %2176 = vrcp.f32 %v2165_v41  ;;  %v1600_v30 = vmul.f32 1.442695, %v1479_v11 }
 0x338   :  { %v2169_v24 = vpop.eup %2168  ;;  %v1730_v31 = vmul.f32 %v2253_v63, %v2167_v35  ;;  %v1608_v56 = vmul.f32 1.442695, %v1483_v57  ;;  %v1482_v47 = vmul.f32 0.75, %v1415_v26 }
 0x339   :  { %v2171_v8 = vpop.eup %2170  ;;  %v1729_v42 = vmul.f32 %v2254_v33, %v2169_v24  ;;  %2178 = vpow2.f32 %v1600_v30 }
 0x33a   :  { %v2173_v49 = vpop.eup %2172  ;;  %1794 = vst [vmem:[%s5050_s1 + $0x1a0] sm:$0xff] %v1730_v31  ;;  %2180 = vrcp.f32 %v2171_v8  ;;  %v1606_v51 = vmul.f32 1.442695, %v1482_v47 }
 0x33b   :  { %v2175_v59 = vpop.eup %2174  ;;  %1793 = vst [vmem:[%s5050_s1 + $0x198] sm:$0xff] %v1729_v42  ;;  %2182 = vrcp.f32 %v2173_v49 }
 0x33c   :  { %2184 = vpow2.f32 %v1608_v56  ;;  %v1421_v28 = vmul.f32 0.6931472, %v2175_v59 }
 0x33d   :  { %v2177_v16 = vpop.eup %2176  ;;  %2186 = vpow2.f32 %v1606_v51 }
 0x33e   :  { %v1733_v7 = vmul.f32 %v2255_v25, %v2177_v16  ;;  %v1485_v45 = vmul.f32 0.75, %v1421_v28 }
 0x33f   :  { %v2179_v5 = vpop.eup %2178 }
 0x340   :  { %v2181_v17 = vpop.eup %2180  ;;  %1797 = vst [vmem:[%s5050_s1 + $0x1b8] sm:$0xff] %v1733_v7  ;;  %2188 = vrcp.f32 %v2179_v5  ;;  %v1612_v1 = vmul.f32 1.442695, %v1485_v45 }
 0x341   :  { %v2183_v38 = vpop.eup %2182  ;;  %v1732_v18 = vmul.f32 %v2256_v58, %v2181_v17 }
 0x342   :  { %v2185_v23 = vpop.eup %2184  ;;  %v1736_v50 = vmul.f32 %v2257_v34, %v2183_v38  ;;  %2190 = vpow2.f32 %v1612_v1 }
 0x343   :  { %v2187_v21 = vpop.eup %2186  ;;  %1796 = vst [vmem:[%s5050_s1 + $0x1b0] sm:$0xff] %v1732_v18  ;;  %2192 = vrcp.f32 %v2185_v23 }
 0x344   :  { %1800 = vst [vmem:[%s5050_s1 + $0x1d0] sm:$0xff] %v1736_v50  ;;  %2194 = vrcp.f32 %v2187_v21 }
 0x346   :  { %v2189_v19 = vpop.eup %2188 }
 0x347   :  { %v1735_v2 = vmul.f32 %v2258_v10, %v2189_v19 }
 0x348   :  { %v2191_v60 = vpop.eup %2190 }
 0x349   :  { %v2193_v3 = vpop.eup %2192  ;;  %1799 = vst [vmem:[%s5050_s1 + $0x1c8] sm:$0xff] %v1735_v2  ;;  %2196 = vrcp.f32 %v2191_v60 }
 0x34a   :  { %v2195_v32 = vpop.eup %2194  ;;  %v1739_v61 = vmul.f32 %v2259_v20, %v2193_v3 }
 0x34b   :  { %v1738_v52 = vmul.f32 %v2260_v48, %v2195_v32 }
 0x34c   :  { %1803 = vst [vmem:[%s5050_s1 + $0x1e8] sm:$0xff] %v1739_v61 }
 0x34d   :  { %1802 = vst [vmem:[%s5050_s1 + $0x1e0] sm:$0xff] %v1738_v52 }
 0x34f   :  { %v2197_v27 = vpop.eup %2196 }
 0x350   :  { %v1741_v14 = vmul.f32 %v2261_v55, %v2197_v27 }
 0x352   :  { %1805 = vst [vmem:[%s5050_s1 + $0x1f8] sm:$0xff] %v1741_v14 }

// kernel: conv_block_forward.3
= control target key start
LH: loop header
LB: loop body
LE: loop exit
PB: predicated region body
PF: predicated region fallthrough
CT: control target
= control target key end

     0   :  { %s3414_s12 = smov 0   ;;  %s3416_s13 = smov 0   ;;  %s4585_s0 = inlined_call_operand.vmem [shape: f32[2,18,18,4], index: 0, kind: input, shape index: {}]   ;;  %s4586_s1 = inlined_call_operand.vmem [shape: f32[3,3,4,128], index: 1, kind: input, shape index: {}]   ;;  %s4587_s2 = inlined_call_operand.vmem [shape: f32[1,128], index: 2, kind: input, shape index: {}]   ;;  %s4588_s3 = inlined_call_operand.vmem [shape: f32[2,256,128], index: 3, kind: output, shape index: {}]  }
   0x1   :  { %s3418_s14 = smov 0  }
   0x2 LB: > { %s25_s15 = sadd.s32 1, %s3388_s13  ;;  %p2837_p0 = scmp.ge.s32.totalorder %s3392_s14, 1  ;;  %s3392_s14 = sphi %s3418_s14, %s13_s14   ;;  %s3388_s13 = sphi %s3416_s13, %s4704_s13   ;;  %s3384_s12 = sphi %s3414_s12, %s4703_s12  }
   0x3   : > { %p27_p1 = scmp.ge.s32.totalorder %s25_s15, 2  ;;  %p151_p2 = scmp.lt.s32.totalorder %s3392_s14, 3 }
   0x5   : > { %s4706_s15 = smov (%p27_p1, %s25_s15), 0  ;;  %p152_p3 = pnand %p2837_p0, %p151_p2 }
   0x7   : > { %155 = sbr.rel (%p152_p3) target bundleno = 731 (0x2db), region = 32 }
   0xc   : > { %v2841_v0 = vld [vmem:[%s4586_s1 + $0x4] sm:$0xf]  ;;  %vm361_vm0 = vcmask 1043456   ;;  %p179_p4 = scmp.lt.s32.totalorder %s3384_s12, 1  ;;  %v2908_v1 = vld [vmem:[%s4586_s1 + $0x8] sm:$0xf] }
   0xd   : > { %3341 = vmatpush.msk.msra.mxu1 %vm361_vm0, %v2841_v0  ;;  %3342 = vmatpush.msk.msra.mxu2 %vm361_vm0, %v2841_v0  ;;  %v2974_v2 = vld [vmem:[%s4586_s1 + $0xc] sm:$0xf]  ;;  %v229_v3 = vld [vmem:[%s4586_s1] sm:$0xf]  ;;  %v3040_v4 = vld [vmem:[%s4586_s1 + $0x10] sm:$0xf] }
   0xe   : > { %s4708_s12 = smov (!%p179_p4, %s3384_s12), 1  ;;  %3343 = vmatpush.msk.msra.mxu3 %vm361_vm0, %v2841_v0  ;;  %2842 = vmatpush.msk.msra.mxu0 %vm361_vm0, %v2841_v0  ;;  %vm264_vm1 = vcmask 31744   ;;  %v3172_v25 = vld [vmem:[%s4586_s1 + $0x18] sm:$0xf]  ;;  %v3238_v26 = vld [vmem:[%s4586_s1 + $0x1c] sm:$0xf] }
   0xf   : > { %2909 = vmatpush.msk.msrb.mxu2 %vm361_vm0, %v2908_v1  ;;  %2875 = vmatpush.msk.msrb.mxu1 %vm361_vm0, %v229_v3  ;;  %s3344_s26 = smul.u32 432, %s4708_s12  ;;  %v3106_v27 = vld [vmem:[%s4586_s1 + $0x14] sm:$0xf]  ;;  %v3304_v32 = vld [vmem:[%s4586_s1 + $0x20] sm:$0xf]  ;;  %s3340_s17 = sshll.u32 %s4708_s12, 8 }
  0x10   : > { %2975 = vmatpush.msk.msrb.mxu3 %vm361_vm0, %v2974_v2  ;;  %3041 = vmatpush.msk.msrb.mxu0 %vm361_vm0, %v3040_v4  ;;  %s4371_s12 = scalar_lea.vmem %s4588_s3, %s3340_s17 }
  0x11   : > { %s3461_s29 = scalar_lea.vmem %s4585_s0, %s3344_s26 }
  0x12   : > { %v3464_v5 = vld [vmem:[%s3461_s29 + $0x61] sm:$0xff]  ;;  %v3481_v9 = vld [vmem:[%s3461_s29 + $0x69] sm:$0xff]  ;;  %v3498_v13 = vld [vmem:[%s3461_s29 + $0x79] sm:$0xff] }
  0x13   : > { %v3467_v6 = vld [vmem:[%s3461_s29 + $0xc1] sm:$0xff]  ;;  %2851 = vmatmul.msk.f32.vlgmr.msra.gmra.mxu1 %vm264_vm1, %v3464_v5  ;;  %v3484_v10 = vld [vmem:[%s3461_s29 + $0xc9] sm:$0xff]  ;;  %v3501_v14 = vld [vmem:[%s3461_s29 + $0xd9] sm:$0xff] }
  0x14   : > { %v3470_v7 = vld [vmem:[%s3461_s29 + $0x121] sm:$0xff]  ;;  %2859 = vmatmul.msk.f32.vlgmr.msra.gmra.mxu2 %vm264_vm1, %v3467_v6  ;;  %v3487_v11 = vld [vmem:[%s3461_s29 + $0x129] sm:$0xff]  ;;  %v3504_v15 = vld [vmem:[%s3461_s29 + $0x139] sm:$0xff]  ;;  %3107 = vmatpush.msk.msra.mxu1 %vm361_vm0, %v3106_v27 }
  0x15   : > { %v230_v8 = vld [vmem:[%s3461_s29 + $0x1] sm:$0xff]  ;;  %2867 = vmatmul.msk.f32.vlgmr.msra.gmra.mxu3 %vm264_vm1, %v3470_v7  ;;  %v231_v12 = vld [vmem:[%s3461_s29 + $0x9] sm:$0xff]  ;;  %v232_v16 = vld [vmem:[%s3461_s29 + $0x19] sm:$0xff]  ;;  %3173 = vmatpush.msk.msra.mxu2 %vm361_vm0, %v3172_v25 }
  0x16   : > { %2843 = vmatmul.msk.f32.vlgmr.msra.gmra.mxu0 %vm264_vm1, %v230_v8  ;;  %v3515_v17 = vld [vmem:[%s3461_s29 + $0x81] sm:$0xff]  ;;  %v3532_v21 = vld [vmem:[%s3461_s29 + $0x91] sm:$0xff]  ;;  %3239 = vmatpush.msk.msra.mxu3 %vm361_vm0, %v3238_v26  ;;  %v3564_v28 = vld [vmem:[%s3461_s29 + $0x99] sm:$0xff] }
  0x17   : > { %v3518_v18 = vld [vmem:[%s3461_s29 + $0xe1] sm:$0xff]  ;;  %v3535_v22 = vld [vmem:[%s3461_s29 + $0xf1] sm:$0xff]  ;;  %v3567_v29 = vld [vmem:[%s3461_s29 + $0xf9] sm:$0xff]  ;;  %3305 = vmatpush.msk.msra.mxu0 %vm361_vm0, %v3304_v32 }
  0x18   : > { %v3521_v19 = vld [vmem:[%s3461_s29 + $0x141] sm:$0xff]  ;;  %v3538_v23 = vld [vmem:[%s3461_s29 + $0x151] sm:$0xff]  ;;  %v3570_v30 = vld [vmem:[%s3461_s29 + $0x159] sm:$0xff] }
  0x19   : > { %v233_v20 = vld [vmem:[%s3461_s29 + $0x21] sm:$0xff]  ;;  %v3541_v24 = vld [vmem:[%s3461_s29 + $0x31] sm:$0xff]  ;;  %v3573_v31 = vld [vmem:[%s3461_s29 + $0x39] sm:$0xff] }
  0x1a   : > { %v3588_v33 = vld [vmem:[%s3461_s29 + $0xa9] sm:$0xff]  ;;  %v3608_v37 = vld [vmem:[%s3461_s29 + $0xb1] sm:$0xff]  ;;  %v197_v41 = vld [vmem:[%s3461_s29] sm:$0xff] }
  0x1b   : > { %2852 = vmatmul.msk.f32.gmra.mxu1 %vm264_vm1, %v3481_v9  ;;  %v3591_v34 = vld [vmem:[%s3461_s29 + $0x109] sm:$0xff]  ;;  %v3611_v38 = vld [vmem:[%s3461_s29 + $0x111] sm:$0xff]  ;;  %v2943_v46 = vld [vmem:[%s3461_s29 + $0x20] sm:$0xff] }
  0x1c   : > { %2860 = vmatmul.msk.f32.gmra.mxu2 %vm264_vm1, %v3484_v10  ;;  %v3594_v35 = vld [vmem:[%s3461_s29 + $0x169] sm:$0xff]  ;;  %v3614_v39 = vld [vmem:[%s3461_s29 + $0x171] sm:$0xff]  ;;  %v3642_v47 = vld [vmem:[%s3461_s29 + $0x1a] sm:$0xff] }
  0x1d   : > { %2868 = vmatmul.msk.f32.gmra.mxu3 %vm264_vm1, %v3487_v11  ;;  %v3597_v36 = vld [vmem:[%s3461_s29 + $0x49] sm:$0xff]  ;;  %v3617_v40 = vld [vmem:[%s3461_s29 + $0x51] sm:$0xff]  ;;  %v3682_v53 = vld [vmem:[%s3461_s29 + $0x3a] sm:$0xff] }
  0x1e   : > { %2844 = vmatmul.msk.f32.gmra.mxu0 %vm264_vm1, %v231_v12  ;;  %v690_v42 = vld [vmem:[%s3461_s29 + $0x2] sm:$0xff]  ;;  %v2942_v43 = vld [vmem:[%s3461_s29 + $0x18] sm:$0xff]  ;;  %v691_v45 = vld [vmem:[%s3461_s29 + $0xa] sm:$0xff] }
  0x1f   : > { %v198_v44 = vld [vmem:[%s3461_s29 + $0x8] sm:$0xff]  ;;  %v3645_v48 = vld [vmem:[%s3461_s29 + $0x30] sm:$0xff]  ;;  %v3658_v50 = vld [vmem:[%s3461_s29 + $0x38] sm:$0xff] }
  0x20   : > { %v3655_v49 = vld [vmem:[%s3461_s29 + $0x22] sm:$0xff]  ;;  %v3668_v51 = vld [vmem:[%s3461_s29 + $0x32] sm:$0xff]  ;;  %v3696_v55 = vld [vmem:[%s3461_s29 + $0x4a] sm:$0xff] }
  0x21   : > { %v3671_v52 = vld [vmem:[%s3461_s29 + $0x48] sm:$0xff]  ;;  %v3685_v54 = vld [vmem:[%s3461_s29 + $0x50] sm:$0xff]  ;;  %v3699_v56 = vld [vmem:[%s3461_s29 + $0x60] sm:$0xff] }
  0x22   : > { %v3710_v57 = vld [vmem:[%s3461_s29 + $0x52] sm:$0xff]  ;;  %v3713_v58 = vld [vmem:[%s3461_s29 + $0x68] sm:$0xff]  ;;  %v3751_v3 = vld [vmem:[%s3461_s29 + $0x80] sm:$0xff] }
  0x23   : > { %2853 = vmatmul.msk.f32.gmra.mxu1 %vm264_vm1, %v3498_v13  ;;  %4615 = vst [vmem:[#allocation2_spill] sm:$0xff] %v3713_v58  ;;  %v3726_v60 = vld [vmem:[%s3461_s29 + $0x62] sm:$0xff]  ;;  %v3729_v61 = vld [vmem:[%s3461_s29 + $0x78] sm:$0xff]  ;;  %v3748_v2 = vld [vmem:[%s3461_s29 + $0x6a] sm:$0xff] }
  0x24   : > { %2861 = vmatmul.msk.f32.gmra.mxu2 %vm264_vm1, %v3501_v14  ;;  %4616 = vst [vmem:[#allocation3_spill] sm:$0xff] %v3729_v61  ;;  %v3770_v12 = vld [vmem:[%s3461_s29 + $0x7a] sm:$0xff]  ;;  %v3792_v26 = vld [vmem:[%s3461_s29 + $0x82] sm:$0xff] }
  0x25   : > { %2869 = vmatmul.msk.f32.gmra.mxu3 %vm264_vm1, %v3504_v15  ;;  %4618 = vst [vmem:[#allocation5_spill] sm:$0xff] %v3748_v2  ;;  %v3795_v27 = vld [vmem:[%s3461_s29 + $0x98] sm:$0xff] }
  0x26   : > { %2845 = vmatmul.msk.f32.gmra.mxu0 %vm264_vm1, %v232_v16  ;;  %4619 = vst [vmem:[#allocation6_spill] sm:$0xff] %v3751_v3 }
  0x27   : > { %4621 = vst [vmem:[#allocation8_spill] sm:$0xff] %v3770_v12 }
  0x28   : > { %4624 = vst [vmem:[#allocation11_spill] sm:$0xff] %v3792_v26 }
  0x29   : > { %4625 = vst [vmem:[#allocation12_spill] sm:$0xff] %v3795_v27 }
  0x2b   : > { %2854 = vmatmul.msk.f32.gmra.mxu1 %vm264_vm1, %v3515_v17 }
  0x2c   : > { %2862 = vmatmul.msk.f32.gmra.mxu2 %vm264_vm1, %v3518_v18 }
  0x2d   : > { %2870 = vmatmul.msk.f32.gmra.mxu3 %vm264_vm1, %v3521_v19 }
  0x2e   : > { %2846 = vmatmul.msk.f32.gmra.mxu0 %vm264_vm1, %v233_v20 }
  0x33   : > { %2855 = vmatmul.msk.f32.gmra.mxu1 %vm264_vm1, %v3532_v21 }
  0x34   : > { %2863 = vmatmul.msk.f32.gmra.mxu2 %vm264_vm1, %v3535_v22 }
  0x35   : > { %2871 = vmatmul.msk.f32.gmra.mxu3 %vm264_vm1, %v3538_v23 }
  0x36   : > { %2847 = vmatmul.msk.f32.gmra.mxu0 %vm264_vm1, %v3541_v24 }
  0x3b   : > { %2856 = vmatmul.msk.f32.gmra.mxu1 %vm264_vm1, %v3564_v28 }
  0x3c   : > { %2864 = vmatmul.msk.f32.gmra.mxu2 %vm264_vm1, %v3567_v29 }
  0x3d   : > { %2872 = vmatmul.msk.f32.gmra.mxu3 %vm264_vm1, %v3570_v30 }
  0x3e   : > { %2848 = vmatmul.msk.f32.gmra.mxu0 %vm264_vm1, %v3573_v31 }
  0x43   : > { %2857 = vmatmul.msk.f32.gmra.mxu1 %vm264_vm1, %v3588_v33 }
  0x44   : > { %2865 = vmatmul.msk.f32.gmra.mxu2 %vm264_vm1, %v3591_v34 }
  0x45   : > { %2873 = vmatmul.msk.f32.gmra.mxu3 %vm264_vm1, %v3594_v35 }
  0x46   : > { %2849 = vmatmul.msk.f32.gmra.mxu0 %vm264_vm1, %v3597_v36 }
  0x4b   : > { %2858 = vmatmul.msk.f32.gmra.mxu1 %vm264_vm1, %v3608_v37 }
  0x4c   : > { %2866 = vmatmul.msk.f32.gmra.mxu2 %vm264_vm1, %v3611_v38 }
  0x4d   : > { %2874 = vmatmul.msk.f32.gmra.mxu3 %vm264_vm1, %v3614_v39 }
  0x4e   : > { %2850 = vmatmul.msk.f32.gmra.mxu0 %vm264_vm1, %v3617_v40 }
  0x53   : > { %2876 = vmatmul.msk.f32.vlgmr.msrb.gmra.mxu1 %vm264_vm1, %v197_v41 }
  0x54   : > { %2910 = vmatmul.msk.f32.vlgmr.msrb.gmra.mxu2 %vm264_vm1, %v690_v42 }
  0x55   : > { %2976 = vmatmul.msk.f32.vlgmr.msrb.gmra.mxu3 %vm264_vm1, %v2942_v43 }
  0x56   : > { %3042 = vmatmul.msk.f32.vlgmr.msrb.gmra.mxu0 %vm264_vm1, %v232_v16 }
  0x5b   : > { %2877 = vmatmul.msk.f32.gmra.mxu1 %vm264_vm1, %v198_v44  ;;  %v3817_v44 = vld [vmem:[%s3461_s29 + $0xa8] sm:$0xff] }
  0x5c   : > { %2911 = vmatmul.msk.f32.gmra.mxu2 %vm264_vm1, %v691_v45  ;;  %4628 = vst [vmem:[#allocation15_spill] sm:$0xff] %v3817_v44 }
  0x5d   : > { %2977 = vmatmul.msk.f32.gmra.mxu3 %vm264_vm1, %v2943_v46 }
  0x5e   : > { %3043 = vmatmul.msk.f32.gmra.mxu0 %vm264_vm1, %v233_v20 }
  0x63   : > { %2878 = vmatmul.msk.f32.gmra.mxu1 %vm264_vm1, %v2942_v43  ;;  %v3814_v43 = vld [vmem:[%s3461_s29 + $0x92] sm:$0xff] }
  0x64   : > { %2912 = vmatmul.msk.f32.gmra.mxu2 %vm264_vm1, %v3642_v47  ;;  %4627 = vst [vmem:[#allocation14_spill] sm:$0xff] %v3814_v43 }
  0x65   : > { %2978 = vmatmul.msk.f32.gmra.mxu3 %vm264_vm1, %v3645_v48 }
  0x66   : > { %3044 = vmatmul.msk.f32.gmra.mxu0 %vm264_vm1, %v3541_v24 }
  0x6b   : > { %2879 = vmatmul.msk.f32.gmra.mxu1 %vm264_vm1, %v2943_v46 }
  0x6c   : > { %2913 = vmatmul.msk.f32.gmra.mxu2 %vm264_vm1, %v3655_v49 }
  0x6d   : > { %2979 = vmatmul.msk.f32.gmra.mxu3 %vm264_vm1, %v3658_v50 }
  0x6e   : > { %3045 = vmatmul.msk.f32.gmra.mxu0 %vm264_vm1, %v3573_v31 }
  0x73   : > { %2880 = vmatmul.msk.f32.gmra.mxu1 %vm264_vm1, %v3645_v48 }
  0x74   : > { %2914 = vmatmul.msk.f32.gmra.mxu2 %vm264_vm1, %v3668_v51 }
  0x75   : > { %2980 = vmatmul.msk.f32.gmra.mxu3 %vm264_vm1, %v3671_v52 }
  0x76   : > { %3046 = vmatmul.msk.f32.gmra.mxu0 %vm264_vm1, %v3597_v36 }
  0x7b   : > { %2881 = vmatmul.msk.f32.gmra.mxu1 %vm264_vm1, %v3658_v50 }
  0x7c   : > { %2915 = vmatmul.msk.f32.gmra.mxu2 %vm264_vm1, %v3682_v53 }
  0x7d   : > { %2981 = vmatmul.msk.f32.gmra.mxu3 %vm264_vm1, %v3685_v54 }
  0x7e   : > { %3047 = vmatmul.msk.f32.gmra.mxu0 %vm264_vm1, %v3617_v40 }
  0x83   : > { %2882 = vmatmul.msk.f32.gmra.mxu1 %vm264_vm1, %v3671_v52 }
  0x84   : > { %2916 = vmatmul.msk.f32.gmra.mxu2 %vm264_vm1, %v3696_v55 }
  0x85   : > { %2982 = vmatmul.msk.f32.gmra.mxu3 %vm264_vm1, %v3699_v56 }
  0x86   : > { %3048 = vmatmul.msk.f32.gmra.mxu0 %vm264_vm1, %v3464_v5 }
  0x8b   : > { %2883 = vmatmul.msk.f32.gmra.mxu1 %vm264_vm1, %v3685_v54 }
  0x8c   : > { %2917 = vmatmul.msk.f32.gmra.mxu2 %vm264_vm1, %v3710_v57 }
  0x8d   : > { %2983 = vmatmul.msk.f32.gmra.mxu3 %vm264_vm1, %v3713_v58 }
  0x8e   : > { %3049 = vmatmul.msk.f32.gmra.mxu0 %vm264_vm1, %v3481_v9 }
  0x90   : > { %v3723_v59 = vpop.f32.mrf.mxu1 }
  0x93   : > { %v3731_v62 = vpop.f32.mrf.mxu0  ;;  %2884 = vmatmul.msk.f32.gmra.mxu1 %vm264_vm1, %v3699_v56 }
  0x94   : > { %2918 = vmatmul.msk.f32.gmra.mxu2 %vm264_vm1, %v3726_v60 }
  0x95   : > { %2984 = vmatmul.msk.f32.gmra.mxu3 %vm264_vm1, %v3729_v61 }
  0x96   : > { %3050 = vmatmul.msk.f32.gmra.mxu0 %vm264_vm1, %v3498_v13  ;;  %v3773_v13 = vld [vmem:[%s3461_s29 + $0x90] sm:$0xff] }
  0x97   : > { %v3741_v63 = vpop.f32.mrf.mxu2  ;;  %4622 = vst [vmem:[#allocation9_spill] sm:$0xff] %v3773_v13 }
  0x98   : > { %v3743_v0 = vpop.f32.mrf.mxu3  ;;  %v3745_v1 = vpop.f32.mrf.mxu1 }
  0x99   : > { %4617 = vst [vmem:[#allocation4_spill] sm:$0xff] %v3743_v0 }
  0x9b   : > { %v3753_v4 = vpop.f32.mrf.mxu0  ;;  %2885 = vmatmul.msk.f32.gmra.mxu1 %vm264_vm1, %v3713_v58  ;;  %v3918_v58 = vld [vmem:[%s3461_s29 + $0xe0] sm:$0xff] }
  0x9c   : > { %2919 = vmatmul.msk.f32.gmra.mxu2 %vm264_vm1, %v3748_v2  ;;  %v3915_v2 = vld [vmem:[%s3461_s29 + $0xca] sm:$0xff] }
  0x9d   : > { %2985 = vmatmul.msk.f32.gmra.mxu3 %vm264_vm1, %v3751_v3 }
  0x9e   : > { %3051 = vmatmul.msk.f32.gmra.mxu0 %vm264_vm1, %v3515_v17 }
  0x9f   : > { %v3763_v5 = vpop.f32.mrf.mxu2 }
  0xa0   : > { %v3765_v8 = vpop.f32.mrf.mxu3  ;;  %v3767_v9 = vpop.f32.mrf.mxu1 }
  0xa1   : > { %4620 = vst [vmem:[#allocation7_spill] sm:$0xff] %v3765_v8  ;;  %v3839_v8 = vld [vmem:[%s3461_s29 + $0xb0] sm:$0xff] }
  0xa2   : > { %4632 = vst [vmem:[#allocation19_spill] sm:$0xff] %v3839_v8 }
  0xa3   : > { %v3775_v16 = vpop.f32.mrf.mxu0  ;;  %2886 = vmatmul.msk.f32.gmra.mxu1 %vm264_vm1, %v3729_v61  ;;  %v3903_v61 = vld [vmem:[%s3461_s29 + $0xd8] sm:$0xff] }
  0xa4   : > { %2920 = vmatmul.msk.f32.gmra.mxu2 %vm264_vm1, %v3770_v12 }
  0xa5   : > { %2986 = vmatmul.msk.f32.gmra.mxu3 %vm264_vm1, %v3773_v13 }
  0xa6   : > { %3052 = vmatmul.msk.f32.gmra.mxu0 %vm264_vm1, %v3532_v21 }
  0xa7   : > { %v3785_v17 = vpop.f32.mrf.mxu2 }
  0xa8   : > { %v3787_v20 = vpop.f32.mrf.mxu3  ;;  %v3789_v25 = vpop.f32.mrf.mxu1 }
  0xa9   : > { %4623 = vst [vmem:[#allocation10_spill] sm:$0xff] %v3787_v20  ;;  %v3836_v20 = vld [vmem:[%s3461_s29 + $0x9a] sm:$0xff] }
  0xaa   : > { %4631 = vst [vmem:[#allocation18_spill] sm:$0xff] %v3836_v20 }
  0xab   : > { %v3797_v32 = vpop.f32.mrf.mxu0  ;;  %2887 = vmatmul.msk.f32.gmra.mxu1 %vm264_vm1, %v3751_v3  ;;  %v3880_v3 = vld [vmem:[%s3461_s29 + $0xb2] sm:$0xff] }
  0xac   : > { %2921 = vmatmul.msk.f32.gmra.mxu2 %vm264_vm1, %v3792_v26  ;;  %4639 = vst [vmem:[#allocation26_spill] sm:$0xff] %v3880_v3 }
  0xad   : > { %2987 = vmatmul.msk.f32.gmra.mxu3 %vm264_vm1, %v3795_v27 }
  0xae   : > { %3053 = vmatmul.msk.f32.gmra.mxu0 %vm264_vm1, %v3564_v28 }
  0xaf   : > { %v3807_v21 = vpop.f32.mrf.mxu2 }
  0xb0   : > { %v3809_v41 = vpop.f32.mrf.mxu3  ;;  %v3811_v42 = vpop.f32.mrf.mxu1 }
  0xb1   : > { %4626 = vst [vmem:[#allocation13_spill] sm:$0xff] %v3809_v41 }
  0xb3   : > { %v3819_v45 = vpop.f32.mrf.mxu0  ;;  %2888 = vmatmul.msk.f32.gmra.mxu1 %vm264_vm1, %v3773_v13  ;;  %v3858_v13 = vld [vmem:[%s3461_s29 + $0xaa] sm:$0xff] }
  0xb4   : > { %2922 = vmatmul.msk.f32.gmra.mxu2 %vm264_vm1, %v3814_v43  ;;  %4635 = vst [vmem:[#allocation22_spill] sm:$0xff] %v3858_v13 }
  0xb5   : > { %2988 = vmatmul.msk.f32.gmra.mxu3 %vm264_vm1, %v3817_v44 }
  0xb6   : > { %3054 = vmatmul.msk.f32.gmra.mxu0 %vm264_vm1, %v3588_v33 }
  0xb7   : > { %v3829_v28 = vpop.f32.mrf.mxu2 }
  0xb8   : > { %4629 = vst [vmem:[#allocation16_spill] sm:$0xff] %v3829_v28  ;;  %v3831_v46 = vpop.f32.mrf.mxu3  ;;  %v3833_v41 = vpop.f32.mrf.mxu1 }
  0xb9   : > { %4630 = vst [vmem:[#allocation17_spill] sm:$0xff] %v3831_v46 }
  0xbb   : > { %v3841_v0 = vpop.f32.mrf.mxu0  ;;  %2889 = vmatmul.msk.f32.gmra.mxu1 %vm264_vm1, %v3795_v27  ;;  %v3861_v27 = vld [vmem:[%s3461_s29 + $0xc0] sm:$0xff] }
  0xbc   : > { %2923 = vmatmul.msk.f32.gmra.mxu2 %vm264_vm1, %v3836_v20  ;;  %4636 = vst [vmem:[#allocation23_spill] sm:$0xff] %v3861_v27 }
  0xbd   : > { %2989 = vmatmul.msk.f32.gmra.mxu3 %vm264_vm1, %v3839_v8 }
  0xbe   : > { %3055 = vmatmul.msk.f32.gmra.mxu0 %vm264_vm1, %v3608_v37 }
  0xbf   : > { %v3851_v33 = vpop.f32.mrf.mxu2 }
  0xc0   : > { %4633 = vst [vmem:[#allocation20_spill] sm:$0xff] %v3851_v33  ;;  %v3853_v46 = vpop.f32.mrf.mxu3  ;;  %v3855_v43 = vpop.f32.mrf.mxu1 }
  0xc1   : > { %4634 = vst [vmem:[#allocation21_spill] sm:$0xff] %v3853_v46 }
  0xc3   : > { %v3863_v26 = vpop.f32.mrf.mxu0  ;;  %2890 = vmatmul.msk.f32.gmra.mxu1 %vm264_vm1, %v3817_v44  ;;  %v3883_v44 = vld [vmem:[%s3461_s29 + $0xc8] sm:$0xff] }
  0xc4   : > { %2924 = vmatmul.msk.f32.gmra.mxu2 %vm264_vm1, %v3858_v13 }
  0xc5   : > { %2990 = vmatmul.msk.f32.gmra.mxu3 %vm264_vm1, %v3861_v27 }
  0xc6   : > { %3056 = vmatmul.msk.f32.gmra.mxu0 %vm264_vm1, %v3467_v6 }
  0xc7   : > { %v3873_v37 = vpop.f32.mrf.mxu2 }
  0xc8   : > { %4637 = vst [vmem:[#allocation24_spill] sm:$0xff] %v3873_v37  ;;  %v3875_v46 = vpop.f32.mrf.mxu3  ;;  %v3877_v20 = vpop.f32.mrf.mxu1  ;;  %v3900_v37 = vld [vmem:[%s3461_s29 + $0xc2] sm:$0xff] }
  0xc9   : > { %4638 = vst [vmem:[#allocation25_spill] sm:$0xff] %v3875_v46 }
  0xca   : > { %4642 = vst [vmem:[#allocation29_spill] sm:$0xff] %v3900_v37 }
  0xcb   : > { %v3885_v12 = vpop.f32.mrf.mxu0  ;;  %2891 = vmatmul.msk.f32.gmra.mxu1 %vm264_vm1, %v3839_v8 }
  0xcc   : > { %2925 = vmatmul.msk.f32.gmra.mxu2 %vm264_vm1, %v3880_v3 }
  0xcd   : > { %2991 = vmatmul.msk.f32.gmra.mxu3 %vm264_vm1, %v3883_v44 }
  0xce   : > { %3057 = vmatmul.msk.f32.gmra.mxu0 %vm264_vm1, %v3484_v10 }
  0xcf   : > { %v3895_v6 = vpop.f32.mrf.mxu2 }
  0xd0   : > { %4640 = vst [vmem:[#allocation27_spill] sm:$0xff] %v3895_v6  ;;  %v3897_v46 = vpop.f32.mrf.mxu3  ;;  %v594_v13 = vpop.f32.mrf.mxu1 }
  0xd1   : > { %4641 = vst [vmem:[#allocation28_spill] sm:$0xff] %v3897_v46  ;;  %v595_v10 = vadd.f32 %v594_v13, %v3731_v62 }
  0xd3   : > { %v1399_v8 = vpop.f32.mrf.mxu0  ;;  %2892 = vmatmul.msk.f32.gmra.mxu1 %vm264_vm1, %v3861_v27 }
  0xd4   : > { %2926 = vmatmul.msk.f32.gmra.mxu2 %vm264_vm1, %v3900_v37 }
  0xd5   : > { %2992 = vmatmul.msk.f32.gmra.mxu3 %vm264_vm1, %v3903_v61 }
  0xd6   : > { %3058 = vmatmul.msk.f32.gmra.mxu0 %vm264_vm1, %v3501_v14 }
  0xd7   : > { %v840_v46 = vpop.f32.mrf.mxu2 }
  0xd8   : > { %v936_v3 = vadd.f32 %v840_v46, %v595_v10  ;;  %v1121_v6 = vpop.f32.mrf.mxu3  ;;  %v597_v33 = vpop.f32.mrf.mxu1 }
  0xd9   : > { %v598_v14 = vadd.f32 %v597_v33, %v3753_v4 }
  0xda   : > { %v1217_v27 = vadd.f32 %v1121_v6, %v936_v3  ;;  %v3935_v6 = vld [vmem:[%s3461_s29 + $0xf0] sm:$0xff] }
  0xdb   : > { %v1402_v37 = vpop.f32.mrf.mxu0  ;;  %2893 = vmatmul.msk.f32.gmra.mxu1 %vm264_vm1, %v3883_v44 }
  0xdc   : > { %v3920_v28 = vadd.f32 %v1399_v8, %v1217_v27  ;;  %2927 = vmatmul.msk.f32.gmra.mxu2 %vm264_vm1, %v3915_v2  ;;  %v3932_v27 = vld [vmem:[%s3461_s29 + $0xda] sm:$0xff] }
  0xdd   : > { %2993 = vmatmul.msk.f32.gmra.mxu3 %vm264_vm1, %v3918_v58 }
  0xde   : > { %4643 = vst [vmem:[#allocation30_spill] sm:$0xff] %v3920_v28  ;;  %3059 = vmatmul.msk.f32.gmra.mxu0 %vm264_vm1, %v3518_v18 }
  0xdf   : > { %v843_v62 = vpop.f32.mrf.mxu2 }
  0xe0   : > { %v937_v3 = vadd.f32 %v843_v62, %v598_v14  ;;  %v1124_v13 = vpop.f32.mrf.mxu3  ;;  %v600_v8 = vpop.f32.mrf.mxu1  ;;  %v3949_v62 = vld [vmem:[%s3461_s29 + $0xe2] sm:$0xff] }
  0xe1   : > { %v601_v18 = vadd.f32 %v600_v8, %v3775_v16 }
  0xe2   : > { %v1218_v46 = vadd.f32 %v1124_v13, %v937_v3  ;;  %v3952_v13 = vld [vmem:[%s3461_s29 + $0xf8] sm:$0xff] }
  0xe3   : > { %v1405_v10 = vpop.f32.mrf.mxu0  ;;  %2894 = vmatmul.msk.f32.gmra.mxu1 %vm264_vm1, %v3903_v61 }
  0xe4   : > { %v3937_v28 = vadd.f32 %v1402_v37, %v1218_v46  ;;  %2928 = vmatmul.msk.f32.gmra.mxu2 %vm264_vm1, %v3932_v27 }
  0xe5   : > { %2994 = vmatmul.msk.f32.gmra.mxu3 %vm264_vm1, %v3935_v6 }
  0xe6   : > { %4644 = vst [vmem:[#allocation31_spill] sm:$0xff] %v3937_v28  ;;  %3060 = vmatmul.msk.f32.gmra.mxu0 %vm264_vm1, %v3535_v22 }
  0xe7   : > { %v846_v4 = vpop.f32.mrf.mxu2 }
  0xe8   : > { %v938_v33 = vadd.f32 %v846_v4, %v601_v18  ;;  %v1127_v14 = vpop.f32.mrf.mxu3  ;;  %v603_v37 = vpop.f32.mrf.mxu1  ;;  %v3966_v4 = vld [vmem:[%s3461_s29 + $0xf2] sm:$0xff] }
  0xe9   : > { %v604_v22 = vadd.f32 %v603_v37, %v3797_v32 }
  0xea   : > { %v1219_v3 = vadd.f32 %v1127_v14, %v938_v33  ;;  %v3969_v14 = vld [vmem:[%s3461_s29 + $0x108] sm:$0xff] }
  0xeb   : > { %v1408_v46 = vpop.f32.mrf.mxu0  ;;  %2895 = vmatmul.msk.f32.gmra.mxu1 %vm264_vm1, %v3918_v58 }
  0xec   : > { %v3954_v28 = vadd.f32 %v1405_v10, %v1219_v3  ;;  %2929 = vmatmul.msk.f32.gmra.mxu2 %vm264_vm1, %v3949_v62 }
  0xed   : > { %2995 = vmatmul.msk.f32.gmra.mxu3 %vm264_vm1, %v3952_v13 }
  0xee   : > { %4645 = vst [vmem:[#allocation32_spill] sm:$0xff] %v3954_v28  ;;  %3061 = vmatmul.msk.f32.gmra.mxu0 %vm264_vm1, %v3567_v29 }
  0xef   : > { %v849_v16 = vpop.f32.mrf.mxu2 }
  0xf0   : > { %v939_v8 = vadd.f32 %v849_v16, %v604_v22  ;;  %v1130_v18 = vpop.f32.mrf.mxu3  ;;  %v606_v10 = vpop.f32.mrf.mxu1  ;;  %v3983_v16 = vld [vmem:[%s3461_s29 + $0xfa] sm:$0xff] }
  0xf1   : > { %v607_v29 = vadd.f32 %v606_v10, %v3819_v45 }
  0xf2   : > { %v1220_v33 = vadd.f32 %v1130_v18, %v939_v8  ;;  %v3986_v18 = vld [vmem:[%s3461_s29 + $0x110] sm:$0xff] }
  0xf3   : > { %v1411_v3 = vpop.f32.mrf.mxu0  ;;  %2896 = vmatmul.msk.f32.gmra.mxu1 %vm264_vm1, %v3935_v6 }
  0xf4   : > { %v3971_v28 = vadd.f32 %v1408_v46, %v1220_v33  ;;  %2930 = vmatmul.msk.f32.gmra.mxu2 %vm264_vm1, %v3966_v4 }
  0xf5   : > { %2996 = vmatmul.msk.f32.gmra.mxu3 %vm264_vm1, %v3969_v14 }
  0xf6   : > { %4646 = vst [vmem:[#allocation33_spill] sm:$0xff] %v3971_v28  ;;  %3062 = vmatmul.msk.f32.gmra.mxu0 %vm264_vm1, %v3591_v34 }
  0xf7   : > { %v852_v32 = vpop.f32.mrf.mxu2 }
  0xf8   : > { %v940_v37 = vadd.f32 %v852_v32, %v607_v29  ;;  %v1133_v22 = vpop.f32.mrf.mxu3  ;;  %v609_v46 = vpop.f32.mrf.mxu1  ;;  %v4000_v32 = vld [vmem:[%s3461_s29 + $0x10a] sm:$0xff] }
  0xf9   : > { %v610_v34 = vadd.f32 %v609_v46, %v3841_v0 }
  0xfa   : > { %v1221_v8 = vadd.f32 %v1133_v22, %v940_v37  ;;  %v4003_v22 = vld [vmem:[%s3461_s29 + $0x120] sm:$0xff] }
  0xfb   : > { %v1414_v33 = vpop.f32.mrf.mxu0  ;;  %2897 = vmatmul.msk.f32.gmra.mxu1 %vm264_vm1, %v3952_v13 }
  0xfc   : > { %v3988_v28 = vadd.f32 %v1411_v3, %v1221_v8  ;;  %2931 = vmatmul.msk.f32.gmra.mxu2 %vm264_vm1, %v3983_v16 }
  0xfd   : > { %2997 = vmatmul.msk.f32.gmra.mxu3 %vm264_vm1, %v3986_v18 }
  0xfe   : > { %4647 = vst [vmem:[#allocation34_spill] sm:$0xff] %v3988_v28  ;;  %3063 = vmatmul.msk.f32.gmra.mxu0 %vm264_vm1, %v3611_v38 }
  0xff   : > { %v855_v45 = vpop.f32.mrf.mxu2 }
 0x100   : > { %v941_v10 = vadd.f32 %v855_v45, %v610_v34  ;;  %v1136_v29 = vpop.f32.mrf.mxu3  ;;  %v612_v3 = vpop.f32.mrf.mxu1  ;;  %v4017_v45 = vld [vmem:[%s3461_s29 + $0x112] sm:$0xff] }
 0x101   : > { %v613_v38 = vadd.f32 %v612_v3, %v3863_v26 }
 0x102   : > { %v1222_v37 = vadd.f32 %v1136_v29, %v941_v10  ;;  %v4020_v29 = vld [vmem:[%s3461_s29 + $0x128] sm:$0xff] }
 0x103   : > { %v1417_v8 = vpop.f32.mrf.mxu0  ;;  %2898 = vmatmul.msk.f32.gmra.mxu1 %vm264_vm1, %v3969_v14 }
 0x104   : > { %v4005_v28 = vadd.f32 %v1414_v33, %v1222_v37  ;;  %2932 = vmatmul.msk.f32.gmra.mxu2 %vm264_vm1, %v4000_v32 }
 0x105   : > { %2998 = vmatmul.msk.f32.gmra.mxu3 %vm264_vm1, %v4003_v22 }
 0x106   : > { %4648 = vst [vmem:[#allocation35_spill] sm:$0xff] %v4005_v28  ;;  %3064 = vmatmul.msk.f32.gmra.mxu0 %vm264_vm1, %v3470_v7 }
 0x107   : > { %v858_v0 = vpop.f32.mrf.mxu2 }
 0x108   : > { %v942_v46 = vadd.f32 %v858_v0, %v613_v38  ;;  %v1139_v34 = vpop.f32.mrf.mxu3  ;;  %v615_v33 = vpop.f32.mrf.mxu1  ;;  %v4034_v0 = vld [vmem:[%s3461_s29 + $0x122] sm:$0xff] }
 0x109   : > { %v616_v7 = vadd.f32 %v615_v33, %v3885_v12 }
 0x10a   : > { %v1223_v10 = vadd.f32 %v1139_v34, %v942_v46  ;;  %v4037_v34 = vld [vmem:[%s3461_s29 + $0x138] sm:$0xff] }
 0x10b   : > { %v1420_v37 = vpop.f32.mrf.mxu0  ;;  %2899 = vmatmul.msk.f32.gmra.mxu1 %vm264_vm1, %v3986_v18 }
 0x10c   : > { %v4022_v28 = vadd.f32 %v1417_v8, %v1223_v10  ;;  %2933 = vmatmul.msk.f32.gmra.mxu2 %vm264_vm1, %v4017_v45 }
 0x10d   : > { %2999 = vmatmul.msk.f32.gmra.mxu3 %vm264_vm1, %v4020_v29 }
 0x10e   : > { %4649 = vst [vmem:[#allocation36_spill] sm:$0xff] %v4022_v28  ;;  %3065 = vmatmul.msk.f32.gmra.mxu0 %vm264_vm1, %v3487_v11 }
 0x10f   : > { %v861_v26 = vpop.f32.mrf.mxu2 }
 0x110   : > { %v943_v3 = vadd.f32 %v861_v26, %v616_v7  ;;  %v1142_v38 = vpop.f32.mrf.mxu3  ;;  %v618_v8 = vpop.f32.mrf.mxu1  ;;  %v4051_v26 = vld [vmem:[%s3461_s29 + $0x12a] sm:$0xff] }
 0x111   : > { %v619_v11 = vadd.f32 %v618_v8, %v3723_v59 }
 0x112   : > { %v1224_v46 = vadd.f32 %v1142_v38, %v943_v3  ;;  %v4054_v38 = vld [vmem:[%s3461_s29 + $0x140] sm:$0xff] }
 0x113   : > { %v1423_v10 = vpop.f32.mrf.mxu0  ;;  %2900 = vmatmul.msk.f32.gmra.mxu1 %vm264_vm1, %v4003_v22 }
 0x114   : > { %v4039_v28 = vadd.f32 %v1420_v37, %v1224_v46  ;;  %2934 = vmatmul.msk.f32.gmra.mxu2 %vm264_vm1, %v4034_v0 }
 0x115   : > { %3000 = vmatmul.msk.f32.gmra.mxu3 %vm264_vm1, %v4037_v34 }
 0x116   : > { %4650 = vst [vmem:[#allocation37_spill] sm:$0xff] %v4039_v28  ;;  %3066 = vmatmul.msk.f32.gmra.mxu0 %vm264_vm1, %v3504_v15 }
 0x117   : > { %v864_v12 = vpop.f32.mrf.mxu2 }
 0x118   : > { %v944_v33 = vadd.f32 %v864_v12, %v619_v11  ;;  %v1145_v7 = vpop.f32.mrf.mxu3  ;;  %v621_v37 = vpop.f32.mrf.mxu1  ;;  %v4068_v12 = vld [vmem:[%s3461_s29 + $0x13a] sm:$0xff] }
 0x119   : > { %v622_v15 = vadd.f32 %v621_v37, %v3745_v1 }
 0x11a   : > { %v1225_v3 = vadd.f32 %v1145_v7, %v944_v33  ;;  %v4071_v7 = vld [vmem:[%s3461_s29 + $0x150] sm:$0xff] }
 0x11b   : > { %v1426_v46 = vpop.f32.mrf.mxu0  ;;  %2901 = vmatmul.msk.f32.gmra.mxu1 %vm264_vm1, %v4020_v29 }
 0x11c   : > { %v4056_v28 = vadd.f32 %v1423_v10, %v1225_v3  ;;  %2935 = vmatmul.msk.f32.gmra.mxu2 %vm264_vm1, %v4051_v26 }
 0x11d   : > { %3001 = vmatmul.msk.f32.gmra.mxu3 %vm264_vm1, %v4054_v38 }
 0x11e   : > { %4651 = vst [vmem:[#allocation38_spill] sm:$0xff] %v4056_v28  ;;  %3067 = vmatmul.msk.f32.gmra.mxu0 %vm264_vm1, %v3521_v19 }
 0x11f   : > { %v867_v59 = vpop.f32.mrf.mxu2 }
 0x120   : > { %v945_v8 = vadd.f32 %v867_v59, %v622_v15  ;;  %v1148_v11 = vpop.f32.mrf.mxu3  ;;  %v624_v10 = vpop.f32.mrf.mxu1  ;;  %v4085_v59 = vld [vmem:[%s3461_s29 + $0x142] sm:$0xff] }
 0x121   : > { %v625_v19 = vadd.f32 %v624_v10, %v3767_v9 }
 0x122   : > { %v1226_v33 = vadd.f32 %v1148_v11, %v945_v8  ;;  %v4088_v11 = vld [vmem:[%s3461_s29 + $0x158] sm:$0xff] }
 0x123   : > { %v1429_v3 = vpop.f32.mrf.mxu0  ;;  %2902 = vmatmul.msk.f32.gmra.mxu1 %vm264_vm1, %v4037_v34 }
 0x124   : > { %v4073_v28 = vadd.f32 %v1426_v46, %v1226_v33  ;;  %2936 = vmatmul.msk.f32.gmra.mxu2 %vm264_vm1, %v4068_v12 }
 0x125   : > { %3002 = vmatmul.msk.f32.gmra.mxu3 %vm264_vm1, %v4071_v7 }
 0x126   : > { %4652 = vst [vmem:[#allocation39_spill] sm:$0xff] %v4073_v28  ;;  %3068 = vmatmul.msk.f32.gmra.mxu0 %vm264_vm1, %v3538_v23 }
 0x127   : > { %v870_v1 = vpop.f32.mrf.mxu2 }
 0x128   : > { %v946_v37 = vadd.f32 %v870_v1, %v625_v19  ;;  %v1151_v15 = vpop.f32.mrf.mxu3  ;;  %v627_v46 = vpop.f32.mrf.mxu1  ;;  %v4102_v1 = vld [vmem:[%s3461_s29 + $0x152] sm:$0xff] }
 0x129   : > { %v628_v23 = vadd.f32 %v627_v46, %v3789_v25 }
 0x12a   : > { %v1227_v8 = vadd.f32 %v1151_v15, %v946_v37  ;;  %v4105_v15 = vld [vmem:[%s3461_s29 + $0x168] sm:$0xff] }
 0x12b   : > { %v1432_v33 = vpop.f32.mrf.mxu0  ;;  %2903 = vmatmul.msk.f32.gmra.mxu1 %vm264_vm1, %v4054_v38  ;;  %4654 = vst [vmem:[#allocation41_spill] sm:$0xff] %v4105_v15 }
 0x12c   : > { %v4090_v28 = vadd.f32 %v1429_v3, %v1227_v8  ;;  %2937 = vmatmul.msk.f32.gmra.mxu2 %vm264_vm1, %v4085_v59 }
 0x12d   : > { %3003 = vmatmul.msk.f32.gmra.mxu3 %vm264_vm1, %v4088_v11 }
 0x12e   : > { %4653 = vst [vmem:[#allocation40_spill] sm:$0xff] %v4090_v28  ;;  %3069 = vmatmul.msk.f32.gmra.mxu0 %vm264_vm1, %v3570_v30 }
 0x12f   : > { %v873_v9 = vpop.f32.mrf.mxu2 }
 0x130   : > { %v947_v10 = vadd.f32 %v873_v9, %v628_v23  ;;  %v1154_v19 = vpop.f32.mrf.mxu3  ;;  %v630_v3 = vpop.f32.mrf.mxu1  ;;  %v4119_v9 = vld [vmem:[%s3461_s29 + $0x15a] sm:$0xff] }
 0x131   : > { %v631_v30 = vadd.f32 %v630_v3, %v3811_v42  ;;  %4656 = vst [vmem:[#allocation43_spill] sm:$0xff] %v4119_v9 }
 0x132   : > { %v1228_v37 = vadd.f32 %v1154_v19, %v947_v10  ;;  %v2971_v19 = vld [vmem:[%s3461_s29 + $0x170] sm:$0xff] }
 0x133   : > { %v1435_v8 = vpop.f32.mrf.mxu0  ;;  %2904 = vmatmul.msk.f32.gmra.mxu1 %vm264_vm1, %v4071_v7 }
 0x134   : > { %v4107_v28 = vadd.f32 %v1432_v33, %v1228_v37  ;;  %2938 = vmatmul.msk.f32.gmra.mxu2 %vm264_vm1, %v4102_v1 }
 0x135   : > { %3004 = vmatmul.msk.f32.gmra.mxu3 %vm264_vm1, %v4105_v15 }
 0x136   : > { %4655 = vst [vmem:[#allocation42_spill] sm:$0xff] %v4107_v28  ;;  %3070 = vmatmul.msk.f32.gmra.mxu0 %vm264_vm1, %v3594_v35 }
 0x137   : > { %v876_v25 = vpop.f32.mrf.mxu2 }
 0x138   : > { %v948_v46 = vadd.f32 %v876_v25, %v631_v30  ;;  %v1157_v23 = vpop.f32.mrf.mxu3  ;;  %v633_v33 = vpop.f32.mrf.mxu1 }
 0x139   : > { %v634_v35 = vadd.f32 %v633_v33, %v3833_v41 }
 0x13a   : > { %v1229_v10 = vadd.f32 %v1157_v23, %v948_v46  ;;  %v2972_v23 = vld [vmem:[%s3461_s29 + $0x180] sm:$0xff] }
 0x13b   : > { %v1438_v37 = vpop.f32.mrf.mxu0  ;;  %2905 = vmatmul.msk.f32.gmra.mxu1 %vm264_vm1, %v4088_v11 }
 0x13c   : > { %v4122_v28 = vadd.f32 %v1435_v8, %v1229_v10  ;;  %2939 = vmatmul.msk.f32.gmra.mxu2 %vm264_vm1, %v4119_v9  ;;  %v4133_v8 = vld [vmem:[%s3461_s29 + $0x16a] sm:$0xff] }
 0x13d   : > { %3005 = vmatmul.msk.f32.gmra.mxu3 %vm264_vm1, %v2971_v19 }
 0x13e   : > { %4657 = vst [vmem:[#allocation44_spill] sm:$0xff] %v4122_v28  ;;  %3071 = vmatmul.msk.f32.gmra.mxu0 %vm264_vm1, %v3614_v39  ;;  %v4137_v28 = vld [vmem:[%s3461_s29 + $0x181] sm:$0xff] }
 0x13f   : > { %v879_v42 = vpop.f32.mrf.mxu2 }
 0x140   : > { %v949_v3 = vadd.f32 %v879_v42, %v634_v35  ;;  %v1160_v30 = vpop.f32.mrf.mxu3  ;;  %v636_v25 = vpop.f32.mrf.mxu1 }
 0x141   : > { %v637_v39 = vadd.f32 %v636_v25, %v3855_v43 }
 0x142   : > { %v1230_v46 = vadd.f32 %v1160_v30, %v949_v3  ;;  %v4150_v3 = vld [vmem:[%s3461_s29 + $0x172] sm:$0xff]  ;;  %v2973_v30 = vld [vmem:[%s3461_s29 + $0x188] sm:$0xff] }
 0x143   : > { %v1441_v10 = vpop.f32.mrf.mxu0  ;;  %2906 = vmatmul.msk.f32.gmra.mxu1 %vm264_vm1, %v4105_v15 }
 0x144   : > { %v4139_v9 = vadd.f32 %v1438_v37, %v1230_v46  ;;  %2940 = vmatmul.msk.f32.gmra.mxu2 %vm264_vm1, %v4133_v8 }
 0x145   : > { %3006 = vmatmul.msk.f32.gmra.mxu3 %vm264_vm1, %v2972_v23 }
 0x146   : > { %4658 = vst [vmem:[#allocation45_spill] sm:$0xff] %v4139_v9  ;;  %3072 = vmatmul.msk.f32.gmra.mxu0 %vm264_vm1, %v4137_v28  ;;  %v4154_v9 = vld [vmem:[%s3461_s29 + $0x189] sm:$0xff] }
 0x147   : > { %v882_v41 = vpop.f32.mrf.mxu2 }
 0x148   : > { %v950_v33 = vadd.f32 %v882_v41, %v637_v39  ;;  %v1163_v35 = vpop.f32.mrf.mxu3  ;;  %v639_v42 = vpop.f32.mrf.mxu1 }
 0x149   : > { %v640_v43 = vadd.f32 %v639_v42, %v3877_v20 }
 0x14a   : > { %v1231_v37 = vadd.f32 %v1163_v35, %v950_v33 }
 0x14b   : > { %v1444_v46 = vpop.f32.mrf.mxu0  ;;  %2907 = vmatmul.msk.f32.gmra.mxu1 %vm264_vm1, %v2971_v19 }
 0x14c   : > { %v4156_v15 = vadd.f32 %v1441_v10, %v1231_v37  ;;  %2941 = vmatmul.msk.f32.gmra.mxu2 %vm264_vm1, %v4150_v3 }
 0x14d   : > { %3007 = vmatmul.msk.f32.gmra.mxu3 %vm264_vm1, %v2973_v30 }
 0x14e   : > { %3073 = vmatmul.msk.f32.gmra.mxu0 %vm264_vm1, %v4154_v9 }
 0x14f   : > { %v885_v25 = vpop.f32.mrf.mxu2 }
 0x150   : > { %v951_v23 = vadd.f32 %v885_v25, %v640_v43  ;;  %v1166_v39 = vpop.f32.mrf.mxu3  ;;  %v642_v41 = vpop.f32.mrf.mxu1 }
 0x151   : > { %v643_v20 = vadd.f32 %v642_v41, %v3741_v63 }
 0x152   : > { %v1232_v33 = vadd.f32 %v1166_v39, %v951_v23 }
 0x153   : > { %v1447_v35 = vpop.f32.mrf.mxu0  ;;  %3108 = vmatmul.msk.f32.vlgmr.msra.gmra.mxu1 %vm264_vm1, %v3642_v47 }
 0x154   : > { %v4165_v10 = vadd.f32 %v1444_v46, %v1232_v33  ;;  %3174 = vmatmul.msk.f32.vlgmr.msra.gmra.mxu2 %vm264_vm1, %v3645_v48 }
 0x155   : > { %3240 = vmatmul.msk.f32.vlgmr.msra.gmra.mxu3 %vm264_vm1, %v3541_v24 }
 0x156   : > { %3306 = vmatmul.msk.f32.vlgmr.msra.gmra.mxu0 %vm264_vm1, %v3668_v51 }
 0x157   : > { %v888_v19 = vpop.f32.mrf.mxu2 }
 0x158   : > { %v952_v42 = vadd.f32 %v888_v19, %v643_v20  ;;  %v1169_v37 = vpop.f32.mrf.mxu3  ;;  %v645_v30 = vpop.f32.mrf.mxu1 }
 0x159   : > { %v646_v24 = vadd.f32 %v645_v30, %v3763_v5 }
 0x15a   : > { %v1233_v46 = vadd.f32 %v1169_v37, %v952_v42 }
 0x15b   : > { %v1450_v43 = vpop.f32.mrf.mxu0  ;;  %3109 = vmatmul.msk.f32.gmra.mxu1 %vm264_vm1, %v3655_v49 }
 0x15c   : > { %v4176_v25 = vadd.f32 %v1447_v35, %v1233_v46  ;;  %3175 = vmatmul.msk.f32.gmra.mxu2 %vm264_vm1, %v3658_v50  ;;  %v3210_v46 = vld [vmem:[%s3461_s29 + $0x61] sm:$0xff] }
 0x15d   : > { %3241 = vmatmul.msk.f32.gmra.mxu3 %vm264_vm1, %v3573_v31 }
 0x15e   : > { %3307 = vmatmul.msk.f32.gmra.mxu0 %vm264_vm1, %v3682_v53 }
 0x15f   : > { %v891_v47 = vpop.f32.mrf.mxu2 }
 0x160   : > { %v953_v48 = vadd.f32 %v891_v47, %v646_v24  ;;  %v1172_v63 = vpop.f32.mrf.mxu3  ;;  %v648_v23 = vpop.f32.mrf.mxu1 }
 0x161   : > { %v649_v31 = vadd.f32 %v648_v23, %v3785_v17  ;;  %v3211_v23 = vld [vmem:[%s3461_s29 + $0x69] sm:$0xff] }
 0x162   : > { %v1234_v39 = vadd.f32 %v1172_v63, %v953_v48 }
 0x163   : > { %v1453_v41 = vpop.f32.mrf.mxu0  ;;  %3110 = vmatmul.msk.f32.gmra.mxu1 %vm264_vm1, %v3668_v51 }
 0x164   : > { %v4187_v33 = vadd.f32 %v1450_v43, %v1234_v39  ;;  %3176 = vmatmul.msk.f32.gmra.mxu2 %vm264_vm1, %v3671_v52 }
 0x165   : > { %3242 = vmatmul.msk.f32.gmra.mxu3 %vm264_vm1, %v3597_v36 }
 0x166   : > { %3308 = vmatmul.msk.f32.gmra.mxu0 %vm264_vm1, %v3696_v55 }
 0x167   : > { %v894_v49 = vpop.f32.mrf.mxu2 }
 0x168   : > { %v954_v50 = vadd.f32 %v894_v49, %v649_v31  ;;  %v1175_v5 = vpop.f32.mrf.mxu3  ;;  %v651_v35 = vpop.f32.mrf.mxu1  ;;  %v4662_v31 = vld [vmem:[#allocation20_spill] sm:$0xff] }
 0x169   : > { %v652_v36 = vadd.f32 %v651_v35, %v3807_v21 }
 0x16a   : > { %v1235_v20 = vadd.f32 %v1175_v5, %v954_v50 }
 0x16b   : > { %v1456_v19 = vpop.f32.mrf.mxu0  ;;  %3111 = vmatmul.msk.f32.gmra.mxu1 %vm264_vm1, %v3682_v53 }
 0x16c   : > { %v4198_v42 = vadd.f32 %v1453_v41, %v1235_v20  ;;  %3177 = vmatmul.msk.f32.gmra.mxu2 %vm264_vm1, %v3685_v54 }
 0x16d   : > { %3243 = vmatmul.msk.f32.gmra.mxu3 %vm264_vm1, %v3617_v40  ;;  %v4659_v40 = vld [vmem:[#allocation16_spill] sm:$0xff] }
 0x16e   : > { %3309 = vmatmul.msk.f32.gmra.mxu0 %vm264_vm1, %v3710_v57 }
 0x16f   : > { %v897_v51 = vpop.f32.mrf.mxu2 }
 0x170   : > { %v955_v52 = vadd.f32 %v897_v51, %v652_v36  ;;  %v1178_v17 = vpop.f32.mrf.mxu3  ;;  %v654_v37 = vpop.f32.mrf.mxu1  ;;  %v3212_v36 = vld [vmem:[%s3461_s29 + $0x79] sm:$0xff] }
 0x171   : > { %v655_v54 = vadd.f32 %v654_v37, %v4659_v40  ;;  %v4665_v37 = vld [vmem:[#allocation24_spill] sm:$0xff] }
 0x172   : > { %v1236_v30 = vadd.f32 %v1178_v17, %v955_v52  ;;  %v4664_v17 = vld [vmem:[#allocation8_spill] sm:$0xff] }
 0x173   : > { %v1459_v43 = vpop.f32.mrf.mxu0  ;;  %3112 = vmatmul.msk.f32.gmra.mxu1 %vm264_vm1, %v3696_v55  ;;  %v4660_v55 = vld [vmem:[#allocation2_spill] sm:$0xff] }
 0x174   : > { %v4210_v53 = vadd.f32 %v1456_v19, %v1236_v30  ;;  %3178 = vmatmul.msk.f32.gmra.mxu2 %vm264_vm1, %v3699_v56  ;;  %v4661_v56 = vld [vmem:[#allocation5_spill] sm:$0xff] }
 0x175   : > { %3244 = vmatmul.msk.f32.gmra.mxu3 %vm264_vm1, %v3210_v46 }
 0x176   : > { %3310 = vmatmul.msk.f32.gmra.mxu0 %vm264_vm1, %v3726_v60 }
 0x177   : > { %v900_v21 = vpop.f32.mrf.mxu2 }
 0x178   : > { %v956_v24 = vadd.f32 %v900_v21, %v655_v54  ;;  %v1181_v47 = vpop.f32.mrf.mxu3  ;;  %v657_v48 = vpop.f32.mrf.mxu1 }
 0x179   : > { %v658_v49 = vadd.f32 %v657_v48, %v4662_v31 }
 0x17a   : > { %v1237_v63 = vadd.f32 %v1181_v47, %v956_v24  ;;  %v3213_v24 = vld [vmem:[%s3461_s29 + $0x81] sm:$0xff] }
 0x17b   : > { %v1462_v39 = vpop.f32.mrf.mxu0  ;;  %3113 = vmatmul.msk.f32.gmra.mxu1 %vm264_vm1, %v3710_v57  ;;  %v4663_v57 = vld [vmem:[#allocation3_spill] sm:$0xff] }
 0x17c   : > { %v4221_v41 = vadd.f32 %v1459_v43, %v1237_v63  ;;  %3179 = vmatmul.msk.f32.gmra.mxu2 %vm264_vm1, %v4660_v55  ;;  %v4667_v63 = vld [vmem:[#allocation11_spill] sm:$0xff] }
 0x17d   : > { %3245 = vmatmul.msk.f32.gmra.mxu3 %vm264_vm1, %v3211_v23  ;;  %v4668_v23 = vld [vmem:[#allocation27_spill] sm:$0xff] }
 0x17e   : > { %3311 = vmatmul.msk.f32.gmra.mxu0 %vm264_vm1, %v4661_v56 }
 0x17f   : > { %v903_v50 = vpop.f32.mrf.mxu2 }
 0x180   : > { %v957_v5 = vadd.f32 %v903_v50, %v658_v49  ;;  %v1184_v35 = vpop.f32.mrf.mxu3  ;;  %v660_v20 = vpop.f32.mrf.mxu1 }
 0x181   : > { %v661_v30 = vadd.f32 %v660_v20, %v4665_v37 }
 0x182   : > { %v1238_v19 = vadd.f32 %v1184_v35, %v957_v5  ;;  %v3214_v35 = vld [vmem:[%s3461_s29 + $0x91] sm:$0xff] }
 0x183   : > { %v1465_v51 = vpop.f32.mrf.mxu0  ;;  %3114 = vmatmul.msk.f32.gmra.mxu1 %vm264_vm1, %v3726_v60  ;;  %v4666_v60 = vld [vmem:[#allocation6_spill] sm:$0xff] }
 0x184   : > { %v4232_v52 = vadd.f32 %v1462_v39, %v1238_v19  ;;  %3180 = vmatmul.msk.f32.gmra.mxu2 %vm264_vm1, %v4663_v57 }
 0x185   : > { %3246 = vmatmul.msk.f32.gmra.mxu3 %vm264_vm1, %v3212_v36  ;;  %v4670_v36 = vld [vmem:[#allocation14_spill] sm:$0xff] }
 0x186   : > { %3312 = vmatmul.msk.f32.gmra.mxu0 %vm264_vm1, %v4664_v17 }
 0x187   : > { %v906_v46 = vpop.f32.mrf.mxu2 }
 0x188   : > { %v958_v43 = vadd.f32 %v906_v46, %v661_v30  ;;  %v1187_v40 = vpop.f32.mrf.mxu3  ;;  %v663_v54 = vpop.f32.mrf.mxu1 }
 0x189   : > { %v664_v39 = vadd.f32 %v663_v54, %v4668_v23  ;;  %v3215_v54 = vld [vmem:[%s3461_s29 + $0x99] sm:$0xff] }
 0x18a   : > { %v1239_v21 = vadd.f32 %v1187_v40, %v958_v43 }
 0x18b   : > { %v1468_v47 = vpop.f32.mrf.mxu0  ;;  %3115 = vmatmul.msk.f32.gmra.mxu1 %vm264_vm1, %v4661_v56  ;;  %v4669_v56 = vld [vmem:[#allocation9_spill] sm:$0xff] }
 0x18c   : > { %v4243_v48 = vadd.f32 %v1465_v51, %v1239_v21  ;;  %3181 = vmatmul.msk.f32.gmra.mxu2 %vm264_vm1, %v4666_v60  ;;  %v4671_v51 = vld [vmem:[#allocation4_spill] sm:$0xff]  ;;  %v4674_v60 = vld [vmem:[#allocation7_spill] sm:$0xff] }
 0x18d   : > { %3247 = vmatmul.msk.f32.gmra.mxu3 %vm264_vm1, %v3213_v24 }
 0x18e   : > { %3313 = vmatmul.msk.f32.gmra.mxu0 %vm264_vm1, %v4667_v63 }
 0x18f   : > { %v909_v55 = vpop.f32.mrf.mxu2 }
 0x190   : > { %v959_v31 = vadd.f32 %v909_v55, %v664_v39  ;;  %v1190_v49 = vpop.f32.mrf.mxu3  ;;  %v666_v50 = vpop.f32.mrf.mxu1 }
 0x191   : > { %v667_v57 = vadd.f32 %v666_v50, %v4671_v51  ;;  %v4677_v51 = vld [vmem:[#allocation10_spill] sm:$0xff] }
 0x192   : > { %v1240_v5 = vadd.f32 %v1190_v49, %v959_v31 }
 0x193   : > { %v1471_v20 = vpop.f32.mrf.mxu0  ;;  %3116 = vmatmul.msk.f32.gmra.mxu1 %vm264_vm1, %v4664_v17  ;;  %v4672_v17 = vld [vmem:[#allocation12_spill] sm:$0xff] }
 0x194   : > { %v4254_v19 = vadd.f32 %v1468_v47, %v1240_v5  ;;  %3182 = vmatmul.msk.f32.gmra.mxu2 %vm264_vm1, %v4669_v56  ;;  %v4673_v47 = vld [vmem:[#allocation18_spill] sm:$0xff]  ;;  %v3216_v5 = vld [vmem:[%s3461_s29 + $0xa9] sm:$0xff] }
 0x195   : > { %3248 = vmatmul.msk.f32.gmra.mxu3 %vm264_vm1, %v3214_v35  ;;  %v4676_v56 = vld [vmem:[#allocation22_spill] sm:$0xff] }
 0x196   : > { %3314 = vmatmul.msk.f32.gmra.mxu0 %vm264_vm1, %v4670_v36 }
 0x197   : > { %v912_v37 = vpop.f32.mrf.mxu2 }
 0x198   : > { %v960_v30 = vadd.f32 %v912_v37, %v667_v57  ;;  %v1193_v46 = vpop.f32.mrf.mxu3  ;;  %v669_v43 = vpop.f32.mrf.mxu1 }
 0x199   : > { %v670_v23 = vadd.f32 %v669_v43, %v4674_v60  ;;  %v4679_v60 = vld [vmem:[#allocation26_spill] sm:$0xff] }
 0x19a   : > { %v1241_v40 = vadd.f32 %v1193_v46, %v960_v30 }
 0x19b   : > { %v1474_v21 = vpop.f32.mrf.mxu0  ;;  %3117 = vmatmul.msk.f32.gmra.mxu1 %vm264_vm1, %v4667_v63  ;;  %v4675_v63 = vld [vmem:[#allocation15_spill] sm:$0xff] }
 0x19c   : > { %v4265_v24 = vadd.f32 %v1471_v20, %v1241_v40  ;;  %3183 = vmatmul.msk.f32.gmra.mxu2 %vm264_vm1, %v4672_v17 }
 0x19d   : > { %3249 = vmatmul.msk.f32.gmra.mxu3 %vm264_vm1, %v3215_v54  ;;  %v3217_v54 = vld [vmem:[%s3461_s29 + $0xb1] sm:$0xff] }
 0x19e   : > { %3315 = vmatmul.msk.f32.gmra.mxu0 %vm264_vm1, %v4673_v47 }
 0x19f   : > { %v915_v39 = vpop.f32.mrf.mxu2 }
 0x1a0   : > { %v961_v55 = vadd.f32 %v915_v39, %v670_v23  ;;  %v1196_v31 = vpop.f32.mrf.mxu3  ;;  %v672_v49 = vpop.f32.mrf.mxu1  ;;  %v4680_v23 = vld [vmem:[#allocation13_spill] sm:$0xff] }
 0x1a1   : > { %v673_v57 = vadd.f32 %v672_v49, %v4677_v51 }
 0x1a2   : > { %v1242_v50 = vadd.f32 %v1196_v31, %v961_v55 }
 0x1a3   : > { %v1477_v35 = vpop.f32.mrf.mxu0  ;;  %3118 = vmatmul.msk.f32.gmra.mxu1 %vm264_vm1, %v4670_v36  ;;  %v4678_v36 = vld [vmem:[#allocation19_spill] sm:$0xff] }
 0x1a4   : > { %v4276_v20 = vadd.f32 %v1474_v21, %v1242_v50  ;;  %3184 = vmatmul.msk.f32.gmra.mxu2 %vm264_vm1, %v4675_v63 }
 0x1a5   : > { %3250 = vmatmul.msk.f32.gmra.mxu3 %vm264_vm1, %v3216_v5 }
 0x1a6   : > { %3316 = vmatmul.msk.f32.gmra.mxu0 %vm264_vm1, %v4676_v56 }
 0x1a7   : > { %v918_v37 = vpop.f32.mrf.mxu2 }
 0x1a8   : > { %v962_v30 = vadd.f32 %v918_v37, %v673_v57  ;;  %v1199_v46 = vpop.f32.mrf.mxu3  ;;  %v675_v43 = vpop.f32.mrf.mxu1  ;;  %v4682_v57 = vld [vmem:[#allocation29_spill] sm:$0xff] }
 0x1a9   : > { %v676_v39 = vadd.f32 %v675_v43, %v4680_v23  ;;  %v4683_v37 = vld [vmem:[#allocation17_spill] sm:$0xff] }
 0x1aa   : > { %v1243_v40 = vadd.f32 %v1199_v46, %v962_v30 }
 0x1ab   : > { %v1480_v21 = vpop.f32.mrf.mxu0  ;;  %3119 = vmatmul.msk.f32.gmra.mxu1 %vm264_vm1, %v4673_v47  ;;  %v4681_v47 = vld [vmem:[#allocation23_spill] sm:$0xff] }
 0x1ac   : > { %v4287_v17 = vadd.f32 %v1477_v35, %v1243_v40  ;;  %3185 = vmatmul.msk.f32.gmra.mxu2 %vm264_vm1, %v4678_v36  ;;  %v3218_v35 = vld [vmem:[%s3461_s29 + $0xc1] sm:$0xff]  ;;  %v3219_v36 = vld [vmem:[%s3461_s29 + $0xc9] sm:$0xff] }
 0x1ad   : > { %3251 = vmatmul.msk.f32.gmra.mxu3 %vm264_vm1, %v3217_v54 }
 0x1ae   : > { %3317 = vmatmul.msk.f32.gmra.mxu0 %vm264_vm1, %v4679_v60 }
 0x1af   : > { %v921_v55 = vpop.f32.mrf.mxu2 }
 0x1b0   : > { %v963_v31 = vadd.f32 %v921_v55, %v676_v39  ;;  %v1202_v49 = vpop.f32.mrf.mxu3  ;;  %v678_v50 = vpop.f32.mrf.mxu1 }
 0x1b1   : > { %v679_v30 = vadd.f32 %v678_v50, %v4683_v37 }
 0x1b2   : > { %v1244_v5 = vadd.f32 %v1202_v49, %v963_v31 }
 0x1b3   : > { %v1483_v63 = vpop.f32.mrf.mxu0  ;;  %3120 = vmatmul.msk.f32.gmra.mxu1 %vm264_vm1, %v4676_v56  ;;  %v4684_v56 = vld [vmem:[#allocation21_spill] sm:$0xff] }
 0x1b4   : > { %v4298_v51 = vadd.f32 %v1480_v21, %v1244_v5  ;;  %3186 = vmatmul.msk.f32.gmra.mxu2 %vm264_vm1, %v4681_v47 }
 0x1b5   : > { %3252 = vmatmul.msk.f32.gmra.mxu3 %vm264_vm1, %v3218_v35 }
 0x1b6   : > { %3318 = vmatmul.msk.f32.gmra.mxu0 %vm264_vm1, %v4682_v57 }
 0x1b7   : > { %v924_v46 = vpop.f32.mrf.mxu2 }
 0x1b8   : > { %v964_v43 = vadd.f32 %v924_v46, %v679_v30  ;;  %v1205_v40 = vpop.f32.mrf.mxu3  ;;  %v681_v54 = vpop.f32.mrf.mxu1 }
 0x1b9   : > { %v682_v55 = vadd.f32 %v681_v54, %v4684_v56 }
 0x1ba   : > { %v1245_v21 = vadd.f32 %v1205_v40, %v964_v43 }
 0x1bb   : > { %v1486_v23 = vpop.f32.mrf.mxu0  ;;  %3121 = vmatmul.msk.f32.gmra.mxu1 %vm264_vm1, %v4679_v60 }
 0x1bc   : > { %v4309_v39 = vadd.f32 %v1483_v63, %v1245_v21  ;;  %3187 = vmatmul.msk.f32.gmra.mxu2 %vm264_vm1, %v3883_v44  ;;  %v3220_v63 = vld [vmem:[%s3461_s29 + $0xd9] sm:$0xff]  ;;  %v3221_v21 = vld [vmem:[%s3461_s29 + $0xe1] sm:$0xff] }
 0x1bd   : > { %3253 = vmatmul.msk.f32.gmra.mxu3 %vm264_vm1, %v3219_v36  ;;  %v4685_v44 = vld [vmem:[#allocation25_spill] sm:$0xff] }
 0x1be   : > { %3319 = vmatmul.msk.f32.gmra.mxu0 %vm264_vm1, %v3915_v2 }
 0x1bf   : > { %v927_v31 = vpop.f32.mrf.mxu2 }
 0x1c0   : > { %v965_v49 = vadd.f32 %v927_v31, %v682_v55  ;;  %v1208_v50 = vpop.f32.mrf.mxu3  ;;  %v684_v5 = vpop.f32.mrf.mxu1 }
 0x1c1   : > { %v685_v60 = vadd.f32 %v684_v5, %v4685_v44  ;;  %v3222_v5 = vld [vmem:[%s3461_s29 + $0xf1] sm:$0xff] }
 0x1c2   : > { %v1246_v35 = vadd.f32 %v1208_v50, %v965_v49 }
 0x1c3   : > { %v1489_v47 = vpop.f32.mrf.mxu0  ;;  %3122 = vmatmul.msk.f32.gmra.mxu1 %vm264_vm1, %v4682_v57 }
 0x1c4   : > { %v4320_v37 = vadd.f32 %v1486_v23, %v1246_v35  ;;  %3188 = vmatmul.msk.f32.gmra.mxu2 %vm264_vm1, %v3903_v61  ;;  %v4686_v61 = vld [vmem:[#allocation28_spill] sm:$0xff] }
 0x1c5   : > { %3254 = vmatmul.msk.f32.gmra.mxu3 %vm264_vm1, %v3220_v63 }
 0x1c6   : > { %3320 = vmatmul.msk.f32.gmra.mxu0 %vm264_vm1, %v3932_v27 }
 0x1c7   : > { %v930_v30 = vpop.f32.mrf.mxu2 }
 0x1c8   : > { %v966_v46 = vadd.f32 %v930_v30, %v685_v60  ;;  %v1211_v43 = vpop.f32.mrf.mxu3  ;;  %v687_v40 = vpop.f32.mrf.mxu1 }
 0x1c9   : > { %v688_v57 = vadd.f32 %v687_v40, %v4686_v61 }
 0x1ca   : > { %v1247_v54 = vadd.f32 %v1211_v43, %v966_v46  ;;  %v4355_v43 = vld [vmem:[%s4587_s2] ss:$0 sm:$0xff] }
 0x1cb   : > { %v1492_v36 = vpop.f32.mrf.mxu0  ;;  %3123 = vmatmul.msk.f32.gmra.mxu1 %vm264_vm1, %v3915_v2 }
 0x1cc   : > { %v4331_v23 = vadd.f32 %v1489_v47, %v1247_v54  ;;  %3189 = vmatmul.msk.f32.gmra.mxu2 %vm264_vm1, %v3918_v58  ;;  %v4687_v58 = vld [vmem:[#allocation30_spill] sm:$0xff]  ;;  %v4688_v54 = vld [vmem:[#allocation31_spill] sm:$0xff] }
 0x1cd   : > { %3255 = vmatmul.msk.f32.gmra.mxu3 %vm264_vm1, %v3221_v21 }
 0x1ce   : > { %3321 = vmatmul.msk.f32.gmra.mxu0 %vm264_vm1, %v3949_v62 }
 0x1cf   : > { %v933_v56 = vpop.f32.mrf.mxu2 }
 0x1d0   : > { %v967_v55 = vadd.f32 %v933_v56, %v688_v57  ;;  %v1214_v31 = vpop.f32.mrf.mxu3  ;;  %v1677_v49 = vpop.f32.mrf.mxu1 }
 0x1d1   : > { %v1773_v63 = vadd.f32 %v1677_v49, %v4687_v58 }
 0x1d2   : > { %v1248_v50 = vadd.f32 %v1214_v31, %v967_v55  ;;  %v3224_v31 = vld [vmem:[%s3461_s29 + $0x109] sm:$0xff] }
 0x1d3   : > { %v2514_v35 = vpop.f32.mrf.mxu0  ;;  %3124 = vmatmul.msk.f32.gmra.mxu1 %vm264_vm1, %v3932_v27  ;;  %v3223_v27 = vld [vmem:[%s3461_s29 + $0xf9] sm:$0xff] }
 0x1d4   : > { %v4342_v2 = vadd.f32 %v1492_v36, %v1248_v50  ;;  %3190 = vmatmul.msk.f32.gmra.mxu2 %vm264_vm1, %v3935_v6 }
 0x1d5   : > { %3256 = vmatmul.msk.f32.gmra.mxu3 %vm264_vm1, %v3222_v5  ;;  %v4689_v5 = vld [vmem:[#allocation32_spill] sm:$0xff] }
 0x1d6   : > { %3322 = vmatmul.msk.f32.gmra.mxu0 %vm264_vm1, %v3966_v4 }
 0x1d7   : > { %v1958_v47 = vpop.f32.mrf.mxu2 }
 0x1d8   : > { %v2054_v44 = vadd.f32 %v1958_v47, %v1773_v63  ;;  %v2236_v60 = vpop.f32.mrf.mxu3  ;;  %v1680_v30 = vpop.f32.mrf.mxu1 }
 0x1d9   : > { %v1774_v21 = vadd.f32 %v1680_v30, %v4688_v54 }
 0x1da   : > { %v2332_v46 = vadd.f32 %v2236_v60, %v2054_v44 }
 0x1db   : > { %v2517_v40 = vpop.f32.mrf.mxu0  ;;  %3125 = vmatmul.msk.f32.gmra.mxu1 %vm264_vm1, %v3949_v62 }
 0x1dc   : > { %v2610_v6 = vadd.f32 %v2514_v35, %v2332_v46  ;;  %3191 = vmatmul.msk.f32.gmra.mxu2 %vm264_vm1, %v3952_v13  ;;  %v3225_v46 = vld [vmem:[%s3461_s29 + $0x111] sm:$0xff] }
 0x1dd   : > { %3257 = vmatmul.msk.f32.gmra.mxu3 %vm264_vm1, %v3223_v27 }
 0x1de   : > { %3323 = vmatmul.msk.f32.gmra.mxu0 %vm264_vm1, %v3983_v16  ;;  %v2646_v36 = vadd.f32 %v4355_v43, %v2610_v6 }
 0x1df   : > { %v1961_v61 = vpop.f32.mrf.mxu2 }
 0x1e0   : > { %v2678_v62 = vmax.f32 %v2646_v36, 0.0  ;;  %v2055_v57 = vadd.f32 %v1961_v61, %v1774_v21  ;;  %v2239_v56 = vpop.f32.mrf.mxu3  ;;  %v1683_v13 = vpop.f32.mrf.mxu1 }
 0x1e1   : > { %v1775_v35 = vadd.f32 %v1683_v13, %v4689_v5 }
 0x1e2   : > { %2710 = vst [vmem:[%s4371_s12] sm:$0xff] %v2678_v62  ;;  %v2333_v55 = vadd.f32 %v2239_v56, %v2055_v57  ;;  %v3226_v56 = vld [vmem:[%s3461_s29 + $0x121] sm:$0xff] }
 0x1e3   : > { %v2520_v49 = vpop.f32.mrf.mxu0  ;;  %3126 = vmatmul.msk.f32.gmra.mxu1 %vm264_vm1, %v3966_v4 }
 0x1e4   : > { %v2611_v50 = vadd.f32 %v2517_v40, %v2333_v55  ;;  %3192 = vmatmul.msk.f32.gmra.mxu2 %vm264_vm1, %v3969_v14  ;;  %v4690_v40 = vld [vmem:[#allocation33_spill] sm:$0xff]  ;;  %v4691_v55 = vld [vmem:[#allocation34_spill] sm:$0xff] }
 0x1e5   : > { %3258 = vmatmul.msk.f32.gmra.mxu3 %vm264_vm1, %v3224_v31 }
 0x1e6   : > { %3324 = vmatmul.msk.f32.gmra.mxu0 %vm264_vm1, %v4000_v32  ;;  %v2647_v58 = vadd.f32 %v4355_v43, %v2611_v50 }
 0x1e7   : > { %v1964_v63 = vpop.f32.mrf.mxu2 }
 0x1e8   : > { %v2679_v47 = vmax.f32 %v2647_v58, 0.0  ;;  %v2056_v44 = vadd.f32 %v1964_v63, %v1775_v35  ;;  %v2242_v60 = vpop.f32.mrf.mxu3  ;;  %v1686_v30 = vpop.f32.mrf.mxu1 }
 0x1e9   : > { %v1776_v6 = vadd.f32 %v1686_v30, %v4690_v40 }
 0x1ea   : > { %2711 = vst [vmem:[%s4371_s12 + $0x8] sm:$0xff] %v2679_v47  ;;  %v2334_v4 = vadd.f32 %v2242_v60, %v2056_v44  ;;  %v3227_v47 = vld [vmem:[%s3461_s29 + $0x129] sm:$0xff] }
 0x1eb   : > { %v2523_v14 = vpop.f32.mrf.mxu0  ;;  %3127 = vmatmul.msk.f32.gmra.mxu1 %vm264_vm1, %v3983_v16  ;;  %v4692_v60 = vld [vmem:[#allocation35_spill] sm:$0xff] }
 0x1ec   : > { %v2612_v27 = vadd.f32 %v2520_v49, %v2334_v4  ;;  %3193 = vmatmul.msk.f32.gmra.mxu2 %vm264_vm1, %v3986_v18 }
 0x1ed   : > { %3259 = vmatmul.msk.f32.gmra.mxu3 %vm264_vm1, %v3225_v46 }
 0x1ee   : > { %3325 = vmatmul.msk.f32.gmra.mxu0 %vm264_vm1, %v4017_v45  ;;  %v2648_v54 = vadd.f32 %v4355_v43, %v2612_v27 }
 0x1ef   : > { %v1967_v21 = vpop.f32.mrf.mxu2 }
 0x1f0   : > { %v2680_v36 = vmax.f32 %v2648_v54, 0.0  ;;  %v2057_v61 = vadd.f32 %v1967_v21, %v1776_v6  ;;  %v2245_v62 = vpop.f32.mrf.mxu3  ;;  %v1689_v57 = vpop.f32.mrf.mxu1  ;;  %v3228_v54 = vld [vmem:[%s3461_s29 + $0x139] sm:$0xff] }
 0x1f1   : > { %v1777_v31 = vadd.f32 %v1689_v57, %v4691_v55  ;;  %v3229_v55 = vld [vmem:[%s3461_s29 + $0x141] sm:$0xff] }
 0x1f2   : > { %2712 = vst [vmem:[%s4371_s12 + $0x10] sm:$0xff] %v2680_v36  ;;  %v2335_v16 = vadd.f32 %v2245_v62, %v2057_v61  ;;  %v4693_v36 = vld [vmem:[#allocation36_spill] sm:$0xff] }
 0x1f3   : > { %v2526_v18 = vpop.f32.mrf.mxu0  ;;  %3128 = vmatmul.msk.f32.gmra.mxu1 %vm264_vm1, %v4000_v32 }
 0x1f4   : > { %v2613_v13 = vadd.f32 %v2523_v14, %v2335_v16  ;;  %3194 = vmatmul.msk.f32.gmra.mxu2 %vm264_vm1, %v4003_v22 }
 0x1f5   : > { %3260 = vmatmul.msk.f32.gmra.mxu3 %vm264_vm1, %v3226_v56 }
 0x1f6   : > { %3326 = vmatmul.msk.f32.gmra.mxu0 %vm264_vm1, %v4034_v0  ;;  %v2649_v49 = vadd.f32 %v4355_v43, %v2613_v13 }
 0x1f7   : > { %v1970_v50 = vpop.f32.mrf.mxu2 }
 0x1f8   : > { %v2681_v5 = vmax.f32 %v2649_v49, 0.0  ;;  %v2058_v35 = vadd.f32 %v1970_v50, %v1777_v31  ;;  %v2248_v58 = vpop.f32.mrf.mxu3  ;;  %v1692_v63 = vpop.f32.mrf.mxu1  ;;  %v4694_v49 = vld [vmem:[#allocation37_spill] sm:$0xff] }
 0x1f9   : > { %v1778_v30 = vadd.f32 %v1692_v63, %v4692_v60  ;;  %v4695_v60 = vld [vmem:[#allocation38_spill] sm:$0xff] }
 0x1fa   : > { %2713 = vst [vmem:[%s4371_s12 + $0x18] sm:$0xff] %v2681_v5  ;;  %v2336_v32 = vadd.f32 %v2248_v58, %v2058_v35 }
 0x1fb   : > { %v2529_v22 = vpop.f32.mrf.mxu0  ;;  %3129 = vmatmul.msk.f32.gmra.mxu1 %vm264_vm1, %v4017_v45 }
 0x1fc   : > { %v2614_v44 = vadd.f32 %v2526_v18, %v2336_v32  ;;  %3195 = vmatmul.msk.f32.gmra.mxu2 %vm264_vm1, %v4020_v29 }
 0x1fd   : > { %3261 = vmatmul.msk.f32.gmra.mxu3 %vm264_vm1, %v3227_v47 }
 0x1fe   : > { %3327 = vmatmul.msk.f32.gmra.mxu0 %vm264_vm1, %v4051_v26  ;;  %v2650_v4 = vadd.f32 %v4355_v43, %v2614_v44 }
 0x1ff   : > { %v1973_v46 = vpop.f32.mrf.mxu2 }
 0x200   : > { %v2682_v14 = vmax.f32 %v2650_v4, 0.0  ;;  %v2059_v27 = vadd.f32 %v1973_v46, %v1778_v30  ;;  %v2251_v40 = vpop.f32.mrf.mxu3  ;;  %v1695_v6 = vpop.f32.mrf.mxu1 }
 0x201   : > { %v1779_v61 = vadd.f32 %v1695_v6, %v4693_v36 }
 0x202   : > { %2714 = vst [vmem:[%s4371_s12 + $0x20] sm:$0xff] %v2682_v14  ;;  %v2337_v45 = vadd.f32 %v2251_v40, %v2059_v27 }
 0x203   : > { %v2532_v29 = vpop.f32.mrf.mxu0  ;;  %3130 = vmatmul.msk.f32.gmra.mxu1 %vm264_vm1, %v4034_v0 }
 0x204   : > { %v2615_v21 = vadd.f32 %v2529_v22, %v2337_v45  ;;  %3196 = vmatmul.msk.f32.gmra.mxu2 %vm264_vm1, %v4037_v34  ;;  %v3230_v22 = vld [vmem:[%s3461_s29 + $0x151] sm:$0xff]  ;;  %v3231_v45 = vld [vmem:[%s3461_s29 + $0x159] sm:$0xff] }
 0x205   : > { %3262 = vmatmul.msk.f32.gmra.mxu3 %vm264_vm1, %v3228_v54 }
 0x206   : > { %3328 = vmatmul.msk.f32.gmra.mxu0 %vm264_vm1, %v4068_v12  ;;  %v2651_v62 = vadd.f32 %v4355_v43, %v2615_v21  ;;  %v4697_v21 = vld [vmem:[#allocation39_spill] sm:$0xff] }
 0x207   : > { %v1976_v57 = vpop.f32.mrf.mxu2 }
 0x208   : > { %v2683_v16 = vmax.f32 %v2651_v62, 0.0  ;;  %v2060_v56 = vadd.f32 %v1976_v57, %v1779_v61  ;;  %v2254_v18 = vpop.f32.mrf.mxu3  ;;  %v1698_v13 = vpop.f32.mrf.mxu1 }
 0x209   : > { %v1780_v50 = vadd.f32 %v1698_v13, %v4694_v49  ;;  %v3232_v13 = vld [vmem:[%s3461_s29 + $0x169] sm:$0xff] }
 0x20a   : > { %2715 = vst [vmem:[%s4371_s12 + $0x28] sm:$0xff] %v2683_v16  ;;  %v2338_v0 = vadd.f32 %v2254_v18, %v2060_v56 }
 0x20b   : > { %v2535_v34 = vpop.f32.mrf.mxu0  ;;  %3131 = vmatmul.msk.f32.gmra.mxu1 %vm264_vm1, %v4051_v26 }
 0x20c   : > { %v2616_v31 = vadd.f32 %v2532_v29, %v2338_v0  ;;  %3197 = vmatmul.msk.f32.gmra.mxu2 %vm264_vm1, %v4054_v38  ;;  %v4696_v29 = vld [vmem:[#allocation43_spill] sm:$0xff] }
 0x20d   : > { %3263 = vmatmul.msk.f32.gmra.mxu3 %vm264_vm1, %v3229_v55  ;;  %v4698_v55 = vld [vmem:[#allocation41_spill] sm:$0xff] }
 0x20e   : > { %3329 = vmatmul.msk.f32.gmra.mxu0 %vm264_vm1, %v4085_v59  ;;  %v2652_v5 = vadd.f32 %v4355_v43, %v2616_v31 }
 0x20f   : > { %v1979_v35 = vpop.f32.mrf.mxu2 }
 0x210   : > { %v2684_v58 = vmax.f32 %v2652_v5, 0.0  ;;  %v2061_v63 = vadd.f32 %v1979_v35, %v1780_v50  ;;  %v2257_v32 = vpop.f32.mrf.mxu3  ;;  %v1701_v47 = vpop.f32.mrf.mxu1 }
 0x211   : > { %v1781_v30 = vadd.f32 %v1701_v47, %v4695_v60  ;;  %v3167_v47 = vld [vmem:[%s3461_s29 + $0x170] sm:$0xff] }
 0x212   : > { %2716 = vst [vmem:[%s4371_s12 + $0x30] sm:$0xff] %v2684_v58  ;;  %v2339_v26 = vadd.f32 %v2257_v32, %v2061_v63  ;;  %v3101_v32 = vld [vmem:[%s3461_s29 + $0x15a] sm:$0xff] }
 0x213   : > { %v2538_v38 = vpop.f32.mrf.mxu0  ;;  %3132 = vmatmul.msk.f32.gmra.mxu1 %vm264_vm1, %v4068_v12 }
 0x214   : > { %v2617_v44 = vadd.f32 %v2535_v34, %v2339_v26  ;;  %3198 = vmatmul.msk.f32.gmra.mxu2 %vm264_vm1, %v4071_v7  ;;  %v4699_v34 = vld [vmem:[#allocation40_spill] sm:$0xff] }
 0x215   : > { %3264 = vmatmul.msk.f32.gmra.mxu3 %vm264_vm1, %v3230_v22  ;;  %v3233_v26 = vld [vmem:[%s3461_s29 + $0x171] sm:$0xff] }
 0x216   : > { %3330 = vmatmul.msk.f32.gmra.mxu0 %vm264_vm1, %v4102_v1  ;;  %v2653_v4 = vadd.f32 %v4355_v43, %v2617_v44 }
 0x217   : > { %v1982_v46 = vpop.f32.mrf.mxu2 }
 0x218   : > { %v2685_v14 = vmax.f32 %v2653_v4, 0.0  ;;  %v2062_v27 = vadd.f32 %v1982_v46, %v1781_v30  ;;  %v2260_v40 = vpop.f32.mrf.mxu3  ;;  %v1704_v6 = vpop.f32.mrf.mxu1 }
 0x219   : > { %v1782_v36 = vadd.f32 %v1704_v6, %v4697_v21  ;;  %v3168_v6 = vld [vmem:[%s3461_s29 + $0x180] sm:$0xff] }
 0x21a   : > { %2717 = vst [vmem:[%s4371_s12 + $0x38] sm:$0xff] %v2685_v14  ;;  %v2340_v12 = vadd.f32 %v2260_v40, %v2062_v27  ;;  %v3102_v40 = vld [vmem:[%s3461_s29 + $0x16a] sm:$0xff] }
 0x21b   : > { %v2541_v7 = vpop.f32.mrf.mxu0  ;;  %3133 = vmatmul.msk.f32.gmra.mxu1 %vm264_vm1, %v4085_v59 }
 0x21c   : > { %v2618_v54 = vadd.f32 %v2538_v38, %v2340_v12  ;;  %3199 = vmatmul.msk.f32.gmra.mxu2 %vm264_vm1, %v4088_v11 }
 0x21d   : > { %3265 = vmatmul.msk.f32.gmra.mxu3 %vm264_vm1, %v3231_v45 }
 0x21e   : > { %3331 = vmatmul.msk.f32.gmra.mxu0 %vm264_vm1, %v4696_v29  ;;  %v2654_v61 = vadd.f32 %v4355_v43, %v2618_v54 }
 0x21f   : > { %v1985_v62 = vpop.f32.mrf.mxu2 }
 0x220   : > { %v2686_v57 = vmax.f32 %v2654_v61, 0.0  ;;  %v2063_v16 = vadd.f32 %v1985_v62, %v1782_v36  ;;  %v2263_v56 = vpop.f32.mrf.mxu3  ;;  %v1707_v18 = vpop.f32.mrf.mxu1 }
 0x221   : > { %v1783_v31 = vadd.f32 %v1707_v18, %v4699_v34  ;;  %v3169_v18 = vld [vmem:[%s3461_s29 + $0x188] sm:$0xff] }
 0x222   : > { %2718 = vst [vmem:[%s4371_s12 + $0x40] sm:$0xff] %v2686_v57  ;;  %v2341_v59 = vadd.f32 %v2263_v56, %v2063_v16  ;;  %v3103_v56 = vld [vmem:[%s3461_s29 + $0x172] sm:$0xff] }
 0x223   : > { %v2544_v11 = vpop.f32.mrf.mxu0  ;;  %3134 = vmatmul.msk.f32.gmra.mxu1 %vm264_vm1, %v4102_v1 }
 0x224   : > { %v2619_v0 = vadd.f32 %v2541_v7, %v2341_v59  ;;  %3200 = vmatmul.msk.f32.gmra.mxu2 %vm264_vm1, %v4698_v55  ;;  %v3300_v7 = vld [vmem:[%s3461_s29 + $0x182] sm:$0xff] }
 0x225   : > { %3266 = vmatmul.msk.f32.gmra.mxu3 %vm264_vm1, %v3232_v13 }
 0x226   : > { %3332 = vmatmul.msk.f32.gmra.mxu0 %vm264_vm1, %v4133_v8  ;;  %v2655_v49 = vadd.f32 %v4355_v43, %v2619_v0  ;;  %v4700_v8 = vld [vmem:[#allocation42_spill] sm:$0xff]  ;;  %v4702_v0 = vld [vmem:[#allocation45_spill] sm:$0xff] }
 0x227   : > { %v1988_v50 = vpop.f32.mrf.mxu2 }
 0x228   : > { %v2687_v5 = vmax.f32 %v2655_v49, 0.0  ;;  %v2064_v35 = vadd.f32 %v1988_v50, %v1783_v31  ;;  %v2266_v58 = vpop.f32.mrf.mxu3  ;;  %v1710_v63 = vpop.f32.mrf.mxu1 }
 0x229   : > { %v1784_v44 = vadd.f32 %v1710_v63, %v4700_v8 }
 0x22a   : > { %2719 = vst [vmem:[%s4371_s12 + $0x48] sm:$0xff] %v2687_v5  ;;  %v2342_v1 = vadd.f32 %v2266_v58, %v2064_v35  ;;  %v3170_v58 = vld [vmem:[%s3461_s29 + $0x198] sm:$0xff] }
 0x22b   : > { %v2547_v22 = vpop.f32.mrf.mxu0  ;;  %3135 = vmatmul.msk.f32.gmra.mxu1 %vm264_vm1, %v3101_v32  ;;  %v3236_v32 = vld [vmem:[%s3461_s29 + $0x199] sm:$0xff] }
 0x22c   : > { %v2620_v38 = vadd.f32 %v2544_v11, %v2342_v1  ;;  %3201 = vmatmul.msk.f32.gmra.mxu2 %vm264_vm1, %v3167_v47  ;;  %v3301_v11 = vld [vmem:[%s3461_s29 + $0x18a] sm:$0xff]  ;;  %v3302_v1 = vld [vmem:[%s3461_s29 + $0x19a] sm:$0xff] }
 0x22d   : > { %3267 = vmatmul.msk.f32.gmra.mxu3 %vm264_vm1, %v3233_v26 }
 0x22e   : > { %3333 = vmatmul.msk.f32.gmra.mxu0 %vm264_vm1, %v4150_v3  ;;  %v2656_v60 = vadd.f32 %v4355_v43, %v2620_v38  ;;  %v4701_v3 = vld [vmem:[#allocation44_spill] sm:$0xff] }
 0x22f   : > { %v1991_v30 = vpop.f32.mrf.mxu2 }
 0x230   : > { %v2688_v4 = vmax.f32 %v2656_v60, 0.0  ;;  %v2065_v46 = vadd.f32 %v1991_v30, %v1784_v44  ;;  %v2269_v14 = vpop.f32.mrf.mxu3  ;;  %v1713_v27 = vpop.f32.mrf.mxu1 }
 0x231   : > { %v1785_v29 = vadd.f32 %v1713_v27, %v4701_v3 }
 0x232   : > { %2720 = vst [vmem:[%s4371_s12 + $0x50] sm:$0xff] %v2688_v4  ;;  %v2343_v12 = vadd.f32 %v2269_v14, %v2065_v46  ;;  %v3171_v4 = vld [vmem:[%s3461_s29 + $0x1a0] sm:$0xff] }
 0x233   : > { %v2550_v45 = vpop.f32.mrf.mxu0  ;;  %3136 = vmatmul.msk.f32.gmra.mxu1 %vm264_vm1, %v3102_v40  ;;  %v3237_v14 = vld [vmem:[%s3461_s29 + $0x1a1] sm:$0xff] }
 0x234   : > { %v2621_v54 = vadd.f32 %v2547_v22, %v2343_v12  ;;  %3202 = vmatmul.msk.f32.gmra.mxu2 %vm264_vm1, %v3168_v6  ;;  %v3303_v40 = vld [vmem:[%s3461_s29 + $0x1a2] sm:$0xff] }
 0x235   : > { %3268 = vmatmul.msk.f32.gmra.mxu3 %vm264_vm1, %v4137_v28 }
 0x236   : > { %3334 = vmatmul.msk.f32.gmra.mxu0 %vm264_vm1, %v3300_v7  ;;  %v2657_v21 = vadd.f32 %v4355_v43, %v2621_v54 }
 0x237   : > { %v1994_v36 = vpop.f32.mrf.mxu2 }
 0x238   : > { %v2689_v61 = vmax.f32 %v2657_v21, 0.0  ;;  %v2066_v62 = vadd.f32 %v1994_v36, %v1785_v29  ;;  %v2272_v57 = vpop.f32.mrf.mxu3  ;;  %v1716_v16 = vpop.f32.mrf.mxu1 }
 0x239   : > { %v1786_v55 = vadd.f32 %v1716_v16, %v4702_v0 }
 0x23a   : > { %2721 = vst [vmem:[%s4371_s12 + $0x58] sm:$0xff] %v2689_v61  ;;  %v2344_v59 = vadd.f32 %v2272_v57, %v2066_v62 }
 0x23b   : > { %v2553_v13 = vpop.f32.mrf.mxu0  ;;  %3137 = vmatmul.msk.f32.gmra.mxu1 %vm264_vm1, %v3103_v56 }
 0x23c   : > { %v2622_v28 = vadd.f32 %v2550_v45, %v2344_v59  ;;  %3203 = vmatmul.msk.f32.gmra.mxu2 %vm264_vm1, %v3169_v18 }
 0x23d   : > { %3269 = vmatmul.msk.f32.gmra.mxu3 %vm264_vm1, %v4154_v9 }
 0x23e   : > { %3335 = vmatmul.msk.f32.gmra.mxu0 %vm264_vm1, %v3301_v11  ;;  %v2658_v34 = vadd.f32 %v4355_v43, %v2622_v28 }
 0x23f   : > { %v1997_v31 = vpop.f32.mrf.mxu2 }
 0x240   : > { %v2690_v49 = vmax.f32 %v2658_v34, 0.0  ;;  %v2067_v50 = vadd.f32 %v1997_v31, %v1786_v55  ;;  %v2275_v5 = vpop.f32.mrf.mxu3  ;;  %v1719_v35 = vpop.f32.mrf.mxu1 }
 0x241   : > { %v1787_v26 = vadd.f32 %v1719_v35, %v4156_v15 }
 0x242   : > { %2722 = vst [vmem:[%s4371_s12 + $0x60] sm:$0xff] %v2690_v49  ;;  %v2345_v63 = vadd.f32 %v2275_v5, %v2067_v50 }
 0x243   : > { %v2556_v47 = vpop.f32.mrf.mxu0  ;;  %3138 = vmatmul.msk.f32.gmra.mxu1 %vm264_vm1, %v3300_v7 }
 0x244   : > { %v2623_v9 = vadd.f32 %v2553_v13, %v2345_v63  ;;  %3204 = vmatmul.msk.f32.gmra.mxu2 %vm264_vm1, %v3170_v58 }
 0x245   : > { %3270 = vmatmul.msk.f32.gmra.mxu3 %vm264_vm1, %v3236_v32 }
 0x246   : > { %3336 = vmatmul.msk.f32.gmra.mxu0 %vm264_vm1, %v3302_v1  ;;  %v2659_v22 = vadd.f32 %v4355_v43, %v2623_v9 }
 0x247   : > { %v2000_v38 = vpop.f32.mrf.mxu2 }
 0x248   : > { %v2691_v8 = vmax.f32 %v2659_v22, 0.0  ;;  %v2068_v44 = vadd.f32 %v2000_v38, %v1787_v26  ;;  %v2278_v60 = vpop.f32.mrf.mxu3  ;;  %v1722_v30 = vpop.f32.mrf.mxu1 }
 0x249   : > { %v1788_v15 = vadd.f32 %v1722_v30, %v4165_v10 }
 0x24a   : > { %2723 = vst [vmem:[%s4371_s12 + $0x68] sm:$0xff] %v2691_v8  ;;  %v2346_v46 = vadd.f32 %v2278_v60, %v2068_v44 }
 0x24b   : > { %v2559_v27 = vpop.f32.mrf.mxu0  ;;  %3139 = vmatmul.msk.f32.gmra.mxu1 %vm264_vm1, %v3301_v11 }
 0x24c   : > { %v2624_v6 = vadd.f32 %v2556_v47, %v2346_v46  ;;  %3205 = vmatmul.msk.f32.gmra.mxu2 %vm264_vm1, %v3171_v4 }
 0x24d   : > { %3271 = vmatmul.msk.f32.gmra.mxu3 %vm264_vm1, %v3237_v14 }
 0x24e   : > { %3337 = vmatmul.msk.f32.gmra.mxu0 %vm264_vm1, %v3303_v40  ;;  %v2660_v12 = vadd.f32 %v4355_v43, %v2624_v6 }
 0x24f   : > { %v2003_v45 = vpop.f32.mrf.mxu2 }
 0x250   : > { %v2692_v7 = vmax.f32 %v2660_v12, 0.0  ;;  %v2069_v54 = vadd.f32 %v2003_v45, %v1788_v15  ;;  %v2281_v3 = vpop.f32.mrf.mxu3  ;;  %v1725_v29 = vpop.f32.mrf.mxu1 }
 0x251   : > { %v1789_v62 = vadd.f32 %v1725_v29, %v4176_v25 }
 0x252   : > { %2724 = vst [vmem:[%s4371_s12 + $0x70] sm:$0xff] %v2692_v7  ;;  %v2347_v21 = vadd.f32 %v2281_v3, %v2069_v54 }
 0x253   : > { %v2562_v36 = vpop.f32.mrf.mxu0 }
 0x254   : > { %v2625_v61 = vadd.f32 %v2559_v27, %v2347_v21 }
 0x256   : > { %v2661_v57 = vadd.f32 %v4355_v43, %v2625_v61 }
 0x257   : > { %v2006_v16 = vpop.f32.mrf.mxu2 }
 0x258   : > { %v2693_v56 = vmax.f32 %v2661_v57, 0.0  ;;  %v2070_v10 = vadd.f32 %v2006_v16, %v1789_v62  ;;  %v2284_v18 = vpop.f32.mrf.mxu3  ;;  %v1728_v59 = vpop.f32.mrf.mxu1 }
 0x259   : > { %v1790_v0 = vadd.f32 %v1728_v59, %v4187_v33 }
 0x25a   : > { %2725 = vst [vmem:[%s4371_s12 + $0x78] sm:$0xff] %v2693_v56  ;;  %v2348_v13 = vadd.f32 %v2284_v18, %v2070_v10 }
 0x25b   : > { %v2565_v11 = vpop.f32.mrf.mxu0 }
 0x25c   : > { %v2626_v28 = vadd.f32 %v2562_v36, %v2348_v13 }
 0x25e   : > { %v2662_v55 = vadd.f32 %v4355_v43, %v2626_v28 }
 0x25f   : > { %v2009_v34 = vpop.f32.mrf.mxu2 }
 0x260   : > { %v2694_v31 = vmax.f32 %v2662_v55, 0.0  ;;  %v2071_v25 = vadd.f32 %v2009_v34, %v1790_v0  ;;  %v2287_v49 = vpop.f32.mrf.mxu3  ;;  %v1731_v50 = vpop.f32.mrf.mxu1 }
 0x261   : > { %v1791_v63 = vadd.f32 %v1731_v50, %v4198_v42 }
 0x262   : > { %2726 = vst [vmem:[%s4371_s12 + $0x80] sm:$0xff] %v2694_v31  ;;  %v2349_v5 = vadd.f32 %v2287_v49, %v2071_v25 }
 0x263   : > { %v2568_v35 = vpop.f32.mrf.mxu0 }
 0x264   : > { %v2627_v58 = vadd.f32 %v2565_v11, %v2349_v5 }
 0x266   : > { %v2663_v32 = vadd.f32 %v4355_v43, %v2627_v58 }
 0x267   : > { %v2012_v47 = vpop.f32.mrf.mxu2 }
 0x268   : > { %v2695_v1 = vmax.f32 %v2663_v32, 0.0  ;;  %v2072_v33 = vadd.f32 %v2012_v47, %v1791_v63  ;;  %v2290_v9 = vpop.f32.mrf.mxu3  ;;  %v1734_v26 = vpop.f32.mrf.mxu1 }
 0x269   : > { %v1792_v44 = vadd.f32 %v1734_v26, %v4210_v53 }
 0x26a   : > { %2727 = vst [vmem:[%s4371_s12 + $0x88] sm:$0xff] %v2695_v1  ;;  %v2350_v22 = vadd.f32 %v2290_v9, %v2072_v33 }
 0x26b   : > { %v2571_v38 = vpop.f32.mrf.mxu0 }
 0x26c   : > { %v2628_v8 = vadd.f32 %v2568_v35, %v2350_v22 }
 0x26e   : > { %v2664_v60 = vadd.f32 %v4355_v43, %v2628_v8 }
 0x26f   : > { %v2015_v30 = vpop.f32.mrf.mxu2 }
 0x270   : > { %v2696_v4 = vmax.f32 %v2664_v60, 0.0  ;;  %v2073_v42 = vadd.f32 %v2015_v30, %v1792_v44  ;;  %v2293_v46 = vpop.f32.mrf.mxu3  ;;  %v1737_v14 = vpop.f32.mrf.mxu1 }
 0x271   : > { %v1793_v15 = vadd.f32 %v1737_v14, %v4221_v41 }
 0x272   : > { %2728 = vst [vmem:[%s4371_s12 + $0x90] sm:$0xff] %v2696_v4  ;;  %v2351_v27 = vadd.f32 %v2293_v46, %v2073_v42 }
 0x273   : > { %v2574_v40 = vpop.f32.mrf.mxu0 }
 0x274   : > { %v2629_v6 = vadd.f32 %v2571_v38, %v2351_v27 }
 0x276   : > { %v2665_v12 = vadd.f32 %v4355_v43, %v2629_v6 }
 0x277   : > { %v2018_v45 = vpop.f32.mrf.mxu2 }
 0x278   : > { %v2697_v7 = vmax.f32 %v2665_v12, 0.0  ;;  %v2074_v53 = vadd.f32 %v2018_v45, %v1793_v15  ;;  %v2296_v54 = vpop.f32.mrf.mxu3  ;;  %v1740_v3 = vpop.f32.mrf.mxu1 }
 0x279   : > { %v1794_v61 = vadd.f32 %v1740_v3, %v4232_v52 }
 0x27a   : > { %2729 = vst [vmem:[%s4371_s12 + $0x98] sm:$0xff] %v2697_v7  ;;  %v2352_v29 = vadd.f32 %v2296_v54, %v2074_v53 }
 0x27b   : > { %v2577_v21 = vpop.f32.mrf.mxu0 }
 0x27c   : > { %v2630_v36 = vadd.f32 %v2574_v40, %v2352_v29 }
 0x27e   : > { %v2666_v62 = vadd.f32 %v4355_v43, %v2630_v36 }
 0x27f   : > { %v2021_v57 = vpop.f32.mrf.mxu2 }
 0x280   : > { %v2698_v16 = vmax.f32 %v2666_v62, 0.0  ;;  %v2075_v41 = vadd.f32 %v2021_v57, %v1794_v61  ;;  %v2299_v56 = vpop.f32.mrf.mxu3  ;;  %v1743_v10 = vpop.f32.mrf.mxu1 }
 0x281   : > { %v1795_v11 = vadd.f32 %v1743_v10, %v4243_v48 }
 0x282   : > { %2730 = vst [vmem:[%s4371_s12 + $0xa0] sm:$0xff] %v2698_v16  ;;  %v2353_v18 = vadd.f32 %v2299_v56, %v2075_v41 }
 0x283   : > { %v2580_v59 = vpop.f32.mrf.mxu0 }
 0x284   : > { %v2631_v13 = vadd.f32 %v2577_v21, %v2353_v18 }
 0x286   : > { %v2667_v28 = vadd.f32 %v4355_v43, %v2631_v13 }
 0x287   : > { %v2024_v0 = vpop.f32.mrf.mxu2 }
 0x288   : > { %v2699_v55 = vmax.f32 %v2667_v28, 0.0  ;;  %v2076_v52 = vadd.f32 %v2024_v0, %v1795_v11  ;;  %v2302_v34 = vpop.f32.mrf.mxu3  ;;  %v1746_v31 = vpop.f32.mrf.mxu1 }
 0x289   : > { %v1796_v5 = vadd.f32 %v1746_v31, %v4254_v19 }
 0x28a   : > { %2731 = vst [vmem:[%s4371_s12 + $0xa8] sm:$0xff] %v2699_v55  ;;  %v2354_v25 = vadd.f32 %v2302_v34, %v2076_v52 }
 0x28b   : > { %v2583_v49 = vpop.f32.mrf.mxu0 }
 0x28c   : > { %v2632_v50 = vadd.f32 %v2580_v59, %v2354_v25 }
 0x28e   : > { %v2668_v35 = vadd.f32 %v4355_v43, %v2632_v50 }
 0x28f   : > { %v2027_v58 = vpop.f32.mrf.mxu2 }
 0x290   : > { %v2700_v63 = vmax.f32 %v2668_v35, 0.0  ;;  %v2077_v48 = vadd.f32 %v2027_v58, %v1796_v5  ;;  %v2305_v32 = vpop.f32.mrf.mxu3  ;;  %v1749_v47 = vpop.f32.mrf.mxu1 }
 0x291   : > { %v1797_v26 = vadd.f32 %v1749_v47, %v4265_v24 }
 0x292   : > { %2732 = vst [vmem:[%s4371_s12 + $0xb0] sm:$0xff] %v2700_v63  ;;  %v2355_v1 = vadd.f32 %v2305_v32, %v2077_v48 }
 0x293   : > { %v2586_v33 = vpop.f32.mrf.mxu0 }
 0x294   : > { %v2633_v9 = vadd.f32 %v2583_v49, %v2355_v1 }
 0x296   : > { %v2669_v22 = vadd.f32 %v4355_v43, %v2633_v9 }
 0x297   : > { %v2030_v38 = vpop.f32.mrf.mxu2 }
 0x298   : > { %v2701_v8 = vmax.f32 %v2669_v22, 0.0  ;;  %v2078_v19 = vadd.f32 %v2030_v38, %v1797_v26  ;;  %v2308_v44 = vpop.f32.mrf.mxu3  ;;  %v1752_v60 = vpop.f32.mrf.mxu1 }
 0x299   : > { %v1798_v46 = vadd.f32 %v1752_v60, %v4276_v20 }
 0x29a   : > { %2733 = vst [vmem:[%s4371_s12 + $0xb8] sm:$0xff] %v2701_v8  ;;  %v2356_v30 = vadd.f32 %v2308_v44, %v2078_v19 }
 0x29b   : > { %v2589_v4 = vpop.f32.mrf.mxu0 }
 0x29c   : > { %v2634_v42 = vadd.f32 %v2586_v33, %v2356_v30 }
 0x29e   : > { %v2670_v14 = vadd.f32 %v4355_v43, %v2634_v42 }
 0x29f   : > { %v2033_v27 = vpop.f32.mrf.mxu2 }
 0x2a0   : > { %v2702_v40 = vmax.f32 %v2670_v14, 0.0  ;;  %v2079_v24 = vadd.f32 %v2033_v27, %v1798_v46  ;;  %v2311_v6 = vpop.f32.mrf.mxu3  ;;  %v1755_v15 = vpop.f32.mrf.mxu1 }
 0x2a1   : > { %v1799_v53 = vadd.f32 %v1755_v15, %v4287_v17 }
 0x2a2   : > { %2734 = vst [vmem:[%s4371_s12 + $0xc0] sm:$0xff] %v2702_v40  ;;  %v2357_v12 = vadd.f32 %v2311_v6, %v2079_v24 }
 0x2a3   : > { %v2592_v45 = vpop.f32.mrf.mxu0 }
 0x2a4   : > { %v2635_v7 = vadd.f32 %v2589_v4, %v2357_v12 }
 0x2a6   : > { %v2671_v54 = vadd.f32 %v4355_v43, %v2635_v7 }
 0x2a7   : > { %v2036_v3 = vpop.f32.mrf.mxu2 }
 0x2a8   : > { %v2703_v29 = vmax.f32 %v2671_v54, 0.0  ;;  %v2080_v20 = vadd.f32 %v2036_v3, %v1799_v53  ;;  %v2314_v21 = vpop.f32.mrf.mxu3  ;;  %v1758_v36 = vpop.f32.mrf.mxu1 }
 0x2a9   : > { %v1800_v16 = vadd.f32 %v1758_v36, %v4298_v51 }
 0x2aa   : > { %2735 = vst [vmem:[%s4371_s12 + $0xc8] sm:$0xff] %v2703_v29  ;;  %v2358_v61 = vadd.f32 %v2314_v21, %v2080_v20 }
 0x2ab   : > { %v2595_v62 = vpop.f32.mrf.mxu0 }
 0x2ac   : > { %v2636_v57 = vadd.f32 %v2592_v45, %v2358_v61 }
 0x2ae   : > { %v2672_v41 = vadd.f32 %v4355_v43, %v2636_v57 }
 0x2af   : > { %v2039_v56 = vpop.f32.mrf.mxu2 }
 0x2b0   : > { %v2704_v10 = vmax.f32 %v2672_v41, 0.0  ;;  %v2081_v17 = vadd.f32 %v2039_v56, %v1800_v16  ;;  %v2317_v18 = vpop.f32.mrf.mxu3  ;;  %v1761_v59 = vpop.f32.mrf.mxu1 }
 0x2b1   : > { %v1801_v0 = vadd.f32 %v1761_v59, %v4309_v39 }
 0x2b2   : > { %2736 = vst [vmem:[%s4371_s12 + $0xd0] sm:$0xff] %v2704_v10  ;;  %v2359_v13 = vadd.f32 %v2317_v18, %v2081_v17 }
 0x2b3   : > { %v2598_v11 = vpop.f32.mrf.mxu0 }
 0x2b4   : > { %v2637_v28 = vadd.f32 %v2595_v62, %v2359_v13 }
 0x2b6   : > { %v2673_v55 = vadd.f32 %v4355_v43, %v2637_v28 }
 0x2b7   : > { %v2042_v52 = vpop.f32.mrf.mxu2 }
 0x2b8   : > { %v2705_v34 = vmax.f32 %v2673_v55, 0.0  ;;  %v2082_v51 = vadd.f32 %v2042_v52, %v1801_v0  ;;  %v2320_v31 = vpop.f32.mrf.mxu3  ;;  %v1764_v25 = vpop.f32.mrf.mxu1 }
 0x2b9   : > { %v1802_v35 = vadd.f32 %v1764_v25, %v4320_v37 }
 0x2ba   : > { %2737 = vst [vmem:[%s4371_s12 + $0xd8] sm:$0xff] %v2705_v34  ;;  %v2360_v49 = vadd.f32 %v2320_v31, %v2082_v51 }
 0x2bb   : > { %v2601_v5 = vpop.f32.mrf.mxu0 }
 0x2bc   : > { %v2638_v50 = vadd.f32 %v2598_v11, %v2360_v49 }
 0x2be   : > { %v2674_v58 = vadd.f32 %v4355_v43, %v2638_v50 }
 0x2bf   : > { %v2045_v63 = vpop.f32.mrf.mxu2 }
 0x2c0   : > { %v2706_v48 = vmax.f32 %v2674_v58, 0.0  ;;  %v2083_v39 = vadd.f32 %v2045_v63, %v1802_v35  ;;  %v2323_v32 = vpop.f32.mrf.mxu3  ;;  %v1767_v47 = vpop.f32.mrf.mxu1 }
 0x2c1   : > { %v1803_v9 = vadd.f32 %v1767_v47, %v4331_v23 }
 0x2c2   : > { %2738 = vst [vmem:[%s4371_s12 + $0xe0] sm:$0xff] %v2706_v48  ;;  %v2361_v1 = vadd.f32 %v2323_v32, %v2083_v39 }
 0x2c3   : > { %v2604_v38 = vpop.f32.mrf.mxu0 }
 0x2c4   : > { %v2639_v33 = vadd.f32 %v2601_v5, %v2361_v1 }
 0x2c6   : > { %v2675_v26 = vadd.f32 %v4355_v43, %v2639_v33 }
 0x2c7   : > { %v2048_v22 = vpop.f32.mrf.mxu2 }
 0x2c8   : > { %v2707_v8 = vmax.f32 %v2675_v26, 0.0  ;;  %v2084_v37 = vadd.f32 %v2048_v22, %v1803_v9  ;;  %v2326_v19 = vpop.f32.mrf.mxu3  ;;  %v1770_v60 = vpop.f32.mrf.mxu1 }
 0x2c9   : > { %v1804_v4 = vadd.f32 %v1770_v60, %v4342_v2 }
 0x2ca   : > { %2739 = vst [vmem:[%s4371_s12 + $0xe8] sm:$0xff] %v2707_v8  ;;  %v2362_v44 = vadd.f32 %v2326_v19, %v2084_v37 }
 0x2cb   : > { %v2607_v40 = vpop.f32.mrf.mxu0 }
 0x2cc   : > { %v2640_v30 = vadd.f32 %v2604_v38, %v2362_v44 }
 0x2ce   : > { %v2676_v42 = vadd.f32 %v4355_v43, %v2640_v30 }
 0x2cf   : > { %v2051_v46 = vpop.f32.mrf.mxu2 }
 0x2d0   : > { %v2708_v14 = vmax.f32 %v2676_v42, 0.0  ;;  %v2085_v23 = vadd.f32 %v2051_v46, %v1804_v4  ;;  %v2329_v27 = vpop.f32.mrf.mxu3 }
 0x2d2   : > { %2740 = vst [vmem:[%s4371_s12 + $0xf0] sm:$0xff] %v2708_v14  ;;  %v2363_v24 = vadd.f32 %v2329_v27, %v2085_v23 }
 0x2d4   : > { %v2641_v6 = vadd.f32 %v2607_v40, %v2363_v24 }
 0x2d6   : > { %v2677_v15 = vadd.f32 %v4355_v43, %v2641_v6 }
 0x2d8   : > { %v2709_v12 = vmax.f32 %v2677_v15, 0.0 }
 0x2da   : > { %2741 = vst [vmem:[%s4371_s12 + $0xf8] sm:$0xff] %v2709_v12 }
 0x2db PF: > { %s13_s14 = sadd.s32 1, %s3392_s14   ;;  %s4703_s12 = smov %s3388_s13 }
 0x2dc   : > { %p10_p5 = scmp.ge.s32.totalorder %s13_s14, 4   ;;  %s4704_s13 = smov %s4706_s15 }
 0x2de   :  { %12 = sbr.rel (!%p10_p5) target bundleno = 2 (0x2), region = 73 }

</bundles_post_ra>
